<compile_context>
chip_gen: v7x
topology: tpu7x:2x2x1
jax: 0.10.0
libtpu: 0.0.40
codegen_flags: <defaults>
</compile_context>

<pallas_src>
from functools import partial

import jax
import jax.numpy as jnp
from jax.experimental import pallas as pl
from jax.experimental.pallas import tpu as pltpu


def _make_divisible(v, divisor, min_value=None):
    if min_value is None:
        min_value = divisor
    new_v = max(min_value, int(v + divisor / 2) // divisor * divisor)
    if new_v < 0.9 * v:
        new_v += divisor
    return new_v


def _h_sigmoid(x):
    # relu6(x + 3) / 6
    return jnp.clip(x + 3.0, 0.0, 6.0) * (1.0 / 6.0)


# ---------------------------------------------------------------------------
# Fused kernel: TB batch images per grid step, lane-folded as (C, TB*H*W).
# ---------------------------------------------------------------------------
def fused_ir_kernel(x_ref, w1_ref, wdw_ref, bias_ref, mask_ref,
                    pmat_ref, emat_ref, wf1t_ref, bf1_ref, wf2t_ref,
                    w2_ref, b3_ref, o_ref, *, W, K):
    N = x_ref.shape[-1]                       # TB * H * W lanes
    Chid = w1_ref.shape[0]
    f32 = jnp.float32

    b1 = bias_ref[:, 0:1]                     # (Chid, 1) BN1 bias
    b2 = bias_ref[:, 1:2]                     # (Chid, 1) BN2 bias
    bf2 = bias_ref[:, 2:3]                    # (Chid, 1) SE fc2 bias

    # --- 1) 1x1 expand conv (BN1 scale folded into bf16 weights) + bias + h_swish ---
    y = jnp.dot(w1_ref[...], x_ref[0].astype(jnp.bfloat16),
                preferred_element_type=f32)                           # (Chid, N)
    y = y + b1
    y = y * _h_sigmoid(y)

    # --- 2) depthwise KxK conv, stride 1, 'same' zero pad (BN2 scale folded in taps) ---
    # Shifted reads over the flattened lane dim via pltpu.roll; image-border taps are
    # zeroed with the precomputed per-lane masks (valid taps never cross images).
    p = (K - 1) // 2
    acc = jnp.zeros((Chid, N), f32)
    for kh in range(K):
        for kw in range(K):
            s = (kh - p) * W + (kw - p)
            shifted = y if s == 0 else pltpu.roll(y, shift=(-s) % N, axis=1)
            t = kh * K + kw
            acc = acc + (shifted * mask_ref[t:t + 1, :]) * wdw_ref[t]
    y = acc + b2                                                      # (Chid, N)

    # --- 3) SE (per-image avg-pool -> fc -> relu -> fc -> h_sigmoid -> scale) + h_swish ---
    pooled = jnp.dot(y, pmat_ref[...], preferred_element_type=f32)    # (Chid, TB)
    h1 = jnp.dot(wf1t_ref[...], pooled, preferred_element_type=f32)   # (Cred, TB)
    h1 = jnp.maximum(h1 + bf1_ref[...], 0.0)
    se = jnp.dot(wf2t_ref[...], h1, preferred_element_type=f32)       # (Chid, TB)
    se = _h_sigmoid(se + bf2)
    y = y * jnp.dot(se, emat_ref[...], preferred_element_type=f32)    # per-image scale
    y = y * _h_sigmoid(y)

    # --- 4) 1x1 project conv (BN3 scale folded into bf16 weights) + bias + residual ---
    out = jnp.dot(w2_ref[...], y.astype(jnp.bfloat16),
                  preferred_element_type=f32)                         # (Cout, N)
    o_ref[0] = out + b3_ref[...] + x_ref[0]


# ---------------------------------------------------------------------------
# Wrapper
# ---------------------------------------------------------------------------
def _choose_tb(B, tb_max=32):
    # Largest TB that divides B while keeping >=2 grid steps (for v7x 2-TC sharding).
    tb = min(tb_max, B)
    while tb > 1 and (B % tb != 0 or B // tb < 2):
        tb -= 1
    return max(tb, 1)


def inverted_residual(x_nchw, params, K=3, tb_max=32):
    B, Cin, H, W = x_nchw.shape
    HW = H * W
    Chid = params["w_pw1"].shape[1]
    Cout = params["w_pw2"].shape[1]
    Cred = params["w_fc1"].shape[1]
    assert Cin == Cout, "identity residual path requires inp == oup"

    f32, bf16 = jnp.float32, jnp.bfloat16
    TB = _choose_tb(B, tb_max)
    G = B // TB
    N = TB * HW

    # Lane-fold TB images per grid step (one cheap XLA transpose outside the kernel).
    x = (x_nchw.astype(f32).reshape(G, TB, Cin, HW)
         .transpose(0, 2, 1, 3).reshape(G, Cin, N))

    # One-time parameter prep: fold BN scales into weights, pack small biases.
    s1 = params["s_bn1"].reshape(Chid, 1).astype(f32)
    s2 = params["s_bn2"].reshape(1, Chid).astype(f32)
    s3 = params["s_bn3"].reshape(Cout, 1).astype(f32)
    w1 = (params["w_pw1"].T.astype(f32) * s1).astype(bf16)              # (Chid, Cin)
    w2 = (params["w_pw2"].T.astype(f32) * s3).astype(bf16)              # (Cout, Chid)
    wdw = (params["w_dw"].astype(f32) * s2).reshape(K * K, Chid, 1)     # (K*K, Chid, 1)

    bias = jnp.concatenate([params["b_bn1"].reshape(Chid, 1),
                            params["b_bn2"].reshape(Chid, 1),
                            params["b_fc2"].reshape(Chid, 1)], axis=1).astype(f32)
    wf1t = params["w_fc1"].T.astype(f32)                                # (Cred, Chid)
    bf1 = params["b_fc1"].reshape(Cred, 1).astype(f32)                  # (Cred, 1)
    wf2t = params["w_fc2"].T.astype(f32)                                # (Chid, Cred)
    b3 = params["b_bn3"].reshape(Cout, 1).astype(f32)                   # (Cout, 1)

    # Depthwise border masks, precomputed from lane % HW for the lane-folded layout.
    pos = jnp.arange(N, dtype=jnp.int32) % HW
    hh, ww = pos // W, pos % W
    p = (K - 1) // 2
    masks = jnp.stack(
        [((hh + (kh - p) >= 0) & (hh + (kh - p) < H) &
          (ww + (kw - p) >= 0) & (ww + (kw - p) < W)).astype(f32)
         for kh in range(K) for kw in range(K)], axis=0)                # (K*K, N)

    # Per-image average-pool / broadcast matrices (block-diagonal over TB images).
    seg = jnp.arange(N, dtype=jnp.int32) // HW
    emat = (seg[None, :] == jnp.arange(TB, dtype=jnp.int32)[:, None]).astype(f32)  # (TB, N)
    pmat = emat.T * (1.0 / HW)                                          # (N, TB)

    def _full(a):
        nd = a.ndim
        return pl.BlockSpec(a.shape, lambda b, _nd=nd: (0,) * _nd)

    out = pl.pallas_call(
        partial(fused_ir_kernel, W=W, K=K),
        out_shape=jax.ShapeDtypeStruct((G, Cout, N), f32),
        grid=(G,),
        in_specs=[
            pl.BlockSpec((1, Cin, N), lambda b: (b, 0, 0)),   # x (also residual)
            _full(w1), _full(wdw), _full(bias), _full(masks),
            _full(pmat), _full(emat), _full(wf1t), _full(bf1), _full(wf2t),
            _full(w2), _full(b3),
        ],
        out_specs=pl.BlockSpec((1, Cout, N), lambda b: (b, 0, 0)),
        compiler_params=pltpu.CompilerParams(
            dimension_semantics=("parallel",)),
    )(x, w1, wdw, bias, masks, pmat, emat, wf1t, bf1, wf2t, w2, b3)

    return (out.reshape(G, Cout, TB, HW).transpose(0, 2, 1, 3)
            .reshape(B, Cout, H, W))


# ---------------------------------------------------------------------------
# Pure-JAX reference (for correctness check)
# ---------------------------------------------------------------------------
def reference(x_nchw, params, K=3):
    x = jnp.transpose(x_nchw, (0, 2, 3, 1)).astype(jnp.float32)
    Chid = params["w_pw1"].shape[1]

    def hsig(v):
        return jnp.clip(v + 3.0, 0.0, 6.0) / 6.0

    y = jnp.einsum("bhwc,cd->bhwd", x, params["w_pw1"])
    y = y * params["s_bn1"].reshape(1, 1, 1, -1) + params["b_bn1"].reshape(1, 1, 1, -1)
    y = y * hsig(y)

    dw = params["w_dw"].reshape(K, K, 1, Chid)
    p = (K - 1) // 2
    y = jax.lax.conv_general_dilated(
        y, dw, (1, 1), ((p, p), (p, p)),
        dimension_numbers=("NHWC", "HWIO", "NHWC"), feature_group_count=Chid)
    y = y * params["s_bn2"].reshape(1, 1, 1, -1) + params["b_bn2"].reshape(1, 1, 1, -1)

    pooled = jnp.mean(y, axis=(1, 2))                          # (B, Chid)
    h = jnp.maximum(pooled @ params["w_fc1"] + params["b_fc1"], 0.0)
    se = hsig(h @ params["w_fc2"] + params["b_fc2"])
    y = y * se[:, None, None, :]
    y = y * hsig(y)

    out = jnp.einsum("bhwc,cd->bhwd", y, params["w_pw2"])
    out = out * params["s_bn3"].reshape(1, 1, 1, -1) + params["b_bn3"].reshape(1, 1, 1, -1)
    out = out + x
    return jnp.transpose(out, (0, 3, 1, 2))


def _bn_fold(keys, C, eps=1e-5):
    kg, kb, km, kv = keys
    gamma = 1.0 + 0.1 * jax.random.normal(kg, (1, C), jnp.float32)
    beta = 0.1 * jax.random.normal(kb, (1, C), jnp.float32)
    mean = 0.1 * jax.random.normal(km, (1, C), jnp.float32)
    var = jnp.abs(jax.random.normal(kv, (1, C), jnp.float32)) + 0.5
    scale = gamma / jnp.sqrt(var + eps)
    bias = beta - mean * scale
    return scale, bias


if __name__ == "__main__":
    B, Cin, H, W = 8, 16, 16, 16
    Chid, Cout, K = 32, 16, 3
    Cred = _make_divisible(Chid // 4, 8)        # SE hidden dim = 8

    key = jax.random.PRNGKey(0)
    ks = jax.random.split(key, 20)

    s_bn1, b_bn1 = _bn_fold(ks[7:11], Chid)
    s_bn2, b_bn2 = _bn_fold(ks[11:15], Chid)
    s_bn3, b_bn3 = _bn_fold(ks[15:19], Cout)

    params = {
        "w_pw1": 0.1 * jax.random.normal(ks[0], (Cin, Chid), jnp.float32),
        "w_dw":  0.1 * jax.random.normal(ks[1], (K * K, Chid), jnp.float32),
        "w_pw2": 0.1 * jax.random.normal(ks[2], (Chid, Cout), jnp.float32),
        "w_fc1": 0.1 * jax.random.normal(ks[3], (Chid, Cred), jnp.float32),
        "b_fc1": 0.1 * jax.random.normal(ks[4], (1, Cred), jnp.float32),
        "w_fc2": 0.1 * jax.random.normal(ks[5], (Cred, Chid), jnp.float32),
        "b_fc2": 0.1 * jax.random.normal(ks[6], (1, Chid), jnp.float32),
        "s_bn1": s_bn1, "b_bn1": b_bn1,
        "s_bn2": s_bn2, "b_bn2": b_bn2,
        "s_bn3": s_bn3, "b_bn3": b_bn3,
    }

    x = jax.random.normal(ks[19], (B, Cin, H, W), jnp.float32)

    out = inverted_residual(x, params, K)
    out = jax.block_until_ready(out)

    ref = reference(x, params, K)
    assert out.shape == (B, Cout, H, W), out.shape
    max_err = float(jnp.max(jnp.abs(out - ref)))
    # Tolerance accounts for bf16 MXU operands on the two 1x1-conv matmuls
    # (f32 accumulation, f32 everywhere else).
    assert jnp.allclose(out, ref, atol=5e-3, rtol=5e-3), max_err

    print("KERNEL_OK")
</pallas_src>

<mosaic_0001>
module attributes {stable_mosaic.version = 11 : i64} {
  func.func @fused_ir_kernel(%arg0: i32, %arg1: memref<1x16x1024xf32, #tpu.memory_space<vmem>>, %arg2: memref<32x16xbf16, #tpu.memory_space<vmem>>, %arg3: memref<9x32x1xf32, #tpu.memory_space<vmem>>, %arg4: memref<32x3xf32, #tpu.memory_space<vmem>>, %arg5: memref<9x1024xf32, #tpu.memory_space<vmem>>, %arg6: memref<1024x4xf32, #tpu.memory_space<vmem>>, %arg7: memref<4x1024xf32, #tpu.memory_space<vmem>>, %arg8: memref<8x32xf32, #tpu.memory_space<vmem>>, %arg9: memref<8x1xf32, #tpu.memory_space<vmem>>, %arg10: memref<32x8xf32, #tpu.memory_space<vmem>>, %arg11: memref<16x32xbf16, #tpu.memory_space<vmem>>, %arg12: memref<16x1xf32, #tpu.memory_space<vmem>>, %arg13: memref<1x16x1024xf32, #tpu.memory_space<vmem>>) attributes {dimension_semantics = [#tpu.dimension_semantics<parallel>], iteration_bounds = array<i64: 2>, scalar_prefetch = 0 : i64, scratch_operands = 0 : i64, tpu.core_type = #tpu.core_type<tc>, window_params = [{transform_indices = @transform_0, window_bounds = array<i64: 1, 16, 1024>}, {pipeline_mode = #tpu.pipeline_mode<synchronous>, transform_indices = @transform_1, window_bounds = array<i64: 32, 16>}, {pipeline_mode = #tpu.pipeline_mode<synchronous>, transform_indices = @transform_2, window_bounds = array<i64: 9, 32, 1>}, {pipeline_mode = #tpu.pipeline_mode<synchronous>, transform_indices = @transform_3, window_bounds = array<i64: 32, 3>}, {pipeline_mode = #tpu.pipeline_mode<synchronous>, transform_indices = @transform_4, window_bounds = array<i64: 9, 1024>}, {pipeline_mode = #tpu.pipeline_mode<synchronous>, transform_indices = @transform_5, window_bounds = array<i64: 1024, 4>}, {pipeline_mode = #tpu.pipeline_mode<synchronous>, transform_indices = @transform_6, window_bounds = array<i64: 4, 1024>}, {pipeline_mode = #tpu.pipeline_mode<synchronous>, transform_indices = @transform_7, window_bounds = array<i64: 8, 32>}, {pipeline_mode = #tpu.pipeline_mode<synchronous>, transform_indices = @transform_8, window_bounds = array<i64: 8, 1>}, {pipeline_mode = #tpu.pipeline_mode<synchronous>, transform_indices = @transform_9, window_bounds = array<i64: 32, 8>}, {pipeline_mode = #tpu.pipeline_mode<synchronous>, transform_indices = @transform_10, window_bounds = array<i64: 16, 32>}, {pipeline_mode = #tpu.pipeline_mode<synchronous>, transform_indices = @transform_11, window_bounds = array<i64: 16, 1>}, {transform_indices = @transform_12, window_bounds = array<i64: 1, 16, 1024>}]} {
    %c0 = arith.constant 0 : index
    %c0_0 = arith.constant 0 : index
    %0 = vector.load %arg4[%c0, %c0_0] : memref<32x3xf32, #tpu.memory_space<vmem>>, vector<32x1xf32>
    %c0_1 = arith.constant 0 : index
    %c1 = arith.constant 1 : index
    %1 = vector.load %arg4[%c0_1, %c1] : memref<32x3xf32, #tpu.memory_space<vmem>>, vector<32x1xf32>
    %c0_2 = arith.constant 0 : index
    %c2 = arith.constant 2 : index
    %2 = vector.load %arg4[%c0_2, %c2] : memref<32x3xf32, #tpu.memory_space<vmem>>, vector<32x1xf32>
    %c0_3 = arith.constant 0 : index
    %c0_4 = arith.constant 0 : index
    %3 = vector.load %arg2[%c0_3, %c0_4] : memref<32x16xbf16, #tpu.memory_space<vmem>>, vector<32x16xbf16>
    %c0_5 = arith.constant 0 : index
    %c0_6 = arith.constant 0 : index
    %c0_7 = arith.constant 0 : index
    %4 = vector.load %arg1[%c0_5, %c0_6, %c0_7] : memref<1x16x1024xf32, #tpu.memory_space<vmem>>, vector<1x16x1024xf32>
    %5 = vector.shape_cast %4 : vector<1x16x1024xf32> to vector<16x1024xf32>
    %6 = arith.truncf %5 : vector<16x1024xf32> to vector<16x1024xbf16>
    %cst = arith.constant dense<0.000000e+00> : vector<32x1024xf32>
    %7 = tpu.matmul %3, %6, %cst {dimension_numbers = #tpu.dot_dimension_numbers<[1], [0], [0], [1], [0, 0, 1, 1], [], []>} : vector<32x16xbf16>, vector<16x1024xbf16>, vector<32x1024xf32> -> vector<32x1024xf32>
    %8 = vector.broadcast %0 : vector<32x1xf32> to vector<32x1024xf32>
    %9 = arith.addf %7, %8 : vector<32x1024xf32>
    %cst_8 = arith.constant 3.000000e+00 : f32
    %10 = vector.broadcast %cst_8 : f32 to vector<32x1024xf32>
    %11 = arith.addf %9, %10 : vector<32x1024xf32>
    %cst_9 = arith.constant 0.000000e+00 : f32
    %cst_10 = arith.constant 6.000000e+00 : f32
    %12 = vector.broadcast %cst_9 : f32 to vector<32x1024xf32>
    %13 = arith.maximumf %12, %11 : vector<32x1024xf32>
    %14 = vector.broadcast %cst_10 : f32 to vector<32x1024xf32>
    %15 = arith.minimumf %14, %13 : vector<32x1024xf32>
    %cst_11 = arith.constant 0.166666672 : f32
    %16 = vector.broadcast %cst_11 : f32 to vector<32x1024xf32>
    %17 = arith.mulf %15, %16 : vector<32x1024xf32>
    %18 = arith.mulf %9, %17 : vector<32x1024xf32>
    %cst_12 = arith.constant 0.000000e+00 : f32
    %19 = vector.broadcast %cst_12 : f32 to vector<32x1024xf32>
    %c17_i32 = arith.constant 17 : i32
    %20 = tpu.dynamic_rotate %18 by %c17_i32 dim 1 : vector<32x1024xf32>, i32 -> vector<32x1024xf32>
    %c0_13 = arith.constant 0 : index
    %c0_14 = arith.constant 0 : index
    %21 = vector.load %arg5[%c0_13, %c0_14] : memref<9x1024xf32, #tpu.memory_space<vmem>>, vector<1x1024xf32>
    %22 = vector.broadcast %21 : vector<1x1024xf32> to vector<32x1024xf32>
    %23 = arith.mulf %20, %22 : vector<32x1024xf32>
    %c0_15 = arith.constant 0 : index
    %c0_16 = arith.constant 0 : index
    %c0_17 = arith.constant 0 : index
    %24 = vector.load %arg3[%c0_15, %c0_16, %c0_17] : memref<9x32x1xf32, #tpu.memory_space<vmem>>, vector<1x32x1xf32>
    %25 = vector.shape_cast %24 : vector<1x32x1xf32> to vector<32x1xf32>
    %26 = vector.broadcast %25 : vector<32x1xf32> to vector<32x1024xf32>
    %27 = arith.mulf %23, %26 : vector<32x1024xf32>
    %28 = arith.addf %19, %27 : vector<32x1024xf32>
    %c16_i32 = arith.constant 16 : i32
    %29 = tpu.dynamic_rotate %18 by %c16_i32 dim 1 : vector<32x1024xf32>, i32 -> vector<32x1024xf32>
    %c1_18 = arith.constant 1 : index
    %c0_19 = arith.constant 0 : index
    %30 = vector.load %arg5[%c1_18, %c0_19] : memref<9x1024xf32, #tpu.memory_space<vmem>>, vector<1x1024xf32>
    %31 = vector.broadcast %30 : vector<1x1024xf32> to vector<32x1024xf32>
    %32 = arith.mulf %29, %31 : vector<32x1024xf32>
    %c1_20 = arith.constant 1 : index
    %c0_21 = arith.constant 0 : index
    %c0_22 = arith.constant 0 : index
    %33 = vector.load %arg3[%c1_20, %c0_21, %c0_22] : memref<9x32x1xf32, #tpu.memory_space<vmem>>, vector<1x32x1xf32>
    %34 = vector.shape_cast %33 : vector<1x32x1xf32> to vector<32x1xf32>
    %35 = vector.broadcast %34 : vector<32x1xf32> to vector<32x1024xf32>
    %36 = arith.mulf %32, %35 : vector<32x1024xf32>
    %37 = arith.addf %28, %36 : vector<32x1024xf32>
    %c15_i32 = arith.constant 15 : i32
    %38 = tpu.dynamic_rotate %18 by %c15_i32 dim 1 : vector<32x1024xf32>, i32 -> vector<32x1024xf32>
    %c2_23 = arith.constant 2 : index
    %c0_24 = arith.constant 0 : index
    %39 = vector.load %arg5[%c2_23, %c0_24] : memref<9x1024xf32, #tpu.memory_space<vmem>>, vector<1x1024xf32>
    %40 = vector.broadcast %39 : vector<1x1024xf32> to vector<32x1024xf32>
    %41 = arith.mulf %38, %40 : vector<32x1024xf32>
    %c2_25 = arith.constant 2 : index
    %c0_26 = arith.constant 0 : index
    %c0_27 = arith.constant 0 : index
    %42 = vector.load %arg3[%c2_25, %c0_26, %c0_27] : memref<9x32x1xf32, #tpu.memory_space<vmem>>, vector<1x32x1xf32>
    %43 = vector.shape_cast %42 : vector<1x32x1xf32> to vector<32x1xf32>
    %44 = vector.broadcast %43 : vector<32x1xf32> to vector<32x1024xf32>
    %45 = arith.mulf %41, %44 : vector<32x1024xf32>
    %46 = arith.addf %37, %45 : vector<32x1024xf32>
    %c1_i32 = arith.constant 1 : i32
    %47 = tpu.dynamic_rotate %18 by %c1_i32 dim 1 : vector<32x1024xf32>, i32 -> vector<32x1024xf32>
    %c3 = arith.constant 3 : index
    %c0_28 = arith.constant 0 : index
    %48 = vector.load %arg5[%c3, %c0_28] : memref<9x1024xf32, #tpu.memory_space<vmem>>, vector<1x1024xf32>
    %49 = vector.broadcast %48 : vector<1x1024xf32> to vector<32x1024xf32>
    %50 = arith.mulf %47, %49 : vector<32x1024xf32>
    %c3_29 = arith.constant 3 : index
    %c0_30 = arith.constant 0 : index
    %c0_31 = arith.constant 0 : index
    %51 = vector.load %arg3[%c3_29, %c0_30, %c0_31] : memref<9x32x1xf32, #tpu.memory_space<vmem>>, vector<1x32x1xf32>
    %52 = vector.shape_cast %51 : vector<1x32x1xf32> to vector<32x1xf32>
    %53 = vector.broadcast %52 : vector<32x1xf32> to vector<32x1024xf32>
    %54 = arith.mulf %50, %53 : vector<32x1024xf32>
    %55 = arith.addf %46, %54 : vector<32x1024xf32>
    %c4 = arith.constant 4 : index
    %c0_32 = arith.constant 0 : index
    %56 = vector.load %arg5[%c4, %c0_32] : memref<9x1024xf32, #tpu.memory_space<vmem>>, vector<1x1024xf32>
    %57 = vector.broadcast %56 : vector<1x1024xf32> to vector<32x1024xf32>
    %58 = arith.mulf %18, %57 : vector<32x1024xf32>
    %c4_33 = arith.constant 4 : index
    %c0_34 = arith.constant 0 : index
    %c0_35 = arith.constant 0 : index
    %59 = vector.load %arg3[%c4_33, %c0_34, %c0_35] : memref<9x32x1xf32, #tpu.memory_space<vmem>>, vector<1x32x1xf32>
    %60 = vector.shape_cast %59 : vector<1x32x1xf32> to vector<32x1xf32>
    %61 = vector.broadcast %60 : vector<32x1xf32> to vector<32x1024xf32>
    %62 = arith.mulf %58, %61 : vector<32x1024xf32>
    %63 = arith.addf %55, %62 : vector<32x1024xf32>
    %c1023_i32 = arith.constant 1023 : i32
    %64 = tpu.dynamic_rotate %18 by %c1023_i32 dim 1 : vector<32x1024xf32>, i32 -> vector<32x1024xf32>
    %c5 = arith.constant 5 : index
    %c0_36 = arith.constant 0 : index
    %65 = vector.load %arg5[%c5, %c0_36] : memref<9x1024xf32, #tpu.memory_space<vmem>>, vector<1x1024xf32>
    %66 = vector.broadcast %65 : vector<1x1024xf32> to vector<32x1024xf32>
    %67 = arith.mulf %64, %66 : vector<32x1024xf32>
    %c5_37 = arith.constant 5 : index
    %c0_38 = arith.constant 0 : index
    %c0_39 = arith.constant 0 : index
    %68 = vector.load %arg3[%c5_37, %c0_38, %c0_39] : memref<9x32x1xf32, #tpu.memory_space<vmem>>, vector<1x32x1xf32>
    %69 = vector.shape_cast %68 : vector<1x32x1xf32> to vector<32x1xf32>
    %70 = vector.broadcast %69 : vector<32x1xf32> to vector<32x1024xf32>
    %71 = arith.mulf %67, %70 : vector<32x1024xf32>
    %72 = arith.addf %63, %71 : vector<32x1024xf32>
    %c1009_i32 = arith.constant 1009 : i32
    %73 = tpu.dynamic_rotate %18 by %c1009_i32 dim 1 : vector<32x1024xf32>, i32 -> vector<32x1024xf32>
    %c6 = arith.constant 6 : index
    %c0_40 = arith.constant 0 : index
    %74 = vector.load %arg5[%c6, %c0_40] : memref<9x1024xf32, #tpu.memory_space<vmem>>, vector<1x1024xf32>
    %75 = vector.broadcast %74 : vector<1x1024xf32> to vector<32x1024xf32>
    %76 = arith.mulf %73, %75 : vector<32x1024xf32>
    %c6_41 = arith.constant 6 : index
    %c0_42 = arith.constant 0 : index
    %c0_43 = arith.constant 0 : index
    %77 = vector.load %arg3[%c6_41, %c0_42, %c0_43] : memref<9x32x1xf32, #tpu.memory_space<vmem>>, vector<1x32x1xf32>
    %78 = vector.shape_cast %77 : vector<1x32x1xf32> to vector<32x1xf32>
    %79 = vector.broadcast %78 : vector<32x1xf32> to vector<32x1024xf32>
    %80 = arith.mulf %76, %79 : vector<32x1024xf32>
    %81 = arith.addf %72, %80 : vector<32x1024xf32>
    %c1008_i32 = arith.constant 1008 : i32
    %82 = tpu.dynamic_rotate %18 by %c1008_i32 dim 1 : vector<32x1024xf32>, i32 -> vector<32x1024xf32>
    %c7 = arith.constant 7 : index
    %c0_44 = arith.constant 0 : index
    %83 = vector.load %arg5[%c7, %c0_44] : memref<9x1024xf32, #tpu.memory_space<vmem>>, vector<1x1024xf32>
    %84 = vector.broadcast %83 : vector<1x1024xf32> to vector<32x1024xf32>
    %85 = arith.mulf %82, %84 : vector<32x1024xf32>
    %c7_45 = arith.constant 7 : index
    %c0_46 = arith.constant 0 : index
    %c0_47 = arith.constant 0 : index
    %86 = vector.load %arg3[%c7_45, %c0_46, %c0_47] : memref<9x32x1xf32, #tpu.memory_space<vmem>>, vector<1x32x1xf32>
    %87 = vector.shape_cast %86 : vector<1x32x1xf32> to vector<32x1xf32>
    %88 = vector.broadcast %87 : vector<32x1xf32> to vector<32x1024xf32>
    %89 = arith.mulf %85, %88 : vector<32x1024xf32>
    %90 = arith.addf %81, %89 : vector<32x1024xf32>
    %c1007_i32 = arith.constant 1007 : i32
    %91 = tpu.dynamic_rotate %18 by %c1007_i32 dim 1 : vector<32x1024xf32>, i32 -> vector<32x1024xf32>
    %c8 = arith.constant 8 : index
    %c0_48 = arith.constant 0 : index
    %92 = vector.load %arg5[%c8, %c0_48] : memref<9x1024xf32, #tpu.memory_space<vmem>>, vector<1x1024xf32>
    %93 = vector.broadcast %92 : vector<1x1024xf32> to vector<32x1024xf32>
    %94 = arith.mulf %91, %93 : vector<32x1024xf32>
    %c8_49 = arith.constant 8 : index
    %c0_50 = arith.constant 0 : index
    %c0_51 = arith.constant 0 : index
    %95 = vector.load %arg3[%c8_49, %c0_50, %c0_51] : memref<9x32x1xf32, #tpu.memory_space<vmem>>, vector<1x32x1xf32>
    %96 = vector.shape_cast %95 : vector<1x32x1xf32> to vector<32x1xf32>
    %97 = vector.broadcast %96 : vector<32x1xf32> to vector<32x1024xf32>
    %98 = arith.mulf %94, %97 : vector<32x1024xf32>
    %99 = arith.addf %90, %98 : vector<32x1024xf32>
    %100 = vector.broadcast %1 : vector<32x1xf32> to vector<32x1024xf32>
    %101 = arith.addf %99, %100 : vector<32x1024xf32>
    %c0_52 = arith.constant 0 : index
    %c0_53 = arith.constant 0 : index
    %102 = vector.load %arg6[%c0_52, %c0_53] : memref<1024x4xf32, #tpu.memory_space<vmem>>, vector<1024x4xf32>
    %cst_54 = arith.constant dense<0.000000e+00> : vector<32x4xf32>
    %103 = tpu.matmul %101, %102, %cst_54 {dimension_numbers = #tpu.dot_dimension_numbers<[1], [0], [0], [1], [0, 0, 1, 1], [], []>} : vector<32x1024xf32>, vector<1024x4xf32>, vector<32x4xf32> -> vector<32x4xf32>
    %c0_55 = arith.constant 0 : index
    %c0_56 = arith.constant 0 : index
    %104 = vector.load %arg8[%c0_55, %c0_56] : memref<8x32xf32, #tpu.memory_space<vmem>>, vector<8x32xf32>
    %cst_57 = arith.constant dense<0.000000e+00> : vector<8x4xf32>
    %105 = tpu.matmul %104, %103, %cst_57 {dimension_numbers = #tpu.dot_dimension_numbers<[1], [0], [0], [1], [0, 0, 1, 1], [], []>} : vector<8x32xf32>, vector<32x4xf32>, vector<8x4xf32> -> vector<8x4xf32>
    %c0_58 = arith.constant 0 : index
    %c0_59 = arith.constant 0 : index
    %106 = vector.load %arg9[%c0_58, %c0_59] : memref<8x1xf32, #tpu.memory_space<vmem>>, vector<8x1xf32>
    %107 = vector.broadcast %106 : vector<8x1xf32> to vector<8x4xf32>
    %108 = arith.addf %105, %107 : vector<8x4xf32>
    %cst_60 = arith.constant 0.000000e+00 : f32
    %109 = vector.broadcast %cst_60 : f32 to vector<8x4xf32>
    %110 = arith.maximumf %108, %109 : vector<8x4xf32>
    %c0_61 = arith.constant 0 : index
    %c0_62 = arith.constant 0 : index
    %111 = vector.load %arg10[%c0_61, %c0_62] : memref<32x8xf32, #tpu.memory_space<vmem>>, vector<32x8xf32>
    %cst_63 = arith.constant dense<0.000000e+00> : vector<32x4xf32>
    %112 = tpu.matmul %111, %110, %cst_63 {dimension_numbers = #tpu.dot_dimension_numbers<[1], [0], [0], [1], [0, 0, 1, 1], [], []>} : vector<32x8xf32>, vector<8x4xf32>, vector<32x4xf32> -> vector<32x4xf32>
    %113 = vector.broadcast %2 : vector<32x1xf32> to vector<32x4xf32>
    %114 = arith.addf %112, %113 : vector<32x4xf32>
    %cst_64 = arith.constant 3.000000e+00 : f32
    %115 = vector.broadcast %cst_64 : f32 to vector<32x4xf32>
    %116 = arith.addf %114, %115 : vector<32x4xf32>
    %cst_65 = arith.constant 0.000000e+00 : f32
    %cst_66 = arith.constant 6.000000e+00 : f32
    %117 = vector.broadcast %cst_65 : f32 to vector<32x4xf32>
    %118 = arith.maximumf %117, %116 : vector<32x4xf32>
    %119 = vector.broadcast %cst_66 : f32 to vector<32x4xf32>
    %120 = arith.minimumf %119, %118 : vector<32x4xf32>
    %cst_67 = arith.constant 0.166666672 : f32
    %121 = vector.broadcast %cst_67 : f32 to vector<32x4xf32>
    %122 = arith.mulf %120, %121 : vector<32x4xf32>
    %c0_68 = arith.constant 0 : index
    %c0_69 = arith.constant 0 : index
    %123 = vector.load %arg7[%c0_68, %c0_69] : memref<4x1024xf32, #tpu.memory_space<vmem>>, vector<4x1024xf32>
    %cst_70 = arith.constant dense<0.000000e+00> : vector<32x1024xf32>
    %124 = tpu.matmul %122, %123, %cst_70 {dimension_numbers = #tpu.dot_dimension_numbers<[1], [0], [0], [1], [0, 0, 1, 1], [], []>} : vector<32x4xf32>, vector<4x1024xf32>, vector<32x1024xf32> -> vector<32x1024xf32>
    %125 = arith.mulf %101, %124 : vector<32x1024xf32>
    %cst_71 = arith.constant 3.000000e+00 : f32
    %126 = vector.broadcast %cst_71 : f32 to vector<32x1024xf32>
    %127 = arith.addf %125, %126 : vector<32x1024xf32>
    %cst_72 = arith.constant 0.000000e+00 : f32
    %cst_73 = arith.constant 6.000000e+00 : f32
    %128 = vector.broadcast %cst_72 : f32 to vector<32x1024xf32>
    %129 = arith.maximumf %128, %127 : vector<32x1024xf32>
    %130 = vector.broadcast %cst_73 : f32 to vector<32x1024xf32>
    %131 = arith.minimumf %130, %129 : vector<32x1024xf32>
    %cst_74 = arith.constant 0.166666672 : f32
    %132 = vector.broadcast %cst_74 : f32 to vector<32x1024xf32>
    %133 = arith.mulf %131, %132 : vector<32x1024xf32>
    %134 = arith.mulf %125, %133 : vector<32x1024xf32>
    %c0_75 = arith.constant 0 : index
    %c0_76 = arith.constant 0 : index
    %135 = vector.load %arg11[%c0_75, %c0_76] : memref<16x32xbf16, #tpu.memory_space<vmem>>, vector<16x32xbf16>
    %136 = arith.truncf %134 : vector<32x1024xf32> to vector<32x1024xbf16>
    %cst_77 = arith.constant dense<0.000000e+00> : vector<16x1024xf32>
    %137 = tpu.matmul %135, %136, %cst_77 {dimension_numbers = #tpu.dot_dimension_numbers<[1], [0], [0], [1], [0, 0, 1, 1], [], []>} : vector<16x32xbf16>, vector<32x1024xbf16>, vector<16x1024xf32> -> vector<16x1024xf32>
    %c0_78 = arith.constant 0 : index
    %c0_79 = arith.constant 0 : index
    %138 = vector.load %arg12[%c0_78, %c0_79] : memref<16x1xf32, #tpu.memory_space<vmem>>, vector<16x1xf32>
    %139 = vector.broadcast %138 : vector<16x1xf32> to vector<16x1024xf32>
    %140 = arith.addf %137, %139 : vector<16x1024xf32>
    %c0_80 = arith.constant 0 : index
    %c0_81 = arith.constant 0 : index
    %c0_82 = arith.constant 0 : index
    %141 = vector.load %arg1[%c0_80, %c0_81, %c0_82] : memref<1x16x1024xf32, #tpu.memory_space<vmem>>, vector<1x16x1024xf32>
    %142 = vector.shape_cast %141 : vector<1x16x1024xf32> to vector<16x1024xf32>
    %143 = arith.addf %140, %142 : vector<16x1024xf32>
    %c0_83 = arith.constant 0 : index
    %c0_84 = arith.constant 0 : index
    %c0_85 = arith.constant 0 : index
    %144 = vector.load %arg13[%c0_83, %c0_84, %c0_85] : memref<1x16x1024xf32, #tpu.memory_space<vmem>>, vector<1x16x1024xf32>
    %145 = vector.shape_cast %144 : vector<1x16x1024xf32> to vector<16x1024xf32>
    %146 = vector.shape_cast %143 : vector<16x1024xf32> to vector<1x16x1024xf32>
    tpu.vector_store %arg13[%c0_83, %c0_84, %c0_85], %146 {strides = array<i32>} : memref<1x16x1024xf32, #tpu.memory_space<vmem>>, vector<1x16x1024xf32>,
    return
  }
  func.func @transform_0(%arg0: i32) -> (i32, i32, i32) {
    %c0_i32 = arith.constant 0 : i32
    %c0_i32_0 = arith.constant 0 : i32
    %c0_i32_1 = arith.constant 0 : i32
    return %arg0, %c0_i32, %c0_i32_0 : i32, i32, i32
  }
  func.func @transform_1(%arg0: i32) -> (i32, i32) {
    %c0_i32 = arith.constant 0 : i32
    %c0_i32_0 = arith.constant 0 : i32
    %c0_i32_1 = arith.constant 0 : i32
    return %c0_i32, %c0_i32_0 : i32, i32
  }
  func.func @transform_2(%arg0: i32) -> (i32, i32, i32) {
    %c0_i32 = arith.constant 0 : i32
    %c0_i32_0 = arith.constant 0 : i32
    %c0_i32_1 = arith.constant 0 : i32
    %c0_i32_2 = arith.constant 0 : i32
    return %c0_i32, %c0_i32_0, %c0_i32_1 : i32, i32, i32
  }
  func.func @transform_3(%arg0: i32) -> (i32, i32) {
    %c0_i32 = arith.constant 0 : i32
    %c0_i32_0 = arith.constant 0 : i32
    %c0_i32_1 = arith.constant 0 : i32
    return %c0_i32, %c0_i32_0 : i32, i32
  }
  func.func @transform_4(%arg0: i32) -> (i32, i32) {
    %c0_i32 = arith.constant 0 : i32
    %c0_i32_0 = arith.constant 0 : i32
    %c0_i32_1 = arith.constant 0 : i32
    return %c0_i32, %c0_i32_0 : i32, i32
  }
  func.func @transform_5(%arg0: i32) -> (i32, i32) {
    %c0_i32 = arith.constant 0 : i32
    %c0_i32_0 = arith.constant 0 : i32
    %c0_i32_1 = arith.constant 0 : i32
    return %c0_i32, %c0_i32_0 : i32, i32
  }
  func.func @transform_6(%arg0: i32) -> (i32, i32) {
    %c0_i32 = arith.constant 0 : i32
    %c0_i32_0 = arith.constant 0 : i32
    %c0_i32_1 = arith.constant 0 : i32
    return %c0_i32, %c0_i32_0 : i32, i32
  }
  func.func @transform_7(%arg0: i32) -> (i32, i32) {
    %c0_i32 = arith.constant 0 : i32
    %c0_i32_0 = arith.constant 0 : i32
    %c0_i32_1 = arith.constant 0 : i32
    return %c0_i32, %c0_i32_0 : i32, i32
  }
  func.func @transform_8(%arg0: i32) -> (i32, i32) {
    %c0_i32 = arith.constant 0 : i32
    %c0_i32_0 = arith.constant 0 : i32
    %c0_i32_1 = arith.constant 0 : i32
    return %c0_i32, %c0_i32_0 : i32, i32
  }
  func.func @transform_9(%arg0: i32) -> (i32, i32) {
    %c0_i32 = arith.constant 0 : i32
    %c0_i32_0 = arith.constant 0 : i32
    %c0_i32_1 = arith.constant 0 : i32
    return %c0_i32, %c0_i32_0 : i32, i32
  }
  func.func @transform_10(%arg0: i32) -> (i32, i32) {
    %c0_i32 = arith.constant 0 : i32
    %c0_i32_0 = arith.constant 0 : i32
    %c0_i32_1 = arith.constant 0 : i32
    return %c0_i32, %c0_i32_0 : i32, i32
  }
  func.func @transform_11(%arg0: i32) -> (i32, i32) {
    %c0_i32 = arith.constant 0 : i32
    %c0_i32_0 = arith.constant 0 : i32
    %c0_i32_1 = arith.constant 0 : i32
    return %c0_i32, %c0_i32_0 : i32, i32
  }
  func.func @transform_12(%arg0: i32) -> (i32, i32, i32) {
    %c0_i32 = arith.constant 0 : i32
    %c0_i32_0 = arith.constant 0 : i32
    %c0_i32_1 = arith.constant 0 : i32
    return %arg0, %c0_i32, %c0_i32_0 : i32, i32, i32
  }
}

</mosaic_0001>

<bundles_post_ra>
// kernel: tpu_custom_call.1
= control target key start
LH: loop header
LB: loop body
LE: loop exit
PB: predicated region body
PF: predicated region fallthrough
CT: control target
= control target key end

     0   :  { %s9993_s0 = inlined_call_operand.vmem [shape: f32[2,16,1024], index: 0, kind: input, shape index: {}]   ;;  %s9994_s1 = inlined_call_operand.vmem [shape: bf16[32,16], index: 1, kind: input, shape index: {}]   ;;  %s9995_s2 = inlined_call_operand.vmem [shape: f32[9,32,1], index: 2, kind: input, shape index: {}]   ;;  %s9996_s3 = inlined_call_operand.vmem [shape: f32[32,3], index: 3, kind: input, shape index: {}]   ;;  %s9997_s4 = inlined_call_operand.vmem [shape: f32[9,1024], index: 4, kind: input, shape index: {}]   ;;  %s9998_s5 = inlined_call_operand.vmem [shape: f32[1024,4], index: 5, kind: input, shape index: {}]   ;;  %s9999_s6 = inlined_call_operand.vmem [shape: f32[4,1024], index: 6, kind: input, shape index: {}]   ;;  %s10000_s7 = inlined_call_operand.vmem [shape: f32[8,32], index: 7, kind: input, shape index: {}]   ;;  %s10001_s8 = inlined_call_operand.vmem [shape: f32[8,1], index: 8, kind: input, shape index: {}]   ;;  %s10002_s9 = inlined_call_operand.vmem [shape: f32[32,8], index: 9, kind: input, shape index: {}]   ;;  %s10003_s10 = inlined_call_operand.vmem [shape: bf16[16,32], index: 10, kind: input, shape index: {}]   ;;  %s10004_s11 = inlined_call_operand.vmem [shape: f32[16,1], index: 11, kind: input, shape index: {}]   ;;  %s10005_s12 = inlined_call_operand.hbm [shape: f32[2,16,1024], index: 12, kind: output, shape index: {}]  }
   0x1   :  { %10468 = sst [smem:[#allocation220_spill]] %s9993_s0 }
   0x2   :  { %10469 = sst [smem:[#allocation221_spill]] %s9994_s1 }
   0x3   :  { %10470 = sst [smem:[#allocation222_spill]] %s10005_s12 }
   0x4   :  { %17 = vsyncpa [#allocation3], 0 }
   0x5   :  { %19 = vsyncpa [#allocation3 + $0x1], 0  ;;  %s5450_s21 = smov 0   ;;  %s5452_s22 = smov 0  }
   0x6   :  { %s5454_s23 = smov 0   ;;  %s5456_s24 = smov 0  }
   0x7 LB: > { %10471 = sst [smem:[#allocation5_spill]] %s5354_s21  ;;  %s5471_s25 = sadd.s32 4294967295, %s5366_s24   ;;  %s5366_s24 = sphi %s5456_s24, %s11355_s24   ;;  %s5362_s23 = sphi %s5454_s23, %s11357_s23   ;;  %s5358_s22 = sphi %s5452_s22, %s11359_s22   ;;  %s5354_s21 = sphi %s5450_s21, %s11358_s21  }
   0x8   : > { %10472 = sst [smem:[#allocation6_spill]] %s5362_s23  ;;  %s4764_s26 = sadd.s32 4294967294, %s5366_s24  }
   0x9   : > { %10473 = sst [smem:[#allocation7_spill]] %s5366_s24  ;;  %s5475_s27 = sadd.s32 1, %s5366_s24  }
   0xa   : > { %10474 = sst [smem:[#allocation8_spill]] %s5475_s27  ;;  %s289_s28 = sadd.s32 1, %s5362_s23 }
   0xb   : > { %s286_s29 = ssub.s32 %s5366_s24, %s5475_s27  ;;  %p299_p0 = scmp.ne.s32.totalorder %s5362_s23, %s5358_s22 }
   0xc   : > { %p287_p1 = scmp.eq.s32.totalorder %s286_s29, 0  ;;  %p300_p2 = scmp.eq.s32.totalorder %s5471_s25, 1 }
   0xd   : > { %p305_p3 = scmp.ne.s32.totalorder %s5358_s22, %s5354_s21  ;;  %p306_p4 = scmp.eq.s32.totalorder %s4764_s26, 1 }
   0xe   : > { %s5486_s30 = scalar_select %p287_p1, %s5362_s23, %s289_s28  }
   0xf   : > { %p5488_p5 = por %p300_p2, %p299_p0  ;;  %p5492_p6 = por %p306_p4, %p305_p3 }
  0x10   : > { %10475 = sst [smem:[#allocation9_spill]] %s5486_s30  ;;  %p4767_p7 = scmp.ge.s32.totalorder %s5366_s24, 1 }
  0x11   : > { %s10477_s14 = scalar_select %p5492_p6, 1, 0 }
  0x12   : > { %p365_p8 = scmp.lt.s32.totalorder %s5366_s24, 3 }
  0x13   : > { %10478 = sst [smem:[#allocation10_spill]] %s10477_s14 }
  0x14   : > { %p366_p9 = pnand %p4767_p7, %p365_p8 }
  0x16   : > { %369 = sbr.rel (%p366_p9) target bundleno = 2131 (0x853), region = 68 }
  0x1d   : > { %p407_p10 = scmp.lt.s32.totalorder %s5471_s25, 1  ;;  %v10008_v0 = vmov 0   ;;  %v413_v1 = vld [vmem:[%s9996_s3] sm:$0xff]  ;;  %v414_v2 = vld [vmem:[%s9996_s3 + $0x8] sm:$0xff]  ;;  %s10479_s0 = sld [smem:[#allocation220_spill]]  ;;  %v415_v3 = vld [vmem:[%s9996_s3 + $0x10] sm:$0xff]  ;;  %v10007_v60 = vlaneseq }
  0x1e   : > { %514 = vmatprep.mubr.bf16.mxu0 %v10008_v0  ;;  %567 = vmatprep.mubr.bf16.mxu1 %v10008_v0  ;;  %v1029_v7 = vld [vmem:[%s9995_s2] sm:$0xff]  ;;  %s10480_s1 = sld [smem:[#allocation221_spill]]  ;;  %vm475_vm0 = vcmask 130048   ;;  %v416_v29 = vld [vmem:[%s9996_s3 + $0x18] sm:$0xff]  ;;  %v1031_v40 = vld [vmem:[%s9995_s2 + $0x10] sm:$0xff]  ;;  %s10100_s26 = smov 17  }
  0x1f   : > { %s408_s15 = scalar_select %p407_p10, %s5471_s25, 1  ;;  %5264 = vset.pattern.permute.xlu0 %v10008_v0  ;;  %5265 = vset.pattern.permute.xlu1 %v10008_v0  ;;  %v4789_v31 = vld [vmem:[%s9995_s2 + $0x40] sm:$0xff]  ;;  %v1030_v41 = vld [vmem:[%s9995_s2 + $0x8] sm:$0xff]  ;;  %v4785_v42 = vld [vmem:[%s9995_s2 + $0x30] sm:$0xff]  ;;  %v5645_v61 = vshrl.u32 %v10007_v60, 7  ;;  %vm5379_vm9 = vmmov 0  }
  0x20   : > { %447 = vperm.xlu0 %5264, %v413_v1   ;;  %457 = vperm.xlu1 %5265, %v415_v3   ;;  %v4783_v32 = vld [vmem:[%s9995_s2 + $0x20] sm:$0xff]  ;;  %v4784_v43 = vld [vmem:[%s9995_s2 + $0x28] sm:$0xff]  ;;  %v4791_v44 = vld [vmem:[%s9995_s2 + $0x50] sm:$0xff]  ;;  %s10106_s28 = smov 16   ;;  %s10119_s16 = smov 15   ;;  %vm3647_vm10 = vcmask 261120  }
  0x21   : > { %s4868_s18 = sshll.u32 %s408_s15, 7  ;;  %v4801_v34 = vld [vmem:[%s9995_s2 + $0x80] sm:$0xff]  ;;  %v4790_v45 = vld [vmem:[%s9995_s2 + $0x48] sm:$0xff]  ;;  %v4786_v46 = vld [vmem:[%s9995_s2 + $0x38] sm:$0xff]  ;;  %v5654_v1 = vsub.s32 4, %v5645_v61  ;;  %v5660_v3 = vsub.s32 5, %v5645_v61 }
  0x22   : > { %v4795_v35 = vld [vmem:[%s9995_s2 + $0x60] sm:$0xff]  ;;  %v4796_v47 = vld [vmem:[%s9995_s2 + $0x68] sm:$0xff]  ;;  %v4792_v50 = vld [vmem:[%s9995_s2 + $0x58] sm:$0xff]  ;;  %s10104_s15 = smov 112   ;;  %s10096_s23 = smov 111   ;;  %vm3742_vm11 = vcmask 64512  }
  0x23   : > { %s5513_s29 = scalar_lea.vmem %s10479_s0, %s4868_s18  ;;  %v4807_v36 = vld [vmem:[%s9995_s2 + $0xa0] sm:$0xff]  ;;  %v4808_v48 = vld [vmem:[%s9995_s2 + $0xa8] sm:$0xff]  ;;  %v1032_v51 = vld [vmem:[%s9995_s2 + $0x18] sm:$0xff]  ;;  %10481 = vst [vmem:[#allocation11_spill] sm:$0xff] %v5654_v1  ;;  %s10102_s30 = smov 1   ;;  %vm3881_vm12 = vcmask 1043456  }
  0x24   : > { %v422_v4 = vld [vmem:[%s5513_s29 + $0x8] sm:$0xff]  ;;  %v424_v6 = vld [vmem:[%s5513_s29 + $0x18] sm:$0xff]  ;;  %v421_v10 = vld [vmem:[%s5513_s29] sm:$0xff]  ;;  %452 = vperm.xlu0 %5264, %v414_v2   ;;  %462 = vperm.xlu1 %5265, %v416_v29   ;;  %v5657_v2 = vsub.s32 6, %v5645_v61  ;;  %10483 = vst [vmem:[#allocation13_spill] sm:$0xff] %v5660_v3  ;;  %s10109_s17 = smov 127  }
  0x25   : > { %v430_v5 = vld [vmem:[%s5513_s29 + $0x48] sm:$0xff]  ;;  %v432_v9 = vld [vmem:[%s5513_s29 + $0x58] sm:$0xff]  ;;  %v429_v11 = vld [vmem:[%s5513_s29 + $0x40] sm:$0xff]  ;;  %s10098_s18 = smov 113   ;;  %s10597_s0 = smov 127   ;;  %vm3868_vm13 = vcmask 31744  }
  0x26   : > { %v438_v8 = vpack.c.bf16 %v430_v5, %v422_v4  ;;  %v5273_v12 = vld [vmem:[%s10480_s1] sm:$0xff]   ;;  %v440_v13 = vpack.c.bf16 %v432_v9, %v424_v6  ;;  %v437_v14 = vpack.c.bf16 %v429_v11, %v421_v10  ;;  %v423_v15 = vld [vmem:[%s5513_s29 + $0x10] sm:$0xff]  ;;  %v426_v17 = vld [vmem:[%s5513_s29 + $0x28] sm:$0xff]  ;;  %10482 = vst [vmem:[#allocation12_spill] sm:$0xff] %v5657_v2  ;;  %v5663_v4 = vsub.s32 7, %v5645_v61  ;;  %s10602_s19 = smov 17  }
  0x27   : > { %v431_v16 = vld [vmem:[%s5513_s29 + $0x50] sm:$0xff]  ;;  %v434_v19 = vld [vmem:[%s5513_s29 + $0x68] sm:$0xff]  ;;  %v428_v20 = vld [vmem:[%s5513_s29 + $0x38] sm:$0xff]  ;;  %s10609_s27 = smov 112   ;;  %s5382_s20 = smov [#allocation2]  }
  0x28   : > { %482 = vmatprep.subr.bf16.mxu0 %v438_v8  ;;  %v439_v18 = vpack.c.bf16 %v431_v16, %v423_v15  ;;  %v436_v21 = vld [vmem:[%s5513_s29 + $0x78] sm:$0xff]  ;;  %535 = vmatprep.subr.bf16.mxu1 %v440_v13  ;;  %v442_v22 = vpack.c.bf16 %v434_v19, %v426_v17  ;;  %v425_v24 = vld [vmem:[%s5513_s29 + $0x20] sm:$0xff]  ;;  %v427_v26 = vld [vmem:[%s5513_s29 + $0x30] sm:$0xff]  ;;  %10484 = vst [vmem:[#allocation14_spill] sm:$0xff] %v5663_v4 }
  0x29   : > { %483 = vmatpush1.bf16.msra.mxu0 %v437_v14  ;;  %v444_v23 = vpack.c.bf16 %v436_v21, %v428_v20  ;;  %v433_v25 = vld [vmem:[%s5513_s29 + $0x60] sm:$0xff]  ;;  %v435_v28 = vld [vmem:[%s5513_s29 + $0x70] sm:$0xff]  ;;  %1035 = vperm.xlu0 %5264, %v1029_v7   ;;  %v5274_v33 = vld [vmem:[%s10480_s1 + $0x8] sm:$0xff]  }
  0x2a   : > { %536 = vmatpush1.bf16.msra.mxu1 %v439_v18  ;;  %v441_v27 = vpack.c.bf16 %v433_v25, %v425_v24  ;;  %588 = vmatprep.subr.bf16.mxu0 %v442_v22  ;;  %v443_v30 = vpack.c.bf16 %v435_v28, %v427_v26  ;;  %v4819_v37 = vld [vmem:[%s9995_s2 + $0xe0] sm:$0xff]  ;;  %v4802_v49 = vld [vmem:[%s9995_s2 + $0x88] sm:$0xff]  ;;  %v4797_v53 = vld [vmem:[%s9995_s2 + $0x70] sm:$0xff] }
  0x2b   : > { %641 = vmatprep.subr.bf16.mxu1 %v444_v23  ;;  %1298 = vperm.xlu1 %5265, %v4783_v32   ;;  %v4813_v38 = vld [vmem:[%s9995_s2 + $0xc0] sm:$0xff]  ;;  %v4814_v52 = vld [vmem:[%s9995_s2 + $0xc8] sm:$0xff]  ;;  %v4798_v54 = vld [vmem:[%s9995_s2 + $0x78] sm:$0xff] }
  0x2c   : > { %4773 = vmatmul.mubr.msk.bf16.vlgmr.msra.gmra.mrb[0].mxu0 %vm475_vm0, %v5273_v12  ;;  %v4825_v39 = vld [vmem:[%s9995_s2 + $0x100] sm:$0xff]  ;;  %v4803_v55 = vld [vmem:[%s9995_s2 + $0x90] sm:$0xff]  ;;  %v4820_v56 = vld [vmem:[%s9995_s2 + $0xe8] sm:$0xff] }
  0x2d   : > { %4775 = vmatmul.mubr.msk.bf16.vlgmr.msra.gmra.mrb[0].mxu1 %vm475_vm0, %v5273_v12  ;;  %524 = vmatprep.mubr.bf16.mxu0 %v10008_v0  ;;  %v4809_v57 = vld [vmem:[%s9995_s2 + $0xb0] sm:$0xff]  ;;  %v4804_v59 = vld [vmem:[%s9995_s2 + $0x98] sm:$0xff] }
  0x2e   : > { %577 = vmatprep.mubr.bf16.mxu1 %v10008_v0  ;;  %589 = vmatpush1.bf16.msra.mxu0 %v441_v27  ;;  %v4815_v58 = vld [vmem:[%s9995_s2 + $0xd0] sm:$0xff] }
  0x2f   : > { %642 = vmatpush1.bf16.msra.mxu1 %v443_v30  ;;  %1561 = vperm.xlu0 %5264, %v4789_v31   ;;  %v4799_v62 = vld [vmem:[%s9997_s4 + $0x4] ss:$8 sm:$0xf] }
  0x30   : > { %1824 = vperm.xlu1 %5265, %v4795_v35   ;;  %v4800_v63 = vld [vmem:[%s9997_s4 + $0x4] ss:$8 sm:$0xf0] }
  0x31   : > { %v5665_v5 = vor.u32 %v4800_v63, %v4799_v62 }
  0x33   : > { %1990 = vperm.xlu0 %5264, %v4801_v34   ;;  %v5669_v6 = vrot.slane %v5665_v5, %v5654_v1  ;;  %v5673_v7 = vrot.slane %v5665_v5, %v5657_v2  ;;  %v5677_v8 = vrot.slane %v5665_v5, %v5660_v3  ;;  %v5681_v9 = vrot.slane %v5665_v5, %v5663_v4 }
  0x34   : > { %4774 = vmatmul.mubr.msk.bf16.gmra.mrb[4].mxu0 %vm475_vm0, %v5274_v33  ;;  %2779 = vperm.xlu1 %5265, %v4819_v37  }
  0x35   : > { %4776 = vmatmul.mubr.msk.bf16.gmra.mrb[4].mxu1 %vm475_vm0, %v5274_v33  ;;  %620 = vmatprep.mubr.bf16.mxu0 %v10008_v0  ;;  %10485 = vst [vmem:[#allocation15_spill] sm:$0xff] %v5669_v6  ;;  %10486 = vst [vmem:[#allocation16_spill] sm:$0xff] %v5673_v7 }
  0x36   : > { %673 = vmatprep.mubr.bf16.mxu1 %v10008_v0  ;;  %10487 = vst [vmem:[#allocation17_spill] sm:$0xff] %v5677_v8  ;;  %10488 = vst [vmem:[#allocation18_spill] sm:$0xff] %v5681_v9 }
  0x37   : > { %2253 = vperm.xlu0 %5264, %v4807_v36  }
  0x38   : > { %3042 = vperm.xlu1 %5265, %v4825_v39  }
  0x3b   : > { %2516 = vperm.xlu0 %5264, %v4813_v38  }
  0x3c   : > { %4777 = vmatmul.mubr.msk.bf16.vlgmr.msra.gmra.mrb[8].mxu0 %vm475_vm0, %v5273_v12  ;;  %1040 = vperm.xlu1 %5265, %v1030_v41  }
  0x3d   : > { %4779 = vmatmul.mubr.msk.bf16.vlgmr.msra.gmra.mrb[8].mxu1 %vm475_vm0, %v5273_v12  ;;  %630 = vmatprep.mubr.bf16.mxu0 %v10008_v0 }
  0x3e   : > { %683 = vmatprep.mubr.bf16.mxu1 %v10008_v0 }
  0x3f   : > { %1045 = vperm.xlu0 %5264, %v1031_v40  }
  0x40   : > { %1303 = vperm.xlu1 %5265, %v4784_v43  }
  0x43   : > { %1308 = vperm.xlu0 %5264, %v4785_v42  }
  0x44   : > { %4778 = vmatmul.mubr.msk.bf16.gmra.mrb[12].mxu0 %vm475_vm0, %v5274_v33  ;;  %1566 = vperm.xlu1 %5265, %v4790_v45  }
  0x45   : > { %4780 = vmatmul.mubr.msk.bf16.gmra.mrb[12].mxu1 %vm475_vm0, %v5274_v33 }
  0x47   : > { %1571 = vperm.xlu0 %5264, %v4791_v44  }
  0x48   : > { %1829 = vperm.xlu1 %5265, %v4796_v47  }
  0x4b   : > { %1313 = vperm.xlu0 %5264, %v4786_v46  }
  0x4c   : > { %1995 = vperm.xlu1 %5265, %v4802_v49  }
  0x4f   : > { %2258 = vperm.xlu0 %5264, %v4808_v48  }
  0x50   : > { %1050 = vperm.xlu1 %5265, %v1032_v51  }
  0x53   : > { %1576 = vperm.xlu0 %5264, %v4792_v50  }
  0x54   : > { %1834 = vperm.xlu1 %5265, %v4797_v53  }
  0x57   : > { %2521 = vperm.xlu0 %5264, %v4814_v52  }
  0x58   : > { %2000 = vperm.xlu1 %5265, %v4803_v55  }
  0x5b   : > { %1839 = vperm.xlu0 %5264, %v4798_v54  }
  0x5c   : > { %2263 = vperm.xlu1 %5265, %v4809_v57  }
  0x5f   : > { %2784 = vperm.xlu0 %5264, %v4820_v56  }
  0x60   : > { %2005 = vperm.xlu1 %5265, %v4804_v59  }
  0x63   : > { %2526 = vperm.xlu0 %5264, %v4815_v58  }
  0x9f   : > { %v5683_v10 = vpop.permute.xlu0 %447 }
  0xff   : > { %v516_v11 = vpop.f32.mrb[0].mxu0 }
 0x100   : > { %v517_v12 = vadd.f32 %v516_v11, %v5683_v10  ;;  %v569_v13 = vpop.f32.mrb[0].mxu1  ;;  %v518_v14 = vpop.f32.mrb[1].mxu0 }
 0x101   : > { %v570_v15 = vadd.f32 %v569_v13, %v5683_v10  ;;  %v571_v16 = vpop.f32.mrb[1].mxu1  ;;  %v5687_v17 = vpop.f32.mrb[2].mxu0  ;;  %v519_v41 = vadd.f32 %v518_v14, %v5683_v10 }
 0x102   : > { %v694_v18 = vadd.f32 3.0, %v517_v12  ;;  %v5689_v19 = vpop.f32.mrb[2].mxu1  ;;  %v5691_v20 = vpop.f32.mrb[3].mxu0  ;;  %v572_v26 = vadd.f32 %v571_v16, %v5683_v10 }
 0x103   : > { %v696_v21 = vadd.f32 3.0, %v570_v15  ;;  %v5693_v22 = vpop.f32.mrb[3].mxu1  ;;  %v695_v48 = vadd.f32 3.0, %v519_v41  ;;  %v5777_v16 = vpop.permute.xlu1 %457 }
 0x104   : > { %v726_v23 = vmax.f32 %v694_v18, 0.0  ;;  %v697_v33 = vadd.f32 3.0, %v572_v26 }
 0x105   : > { %v728_v24 = vmax.f32 %v696_v21, 0.0  ;;  %v727_v53 = vmax.f32 %v695_v48, 0.0 }
 0x106   : > { %v758_v25 = vmin.f32 %v726_v23, 6.0  ;;  %v729_v42 = vmax.f32 %v697_v33, 0.0 }
 0x107   : > { %v760_v27 = vmin.f32 %v728_v24, 6.0  ;;  %v5696_v28 = vpop.f32.mrb[4].mxu0  ;;  %v759_v62 = vmin.f32 %v727_v53, 6.0  ;;  %v5787_v23 = vpop.permute.xlu1 %462 }
 0x108   : > { %v790_v29 = vmul.f32 0.16666667, %v758_v25  ;;  %v5698_v30 = vpop.f32.mrb[4].mxu1  ;;  %v5706_v36 = vpop.f32.mrb[5].mxu0  ;;  %v761_v49 = vmin.f32 %v729_v42, 6.0 }
 0x109   : > { %v792_v31 = vmul.f32 0.16666667, %v760_v27  ;;  %v5702_v34 = vpop.f32.mrb[5].mxu1  ;;  %v5712_v38 = vpop.f32.mrb[6].mxu0  ;;  %v791_v14 = vmul.f32 0.16666667, %v759_v62 }
 0x10a   : > { %v5700_v32 = vmul.f32 %v790_v29, %v517_v12  ;;  %v5708_v37 = vpop.f32.mrb[6].mxu1  ;;  %v5718_v40 = vpop.f32.mrb[7].mxu0  ;;  %v793_v54 = vmul.f32 0.16666667, %v761_v49 }
 0x10b   : > { %v5704_v35 = vmul.f32 %v792_v31, %v570_v15  ;;  %v5714_v39 = vpop.f32.mrb[7].mxu1  ;;  %v5773_v15 = vpop.permute.xlu0 %452  ;;  %v5779_v18 = vmul.f32 %v791_v14, %v519_v41 }
 0x10c   : > { %10489 = vst [vmem:[#allocation19_spill] sm:$0xff] %v5700_v32  ;;  %854 = vrot.lane.b32.xlu1 %v5700_v32, %s10100_s26  ;;  %v5759_v63 = vmul.f32 %v793_v54, %v572_v26  ;;  %v5799_v25 = vpop.permute.xlu1 %1298  ;;  %v521_v29 = vadd.f32 %v5687_v17, %v5773_v15  ;;  %v574_v42 = vadd.f32 %v5689_v19, %v5773_v15 }
 0x10d   : > { %870 = vrot.lane.b32.xlu0 %v5704_v35, %s10100_s26  ;;  %10490 = vst [vmem:[#allocation20_spill] sm:$0xff] %v5779_v18  ;;  %10493 = vst [vmem:[#allocation23_spill] sm:$0xff] %v5799_v25  ;;  %v523_v0 = vadd.f32 %v5691_v20, %v5773_v15 }
 0x10e   : > { %v702_v41 = vadd.f32 3.0, %v521_v29  ;;  %v704_v48 = vadd.f32 3.0, %v574_v42 }
 0x10f   : > { %v5721_v43 = vpop.f32.mrb[8].mxu0  ;;  %v5785_v21 = vpop.permute.xlu0 %1035 }
 0x110   : > { %v5723_v44 = vpop.f32.mrb[8].mxu1  ;;  %v5725_v45 = vpop.f32.mrb[9].mxu0  ;;  %1117 = vrot.lane.b32.xlu1 %v5700_v32, %s10106_s28  ;;  %10491 = vst [vmem:[#allocation21_spill] sm:$0xff] %v5785_v21  ;;  %v734_v17 = vmax.f32 %v702_v41, 0.0  ;;  %v736_v19 = vmax.f32 %v704_v48, 0.0 }
 0x111   : > { %v5729_v46 = vpop.f32.mrb[9].mxu1  ;;  %1133 = vrot.lane.b32.xlu0 %v5704_v35, %s10106_s28  ;;  %v5733_v47 = vpop.f32.mrb[10].mxu0 }
 0x112   : > { %v5735_v50 = vpop.f32.mrb[10].mxu1  ;;  %v5737_v51 = vpop.f32.mrb[11].mxu0  ;;  %v766_v54 = vmin.f32 %v734_v17, 6.0  ;;  %v768_v60 = vmin.f32 %v736_v19, 6.0  ;;  %v703_v19 = vadd.f32 3.0, %v523_v0 }
 0x113   : > { %v5739_v52 = vpop.f32.mrb[11].mxu1  ;;  %v5795_v24 = vpop.permute.xlu0 %1561 }
 0x114   : > { %2598 = vrot.lane.b32.xlu1 %v5700_v32, %s10104_s15  ;;  %10492 = vst [vmem:[#allocation22_spill] sm:$0xff] %v5795_v24  ;;  %v5807_v27 = vpop.permute.xlu1 %1824  ;;  %v798_v41 = vmul.f32 0.16666667, %v766_v54  ;;  %v800_v48 = vmul.f32 0.16666667, %v768_v60  ;;  %v735_v20 = vmax.f32 %v703_v19, 0.0 }
 0x115   : > { %1380 = vrot.lane.b32.xlu0 %v5700_v32, %s10119_s16  ;;  %10495 = vst [vmem:[#allocation25_spill] sm:$0xff] %v5807_v27 }
 0x116   : > { %v5849_v17 = vmul.f32 %v798_v41, %v521_v29  ;;  %v5861_v54 = vmul.f32 %v800_v48, %v574_v42  ;;  %v576_v29 = vadd.f32 %v5693_v22, %v5773_v15  ;;  %v767_v42 = vmin.f32 %v735_v20, 6.0 }
 0x117   : > { %v5745_v55 = vpop.f32.mrb[12].mxu0  ;;  %v5805_v26 = vpop.permute.xlu0 %1990 }
 0x118   : > { %2877 = vrot.lane.b32.xlu1 %v5704_v35, %s10096_s23  ;;  %v5749_v56 = vpop.f32.mrb[12].mxu1  ;;  %v5751_v57 = vpop.f32.mrb[13].mxu0  ;;  %10494 = vst [vmem:[#allocation24_spill] sm:$0xff] %v5805_v26  ;;  %v705_v3 = vadd.f32 3.0, %v576_v29  ;;  %v799_v19 = vmul.f32 0.16666667, %v767_v42  ;;  %v527_v42 = vadd.f32 %v5696_v28, %v5777_v16 }
 0x119   : > { %1396 = vrot.lane.b32.xlu0 %v5704_v35, %s10119_s16  ;;  %v5755_v58 = vpop.f32.mrb[13].mxu1  ;;  %v5757_v59 = vpop.f32.mrb[14].mxu0 }
 0x11a   : > { %v5761_v11 = vpop.f32.mrb[14].mxu1  ;;  %v5763_v12 = vpop.f32.mrb[15].mxu0  ;;  %v737_v48 = vmax.f32 %v705_v3, 0.0  ;;  %v5891_v20 = vmul.f32 %v799_v19, %v523_v0  ;;  %v710_v0 = vadd.f32 3.0, %v527_v42 }
 0x11b   : > { %v5765_v13 = vpop.f32.mrb[15].mxu1  ;;  %v5817_v31 = vpop.permute.xlu0 %2253 }
 0x11c   : > { %878 = vrot.lane.b32.xlu1 %v5759_v63, %s10100_s26  ;;  %10496 = vst [vmem:[#allocation26_spill] sm:$0xff] %v5817_v31  ;;  %v5821_v33 = vpop.permute.xlu1 %2779 }
 0x11d   : > { %1643 = vrot.lane.b32.xlu0 %v5700_v32, %s10102_s30  ;;  %10497 = vst [vmem:[#allocation27_spill] sm:$0xff] %v5821_v33 }
 0x11f   : > { %v5829_v49 = vpop.permute.xlu0 %2516 }
 0x120   : > { %1141 = vrot.lane.b32.xlu1 %v5759_v63, %s10106_s28  ;;  %10498 = vst [vmem:[#allocation28_spill] sm:$0xff] %v5829_v49  ;;  %v5831_v53 = vpop.permute.xlu1 %3042  ;;  %v582_v49 = vadd.f32 %v5702_v34, %v5777_v16 }
 0x121   : > { %1659 = vrot.lane.b32.xlu0 %v5704_v35, %s10102_s30  ;;  %10499 = vst [vmem:[#allocation29_spill] sm:$0xff] %v5831_v53  ;;  %v529_v53 = vadd.f32 %v5706_v36, %v5777_v16 }
 0x122   : > { %v713_v24 = vadd.f32 3.0, %v582_v49 }
 0x123   : > { %v5839_v62 = vpop.permute.xlu0 %1045 }
 0x124   : > { %1388 = vrot.lane.b32.xlu1 %v5779_v18, %s10119_s16  ;;  %10500 = vst [vmem:[#allocation30_spill] sm:$0xff] %v5839_v62  ;;  %v5843_v14 = vpop.permute.xlu1 %1040  ;;  %v745_v25 = vmax.f32 %v713_v24, 0.0 }
 0x125   : > { %2088 = vrot.lane.b32.xlu0 %v5704_v35, %s10109_s17  ;;  %10501 = vst [vmem:[#allocation31_spill] sm:$0xff] %v5843_v14 }
 0x127   : > { %v5853_v4 = vpop.permute.xlu0 %1308 }
 0x128   : > { %1404 = vrot.lane.b32.xlu1 %v5759_v63, %s10119_s16  ;;  %10502 = vst [vmem:[#allocation32_spill] sm:$0xff] %v5853_v4  ;;  %v5855_v2 = vpop.permute.xlu1 %1303 }
 0x129   : > { %2072 = vrot.lane.b32.xlu0 %v5700_v32, %s10109_s17  ;;  %10503 = vst [vmem:[#allocation33_spill] sm:$0xff] %v5855_v2 }
 0x12b   : > { %v5867_v60 = vpop.permute.xlu0 %1571 }
 0x12c   : > { %1651 = vrot.lane.b32.xlu1 %v5779_v18, %s10102_s30  ;;  %10504 = vst [vmem:[#allocation34_spill] sm:$0xff] %v5867_v60  ;;  %v5871_v41 = vpop.permute.xlu1 %1566 }
 0x12d   : > { %2351 = vrot.lane.b32.xlu0 %v5704_v35, %s10098_s18  ;;  %10505 = vst [vmem:[#allocation35_spill] sm:$0xff] %v5871_v41  ;;  %v769_v41 = vmin.f32 %v737_v48, 6.0 }
 0x12f   : > { %v5877_v22 = vpop.permute.xlu0 %1313 }
 0x130   : > { %1667 = vrot.lane.b32.xlu1 %v5759_v63, %s10102_s30  ;;  %10506 = vst [vmem:[#allocation36_spill] sm:$0xff] %v5877_v22  ;;  %v5879_v2 = vpop.permute.xlu1 %1829 }
 0x131   : > { %2335 = vrot.lane.b32.xlu0 %v5700_v32, %s10098_s18  ;;  %10507 = vst [vmem:[#allocation37_spill] sm:$0xff] %v5879_v2  ;;  %v801_v2 = vmul.f32 0.16666667, %v769_v41  ;;  %v580_v41 = vadd.f32 %v5698_v30, %v5777_v16 }
 0x133   : > { %v5887_v14 = vpop.permute.xlu0 %2258  ;;  %v5905_v1 = vmul.f32 %v801_v2, %v576_v29  ;;  %v742_v2 = vmax.f32 %v710_v0, 0.0  ;;  %v712_v29 = vadd.f32 3.0, %v580_v41 }
 0x134   : > { %2080 = vrot.lane.b32.xlu1 %v5779_v18, %s10109_s17  ;;  %10508 = vst [vmem:[#allocation38_spill] sm:$0xff] %v5887_v14  ;;  %v5893_v3 = vpop.permute.xlu1 %1995 }
 0x135   : > { %2614 = vrot.lane.b32.xlu0 %v5704_v35, %s10104_s15  ;;  %10509 = vst [vmem:[#allocation39_spill] sm:$0xff] %v5893_v3  ;;  %v774_v30 = vmin.f32 %v742_v2, 6.0  ;;  %v744_v33 = vmax.f32 %v712_v29, 0.0 }
 0x137   : > { %v5903_v14 = vpop.permute.xlu0 %1576  ;;  %v806_v36 = vmul.f32 0.16666667, %v774_v30  ;;  %v776_v0 = vmin.f32 %v744_v33, 6.0 }
 0x138   : > { %2096 = vrot.lane.b32.xlu1 %v5759_v63, %s10109_s17  ;;  %v5901_v48 = vpop.permute.xlu1 %1050  ;;  %10511 = vst [vmem:[#allocation41_spill] sm:$0xff] %v5903_v14 }
 0x139   : > { %2861 = vrot.lane.b32.xlu0 %v5700_v32, %s10096_s23  ;;  %10510 = vst [vmem:[#allocation40_spill] sm:$0xff] %v5901_v48  ;;  %v5945_v29 = vmul.f32 %v806_v36, %v527_v42 }
 0x13b   : > { %v5917_v28 = vpop.permute.xlu0 %2521 }
 0x13c   : > { %2343 = vrot.lane.b32.xlu1 %v5779_v18, %s10098_s18  ;;  %v5913_v19 = vpop.permute.xlu1 %1834  ;;  %10513 = vst [vmem:[#allocation43_spill] sm:$0xff] %v5917_v28  ;;  %v711_v28 = vadd.f32 3.0, %v529_v53 }
 0x13d   : > { %862 = vrot.lane.b32.xlu0 %v5779_v18, %s10100_s26  ;;  %10512 = vst [vmem:[#allocation42_spill] sm:$0xff] %v5913_v19 }
 0x13e   : > { %v743_v21 = vmax.f32 %v711_v28, 0.0  ;;  %v777_v28 = vmin.f32 %v745_v25, 6.0  ;;  %v584_v25 = vadd.f32 %v5708_v37, %v5787_v23 }
 0x13f   : > { %v5931_v27 = vpop.permute.xlu0 %1839 }
 0x140   : > { %2359 = vrot.lane.b32.xlu1 %v5759_v63, %s10098_s18  ;;  %v5929_v31 = vpop.permute.xlu1 %2000  ;;  %10515 = vst [vmem:[#allocation45_spill] sm:$0xff] %v5931_v27  ;;  %v808_v27 = vmul.f32 0.16666667, %v776_v0  ;;  %v775_v9 = vmin.f32 %v743_v21, 6.0  ;;  %v809_v21 = vmul.f32 0.16666667, %v777_v28 }
 0x141   : > { %1125 = vrot.lane.b32.xlu0 %v5779_v18, %s10106_s28  ;;  %10514 = vst [vmem:[#allocation44_spill] sm:$0xff] %v5929_v31  ;;  %v720_v0 = vadd.f32 3.0, %v584_v25 }
 0x142   : > { %v5951_v33 = vmul.f32 %v808_v27, %v580_v41  ;;  %v807_v30 = vmul.f32 0.16666667, %v775_v9  ;;  %v5971_v9 = vmul.f32 %v809_v21, %v582_v49 }
 0x143   : > { %v5941_v34 = vpop.permute.xlu0 %2784  ;;  %v752_v37 = vmax.f32 %v720_v0, 0.0 }
 0x144   : > { %2606 = vrot.lane.b32.xlu1 %v5779_v18, %s10104_s15  ;;  %v5937_v2 = vpop.permute.xlu1 %2263  ;;  %10517 = vst [vmem:[#allocation47_spill] sm:$0xff] %v5941_v34  ;;  %v5961_v24 = vmul.f32 %v807_v30, %v529_v53  ;;  %10522 = vst [vmem:[#allocation52_spill] sm:$0xff] %v5971_v9  ;;  %v531_v53 = vadd.f32 %v5712_v38, %v5787_v23 }
 0x145   : > { %2622 = vrot.lane.b32.xlu0 %v5759_v63, %s10104_s15  ;;  %10516 = vst [vmem:[#allocation46_spill] sm:$0xff] %v5937_v2 }
 0x146   : > { %v718_v49 = vadd.f32 3.0, %v531_v53 }
 0x147   : > { %v5955_v34 = vpop.permute.xlu0 %2526 }
 0x148   : > { %2885 = vrot.lane.b32.xlu1 %v5759_v63, %s10096_s23  ;;  %v5953_v2 = vpop.permute.xlu1 %2005  ;;  %10519 = vst [vmem:[#allocation49_spill] sm:$0xff] %v5955_v34  ;;  %v750_v21 = vmax.f32 %v718_v49, 0.0  ;;  %v586_v34 = vadd.f32 %v5714_v39, %v5787_v23 }
 0x149   : > { %2869 = vrot.lane.b32.xlu0 %v5779_v18, %s10096_s23  ;;  %10518 = vst [vmem:[#allocation48_spill] sm:$0xff] %v5953_v2  ;;  %v3226_v18 = vld [vmem:[%s9998_s5 + $0x1b0] sm:$0xff] }
 0x14a   : > { %v782_v0 = vmin.f32 %v750_v21, 6.0 }
 0x14c   : > { %1119 = vrot.lane.b32.xlu1 %v5849_v17, %s10106_s28 }
 0x14d   : > { %856 = vrot.lane.b32.xlu0 %v5849_v17, %s10100_s26 }
 0x150   : > { %1398 = vrot.lane.b32.xlu1 %v5861_v54, %s10119_s16 }
 0x151   : > { %872 = vrot.lane.b32.xlu0 %v5861_v54, %s10100_s26 }
 0x154   : > { %1645 = vrot.lane.b32.xlu1 %v5849_v17, %s10102_s30 }
 0x155   : > { %1135 = vrot.lane.b32.xlu0 %v5861_v54, %s10106_s28 }
 0x158   : > { %1661 = vrot.lane.b32.xlu1 %v5861_v54, %s10102_s30 }
 0x159   : > { %1382 = vrot.lane.b32.xlu0 %v5849_v17, %s10119_s16 }
 0x15c   : > { %2353 = vrot.lane.b32.xlu1 %v5861_v54, %s10098_s18 }
 0x15d   : > { %2090 = vrot.lane.b32.xlu0 %v5861_v54, %s10109_s17 }
 0x160   : > { %864 = vrot.lane.b32.xlu1 %v5891_v20, %s10100_s26 }
 0x161   : > { %2074 = vrot.lane.b32.xlu0 %v5849_v17, %s10109_s17 }
 0x164   : > { %1127 = vrot.lane.b32.xlu1 %v5891_v20, %s10106_s28 }
 0x165   : > { %1406 = vrot.lane.b32.xlu0 %v5905_v1, %s10119_s16 }
 0x168   : > { %880 = vrot.lane.b32.xlu1 %v5905_v1, %s10100_s26 }
 0x169   : > { %1653 = vrot.lane.b32.xlu0 %v5891_v20, %s10102_s30 }
 0x16c   : > { %1143 = vrot.lane.b32.xlu1 %v5905_v1, %s10106_s28 }
 0x16d   : > { %1669 = vrot.lane.b32.xlu0 %v5905_v1, %s10102_s30 }
 0x170   : > { %1390 = vrot.lane.b32.xlu1 %v5891_v20, %s10119_s16 }
 0x171   : > { %2098 = vrot.lane.b32.xlu0 %v5905_v1, %s10109_s17 }
 0x174   : > { %2082 = vrot.lane.b32.xlu1 %v5891_v20, %s10109_s17 }
 0x175   : > { %2345 = vrot.lane.b32.xlu0 %v5891_v20, %s10098_s18 }
 0x178   : > { %858 = vrot.lane.b32.xlu1 %v5945_v29, %s10100_s26 }
 0x179   : > { %1121 = vrot.lane.b32.xlu0 %v5945_v29, %s10106_s28 }
 0x17c   : > { %1663 = vrot.lane.b32.xlu1 %v5951_v33, %s10102_s30 }
 0x17d   : > { %874 = vrot.lane.b32.xlu0 %v5951_v33, %s10100_s26 }
 0x17e   : > { %v5963_v42 = vpop.permute.xlu1 %854 }
 0x17f   : > { %10520 = vst [vmem:[#allocation50_spill] sm:$0xff] %v5963_v42  ;;  %v5965_v36 = vpop.permute.xlu0 %870 }
 0x180   : > { %10521 = vst [vmem:[#allocation51_spill] sm:$0xff] %v5965_v36  ;;  %1129 = vrot.lane.b32.xlu1 %v5961_v24, %s10106_s28 }
 0x181   : > { %1137 = vrot.lane.b32.xlu0 %v5951_v33, %s10106_s28 }
 0x182   : > { %v5975_v27 = vpop.permute.xlu1 %1117 }
 0x183   : > { %10523 = vst [vmem:[#allocation53_spill] sm:$0xff] %v5975_v27  ;;  %v5979_v41 = vpop.permute.xlu0 %1133  ;;  %v3177_v27 = vld [vmem:[%s9998_s5 + $0x28] sm:$0xff] }
 0x184   : > { %10524 = vst [vmem:[#allocation54_spill] sm:$0xff] %v5979_v41  ;;  %882 = vrot.lane.b32.xlu1 %v5971_v9, %s10100_s26 }
 0x185   : > { %1384 = vrot.lane.b32.xlu0 %v5945_v29, %s10119_s16 }
 0x186   : > { %v5985_v28 = vpop.permute.xlu1 %2598 }
 0x187   : > { %10525 = vst [vmem:[#allocation55_spill] sm:$0xff] %v5985_v28  ;;  %v5987_v30 = vpop.permute.xlu0 %1380  ;;  %v784_v28 = vmin.f32 %v752_v37, 6.0  ;;  %v814_v37 = vmul.f32 0.16666667, %v782_v0 }
 0x188   : > { %10526 = vst [vmem:[#allocation56_spill] sm:$0xff] %v5987_v30  ;;  %1145 = vrot.lane.b32.xlu1 %v5971_v9, %s10106_s28  ;;  %v533_v30 = vadd.f32 %v5718_v40, %v5787_v23 }
 0x189   : > { %1400 = vrot.lane.b32.xlu0 %v5951_v33, %s10119_s16  ;;  %v816_v39 = vmul.f32 0.16666667, %v784_v28 }
 0x18a   : > { %v5993_v38 = vpop.permute.xlu1 %2877 }
 0x18b   : > { %10527 = vst [vmem:[#allocation57_spill] sm:$0xff] %v5993_v38  ;;  %v5997_v2 = vpop.permute.xlu0 %1396  ;;  %v721_v38 = vadd.f32 3.0, %v586_v34  ;;  %v6021_v40 = vmul.f32 %v816_v39, %v584_v25 }
 0x18c   : > { %10528 = vst [vmem:[#allocation58_spill] sm:$0xff] %v5997_v2  ;;  %1392 = vrot.lane.b32.xlu1 %v5961_v24, %s10119_s16  ;;  %v719_v2 = vadd.f32 3.0, %v533_v30 }
 0x18d   : > { %1647 = vrot.lane.b32.xlu0 %v5945_v29, %s10102_s30  ;;  %v753_v36 = vmax.f32 %v721_v38, 0.0  ;;  %10533 = vst [vmem:[#allocation63_spill] sm:$0xff] %v6021_v40 }
 0x18e   : > { %v6005_v42 = vpop.permute.xlu1 %878  ;;  %v751_v21 = vmax.f32 %v719_v2, 0.0  ;;  %v678_v2 = vadd.f32 %v5729_v46, %v5683_v10 }
 0x18f   : > { %10529 = vst [vmem:[#allocation59_spill] sm:$0xff] %v6005_v42  ;;  %v6007_v49 = vpop.permute.xlu0 %1643  ;;  %v6027_v42 = vmul.f32 %v814_v37, %v531_v53  ;;  %v785_v0 = vmin.f32 %v753_v36, 6.0 }
 0x190   : > { %10530 = vst [vmem:[#allocation60_spill] sm:$0xff] %v6007_v49  ;;  %1408 = vrot.lane.b32.xlu1 %v5971_v9, %s10119_s16  ;;  %v623_v49 = vadd.f32 %v5721_v43, %v5683_v10  ;;  %v701_v37 = vadd.f32 3.0, %v678_v2 }
 0x191   : > { %866 = vrot.lane.b32.xlu0 %v5961_v24, %s10100_s26  ;;  %v817_v43 = vmul.f32 0.16666667, %v785_v0 }
 0x192   : > { %v6013_v7 = vpop.permute.xlu1 %1141  ;;  %v698_v25 = vadd.f32 3.0, %v623_v49 }
 0x193   : > { %10531 = vst [vmem:[#allocation61_spill] sm:$0xff] %v6013_v7  ;;  %v6015_v8 = vpop.permute.xlu0 %1659 }
 0x194   : > { %10532 = vst [vmem:[#allocation62_spill] sm:$0xff] %v6015_v8  ;;  %1655 = vrot.lane.b32.xlu1 %v5961_v24, %s10102_s30  ;;  %v783_v8 = vmin.f32 %v751_v21, 6.0  ;;  %v730_v53 = vmax.f32 %v698_v25, 0.0  ;;  %v6047_v21 = vmul.f32 %v817_v43, %v586_v34  ;;  %v627_v43 = vadd.f32 %v5733_v47, %v5773_v15 }
 0x195   : > { %1671 = vrot.lane.b32.xlu0 %v5971_v9, %s10102_s30 }
 0x196   : > { %v6025_v28 = vpop.permute.xlu1 %1388  ;;  %v815_v36 = vmul.f32 0.16666667, %v783_v8  ;;  %10539 = vst [vmem:[#allocation69_spill] sm:$0xff] %v6047_v21  ;;  %v762_v0 = vmin.f32 %v730_v53, 6.0 }
 0x197   : > { %10534 = vst [vmem:[#allocation64_spill] sm:$0xff] %v6025_v28  ;;  %v6029_v38 = vpop.permute.xlu0 %2088 }
 0x198   : > { %10535 = vst [vmem:[#allocation65_spill] sm:$0xff] %v6029_v38  ;;  %876 = vrot.lane.b32.xlu1 %v6021_v40, %s10100_s26  ;;  %v6055_v46 = vmul.f32 %v815_v36, %v533_v30  ;;  %v794_v34 = vmul.f32 0.16666667, %v762_v0  ;;  %v682_v30 = vadd.f32 %v5739_v52, %v5773_v15 }
 0x199   : > { %860 = vrot.lane.b32.xlu0 %v6027_v42, %s10100_s26 }
 0x19a   : > { %v6037_v39 = vpop.permute.xlu1 %1404  ;;  %10541 = vst [vmem:[#allocation71_spill] sm:$0xff] %v6055_v46  ;;  %v6077_v53 = vmul.f32 %v794_v34, %v623_v49  ;;  %v709_v47 = vadd.f32 3.0, %v682_v30  ;;  %v688_v34 = vadd.f32 %v5755_v58, %v5777_v16 }
 0x19b   : > { %10536 = vst [vmem:[#allocation66_spill] sm:$0xff] %v6037_v39  ;;  %v6039_v7 = vpop.permute.xlu0 %2072 }
 0x19c   : > { %10537 = vst [vmem:[#allocation67_spill] sm:$0xff] %v6039_v7  ;;  %1139 = vrot.lane.b32.xlu1 %v6021_v40, %s10106_s28  ;;  %v733_v7 = vmax.f32 %v701_v37, 0.0  ;;  %v741_v49 = vmax.f32 %v709_v47, 0.0 }
 0x19d   : > { %1123 = vrot.lane.b32.xlu0 %v6027_v42, %s10106_s28 }
 0x19e   : > { %v6045_v38 = vpop.permute.xlu1 %1651  ;;  %v765_v25 = vmin.f32 %v733_v7, 6.0  ;;  %v706_v7 = vadd.f32 3.0, %v627_v43 }
 0x19f   : > { %10538 = vst [vmem:[#allocation68_spill] sm:$0xff] %v6045_v38  ;;  %v6049_v28 = vpop.permute.xlu0 %2351 }
 0x1a0   : > { %10540 = vst [vmem:[#allocation70_spill] sm:$0xff] %v6049_v28  ;;  %1386 = vrot.lane.b32.xlu1 %v6027_v42, %s10119_s16  ;;  %v797_v37 = vmul.f32 0.16666667, %v765_v25 }
 0x1a1   : > { %884 = vrot.lane.b32.xlu0 %v6047_v21, %s10100_s26 }
 0x1a2   : > { %v6057_v39 = vpop.permute.xlu1 %1667  ;;  %v6087_v52 = vmul.f32 %v797_v37, %v678_v2  ;;  %v773_v2 = vmin.f32 %v741_v49, 6.0  ;;  %v717_v37 = vadd.f32 3.0, %v688_v34 }
 0x1a3   : > { %10542 = vst [vmem:[#allocation72_spill] sm:$0xff] %v6057_v39  ;;  %v6059_v8 = vpop.permute.xlu0 %2335 }
 0x1a4   : > { %10543 = vst [vmem:[#allocation73_spill] sm:$0xff] %v6059_v8  ;;  %868 = vrot.lane.b32.xlu1 %v6055_v46, %s10100_s26  ;;  %10548 = vst [vmem:[#allocation78_spill] sm:$0xff] %v6087_v52  ;;  %v805_v39 = vmul.f32 0.16666667, %v773_v2 }
 0x1a5   : > { %1147 = vrot.lane.b32.xlu0 %v6047_v21, %s10106_s28 }
 0x1a6   : > { %v6067_v28 = vpop.permute.xlu1 %2080 }
 0x1a7   : > { %10544 = vst [vmem:[#allocation74_spill] sm:$0xff] %v6067_v28  ;;  %v6071_v36 = vpop.permute.xlu0 %2614 }
 0x1a8   : > { %10545 = vst [vmem:[#allocation75_spill] sm:$0xff] %v6071_v36  ;;  %1131 = vrot.lane.b32.xlu1 %v6055_v46, %s10106_s28  ;;  %v738_v36 = vmax.f32 %v706_v7, 0.0  ;;  %v692_v7 = vadd.f32 %v5765_v13, %v5787_v23 }
 0x1a9   : > { %1394 = vrot.lane.b32.xlu0 %v6055_v46, %s10119_s16 }
 0x1aa   : > { %v6079_v0 = vpop.permute.xlu1 %2096  ;;  %v725_v38 = vadd.f32 3.0, %v692_v7 }
 0x1ab   : > { %10546 = vst [vmem:[#allocation76_spill] sm:$0xff] %v6079_v0  ;;  %v6081_v8 = vpop.permute.xlu0 %2861 }
 0x1ac   : > { %10547 = vst [vmem:[#allocation77_spill] sm:$0xff] %v6081_v8  ;;  %2630 = vrot.lane.b32.xlu1 %v6077_v53, %s10104_s15  ;;  %v770_v8 = vmin.f32 %v738_v36, 6.0  ;;  %v749_v36 = vmax.f32 %v717_v37, 0.0  ;;  %v757_v6 = vmax.f32 %v725_v38, 0.0 }
 0x1ad   : > { %2104 = vrot.lane.b32.xlu0 %v6077_v53, %s10109_s17 }
 0x1ae   : > { %v6089_v28 = vpop.permute.xlu1 %2343  ;;  %v802_v58 = vmul.f32 0.16666667, %v770_v8  ;;  %v781_v8 = vmin.f32 %v749_v36, 6.0 }
 0x1af   : > { %10549 = vst [vmem:[#allocation79_spill] sm:$0xff] %v6089_v28  ;;  %v6093_v25 = vpop.permute.xlu0 %862 }
 0x1b0   : > { %10550 = vst [vmem:[#allocation80_spill] sm:$0xff] %v6093_v25  ;;  %1173 = vrot.lane.b32.xlu1 %v6087_v52, %s10106_s28  ;;  %v6117_v13 = vmul.f32 %v802_v58, %v627_v43  ;;  %v6121_v25 = vmul.f32 %v805_v39, %v682_v30  ;;  %v813_v37 = vmul.f32 0.16666667, %v781_v8 }
 0x1b1   : > { %2367 = vrot.lane.b32.xlu0 %v6077_v53, %s10098_s18 }
 0x1b2   : > { %v6099_v0 = vpop.permute.xlu1 %2359  ;;  %10555 = vst [vmem:[#allocation85_spill] sm:$0xff] %v6117_v13  ;;  %10557 = vst [vmem:[#allocation87_spill] sm:$0xff] %v6121_v25  ;;  %v6139_v39 = vmul.f32 %v813_v37, %v688_v34 }
 0x1b3   : > { %10551 = vst [vmem:[#allocation81_spill] sm:$0xff] %v6099_v0  ;;  %v6103_v47 = vpop.permute.xlu0 %1125 }
 0x1b4   : > { %10552 = vst [vmem:[#allocation82_spill] sm:$0xff] %v6103_v47  ;;  %1436 = vrot.lane.b32.xlu1 %v6087_v52, %s10119_s16  ;;  %10562 = vst [vmem:[#allocation92_spill] sm:$0xff] %v6139_v39 }
 0x1b5   : > { %2893 = vrot.lane.b32.xlu0 %v6077_v53, %s10096_s23  ;;  %s10612_s23 = smov 111  }
 0x1b6   : > { %v6109_v28 = vpop.permute.xlu1 %2606 }
 0x1b7   : > { %10553 = vst [vmem:[#allocation83_spill] sm:$0xff] %v6109_v28  ;;  %v6111_v0 = vpop.permute.xlu0 %2622 }
 0x1b8   : > { %10554 = vst [vmem:[#allocation84_spill] sm:$0xff] %v6111_v0  ;;  %1699 = vrot.lane.b32.xlu1 %v6087_v52, %s10102_s30  ;;  %v789_v0 = vmin.f32 %v757_v6, 6.0 }
 0x1b9   : > { %910 = vrot.lane.b32.xlu0 %v6087_v52, %s10100_s26  ;;  %v3176_v52 = vld [vmem:[%s9998_s5 + $0x20] sm:$0xff] }
 0x1ba   : > { %v6119_v49 = vpop.permute.xlu1 %2885  ;;  %v821_v30 = vmul.f32 0.16666667, %v789_v0  ;;  %v625_v0 = vadd.f32 %v5725_v45, %v5683_v10 }
 0x1bb   : > { %10556 = vst [vmem:[#allocation86_spill] sm:$0xff] %v6119_v49  ;;  %v6123_v28 = vpop.permute.xlu0 %2869 }
 0x1bc   : > { %10558 = vst [vmem:[#allocation88_spill] sm:$0xff] %v6123_v28  ;;  %2106 = vrot.lane.b32.xlu1 %v6117_v13, %s10109_s17  ;;  %v6149_v36 = vmul.f32 %v821_v30, %v692_v7  ;;  %v699_v7 = vadd.f32 3.0, %v625_v0 }
 0x1bd   : > { %912 = vrot.lane.b32.xlu0 %v6121_v25, %s10100_s26 }
 0x1be   : > { %v6129_v2 = vpop.permute.xlu1 %1119  ;;  %10565 = vst [vmem:[#allocation95_spill] sm:$0xff] %v6149_v36  ;;  %v731_v45 = vmax.f32 %v699_v7, 0.0 }
 0x1bf   : > { %10559 = vst [vmem:[#allocation89_spill] sm:$0xff] %v6129_v2  ;;  %v6131_v43 = vpop.permute.xlu0 %856 }
 0x1c0   : > { %10560 = vst [vmem:[#allocation90_spill] sm:$0xff] %v6131_v43  ;;  %1175 = vrot.lane.b32.xlu1 %v6121_v25, %s10106_s28 }
 0x1c1   : > { %1438 = vrot.lane.b32.xlu0 %v6121_v25, %s10119_s16 }
 0x1c2   : > { %v6137_v38 = vpop.permute.xlu1 %1398 }
 0x1c3   : > { %10561 = vst [vmem:[#allocation91_spill] sm:$0xff] %v6137_v38  ;;  %v6141_v58 = vpop.permute.xlu0 %872 }
 0x1c4   : > { %10563 = vst [vmem:[#allocation93_spill] sm:$0xff] %v6141_v58  ;;  %1701 = vrot.lane.b32.xlu1 %v6121_v25, %s10102_s30 }
 0x1c5   : > { %1177 = vrot.lane.b32.xlu0 %v6139_v39, %s10106_s28 }
 0x1c6   : > { %v6147_v6 = vpop.permute.xlu1 %1645 }
 0x1c7   : > { %10564 = vst [vmem:[#allocation94_spill] sm:$0xff] %v6147_v6  ;;  %v6151_v8 = vpop.permute.xlu0 %1135 }
 0x1c8   : > { %10566 = vst [vmem:[#allocation96_spill] sm:$0xff] %v6151_v8  ;;  %914 = vrot.lane.b32.xlu1 %v6139_v39, %s10100_s26 }
 0x1c9   : > { %1179 = vrot.lane.b32.xlu0 %v6149_v36, %s10106_s28 }
 0x1ca   : > { %v6159_v34 = vpop.permute.xlu1 %1661 }
 0x1cb   : > { %10567 = vst [vmem:[#allocation97_spill] sm:$0xff] %v6159_v34  ;;  %v6161_v37 = vpop.permute.xlu0 %1382 }
 0x1cc   : > { %10568 = vst [vmem:[#allocation98_spill] sm:$0xff] %v6161_v37  ;;  %1440 = vrot.lane.b32.xlu1 %v6139_v39, %s10119_s16 }
 0x1cd   : > { %1442 = vrot.lane.b32.xlu0 %v6149_v36, %s10119_s16 }
 0x1ce   : > { %v6167_v30 = vpop.permute.xlu1 %2353 }
 0x1cf   : > { %10569 = vst [vmem:[#allocation99_spill] sm:$0xff] %v6167_v30  ;;  %v6169_v38 = vpop.permute.xlu0 %2090  ;;  %v4826_v30 = vld [vmem:[%s9995_s2 + $0x108] sm:$0xff] }
 0x1d0   : > { %10570 = vst [vmem:[#allocation100_spill] sm:$0xff] %v6169_v38  ;;  %1703 = vrot.lane.b32.xlu1 %v6139_v39, %s10102_s30  ;;  %v763_v38 = vmin.f32 %v731_v45, 6.0 }
 0x1d1   : > { %886 = vrot.lane.b32.xlu0 %v6077_v53, %s10100_s26 }
 0x1d2   : > { %v6175_v34 = vpop.permute.xlu1 %864  ;;  %v795_v7 = vmul.f32 0.16666667, %v763_v38 }
 0x1d3   : > { %10571 = vst [vmem:[#allocation101_spill] sm:$0xff] %v6175_v34  ;;  %v6177_v6 = vpop.permute.xlu0 %2074 }
 0x1d4   : > { %10572 = vst [vmem:[#allocation102_spill] sm:$0xff] %v6177_v6  ;;  %916 = vrot.lane.b32.xlu1 %v6149_v36, %s10100_s26  ;;  %v6200_v45 = vmul.f32 %v795_v7, %v625_v0  ;;  %v676_v0 = vadd.f32 %v5723_v44, %v5683_v10 }
 0x1d5   : > { %1149 = vrot.lane.b32.xlu0 %v6077_v53, %s10106_s28 }
 0x1d6   : > { %v6186_v39 = vpop.permute.xlu1 %1127  ;;  %10577 = vst [vmem:[#allocation107_spill] sm:$0xff] %v6200_v45 }
 0x1d7   : > { %10573 = vst [vmem:[#allocation103_spill] sm:$0xff] %v6186_v39  ;;  %v6188_v8 = vpop.permute.xlu0 %1406 }
 0x1d8   : > { %10574 = vst [vmem:[#allocation104_spill] sm:$0xff] %v6188_v8  ;;  %3047 = vperm.xlu1 %5265, %v4826_v30   ;;  %v4810_v30 = vld [vmem:[%s9995_s2 + $0xb8] sm:$0xff] }
 0x1d9   : > { %1402 = vrot.lane.b32.xlu0 %v6021_v40, %s10119_s16 }
 0x1da   : > { %v6192_v6 = vpop.permute.xlu1 %880 }
 0x1db   : > { %10575 = vst [vmem:[#allocation105_spill] sm:$0xff] %v6192_v6  ;;  %v6194_v58 = vpop.permute.xlu0 %1653  ;;  %v700_v6 = vadd.f32 3.0, %v676_v0 }
 0x1dc   : > { %10576 = vst [vmem:[#allocation106_spill] sm:$0xff] %v6194_v58  ;;  %2337 = vrot.lane.b32.xlu1 %v5849_v17, %s10098_s18 }
 0x1dd   : > { %1649 = vrot.lane.b32.xlu0 %v6027_v42, %s10102_s30  ;;  %v732_v10 = vmax.f32 %v700_v6, 0.0 }
 0x1de   : > { %v6202_v37 = vpop.permute.xlu1 %1143 }
 0x1df   : > { %10578 = vst [vmem:[#allocation108_spill] sm:$0xff] %v6202_v37  ;;  %v6204_v8 = vpop.permute.xlu0 %1669 }
 0x1e0   : > { %10579 = vst [vmem:[#allocation109_spill] sm:$0xff] %v6204_v8  ;;  %894 = vrot.lane.b32.xlu1 %v6200_v45, %s10100_s26  ;;  %s10605_s26 = smov 15  }
 0x1e1   : > { %2084 = vrot.lane.b32.xlu0 %v5961_v24, %s10109_s17 }
 0x1e2   : > { %v6210_v38 = vpop.permute.xlu1 %1390 }
 0x1e3   : > { %10580 = vst [vmem:[#allocation110_spill] sm:$0xff] %v6210_v38  ;;  %v6217_v7 = vpop.permute.xlu0 %2098 }
 0x1e4   : > { %10581 = vst [vmem:[#allocation111_spill] sm:$0xff] %v6217_v7  ;;  %1157 = vrot.lane.b32.xlu1 %v6200_v45, %s10106_s28  ;;  %v764_v7 = vmin.f32 %v732_v10, 6.0 }
 0x1e5   : > { %2268 = vperm.xlu0 %5264, %v4810_v30  }
 0x1e6   : > { %v6221_v8 = vpop.permute.xlu1 %2082  ;;  %v796_v38 = vmul.f32 0.16666667, %v764_v7  ;;  %v4821_v7 = vld [vmem:[%s9995_s2 + $0xf0] sm:$0xff] }
 0x1e7   : > { %10582 = vst [vmem:[#allocation112_spill] sm:$0xff] %v6221_v8  ;;  %v6223_v37 = vpop.permute.xlu0 %2345 }
 0x1e8   : > { %10583 = vst [vmem:[#allocation113_spill] sm:$0xff] %v6223_v37  ;;  %1410 = vrot.lane.b32.xlu1 %v6047_v21, %s10119_s16  ;;  %v633_v37 = vadd.f32 %v5745_v55, %v5777_v16  ;;  %v6257_v10 = vmul.f32 %v796_v38, %v676_v0  ;;  %v3189_v38 = vld [vmem:[%s9998_s5 + $0x88] sm:$0xff]  ;;  %v3220_v0 = vld [vmem:[%s9998_s5 + $0x180] sm:$0xff] }
 0x1e9   : > { %2369 = vrot.lane.b32.xlu0 %v6117_v13, %s10098_s18 }
 0x1ea   : > { %v6229_v58 = vpop.permute.xlu1 %858  ;;  %v714_v2 = vadd.f32 3.0, %v633_v37  ;;  %10591 = vst [vmem:[#allocation121_spill] sm:$0xff] %v6257_v10 }
 0x1eb   : > { %10584 = vst [vmem:[#allocation114_spill] sm:$0xff] %v6229_v58  ;;  %v6231_v44 = vpop.permute.xlu0 %1121 }
 0x1ec   : > { %10585 = vst [vmem:[#allocation115_spill] sm:$0xff] %v6231_v44  ;;  %1657 = vrot.lane.b32.xlu1 %v6055_v46, %s10102_s30 }
 0x1ed   : > { %2616 = vrot.lane.b32.xlu0 %v5861_v54, %s10104_s15 }
 0x1ee   : > { %v6237_v30 = vpop.permute.xlu1 %1663 }
 0x1ef   : > { %10586 = vst [vmem:[#allocation116_spill] sm:$0xff] %v6237_v30  ;;  %v6241_v8 = vpop.permute.xlu0 %874  ;;  %v746_v30 = vmax.f32 %v714_v2, 0.0  ;;  %v3188_v2 = vld [vmem:[%s9998_s5 + $0x80] sm:$0xff] }
 0x1f0   : > { %10587 = vst [vmem:[#allocation117_spill] sm:$0xff] %v6241_v8  ;;  %2092 = vrot.lane.b32.xlu1 %v5951_v33, %s10109_s17  ;;  %s10598_s17 = smov 1  }
 0x1f1   : > { %1705 = vrot.lane.b32.xlu0 %v6149_v36, %s10102_s30 }
 0x1f2   : > { %v6247_v6 = vpop.permute.xlu1 %1129 }
 0x1f3   : > { %10588 = vst [vmem:[#allocation118_spill] sm:$0xff] %v6247_v6  ;;  %v6249_v39 = vpop.permute.xlu0 %1137 }
 0x1f4   : > { %10589 = vst [vmem:[#allocation119_spill] sm:$0xff] %v6249_v39  ;;  %2361 = vrot.lane.b32.xlu1 %v5905_v1, %s10098_s18  ;;  %v778_v39 = vmin.f32 %v746_v30, 6.0  ;;  %v3221_v30 = vld [vmem:[%s9998_s5 + $0x188] sm:$0xff]  ;;  %s5308_s18 = sshll.u32 %s5382_s20, 4  ;;  %s5309_s18 = int_to_ptr.vmem [resolvable:$false] %s5308_s18 }
 0x1f5   : > { %2600 = vrot.lane.b32.xlu0 %v5849_v17, %s10104_s15  ;;  %v5107_v43 = vpack.c.bf16 %v3221_v30, %v3220_v0  ;;  %s5310_s14 = scalar_lea.vmem %s5309_s18, 4096 }
 0x1f6   : > { %v6255_v55 = vpop.permute.xlu1 %882  ;;  %v810_v28 = vmul.f32 0.16666667, %v778_v39  ;;  %v3191_v39 = vld [vmem:[%s9998_s5 + $0x98] sm:$0xff] }
 0x1f7   : > { %10590 = vst [vmem:[#allocation120_spill] sm:$0xff] %v6255_v55  ;;  %v6259_v8 = vpop.permute.xlu0 %1384  ;;  %5108 = vmatprep.subr.bf16.mxu1 %v5107_v43  ;;  %v3190_v43 = vld [vmem:[%s9998_s5 + $0x90] sm:$0xff] }
 0x1f8   : > { %10592 = vst [vmem:[#allocation122_spill] sm:$0xff] %v6259_v8  ;;  %2608 = vrot.lane.b32.xlu1 %v5891_v20, %s10104_s15  ;;  %v6308_v0 = vmul.f32 %v810_v28, %v633_v37  ;;  %v5079_v28 = vpack.c.bf16 %v3191_v39, %v3190_v43  ;;  %v3223_v37 = vld [vmem:[%s9998_s5 + $0x198] sm:$0xff]  ;;  %v3192_v39 = vld [vmem:[%s9998_s5 + $0xa0] sm:$0xff] }
 0x1f9   : > { %1165 = vrot.lane.b32.xlu0 %v6257_v10, %s10106_s28  ;;  %v3207_v43 = vld [vmem:[%s9998_s5 + $0x118] sm:$0xff]  ;;  %s10623_s28 = smov 16  }
 0x1fa   : > { %v6268_v36 = vpop.permute.xlu1 %1145  ;;  %10600 = vst [vmem:[#allocation128_spill] sm:$0xff] %v6308_v0 }
 0x1fb   : > { %10593 = vst [vmem:[#allocation123_spill] sm:$0xff] %v6268_v36  ;;  %v6270_v6 = vpop.permute.xlu0 %1400  ;;  %v5075_v36 = vpack.c.bf16 %v3189_v38, %v3188_v2  ;;  %v3204_v2 = vld [vmem:[%s9998_s5 + $0x100] sm:$0xff]  ;;  %v3205_v38 = vld [vmem:[%s9998_s5 + $0x108] sm:$0xff] }
 0x1fc   : > { %10594 = vst [vmem:[#allocation124_spill] sm:$0xff] %v6270_v6  ;;  %2789 = vperm.xlu1 %5265, %v4821_v7   ;;  %v3172_v7 = vld [vmem:[%s9998_s5] sm:$0xff]  ;;  %v3173_v6 = vld [vmem:[%s9998_s5 + $0x8] sm:$0xff]  ;;  %v5109_v25 = vpack.c.bf16 %v3205_v38, %v3204_v2  ;;  %v3175_v2 = vld [vmem:[%s9998_s5 + $0x18] sm:$0xff] }
 0x1fd   : > { %1420 = vrot.lane.b32.xlu0 %v6200_v45, %s10119_s16  ;;  %v5077_v34 = vpack.c.bf16 %v3173_v6, %v3172_v7  ;;  %5076 = vmatprep.subr.bf16.mxu0 %v5075_v36  ;;  %v3174_v7 = vld [vmem:[%s9998_s5 + $0x10] sm:$0xff]  ;;  %s10606_s16 = smov 113  }
 0x1fe   : > { %v6292_v55 = vpop.permute.xlu1 %1392  ;;  %5110 = vmatpush3.bf16.msra.mxu1 %v5109_v25  ;;  %v3222_v25 = vld [vmem:[%s9998_s5 + $0x190] sm:$0xff] }
 0x1ff   : > { %10595 = vst [vmem:[#allocation125_spill] sm:$0xff] %v6292_v55  ;;  %v6300_v49 = vpop.permute.xlu0 %1647  ;;  %5078 = vmatpush3.bf16.msra.mxu0 %v5077_v34  ;;  %v3206_v38 = vld [vmem:[%s9998_s5 + $0x110] sm:$0xff]  ;;  %v5111_v55 = vpack.c.bf16 %v3223_v37, %v3222_v25  ;;  %v3208_v25 = vld [vmem:[%s9998_s5 + $0x120] sm:$0xff]  ;;  %v3209_v37 = vld [vmem:[%s9998_s5 + $0x128] sm:$0xff] }
 0x200   : > { %10596 = vst [vmem:[#allocation126_spill] sm:$0xff] %v6300_v49  ;;  %2076 = vrot.lane.b32.xlu1 %v5945_v29, %s10597_s0  ;;  %5080 = vmatprep.subr.bf16.mxu0 %v5079_v28  ;;  %v3225_v28 = vld [vmem:[%s9998_s5 + $0x1a8] sm:$0xff]  ;;  %v5113_v41 = vpack.c.bf16 %v3207_v43, %v3206_v38  ;;  %v3194_v38 = vld [vmem:[%s9998_s5 + $0xb0] sm:$0xff]  ;;  %v3195_v43 = vld [vmem:[%s9998_s5 + $0xb8] sm:$0xff] }
 0x201   : > { %1673 = vrot.lane.b32.xlu0 %v6047_v21, %s10598_s17  ;;  %5112 = vmatprep.subr.bf16.mxu1 %v5111_v55 }
 0x202   : > { %v6306_v6 = vpop.permute.xlu1 %1408  ;;  %5114 = vmatpush3.bf16.msra.mxu1 %v5113_v41  ;;  %v3210_v41 = vld [vmem:[%s9998_s5 + $0x130] sm:$0xff] }
 0x203   : > { %10599 = vst [vmem:[#allocation127_spill] sm:$0xff] %v6306_v6  ;;  %v6310_v30 = vpop.permute.xlu0 %866 }
 0x204   : > { %10601 = vst [vmem:[#allocation129_spill] sm:$0xff] %v6310_v30  ;;  %902 = vrot.lane.b32.xlu1 %v6257_v10, %s10602_s19  ;;  %v5081_v30 = vpack.c.bf16 %v3175_v2, %v3174_v7 }
 0x205   : > { %2108 = vrot.lane.b32.xlu0 %v6308_v0, %s10597_s0 }
 0x206   : > { %v6322_v36 = vpop.permute.xlu1 %1655  ;;  %5082 = vmatpush3.bf16.msra.mxu0 %v5081_v30  ;;  %v3179_v30 = vld [vmem:[%s9998_s5 + $0x38] sm:$0xff] }
 0x207   : > { %10603 = vst [vmem:[#allocation130_spill] sm:$0xff] %v6322_v36  ;;  %v6327_v34 = vpop.permute.xlu0 %1671  ;;  %v3224_v36 = vld [vmem:[%s9998_s5 + $0x1a0] sm:$0xff] }
 0x208   : > { %10604 = vst [vmem:[#allocation131_spill] sm:$0xff] %v6327_v34  ;;  %1412 = vrot.lane.b32.xlu1 %v6077_v53, %s10605_s26  ;;  %v3193_v34 = vld [vmem:[%s9998_s5 + $0xa8] sm:$0xff]  ;;  %v5115_v2 = vpack.c.bf16 %v3225_v28, %v3224_v36  ;;  %v5117_v36 = vpack.c.bf16 %v3209_v37, %v3208_v25  ;;  %v3211_v25 = vld [vmem:[%s9998_s5 + $0x138] sm:$0xff]  ;;  %v4827_v37 = vld [vmem:[%s9995_s2 + $0x110] sm:$0xff] }
 0x209   : > { %2355 = vrot.lane.b32.xlu0 %v5951_v33, %s10606_s16  ;;  %v5083_v7 = vpack.c.bf16 %v3193_v34, %v3192_v39  ;;  %v5087_v39 = vpack.c.bf16 %v3195_v43, %v3194_v38  ;;  %v3196_v38 = vld [vmem:[%s9998_s5 + $0xc0] sm:$0xff]  ;;  %v3197_v43 = vld [vmem:[%s9998_s5 + $0xc8] sm:$0xff] }
 0x20a   : > { %v6357_v6 = vpop.permute.xlu1 %876  ;;  %5116 = vmatprep.subr.bf16.mxu1 %v5115_v2  ;;  %v5121_v2 = vpack.c.bf16 %v3211_v25, %v3210_v41  ;;  %v3212_v41 = vld [vmem:[%s9998_s5 + $0x140] sm:$0xff]  ;;  %v3213_v25 = vld [vmem:[%s9998_s5 + $0x148] sm:$0xff] }
 0x20b   : > { %10607 = vst [vmem:[#allocation132_spill] sm:$0xff] %v6357_v6  ;;  %v6368_v47 = vpop.permute.xlu0 %860  ;;  %v5085_v6 = vpack.c.bf16 %v3177_v27, %v3176_v52  ;;  %5084 = vmatprep.subr.bf16.mxu0 %v5083_v7  ;;  %v3227_v27 = vld [vmem:[%s9998_s5 + $0x1b8] sm:$0xff]  ;;  %v3178_v52 = vld [vmem:[%s9998_s5 + $0x30] sm:$0xff]  ;;  %5118 = vmatpush3.bf16.msra.mxu1 %v5117_v36  ;;  %v3229_v36 = vld [vmem:[%s9998_s5 + $0x1c8] sm:$0xff] }
 0x20c   : > { %10608 = vst [vmem:[#allocation133_spill] sm:$0xff] %v6368_v47  ;;  %1665 = vrot.lane.b32.xlu1 %v6021_v40, %s10598_s17  ;;  %v5119_v28 = vpack.c.bf16 %v3227_v27, %v3226_v18  ;;  %v5089_v18 = vpack.c.bf16 %v3179_v30, %v3178_v52  ;;  %v3228_v27 = vld [vmem:[%s9998_s5 + $0x1c0] sm:$0xff]  ;;  %v3181_v30 = vld [vmem:[%s9998_s5 + $0x48] sm:$0xff] }
 0x20d   : > { %2624 = vrot.lane.b32.xlu0 %v5905_v1, %s10609_s27  ;;  %5086 = vmatpush3.bf16.msra.mxu0 %v5085_v6  ;;  %v5091_v6 = vpack.c.bf16 %v3197_v43, %v3196_v38  ;;  %v3180_v52 = vld [vmem:[%s9998_s5 + $0x40] sm:$0xff]  ;;  %v3198_v43 = vld [vmem:[%s9998_s5 + $0xd0] sm:$0xff] }
 0x20e   : > { %v6389_v55 = vpop.permute.xlu1 %1139  ;;  %5088 = vmatprep.subr.bf16.mxu0 %v5087_v39  ;;  %5120 = vmatprep.subr.bf16.mxu1 %v5119_v28  ;;  %v4816_v39 = vld [vmem:[%s9995_s2 + $0xd8] sm:$0xff]  ;;  %v5123_v28 = vpack.c.bf16 %v3229_v36, %v3228_v27  ;;  %v5093_v38 = vpack.c.bf16 %v3181_v30, %v3180_v52  ;;  %v3230_v27 = vld [vmem:[%s9998_s5 + $0x1d0] sm:$0xff]  ;;  %v6459_v36 = vadd.f32 %v5737_v51, %v5773_v15 }
 0x20f   : > { %10610 = vst [vmem:[#allocation134_spill] sm:$0xff] %v6389_v55  ;;  %v6400_v34 = vpop.permute.xlu0 %1123  ;;  %5122 = vmatpush3.bf16.msra.mxu1 %v5121_v2  ;;  %v3182_v52 = vld [vmem:[%s9998_s5 + $0x50] sm:$0xff]  ;;  %v3183_v30 = vld [vmem:[%s9998_s5 + $0x58] sm:$0xff] }
 0x210   : > { %10611 = vst [vmem:[#allocation135_spill] sm:$0xff] %v6400_v34  ;;  %2100 = vrot.lane.b32.xlu1 %v5971_v9, %s10597_s0  ;;  %5124 = vmatprep.subr.bf16.mxu1 %v5123_v28  ;;  %v3214_v2 = vld [vmem:[%s9998_s5 + $0x150] sm:$0xff]  ;;  %v3232_v28 = vld [vmem:[%s9998_s5 + $0x1e0] sm:$0xff] }
 0x211   : > { %2871 = vrot.lane.b32.xlu0 %v5891_v20, %s10612_s23  ;;  %5090 = vmatpush3.bf16.msra.mxu0 %v5089_v18  ;;  %v3231_v18 = vld [vmem:[%s9998_s5 + $0x1d8] sm:$0xff] }
 0x212   : > { %v6415_v7 = vpop.permute.xlu1 %1386  ;;  %5092 = vmatprep.subr.bf16.mxu0 %v5091_v6  ;;  %v3215_v6 = vld [vmem:[%s9998_s5 + $0x158] sm:$0xff] }
 0x213   : > { %10613 = vst [vmem:[#allocation136_spill] sm:$0xff] %v6415_v7  ;;  %v6426_v55 = vpop.permute.xlu0 %884 }
 0x214   : > { %10614 = vst [vmem:[#allocation137_spill] sm:$0xff] %v6426_v55  ;;  %2347 = vrot.lane.b32.xlu1 %v5961_v24, %s10606_s16  ;;  %v3199_v55 = vld [vmem:[%s9998_s5 + $0xd8] sm:$0xff] }
 0x215   : > { %3052 = vperm.xlu0 %5264, %v4827_v37   ;;  %v5125_v37 = vpack.c.bf16 %v3213_v25, %v3212_v41  ;;  %v5095_v51 = vpack.c.bf16 %v3199_v55, %v3198_v43  ;;  %v5377_v41 = vmov 1   ;;  %5094 = vmatpush3.bf16.msra.mxu0 %v5093_v38  ;;  %v5097_v25 = vpack.c.bf16 %v3183_v30, %v3182_v52  ;;  %v3201_v55 = vld [vmem:[%s9998_s5 + $0xe8] sm:$0xff]  ;;  %v3184_v52 = vld [vmem:[%s9998_s5 + $0x60] sm:$0xff] }
 0x216   : > { %v6461_v3 = vpop.permute.xlu1 %868  ;;  %v707_v43 = vadd.f32 3.0, %v6459_v36  ;;  %v3185_v30 = vld [vmem:[%s9998_s5 + $0x68] sm:$0xff] }
 0x217   : > { %10615 = vst [vmem:[#allocation138_spill] sm:$0xff] %v6461_v3  ;;  %v6472_v26 = vpop.permute.xlu0 %1147  ;;  %v5127_v3 = vpack.c.bf16 %v3231_v18, %v3230_v27  ;;  %5126 = vmatpush3.bf16.msra.mxu1 %v5125_v37  ;;  %v5129_v27 = vpack.c.bf16 %v3215_v6, %v3214_v2  ;;  %v3233_v18 = vld [vmem:[%s9998_s5 + $0x1e8] sm:$0xff]  ;;  %5096 = vmatprep.subr.bf16.mxu0 %v5095_v51  ;;  %v3216_v37 = vld [vmem:[%s9998_s5 + $0x160] sm:$0xff]  ;;  %v3234_v51 = vld [vmem:[%s9998_s5 + $0x1f0] sm:$0xff] }
 0x218   : > { %10616 = vst [vmem:[#allocation139_spill] sm:$0xff] %v6472_v26  ;;  %2531 = vperm.xlu1 %5265, %v4816_v39   ;;  %v3200_v26 = vld [vmem:[%s9998_s5 + $0xe0] sm:$0xff]  ;;  %v3217_v2 = vld [vmem:[%s9998_s5 + $0x168] sm:$0xff]  ;;  %v5131_v6 = vpack.c.bf16 %v3233_v18, %v3232_v28 }
 0x219   : > { %5266 = vset.pattern.permute.xlu0 %v5377_v41  ;;  %v5280_v39 = vld [vmem:[%s9996_s3] sm:$0xff]  ;;  %5128 = vmatprep.subr.bf16.mxu1 %v5127_v3  ;;  %v5101_v3 = vpack.c.bf16 %v3185_v30, %v3184_v52  ;;  %v5133_v18 = vpack.c.bf16 %v3217_v2, %v3216_v37  ;;  %v3219_v30 = vld [vmem:[%s9998_s5 + $0x178] sm:$0xff] }
 0x21a   : > { %3125 = vperm.xlu0 %5266, %v5280_v39   ;;  %v6493_v38 = vpop.permute.xlu1 %1131  ;;  %v5099_v39 = vpack.c.bf16 %v3201_v55, %v3200_v26  ;;  %v3203_v26 = vld [vmem:[%s9998_s5 + $0xf8] sm:$0xff]  ;;  %5098 = vmatpush3.bf16.msra.mxu0 %v5097_v25  ;;  %v739_v55 = vmax.f32 %v707_v43, 0.0 }
 0x21b   : > { %10617 = vst [vmem:[#allocation140_spill] sm:$0xff] %v6493_v38  ;;  %v6504_v32 = vpop.permute.xlu0 %1394  ;;  %v3202_v38 = vld [vmem:[%s9998_s5 + $0xf0] sm:$0xff]  ;;  %5130 = vmatpush3.bf16.msra.mxu1 %v5129_v27  ;;  %v3187_v25 = vld [vmem:[%s9998_s5 + $0x78] sm:$0xff] }
 0x21c   : > { %10618 = vst [vmem:[#allocation141_spill] sm:$0xff] %v6504_v32  ;;  %2632 = vrot.lane.b32.xlu1 %v6117_v13, %s10609_s27  ;;  %v3235_v32 = vld [vmem:[%s9998_s5 + $0x1f8] sm:$0xff]  ;;  %5100 = vmatprep.subr.bf16.mxu0 %v5099_v39  ;;  %v5103_v52 = vpack.c.bf16 %v3203_v26, %v3202_v38  ;;  %v3218_v27 = vld [vmem:[%s9998_s5 + $0x170] sm:$0xff]  ;;  %v5281_v26 = vld [vmem:[%s9996_s3 + $0x8] sm:$0xff] }
 0x21d   : > { %5267 = vset.pattern.permute.xlu1 %v5377_v41  ;;  %v3186_v41 = vld [vmem:[%s9998_s5 + $0x70] sm:$0xff]  ;;  %5132 = vmatprep.subr.bf16.mxu1 %v5131_v6  ;;  %v5135_v37 = vpack.c.bf16 %v3235_v32, %v3234_v51  ;;  %v5137_v38 = vpack.c.bf16 %v3219_v30, %v3218_v27 }
 0x21e   : > { %2339 = vrot.lane.b32.xlu0 %v5945_v29, %s10606_s16  ;;  %v6525_v28 = vpop.permute.xlu1 %2630  ;;  %5102 = vmatpush3.bf16.msra.mxu0 %v5101_v3  ;;  %v5105_v2 = vpack.c.bf16 %v3187_v25, %v3186_v41  ;;  %v4781_v30 = vld [vmem:[%s9997_s4 + $0x1] ss:$8 sm:$0xf] }
 0x21f   : > { %10619 = vst [vmem:[#allocation142_spill] sm:$0xff] %v6525_v28  ;;  %v6536_v43 = vpop.permute.xlu0 %2104  ;;  %v771_v28 = vmin.f32 %v739_v55, 6.0  ;;  %5134 = vmatpush3.bf16.msra.mxu1 %v5133_v18  ;;  %5104 = vmatprep.subr.bf16.mxu0 %v5103_v52  ;;  %v10626_v55 = vmov 0  }
 0x220   : > { %10620 = vst [vmem:[#allocation143_spill] sm:$0xff] %v6536_v43  ;;  %2879 = vrot.lane.b32.xlu1 %v5861_v54, %s10612_s23  ;;  %5136 = vmatprep.subr.bf16.mxu1 %v5135_v37  ;;  %v4782_v37 = vld [vmem:[%s9997_s4 + $0x1] ss:$8 sm:$0xf0] }
 0x221   : > { %v803_v32 = vmul.f32 0.16666667, %v771_v28 }
 0x222   : > { %888 = vrot.lane.b32.xlu0 %v6117_v13, %s10602_s19  ;;  %v6548_v39 = vpop.permute.xlu1 %1173  ;;  %5106 = vmatpush3.bf16.msra.mxu0 %v5105_v2 }
 0x223   : > { %10621 = vst [vmem:[#allocation144_spill] sm:$0xff] %v6548_v39  ;;  %v6550_v6 = vpop.permute.xlu0 %2367  ;;  %5138 = vmatpush3.bf16.msra.mxu1 %v5137_v38  ;;  %v6565_v18 = vmul.f32 %v803_v32, %v6459_v36  ;;  %v6583_v36 = vadd.f32 %v5735_v50, %v5773_v15  ;;  %v953_v15 = vld [vmem:[%s9997_s4] ss:$8 sm:$0xf]  ;;  %v10634_v38 = vlaneseq }
 0x224   : > { %10622 = vst [vmem:[#allocation145_spill] sm:$0xff] %v6550_v6  ;;  %3129 = vperm.xlu1 %5267, %v5281_v26   ;;  %v954_v32 = vld [vmem:[%s9997_s4] ss:$8 sm:$0xf0] }
 0x225   : > { %10627 = vst [vmem:[#allocation148_spill] sm:$0xff] %v6565_v18  ;;  %v708_v50 = vadd.f32 3.0, %v6583_v36  ;;  %v6606_v26 = vand.u32 127, %v10634_v38 }
 0x226   : > { %1151 = vrot.lane.b32.xlu0 %v6117_v13, %s10623_s28  ;;  %v6557_v3 = vpop.permute.xlu1 %1436 }
 0x227   : > { %10624 = vst [vmem:[#allocation146_spill] sm:$0xff] %v6557_v3  ;;  %v6559_v51 = vpop.permute.xlu0 %2893  ;;  %vm1181_vm1 = vcmp.lt.s32.totalorder %v6606_v26, 16  ;;  %v740_v38 = vmax.f32 %v708_v50, 0.0  ;;  %v4788_v50 = vld [vmem:[%s9997_s4 + $0x2] ss:$8 sm:$0xf0] }
 0x228   : > { %10625 = vst [vmem:[#allocation147_spill] sm:$0xff] %v6559_v51  ;;  %2863 = vrot.lane.b32.xlu1 %v5849_v17, %s10612_s23  ;;  %v6623_v51 = vor.u32 %v954_v32, %v953_v15  ;;  %vm920_vm2 = vcmp.lt.s32.totalorder %v6606_v26, 17  ;;  %v4794_v3 = vld [vmem:[%s9997_s4 + $0x3] ss:$8 sm:$0xf0]  ;;  %vm1444_vm3 = vcmp.lt.s32.totalorder %v6606_v26, 15 }
 0x229   : > { %5268 = vset.pattern.permute.xlu1 %v10626_v55  ;;  %v6611_v55 = vor.u32 %v4782_v37, %v4781_v30  ;;  %v4787_v37 = vld [vmem:[%s9997_s4 + $0x2] ss:$8 sm:$0xf]  ;;  %v772_v6 = vmin.f32 %v740_v38, 6.0  ;;  %vm1707_vm4 = vcmp.lt.s32.totalorder %v6606_v26, 1  ;;  %vm2136_vm5 = vcmp.lt.s32.totalorder %v6606_v26, 127 }
 0x22a   : > { %1428 = vrot.lane.b32.xlu0 %v6257_v10, %s10605_s26  ;;  %v6569_v28 = vpop.permute.xlu1 %1699  ;;  %10638 = vst [vmem:[#allocation158_spill] sm:$0xff] %v6623_v51  ;;  %v6659_v43 = vor.u32 %v4788_v50, %v4787_v37  ;;  %vm2399_vm6 = vcmp.lt.s32.totalorder %v6606_v26, 113  ;;  %vm2662_vm7 = vcmp.lt.s32.totalorder %v6606_v26, 112  ;;  %vm2925_vm8 = vcmp.lt.s32.totalorder %v6606_v26, 111 }
 0x22b   : > { %10628 = vst [vmem:[#allocation149_spill] sm:$0xff] %v6569_v28  ;;  %v6571_v41 = vpop.permute.xlu0 %910  ;;  %10635 = vst [vmem:[#allocation155_spill] sm:$0xff] %v6611_v55  ;;  %v804_v39 = vmul.f32 0.16666667, %v772_v6  ;;  %v4822_v6 = vld [vmem:[%s9995_s2 + $0xf8] sm:$0xff] }
 0x22c   : > { %10629 = vst [vmem:[#allocation150_spill] sm:$0xff] %v6571_v41  ;;  %896 = vrot.lane.b32.xlu1 %v6565_v18, %s10602_s19  ;;  %10640 = vst [vmem:[#allocation160_spill] sm:$0xff] %v6659_v43 }
 0x22e   : > { %1683 = vrot.lane.b32.xlu0 %v6200_v45, %s10598_s17  ;;  %v6577_v25 = vpop.permute.xlu1 %2106 }
 0x22f   : > { %10630 = vst [vmem:[#allocation151_spill] sm:$0xff] %v6577_v25  ;;  %v6579_v52 = vpop.permute.xlu0 %912  ;;  %v6614_v25 = vsub.s32 0, %v5645_v61 }
 0x230   : > { %10631 = vst [vmem:[#allocation152_spill] sm:$0xff] %v6579_v52  ;;  %1159 = vrot.lane.b32.xlu1 %v6565_v18, %s10623_s28 }
 0x231   : > { %v6644_v15 = vrot.slane %v6623_v51, %v6614_v25  ;;  %v6675_v38 = vrot.slane %v6659_v43, %v6614_v25 }
 0x232   : > { %2094 = vrot.lane.b32.xlu0 %v6021_v40, %s10597_s0  ;;  %v6589_v27 = vpop.permute.xlu1 %1175 }
 0x233   : > { %10632 = vst [vmem:[#allocation153_spill] sm:$0xff] %v6589_v27  ;;  %v6597_v2 = vpop.permute.xlu0 %1438  ;;  %v6627_v27 = vrot.slane %v6611_v55, %v6614_v25  ;;  %10642 = vst [vmem:[#allocation162_spill] sm:$0xff] %v6675_v38 }
 0x234   : > { %10633 = vst [vmem:[#allocation154_spill] sm:$0xff] %v6597_v2  ;;  %1675 = vrot.lane.b32.xlu1 %v6077_v53, %s10598_s17 }
 0x236   : > { %2371 = vrot.lane.b32.xlu0 %v6308_v0, %s10606_s16  ;;  %v6618_v2 = vpop.permute.xlu1 %1701 }
 0x237   : > { %10636 = vst [vmem:[#allocation156_spill] sm:$0xff] %v6618_v2  ;;  %v6621_v52 = vpop.permute.xlu0 %1177 }
 0x238   : > { %10637 = vst [vmem:[#allocation157_spill] sm:$0xff] %v6621_v52  ;;  %v1212_v30 = vsel %vm1181_vm1, %v6621_v52, %v6231_v44  ;;  %2086 = vrot.lane.b32.xlu1 %v6055_v46, %s10597_s0  ;;  %v6653_v44 = vadd.f32 %v5757_v59, %v5787_v23  ;;  %v4793_v59 = vld [vmem:[%s9997_s4 + $0x3] ss:$8 sm:$0xf] }
 0x239   : > { %v1275_v32 = vmul.f32 %v6627_v27, %v1212_v30  ;;  %v6688_v41 = vor.u32 %v4794_v3, %v4793_v59 }
 0x23a   : > { %2618 = vrot.lane.b32.xlu0 %v5951_v33, %s10609_s27  ;;  %v6649_v52 = vpop.permute.xlu1 %914 }
 0x23b   : > { %10639 = vst [vmem:[#allocation159_spill] sm:$0xff] %v6649_v52  ;;  %v951_v2 = vsel %vm920_vm2, %v6649_v52, %v6229_v58  ;;  %v6661_v28 = vpop.permute.xlu0 %1179  ;;  %v1332_v37 = vmul.f32 %v5853_v4, %v1275_v32  ;;  %v722_v52 = vadd.f32 3.0, %v6653_v44  ;;  %10644 = vst [vmem:[#allocation164_spill] sm:$0xff] %v6688_v41  ;;  %v6699_v4 = vadd.f32 %v5751_v57, %v5777_v16 }
 0x23c   : > { %10641 = vst [vmem:[#allocation161_spill] sm:$0xff] %v6661_v28  ;;  %v1013_v30 = vmul.f32 %v6644_v15, %v951_v2  ;;  %2363 = vrot.lane.b32.xlu1 %v5971_v9, %s10606_s16 }
 0x23d   : > { %v754_v59 = vmax.f32 %v722_v52, 0.0 }
 0x23e   : > { %v1069_v2 = vmul.f32 %v5839_v62, %v1013_v30  ;;  %2887 = vrot.lane.b32.xlu0 %v5905_v1, %s10612_s23  ;;  %v6681_v50 = vpop.permute.xlu1 %1440  ;;  %v6695_v30 = vadd.f32 %v5749_v56, %v5777_v16  ;;  %v6715_v56 = vrot.slane %v6688_v41, %v6614_v25 }
 0x23f   : > { %10643 = vst [vmem:[#allocation163_spill] sm:$0xff] %v6681_v50  ;;  %v1475_v58 = vsel %vm1444_vm3, %v6681_v50, %v6259_v8  ;;  %v6703_v50 = vrot.slane %v5665_v5, %v6614_v25  ;;  %v6717_v57 = vpop.permute.xlu0 %1442 }
 0x240   : > { %v1364_v45 = vadd.f32 %v1332_v37, %v1069_v2  ;;  %v1538_v32 = vmul.f32 %v6675_v38, %v1475_v58  ;;  %2610 = vrot.lane.b32.xlu1 %v5961_v24, %s10609_s27  ;;  %v6710_v58 = vadd.f32 %v5761_v11, %v5787_v23  ;;  %10645 = vst [vmem:[#allocation165_spill] sm:$0xff] %v6717_v57 }
 0x241   : > { %v6726_v11 = vadd.f32 %v5763_v12, %v5787_v23  ;;  %v1213_v37 = vsel %vm1181_vm1, %v6661_v28, %v6400_v34  ;;  %v1967_v12 = vmul.f32 %v6703_v50, %v5945_v29  ;;  %v1476_v23 = vsel %vm1444_vm3, %v6717_v57, %v6415_v7 }
 0x242   : > { %v1595_v16 = vmul.f32 %v5867_v60, %v1538_v32  ;;  %2078 = vrot.lane.b32.xlu0 %v6027_v42, %s10597_s0  ;;  %v6722_v3 = vpop.permute.xlu1 %1703  ;;  %v6737_v32 = vmul.f32 %v804_v39, %v6583_v36  ;;  %v716_v28 = vadd.f32 3.0, %v6695_v30  ;;  %v715_v34 = vadd.f32 3.0, %v6699_v4 }
 0x243   : > { %10646 = vst [vmem:[#allocation166_spill] sm:$0xff] %v6722_v3  ;;  %v1738_v2 = vsel %vm1707_vm4, %v6722_v3, %v6300_v49  ;;  %v1283_v3 = vmul.f32 %v6627_v27, %v1213_v37  ;;  %v786_v36 = vmin.f32 %v754_v59, 6.0  ;;  %v1546_v57 = vmul.f32 %v6675_v38, %v1476_v23  ;;  %v6761_v37 = vpop.permute.xlu0 %886 }
 0x244   : > { %10647 = vst [vmem:[#allocation167_spill] sm:$0xff] %v6737_v32  ;;  %v1627_v60 = vadd.f32 %v1595_v16, %v1364_v45  ;;  %v1801_v52 = vmul.f32 %v6715_v56, %v1738_v2  ;;  %2794 = vperm.xlu1 %5268, %v4822_v6   ;;  %v724_v6 = vadd.f32 3.0, %v6710_v58  ;;  %v723_v16 = vadd.f32 3.0, %v6726_v11  ;;  %10649 = vst [vmem:[#allocation169_spill] sm:$0xff] %v6761_v37 }
 0x245   : > { %v2024_v59 = vmul.f32 %v5929_v31, %v1967_v12  ;;  %v748_v23 = vmax.f32 %v716_v28, 0.0 }
 0x246   : > { %v1858_v39 = vmul.f32 %v5913_v19, %v1801_v52  ;;  %904 = vrot.lane.b32.xlu0 %v6737_v32, %s10602_s19  ;;  %v6752_v45 = vpop.permute.xlu1 %916  ;;  %v1340_v19 = vmul.f32 %v5877_v22, %v1283_v3  ;;  %v756_v37 = vmax.f32 %v724_v6, 0.0 }
 0x247   : > { %10648 = vst [vmem:[#allocation168_spill] sm:$0xff] %v6752_v45  ;;  %v952_v2 = vsel %vm920_vm2, %v6752_v45, %v6368_v47  ;;  %v747_v47 = vmax.f32 %v715_v34, 0.0  ;;  %v6776_v12 = vpop.permute.xlu0 %1149  ;;  %v780_v3 = vmin.f32 %v748_v23, 6.0 }
 0x248   : > { %v1890_v52 = vadd.f32 %v1858_v39, %v1627_v60  ;;  %v1021_v7 = vmul.f32 %v6644_v15, %v952_v2  ;;  %2895 = vrot.lane.b32.xlu1 %v6117_v13, %s10612_s23  ;;  %v818_v60 = vmul.f32 0.16666667, %v786_v36  ;;  %v755_v39 = vmax.f32 %v723_v16, 0.0  ;;  %10651 = vst [vmem:[#allocation171_spill] sm:$0xff] %v6776_v12  ;;  %v10672_v12 = vld [vmem:[#allocation19_spill] sm:$0xff] }
 0x249   : > { %v1603_v2 = vmul.f32 %v5903_v14, %v1546_v57  ;;  %v788_v28 = vmin.f32 %v756_v37, 6.0  ;;  %v4805_v37 = vld [vmem:[%s9997_s4 + $0x5] ss:$8 sm:$0xf] }
 0x24a   : > { %v1077_v49 = vmul.f32 %v5901_v48, %v1021_v7  ;;  %1414 = vrot.lane.b32.xlu0 %v6117_v13, %s10605_s26  ;;  %v6771_v45 = vadd.f32 %v2024_v59, %v1890_v52  ;;  %v779_v52 = vmin.f32 %v747_v47, 6.0  ;;  %v6783_v34 = vmul.f32 %v818_v60, %v6653_v44  ;;  %v4806_v59 = vld [vmem:[%s9997_s4 + $0x5] ss:$8 sm:$0xf0] }
 0x24b   : > { %v787_v36 = vmin.f32 %v755_v39, 6.0  ;;  %v6796_v47 = vsub.s32 1, %v5645_v61  ;;  %v820_v44 = vmul.f32 0.16666667, %v788_v28  ;;  %v6798_v16 = vpop.permute.xlu0 %1402 }
 0x24c   : > { %10650 = vst [vmem:[#allocation170_spill] sm:$0xff] %v6771_v45  ;;  %v1372_v62 = vadd.f32 %v1340_v19, %v1077_v49  ;;  %2602 = vrot.lane.b32.xlu1 %v5945_v29, %s10609_s27  ;;  %10652 = vst [vmem:[#allocation172_spill] sm:$0xff] %v6783_v34  ;;  %v6788_v19 = vsub.s32 2, %v5645_v61  ;;  %v812_v49 = vmul.f32 0.16666667, %v780_v3 }
 0x24d   : > { %v811_v57 = vmul.f32 0.16666667, %v779_v52  ;;  %v819_v6 = vmul.f32 0.16666667, %v787_v36  ;;  %10653 = vst [vmem:[#allocation173_spill] sm:$0xff] %v6798_v16  ;;  %v6826_v3 = vrot.slane %v5665_v5, %v6796_v47 }
 0x24e   : > { %1691 = vrot.lane.b32.xlu0 %v6257_v10, %s10598_s17  ;;  %v6780_v7 = vadd.f32 %v1603_v2, %v1372_v62  ;;  %v6793_v62 = vsub.s32 3, %v5645_v61  ;;  %v1922_v23 = vrot.slane %v5665_v5, %v6788_v19  ;;  %v6813_v61 = vmul.f32 %v812_v49, %v6695_v30  ;;  %v4811_v39 = vld [vmem:[%s9997_s4 + $0x6] ss:$8 sm:$0xf] }
 0x24f   : > { %v6816_v60 = vmul.f32 %v811_v57, %v6699_v4  ;;  %v4812_v2 = vld [vmem:[%s9997_s4 + $0x6] ss:$8 sm:$0xf0]  ;;  %10656 = vst [vmem:[#allocation176_spill] sm:$0xff] %v6826_v3  ;;  %v6833_v4 = vmul.f32 %v820_v44, %v6710_v58  ;;  %v6836_v28 = vmul.f32 %v819_v6, %v6726_v11  ;;  %v6842_v49 = vor.u32 %v4806_v59, %v4805_v37  ;;  %v6876_v45 = vpop.permute.xlu0 %1649 }
 0x250   : > { %1167 = vrot.lane.b32.xlu1 %v6737_v32, %s10623_s28  ;;  %10654 = vst [vmem:[#allocation174_spill] sm:$0xff] %v6813_v61  ;;  %v1926_v52 = vrot.slane %v5665_v5, %v6793_v62  ;;  %v6840_v36 = vrot.slane %v6623_v51, %v6793_v62  ;;  %v6848_v5 = vrot.slane %v6611_v55, %v6793_v62  ;;  %10667 = vst [vmem:[#allocation187_spill] sm:$0xff] %v6876_v45 }
 0x251   : > { %10655 = vst [vmem:[#allocation175_spill] sm:$0xff] %v6816_v60  ;;  %10658 = vst [vmem:[#allocation178_spill] sm:$0xff] %v6833_v4  ;;  %v6852_v58 = vrot.slane %v6659_v43, %v6796_v47  ;;  %v6856_v11 = vrot.slane %v6659_v43, %v6788_v19  ;;  %v6860_v57 = vrot.slane %v6623_v51, %v6796_v47 }
 0x252   : > { %2110 = vrot.lane.b32.xlu0 %v6783_v34, %s10597_s0  ;;  %10659 = vst [vmem:[#allocation179_spill] sm:$0xff] %v6836_v28  ;;  %10660 = vst [vmem:[#allocation180_spill] sm:$0xff] %v6842_v49  ;;  %v6864_v44 = vrot.slane %v6659_v43, %v6793_v62  ;;  %v6868_v6 = vrot.slane %v6688_v41, %v6796_v47  ;;  %v6872_v37 = vrot.slane %v6623_v51, %v6788_v19 }
 0x253   : > { %10661 = vst [vmem:[#allocation181_spill] sm:$0xff] %v6852_v58  ;;  %10662 = vst [vmem:[#allocation182_spill] sm:$0xff] %v6856_v11  ;;  %v6874_v59 = vor.u32 %v4812_v2, %v4811_v39  ;;  %v6882_v14 = vrot.slane %v6688_v41, %v6788_v19  ;;  %v6886_v4 = vrot.slane %v6688_v41, %v6793_v62 }
 0x254   : > { %1422 = vrot.lane.b32.xlu1 %v6565_v18, %s10605_s26  ;;  %10663 = vst [vmem:[#allocation183_spill] sm:$0xff] %v6860_v57  ;;  %10664 = vst [vmem:[#allocation184_spill] sm:$0xff] %v6868_v6  ;;  %v1953_v48 = vmul.f32 %v1922_v23, %v5704_v35  ;;  %v1960_v43 = vmul.f32 %v6826_v3, %v5891_v20  ;;  %v6895_v2 = vrot.slane %v6842_v49, %v6614_v25 }
 0x255   : > { %10665 = vst [vmem:[#allocation185_spill] sm:$0xff] %v6872_v37  ;;  %10666 = vst [vmem:[#allocation186_spill] sm:$0xff] %v6874_v59  ;;  %v6899_v16 = vrot.slane %v6842_v49, %v6796_v47  ;;  %v1954_v22 = vmul.f32 %v1926_v52, %v5759_v63  ;;  %v1951_v41 = vmul.f32 %v6703_v50, %v10672_v12 }
 0x256   : > { %2357 = vrot.lane.b32.xlu0 %v6021_v40, %s10606_s16  ;;  %10668 = vst [vmem:[#allocation188_spill] sm:$0xff] %v6886_v4  ;;  %10670 = vst [vmem:[#allocation190_spill] sm:$0xff] %v6895_v2  ;;  %v6908_v35 = vrot.slane %v6842_v49, %v6788_v19  ;;  %v1962_v20 = vmul.f32 %v1926_v52, %v5905_v1  ;;  %v1959_v28 = vmul.f32 %v6703_v50, %v5849_v17 }
 0x257   : > { %v6830_v30 = vpop.permute.xlu1 %3047  ;;  %10671 = vst [vmem:[#allocation191_spill] sm:$0xff] %v6899_v16  ;;  %v1968_v8 = vmul.f32 %v6826_v3, %v5961_v24  ;;  %v6917_v63 = vrot.slane %v6874_v59, %v6614_v25  ;;  %v6921_v12 = vrot.slane %v6611_v55, %v6796_v47  ;;  %v1961_v1 = vmul.f32 %v1922_v23, %v5861_v54  ;;  %v6949_v54 = vpop.permute.xlu0 %2084 }
 0x258   : > { %10657 = vst [vmem:[#allocation177_spill] sm:$0xff] %v6830_v30  ;;  %2102 = vrot.lane.b32.xlu1 %v6047_v21, %s10597_s0  ;;  %10673 = vst [vmem:[#allocation19_spill] sm:$0xff] %v6908_v35  ;;  %v6925_v30 = vrot.slane %v6611_v55, %v6788_v19  ;;  %v6932_v17 = vrot.slane %v6874_v59, %v6796_v47  ;;  %v1969_v55 = vmul.f32 %v1922_v23, %v5951_v33 }
 0x259   : > { %10674 = vst [vmem:[#allocation192_spill] sm:$0xff] %v6917_v63  ;;  %10675 = vst [vmem:[#allocation193_spill] sm:$0xff] %v6921_v12  ;;  %v7024_v38 = vrot.slane %v6874_v59, %v6788_v19 }
 0x25a   : > { %2634 = vrot.lane.b32.xlu0 %v6308_v0, %s10609_s27  ;;  %10676 = vst [vmem:[#allocation194_spill] sm:$0xff] %v6925_v30  ;;  %10677 = vst [vmem:[#allocation195_spill] sm:$0xff] %v6932_v17  ;;  %v10685_v17 = vld [vmem:[#allocation20_spill] sm:$0xff] }
 0x25b   : > { %v6891_v39 = vpop.permute.xlu1 %2337  ;;  %10684 = vst [vmem:[#allocation199_spill] sm:$0xff] %v6949_v54  ;;  %v10689_v54 = vld [vmem:[#allocation54_spill] sm:$0xff] }
 0x25c   : > { %10669 = vst [vmem:[#allocation189_spill] sm:$0xff] %v6891_v39  ;;  %2349 = vrot.lane.b32.xlu1 %v6055_v46, %s10606_s16  ;;  %v10678_v39 = vld [vmem:[#allocation24_spill] sm:$0xff]  ;;  %v10679_v46 = vld [vmem:[#allocation39_spill] sm:$0xff] }
 0x25d   : > { %v6935_v51 = vmul.f32 %v10678_v39, %v1953_v48  ;;  %v6938_v61 = vmul.f32 %v10679_v46, %v1960_v43  ;;  %v6944_v2 = vmul.f32 %v10678_v39, %v1954_v22  ;;  %v6947_v34 = vmul.f32 %v10678_v39, %v1951_v41 }
 0x25e   : > { %2881 = vrot.lane.b32.xlu0 %v5951_v33, %s10612_s23  ;;  %v1970_v48 = vmul.f32 %v1926_v52, %v5971_v9  ;;  %v1952_v43 = vmul.f32 %v6826_v3, %v10685_v17  ;;  %v6960_v33 = vmul.f32 %v10679_v46, %v1959_v28  ;;  %v6963_v22 = vmul.f32 %v5929_v31, %v1968_v8  ;;  %v5282_v17 = vld [vmem:[%s9996_s3 + $0x10] sm:$0xff] }
 0x25f   : > { %10680 = vst [vmem:[#allocation24_spill] sm:$0xff] %v6938_v61  ;;  %v6940_v63 = vpop.permute.xlu1 %894  ;;  %10682 = vst [vmem:[#allocation197_spill] sm:$0xff] %v6944_v2  ;;  %v1975_v41 = vmul.f32 %v6703_v50, %v6027_v42  ;;  %v10690_v61 = vld [vmem:[#allocation82_spill] sm:$0xff]  ;;  %v1977_v28 = vmul.f32 %v1922_v23, %v6021_v40  ;;  %v1978_v8 = vmul.f32 %v1926_v52, %v6047_v21  ;;  %v10692_v3 = vld [vmem:[#allocation53_spill] sm:$0xff] }
 0x260   : > { %10681 = vst [vmem:[#allocation196_spill] sm:$0xff] %v6940_v63  ;;  %10683 = vst [vmem:[#allocation198_spill] sm:$0xff] %v6947_v34  ;;  %2626 = vrot.lane.b32.xlu1 %v5971_v9, %s10609_s27  ;;  %v6957_v63 = vmul.f32 %v10679_v46, %v1962_v20  ;;  %v1202_v9 = vsel %vm1181_vm1, %v10690_v61, %v10689_v54  ;;  %v6975_v20 = vmul.f32 %v10679_v46, %v1961_v1  ;;  %v10696_v34 = vld [vmem:[#allocation107_spill] sm:$0xff]  ;;  %v10697_v1 = vld [vmem:[#allocation17_spill] sm:$0xff] }
 0x261   : > { %10687 = vst [vmem:[#allocation200_spill] sm:$0xff] %v6960_v33  ;;  %10688 = vst [vmem:[#allocation201_spill] sm:$0xff] %v6963_v22  ;;  %v1206_v50 = vsel %vm1181_vm1, %v10692_v3, %v10690_v61  ;;  %v10695_v33 = vld [vmem:[#allocation15_spill] sm:$0xff]  ;;  %v10699_v23 = vld [vmem:[#allocation80_spill] sm:$0xff]  ;;  %v7001_v61 = vmul.f32 %v5929_v31, %v1970_v48  ;;  %v1261_v40 = vmul.f32 %v6925_v30, %v1202_v9 }
 0x262   : > { %10686 = vst [vmem:[#allocation20_spill] sm:$0xff] %v6957_v63  ;;  %3133 = vperm.xlu0 %5266, %v5282_v17   ;;  %10691 = vst [vmem:[#allocation54_spill] sm:$0xff] %v6975_v20  ;;  %v6986_v63 = vmul.f32 %v5929_v31, %v1969_v55  ;;  %v1955_v17 = vmul.f32 %v10695_v33, %v6077_v53  ;;  %v1956_v20 = vmul.f32 %v10697_v1, %v10696_v34  ;;  %v10698_v2 = vld [vmem:[#allocation51_spill] sm:$0xff]  ;;  %v10703_v53 = vld [vmem:[#allocation16_spill] sm:$0xff] }
 0x263   : > { %v6983_v22 = vpop.permute.xlu1 %1157  ;;  %v941_v52 = vsel %vm920_vm2, %v10699_v23, %v10698_v2  ;;  %10701 = vst [vmem:[#allocation80_spill] sm:$0xff] %v7001_v61  ;;  %v7004_v55 = vmul.f32 %v10678_v39, %v1952_v43  ;;  %v10706_v31 = vld [vmem:[#allocation78_spill] sm:$0xff] }
 0x264   : > { %10693 = vst [vmem:[#allocation82_spill] sm:$0xff] %v6983_v22  ;;  %10694 = vst [vmem:[#allocation53_spill] sm:$0xff] %v6986_v63  ;;  %v6996_v21 = vpop.permute.xlu0 %2268  ;;  %2873 = vrot.lane.b32.xlu1 %v5961_v24, %s10612_s23  ;;  %v1957_v63 = vmul.f32 %v10703_v53, %v6257_v10  ;;  %v10704_v22 = vld [vmem:[#allocation50_spill] sm:$0xff] }
 0x265   : > { %10700 = vst [vmem:[#allocation51_spill] sm:$0xff] %v6996_v21  ;;  %10702 = vst [vmem:[#allocation202_spill] sm:$0xff] %v7004_v55  ;;  %v945_v34 = vsel %vm920_vm2, %v10704_v22, %v10699_v23  ;;  %v4828_v24 = vld [vmem:[%s9995_s2 + $0x118] sm:$0xff]  ;;  %v10705_v21 = vld [vmem:[#allocation48_spill] sm:$0xff]  ;;  %v1260_v55 = vmul.f32 %v6921_v12, %v1206_v50 }
 0x266   : > { %v7017_v48 = vmul.f32 %v10705_v21, %v1975_v41  ;;  %v10707_v43 = vld [vmem:[#allocation18_spill] sm:$0xff]  ;;  %10708 = vst [vmem:[#allocation50_spill] sm:$0xff] %v7024_v38  ;;  %890 = vrot.lane.b32.xlu0 %v6308_v0, %s10602_s19  ;;  %v7035_v41 = vmul.f32 %v10705_v21, %v1977_v28  ;;  %v7038_v50 = vmul.f32 %v10705_v21, %v1978_v8  ;;  %v10715_v21 = vld [vmem:[#allocation64_spill] sm:$0xff] }
 0x267   : > { %v1958_v61 = vmul.f32 %v10707_v43, %v10706_v31  ;;  %v4817_v9 = vld [vmem:[%s9997_s4 + $0x7] ss:$8 sm:$0xf]  ;;  %v999_v31 = vmul.f32 %v6872_v37, %v941_v52  ;;  %v4823_v30 = vld [vmem:[%s9997_s4 + $0x40] ss:$8 sm:$0xf]  ;;  %v7047_v59 = vpop.permute.xlu1 %1410  ;;  %v7050_v38 = vmul.f32 %v10678_v39, %v1955_v17  ;;  %v7053_v28 = vmul.f32 %v10678_v39, %v1956_v20 }
 0x268   : > { %v4818_v23 = vld [vmem:[%s9997_s4 + $0x7] ss:$8 sm:$0xf0]  ;;  %10709 = vst [vmem:[#allocation203_spill] sm:$0xff] %v7035_v41  ;;  %10710 = vst [vmem:[#allocation204_spill] sm:$0xff] %v7038_v50  ;;  %v1963_v8 = vmul.f32 %v10695_v33, %v6117_v13  ;;  %v7066_v17 = vpop.permute.xlu0 %2369  ;;  %3057 = vperm.xlu1 %5268, %v4828_v24   ;;  %v7069_v20 = vmul.f32 %v10678_v39, %v1957_v63  ;;  %v1964_v13 = vmul.f32 %v10697_v1, %v6565_v18 }
 0x269   : > { %v4824_v12 = vld [vmem:[%s9997_s4 + $0x40] ss:$8 sm:$0xf0]  ;;  %10711 = vst [vmem:[#allocation205_spill] sm:$0xff] %v7047_v59  ;;  %10712 = vst [vmem:[#allocation206_spill] sm:$0xff] %v7050_v38  ;;  %v998_v59 = vmul.f32 %v6860_v57, %v945_v34  ;;  %v7074_v38 = vmul.f32 %v10678_v39, %v1958_v61 }
 0x26a   : > { %10713 = vst [vmem:[#allocation207_spill] sm:$0xff] %v7053_v28  ;;  %v10714_v52 = vld [vmem:[#allocation58_spill] sm:$0xff]  ;;  %v10716_v41 = vld [vmem:[#allocation56_spill] sm:$0xff]  ;;  %10718 = vst [vmem:[#allocation64_spill] sm:$0xff] %v7069_v20  ;;  %v7087_v20 = vor.u32 %v4818_v23, %v4817_v9  ;;  %1153 = vrot.lane.b32.xlu0 %v6308_v0, %s10623_s28 }
 0x26b   : > { %v1465_v50 = vsel %vm1444_vm3, %v10715_v21, %v10714_v52  ;;  %v1469_v37 = vsel %vm1444_vm3, %v10716_v41, %v10715_v21  ;;  %10717 = vst [vmem:[#allocation58_spill] sm:$0xff] %v7066_v17  ;;  %v10719_v33 = vld [vmem:[#allocation23_spill] sm:$0xff]  ;;  %10720 = vst [vmem:[#allocation56_spill] sm:$0xff] %v7074_v38  ;;  %v7080_v21 = vmul.f32 %v10703_v53, %v6737_v32  ;;  %v10722_v34 = vld [vmem:[#allocation61_spill] sm:$0xff]  ;;  %v7100_v38 = vpop.permute.xlu1 %1657 }
 0x26c   : > { %v1318_v28 = vmul.f32 %v10719_v33, %v1261_v40  ;;  %v1198_v63 = vsel %vm1181_vm1, %v10689_v54, %v10722_v34  ;;  %v1317_v24 = vmul.f32 %v10719_v33, %v1260_v55  ;;  %10723 = vst [vmem:[#allocation209_spill] sm:$0xff] %v7087_v20  ;;  %v7089_v40 = vor.u32 %v4824_v12, %v4823_v30  ;;  %v10725_v39 = vld [vmem:[#allocation59_spill] sm:$0xff]  ;;  %v10728_v55 = vld [vmem:[#allocation66_spill] sm:$0xff]  ;;  %v10730_v9 = vld [vmem:[#allocation68_spill] sm:$0xff] }
 0x26d   : > { %10721 = vst [vmem:[#allocation208_spill] sm:$0xff] %v7080_v21  ;;  %v937_v61 = vsel %vm920_vm2, %v10698_v2, %v10725_v39  ;;  %v1523_v53 = vmul.f32 %v6852_v58, %v1469_v37  ;;  %v1524_v1 = vmul.f32 %v6856_v11, %v1465_v50  ;;  %v10726_v21 = vld [vmem:[#allocation21_spill] sm:$0xff]  ;;  %10727 = vst [vmem:[#allocation211_spill] sm:$0xff] %v7100_v38  ;;  %v10729_v12 = vld [vmem:[#allocation62_spill] sm:$0xff]  ;;  %2341 = vrot.lane.b32.xlu1 %v6027_v42, %s10606_s16 }
 0x26e   : > { %10724 = vst [vmem:[#allocation210_spill] sm:$0xff] %v7089_v40  ;;  %v1055_v54 = vmul.f32 %v10726_v21, %v999_v31  ;;  %v1461_v30 = vsel %vm1444_vm3, %v10714_v52, %v10728_v55  ;;  %v1728_v23 = vsel %vm1707_vm4, %v10730_v9, %v10729_v12  ;;  %v10731_v2 = vld [vmem:[#allocation60_spill] sm:$0xff]  ;;  %v1054_v50 = vmul.f32 %v10726_v21, %v998_v59  ;;  %v7115_v31 = vpop.permute.xlu0 %2616  ;;  %v10733_v17 = vld [vmem:[#allocation87_spill] sm:$0xff] }
 0x26f   : > { %v1732_v37 = vsel %vm1707_vm4, %v10731_v2, %v10730_v9  ;;  %v1262_v38 = vmul.f32 %v6848_v5, %v1198_v63  ;;  %v7121_v55 = vmul.f32 %v10679_v46, %v1963_v8  ;;  %v7125_v39 = vmul.f32 %v10707_v43, %v10733_v17  ;;  %1430 = vrot.lane.b32.xlu0 %v6737_v32, %s10605_s26  ;;  %v10737_v8 = vld [vmem:[#allocation22_spill] sm:$0xff] }
 0x270   : > { %v1350_v52 = vadd.f32 %v1318_v28, %v1055_v54  ;;  %v1000_v34 = vmul.f32 %v6840_v36, %v937_v61  ;;  %v1349_v59 = vadd.f32 %v1317_v24, %v1054_v50  ;;  %v7131_v9 = vrot.slane %v7087_v20, %v6788_v19 }
 0x271   : > { %10732 = vst [vmem:[#allocation62_spill] sm:$0xff] %v7121_v55  ;;  %10734 = vst [vmem:[#allocation68_spill] sm:$0xff] %v7125_v39  ;;  %v7136_v28 = vmul.f32 %v10679_v46, %v1964_v13  ;;  %v1581_v63 = vmul.f32 %v10737_v8, %v1524_v1  ;;  %v1525_v54 = vmul.f32 %v6864_v44, %v1461_v30  ;;  %v7142_v39 = vpop.permute.xlu1 %2092  ;;  %2865 = vrot.lane.b32.xlu1 %v5945_v29, %s10612_s23  ;;  %v10744_v55 = vld [vmem:[#allocation72_spill] sm:$0xff] }
 0x272   : > { %10735 = vst [vmem:[#allocation60_spill] sm:$0xff] %v7131_v9  ;;  %v1786_v43 = vmul.f32 %v6868_v6, %v1732_v37  ;;  %v1787_v61 = vmul.f32 %v6882_v14, %v1728_v23  ;;  %10738 = vst [vmem:[#allocation213_spill] sm:$0xff] %v7142_v39  ;;  %v1580_v24 = vmul.f32 %v10737_v8, %v1523_v53  ;;  %v7157_v30 = vpop.permute.xlu0 %1705  ;;  %v10743_v37 = vld [vmem:[#allocation150_spill] sm:$0xff] }
 0x273   : > { %10736 = vst [vmem:[#allocation212_spill] sm:$0xff] %v7136_v28  ;;  %v7147_v50 = vrot.slane %v7087_v20, %v6614_v25  ;;  %v7151_v13 = vrot.slane %v7087_v20, %v6796_v47  ;;  %v7155_v1 = vrot.slane %v7089_v40, %v6614_v25  ;;  %10742 = vst [vmem:[#allocation217_spill] sm:$0xff] %v7157_v30  ;;  %1685 = vrot.lane.b32.xlu0 %v6565_v18, %s10598_s17 }
 0x274   : > { %v1319_v23 = vmul.f32 %v10719_v33, %v1262_v38  ;;  %v1613_v53 = vadd.f32 %v1581_v63, %v1350_v52  ;;  %v949_v46 = vsel %vm920_vm2, %v10743_v37, %v10704_v22  ;;  %v1739_v25 = vsel %vm1707_vm4, %v7157_v30, %v6876_v45  ;;  %v10745_v63 = vld [vmem:[#allocation25_spill] sm:$0xff]  ;;  %v10746_v30 = vld [vmem:[#allocation144_spill] sm:$0xff] }
 0x275   : > { %10739 = vst [vmem:[#allocation214_spill] sm:$0xff] %v7147_v50  ;;  %10740 = vst [vmem:[#allocation215_spill] sm:$0xff] %v7151_v13  ;;  %v1056_v28 = vmul.f32 %v10726_v21, %v1000_v34  ;;  %v1724_v29 = vsel %vm1707_vm4, %v10729_v12, %v10744_v55  ;;  %v1612_v38 = vadd.f32 %v1580_v24, %v1349_v59  ;;  %v7186_v45 = vpop.permute.xlu1 %2361  ;;  %v10748_v12 = vld [vmem:[#allocation65_spill] sm:$0xff]  ;;  %v10749_v59 = vld [vmem:[#allocation74_spill] sm:$0xff]  ;;  %898 = vrot.lane.b32.xlu1 %v6816_v60, %s10602_s19 }
 0x276   : > { %10741 = vst [vmem:[#allocation216_spill] sm:$0xff] %v7155_v1  ;;  %v1809_v52 = vmul.f32 %v6715_v56, %v1739_v25  ;;  %v1582_v22 = vmul.f32 %v10737_v8, %v1525_v54  ;;  %v1843_v17 = vmul.f32 %v10745_v63, %v1786_v43  ;;  %v1844_v37 = vmul.f32 %v10745_v63, %v1787_v61  ;;  %v10750_v25 = vld [vmem:[#allocation76_spill] sm:$0xff]  ;;  %v10751_v61 = vld [vmem:[#allocation45_spill] sm:$0xff]  ;;  %v7198_v39 = vpop.permute.xlu0 %2600 }
 0x277   : > { %v1210_v34 = vsel %vm1181_vm1, %v10746_v30, %v10692_v3  ;;  %10747 = vst [vmem:[#allocation218_spill] sm:$0xff] %v7186_v45  ;;  %v2157_v24 = vsel %vm2136_vm5, %v10749_v59, %v10748_v12  ;;  %v2153_v54 = vsel %vm2136_vm5, %v10748_v12, %v10750_v25  ;;  %v997_v43 = vmul.f32 %v6644_v15, %v949_v46 }
 0x278   : > { %v1866_v55 = vmul.f32 %v10751_v61, %v1809_v52  ;;  %10752 = vst [vmem:[#allocation65_spill] sm:$0xff] %v7198_v39  ;;  %v1351_v3 = vadd.f32 %v1319_v23, %v1056_v28  ;;  %v1788_v30 = vmul.f32 %v6886_v4, %v1724_v29  ;;  %v1876_v18 = vadd.f32 %v1844_v37, %v1613_v53  ;;  %v10757_v29 = vld [vmem:[#allocation70_spill] sm:$0xff]  ;;  %v10769_v39 = vld [vmem:[#allocation149_spill] sm:$0xff] }
 0x279   : > { %v7206_v45 = vrot.slane %v7089_v40, %v6796_v47  ;;  %v1875_v12 = vadd.f32 %v1843_v17, %v1612_v38  ;;  %v7210_v46 = vrot.slane %v7089_v40, %v6788_v19  ;;  %v1259_v52 = vmul.f32 %v6627_v27, %v1210_v34  ;;  %2120 = vrot.lane.b32.xlu0 %v6257_v10, %s10597_s0  ;;  %v10755_v47 = vld [vmem:[#allocation146_spill] sm:$0xff]  ;;  %v7222_v37 = vpop.permute.xlu1 %2608  ;;  %v10756_v19 = vld [vmem:[#allocation81_spill] sm:$0xff] }
 0x27a   : > { %v1898_v61 = vadd.f32 %v1866_v55, %v6780_v7  ;;  %v1614_v28 = vadd.f32 %v1582_v22, %v1351_v3  ;;  %v2215_v23 = vmul.f32 %v6899_v16, %v2157_v24  ;;  %v2216_v53 = vmul.f32 %v6908_v35, %v2153_v54  ;;  %v7233_v22 = vpop.permute.xlu0 %1165  ;;  %1161 = vrot.lane.b32.xlu1 %v6816_v60, %s10623_s28  ;;  %v10761_v24 = vld [vmem:[#allocation79_spill] sm:$0xff] }
 0x27b   : > { %10753 = vst [vmem:[#allocation74_spill] sm:$0xff] %v7206_v45  ;;  %10754 = vst [vmem:[#allocation76_spill] sm:$0xff] %v7210_v46  ;;  %v1473_v17 = vsel %vm1444_vm3, %v10755_v47, %v10716_v41  ;;  %v2416_v7 = vsel %vm2399_vm6, %v10757_v29, %v10756_v19  ;;  %v7230_v55 = vrot.slane %v6842_v49, %v6793_v62  ;;  %v10763_v49 = vld [vmem:[#allocation67_spill] sm:$0xff] }
 0x27c   : > { %v1053_v38 = vmul.f32 %v10726_v21, %v997_v43  ;;  %10759 = vst [vmem:[#allocation70_spill] sm:$0xff] %v7233_v22  ;;  %v7238_v41 = vadd.f32 %v7017_v48, %v1898_v61  ;;  %v1845_v34 = vmul.f32 %v10745_v63, %v1788_v30  ;;  %v2420_v54 = vsel %vm2399_vm6, %v10761_v24, %v10757_v29  ;;  %v10764_v61 = vld [vmem:[#allocation162_spill] sm:$0xff]  ;;  %v10773_v35 = vld [vmem:[#allocation75_spill] sm:$0xff] }
 0x27d   : > { %10758 = vst [vmem:[#allocation81_spill] sm:$0xff] %v7230_v55  ;;  %v2042_v3 = vadd.f32 %v6935_v51, %v1876_v18  ;;  %v7248_v43 = vrot.slane %v7087_v20, %v6793_v62  ;;  %v2161_v47 = vsel %vm2136_vm5, %v10763_v49, %v10749_v59  ;;  %v1316_v48 = vmul.f32 %v10719_v33, %v1259_v52  ;;  %v10766_v22 = vld [vmem:[#allocation202_spill] sm:$0xff]  ;;  %v7266_v49 = vpop.permute.xlu1 %2789  ;;  %v10771_v52 = vld [vmem:[#allocation195_spill] sm:$0xff]  ;;  %v10772_v33 = vld [vmem:[#allocation84_spill] sm:$0xff] }
 0x27e   : > { %10760 = vst [vmem:[#allocation219_spill] sm:$0xff] %v7238_v41  ;;  %v1522_v30 = vmul.f32 %v10764_v61, %v1473_v17  ;;  %v10765_v41 = vld [vmem:[#allocation172_spill] sm:$0xff]  ;;  %v2041_v29 = vadd.f32 %v10766_v22, %v1875_v12  ;;  %v10767_v21 = vld [vmem:[#allocation26_spill] sm:$0xff]  ;;  %v1736_v59 = vsel %vm1707_vm4, %v10769_v39, %v10731_v2  ;;  %10770 = vst [vmem:[#allocation162_spill] sm:$0xff] %v7266_v49  ;;  %v7277_v22 = vpop.permute.xlu0 %1420 }
 0x27f   : > { %10762 = vst [vmem:[#allocation79_spill] sm:$0xff] %v7248_v43  ;;  %2373 = vrot.lane.b32.xlu0 %v10765_v41, %s10606_s16  ;;  %v2272_v51 = vmul.f32 %v10767_v21, %v2215_v23  ;;  %v2273_v18 = vmul.f32 %v10767_v21, %v2216_v53  ;;  %v10768_v20 = vld [vmem:[#allocation50_spill] sm:$0xff]  ;;  %v2478_v17 = vmul.f32 %v10771_v52, %v2420_v54  ;;  %v10774_v23 = vld [vmem:[#allocation83_spill] sm:$0xff]  ;;  %10775 = vst [vmem:[#allocation202_spill] sm:$0xff] %v7277_v22 }
 0x280   : > { %v2479_v10 = vmul.f32 %v10768_v20, %v2416_v7  ;;  %v2679_v12 = vsel %vm2662_vm7, %v10773_v35, %v10772_v33  ;;  %v2683_v53 = vsel %vm2662_vm7, %v10774_v23, %v10773_v35  ;;  %v1348_v7 = vadd.f32 %v1316_v48, %v1053_v38  ;;  %v10776_v20 = vld [vmem:[#allocation85_spill] sm:$0xff]  ;;  %v10777_v49 = vld [vmem:[#allocation190_spill] sm:$0xff]  ;;  %v10781_v48 = vld [vmem:[#allocation63_spill] sm:$0xff] }
 0x281   : > { %1677 = vrot.lane.b32.xlu1 %v10776_v20, %s10598_s17  ;;  %v1877_v2 = vadd.f32 %v1845_v34, %v1614_v28  ;;  %v2214_v39 = vmul.f32 %v10777_v49, %v2161_v47  ;;  %v2305_v54 = vadd.f32 %v2273_v18, %v2042_v3  ;;  %v10778_v41 = vld [vmem:[#allocation186_spill] sm:$0xff]  ;;  %v10780_v52 = vld [vmem:[#allocation73_spill] sm:$0xff]  ;;  %v1579_v35 = vmul.f32 %v10737_v8, %v1522_v30  ;;  %v10782_v28 = vld [vmem:[#allocation28_spill] sm:$0xff] }
 0x282   : > { %v7284_v4 = vrot.slane %v10778_v41, %v6793_v62  ;;  %v2424_v11 = vsel %vm2399_vm6, %v10780_v52, %v10761_v24  ;;  %v1785_v38 = vmul.f32 %v6715_v56, %v1736_v59  ;;  %v2304_v20 = vadd.f32 %v2272_v51, %v2041_v29  ;;  %v10783_v3 = vld [vmem:[#allocation55_spill] sm:$0xff]  ;;  %v7301_v24 = vpop.permute.xlu1 %2076  ;;  %v10785_v59 = vld [vmem:[#allocation86_spill] sm:$0xff]  ;;  %v10786_v52 = vld [vmem:[#allocation57_spill] sm:$0xff] }
 0x283   : > { %2620 = vrot.lane.b32.xlu0 %v10781_v48, %s10609_s27  ;;  %v2536_v47 = vmul.f32 %v10782_v28, %v2479_v10  ;;  %v2742_v34 = vmul.f32 %v7131_v9, %v2679_v12  ;;  %v2687_v18 = vsel %vm2662_vm7, %v10783_v3, %v10774_v23  ;;  %v2741_v41 = vmul.f32 %v7151_v13, %v2683_v53  ;;  %v7312_v12 = vpop.permute.xlu0 %1673  ;;  %v10789_v23 = vld [vmem:[#allocation107_spill] sm:$0xff]  ;;  %v10790_v3 = vld [vmem:[#allocation192_spill] sm:$0xff]  ;;  %v10803_v48 = vld [vmem:[#allocation145_spill] sm:$0xff] }
 0x284   : > { %10779 = vst [vmem:[#allocation84_spill] sm:$0xff] %v7284_v4  ;;  %10784 = vst [vmem:[#allocation75_spill] sm:$0xff] %v7301_v24  ;;  %v2535_v30 = vmul.f32 %v10782_v28, %v2478_v17  ;;  %v2942_v29 = vsel %vm2925_vm8, %v10786_v52, %v10785_v59  ;;  %v7310_v10 = vrot.slane %v7089_v40, %v6793_v62  ;;  %v10791_v24 = vld [vmem:[#allocation88_spill] sm:$0xff]  ;;  %v10792_v62 = vld [vmem:[#allocation77_spill] sm:$0xff] }
 0x285   : > { %v1611_v51 = vadd.f32 %v1579_v35, %v1348_v7  ;;  %10788 = vst [vmem:[#allocation85_spill] sm:$0xff] %v7312_v12  ;;  %2112 = vrot.lane.b32.xlu1 %v10789_v23, %s10597_s0  ;;  %v2271_v53 = vmul.f32 %v10767_v21, %v2214_v39  ;;  %v2477_v8 = vmul.f32 %v10790_v3, %v2424_v11  ;;  %v10793_v11 = vld [vmem:[#allocation27_spill] sm:$0xff]  ;;  %v10804_v3 = vld [vmem:[#allocation110_spill] sm:$0xff] }
 0x286   : > { %10787 = vst [vmem:[#allocation83_spill] sm:$0xff] %v7310_v10  ;;  %v2568_v17 = vadd.f32 %v2536_v47, %v2305_v54  ;;  %v2946_v22 = vsel %vm2925_vm8, %v10791_v24, %v10786_v52  ;;  %v2740_v9 = vmul.f32 %v7147_v50, %v2687_v18  ;;  %v2950_v7 = vsel %vm2925_vm8, %v10792_v62, %v10791_v24  ;;  %v10794_v52 = vld [vmem:[#allocation143_spill] sm:$0xff]  ;;  %v7337_v12 = vpop.permute.xlu1 %902  ;;  %v10797_v62 = vld [vmem:[#allocation90_spill] sm:$0xff] }
 0x287   : > { %v1842_v35 = vmul.f32 %v10745_v63, %v1785_v38  ;;  %2897 = vrot.lane.b32.xlu0 %v6308_v0, %s10612_s23  ;;  %v2567_v39 = vadd.f32 %v2535_v30, %v2304_v20  ;;  %v2799_v54 = vmul.f32 %v10793_v11, %v2742_v34  ;;  %v2798_v47 = vmul.f32 %v10793_v11, %v2741_v41  ;;  %v10796_v38 = vld [vmem:[#allocation101_spill] sm:$0xff]  ;;  %v10798_v30 = vld [vmem:[#allocation103_spill] sm:$0xff]  ;;  %v7348_v63 = vpop.permute.xlu0 %2108  ;;  %v10805_v49 = vld [vmem:[#allocation98_spill] sm:$0xff] }
 0x288   : > { %v3005_v40 = vmul.f32 %v7210_v46, %v2942_v29  ;;  %v2149_v18 = vsel %vm2136_vm5, %v10750_v25, %v10794_v52  ;;  %10795 = vst [vmem:[#allocation86_spill] sm:$0xff] %v7337_v12  ;;  %v3004_v24 = vmul.f32 %v7206_v45, %v2946_v22  ;;  %v946_v20 = vsel %vm920_vm2, %v10797_v62, %v10796_v38  ;;  %v10799_v34 = vld [vmem:[#allocation89_spill] sm:$0xff]  ;;  %v10813_v60 = vld [vmem:[#allocation71_spill] sm:$0xff] }
 0x289   : > { %v1207_v41 = vsel %vm1181_vm1, %v10799_v34, %v10798_v30  ;;  %v1874_v29 = vadd.f32 %v1842_v35, %v1611_v51  ;;  %10800 = vst [vmem:[#allocation57_spill] sm:$0xff] %v7348_v63  ;;  %v10801_v46 = vld [vmem:[#allocation69_spill] sm:$0xff]  ;;  %v2831_v25 = vadd.f32 %v2799_v54, %v2568_v17  ;;  %v3003_v52 = vmul.f32 %v7155_v1, %v2950_v7  ;;  %v10806_v17 = vld [vmem:[#allocation174_spill] sm:$0xff] }
 0x28a   : > { %2365 = vrot.lane.b32.xlu1 %v10801_v46, %s10606_s16  ;;  %v10802_v22 = vld [vmem:[#allocation197_spill] sm:$0xff]  ;;  %v2412_v50 = vsel %vm2399_vm6, %v10756_v19, %v10803_v48  ;;  %v2534_v45 = vmul.f32 %v10782_v28, %v2477_v8  ;;  %v1470_v51 = vsel %vm1444_vm3, %v10805_v49, %v10804_v3  ;;  %v2217_v35 = vmul.f32 %v7230_v55, %v2149_v18  ;;  %v7373_v1 = vpop.permute.xlu1 %1412 }
 0x28b   : > { %v2043_v12 = vadd.f32 %v10802_v22, %v1877_v2  ;;  %906 = vrot.lane.b32.xlu0 %v10806_v17, %s10602_s19  ;;  %v2830_v7 = vadd.f32 %v2798_v47, %v2567_v39  ;;  %v10807_v54 = vld [vmem:[#allocation29_spill] sm:$0xff]  ;;  %v1006_v8 = vmul.f32 %v6860_v57, %v946_v20  ;;  %10810 = vst [vmem:[#allocation88_spill] sm:$0xff] %v7373_v1  ;;  %v10811_v47 = vld [vmem:[#allocation198_spill] sm:$0xff]  ;;  %v7381_v55 = vpop.permute.xlu0 %2355 }
 0x28c   : > { %v3062_v2 = vmul.f32 %v10807_v54, %v3005_v40  ;;  %v10808_v22 = vld [vmem:[#allocation93_spill] sm:$0xff]  ;;  %v7376_v13 = vmul.f32 %v10793_v11, %v2740_v9  ;;  %v3061_v18 = vmul.f32 %v10807_v54, %v3004_v24  ;;  %v2480_v39 = vmul.f32 %v7284_v4, %v2412_v50  ;;  %10812 = vst [vmem:[#allocation101_spill] sm:$0xff] %v7381_v55  ;;  %v10814_v9 = vld [vmem:[#allocation11_spill] sm:$0xff]  ;;  %v10815_v1 = vld [vmem:[#allocation158_spill] sm:$0xff] }
 0x28d   : > { %v942_v19 = vsel %vm920_vm2, %v10796_v38, %v10808_v22  ;;  %v10809_v48 = vld [vmem:[#allocation193_spill] sm:$0xff]  ;;  %v2040_v40 = vadd.f32 %v10811_v47, %v1874_v29  ;;  %v7386_v38 = vmul.f32 %v10807_v54, %v3003_v52  ;;  %v7393_v57 = vrot.slane %v10815_v1, %v10814_v9  ;;  %v10818_v4 = vld [vmem:[#allocation96_spill] sm:$0xff]  ;;  %v10831_v9 = vld [vmem:[#allocation194_spill] sm:$0xff] }
 0x28e   : > { %v1268_v63 = vmul.f32 %v10809_v48, %v1207_v41  ;;  %2612 = vrot.lane.b32.xlu1 %v10813_v60, %s10609_s27  ;;  %v7388_v20 = vadd.f32 %v3062_v2, %v2831_v25  ;;  %v1531_v41 = vmul.f32 %v6852_v58, %v1470_v51  ;;  %v10817_v24 = vld [vmem:[#allocation185_spill] sm:$0xff]  ;;  %v1203_v29 = vsel %vm1181_vm1, %v10798_v30, %v10818_v4  ;;  %v10819_v25 = vld [vmem:[#allocation31_spill] sm:$0xff]  ;;  %v10821_v58 = vld [vmem:[#allocation106_spill] sm:$0xff] }
 0x28f   : > { %10816 = vst [vmem:[#allocation90_spill] sm:$0xff] %v7393_v57  ;;  %v1007_v50 = vmul.f32 %v10817_v24, %v942_v19  ;;  %v2274_v47 = vmul.f32 %v10767_v21, %v2217_v35  ;;  %1416 = vrot.lane.b32.xlu0 %v6308_v0, %s10605_s26  ;;  %v7403_v52 = vadd.f32 %v3061_v18, %v2830_v7  ;;  %v10820_v2 = vld [vmem:[#allocation33_spill] sm:$0xff]  ;;  %v10822_v57 = vld [vmem:[#allocation94_spill] sm:$0xff]  ;;  %v7415_v35 = vpop.permute.xlu1 %1665  ;;  %v10825_v21 = vld [vmem:[#allocation108_spill] sm:$0xff]  ;;  %v7426_v48 = vpop.permute.xlu0 %2624 }
 0x290   : > { %v1062_v51 = vmul.f32 %v10819_v25, %v1006_v8  ;;  %v1325_v55 = vmul.f32 %v10820_v2, %v1268_v63  ;;  %v1733_v19 = vsel %vm1707_vm4, %v10822_v57, %v10821_v58  ;;  %v10823_v24 = vld [vmem:[#allocation142_spill] sm:$0xff]  ;;  %10824 = vst [vmem:[#allocation103_spill] sm:$0xff] %v7415_v35  ;;  %v1199_v7 = vsel %vm1181_vm1, %v10818_v4, %v10825_v21  ;;  %v10826_v18 = vld [vmem:[#allocation153_spill] sm:$0xff]  ;;  %v10828_v1 = vld [vmem:[#allocation52_spill] sm:$0xff] }
 0x291   : > { %v2675_v30 = vsel %vm2662_vm7, %v10772_v33, %v10823_v24  ;;  %v2537_v8 = vmul.f32 %v10782_v28, %v2480_v39  ;;  %v2303_v63 = vadd.f32 %v2271_v53, %v2040_v40  ;;  %v1211_v0 = vsel %vm1181_vm1, %v10826_v18, %v10799_v34  ;;  %10827 = vst [vmem:[#allocation89_spill] sm:$0xff] %v7426_v48  ;;  %v10829_v33 = vld [vmem:[#allocation104_spill] sm:$0xff]  ;;  %v10830_v24 = vld [vmem:[#allocation91_spill] sm:$0xff]  ;;  %v10834_v34 = vld [vmem:[#allocation105_spill] sm:$0xff] }
 0x292   : > { %2889 = vrot.lane.b32.xlu1 %v10828_v1, %s10612_s23  ;;  %v1462_v35 = vsel %vm1444_vm3, %v10830_v24, %v10829_v33  ;;  %v1269_v4 = vmul.f32 %v10831_v9, %v1203_v29  ;;  %v10832_v21 = vld [vmem:[#allocation35_spill] sm:$0xff]  ;;  %v938_v28 = vsel %vm920_vm2, %v10808_v22, %v10834_v34  ;;  %v2306_v1 = vadd.f32 %v2274_v47, %v2043_v12  ;;  %v10835_v48 = vld [vmem:[#allocation152_spill] sm:$0xff] }
 0x293   : > { %v1588_v39 = vmul.f32 %v10832_v21, %v1531_v41  ;;  %v10833_v53 = vld [vmem:[#allocation147_spill] sm:$0xff]  ;;  %v2743_v18 = vmul.f32 %v7248_v43, %v2675_v30  ;;  %v950_v29 = vsel %vm920_vm2, %v10835_v48, %v10797_v62  ;;  %1693 = vrot.lane.b32.xlu0 %v6737_v32, %s10598_s17  ;;  %v1357_v41 = vadd.f32 %v1325_v55, %v1062_v51  ;;  %v7454_v9 = vpop.permute.xlu1 %2100  ;;  %v7458_v34 = vpop.permute.xlu0 %2871 }
 0x294   : > { %v2938_v40 = vsel %vm2925_vm8, %v10785_v59, %v10833_v53  ;;  %v1794_v33 = vmul.f32 %v6868_v6, %v1733_v19  ;;  %v1270_v59 = vmul.f32 %v6848_v5, %v1199_v7  ;;  %v1267_v53 = vmul.f32 %v6627_v27, %v1211_v0  ;;  %10836 = vst [vmem:[#allocation69_spill] sm:$0xff] %v7454_v9  ;;  %v10837_v27 = vld [vmem:[#allocation97_spill] sm:$0xff]  ;;  %v10838_v7 = vld [vmem:[#allocation154_spill] sm:$0xff]  ;;  %v10896_v9 = vld [vmem:[#allocation183_spill] sm:$0xff] }
 0x295   : > { %v1063_v12 = vmul.f32 %v10819_v25, %v1007_v50  ;;  %v2569_v22 = vadd.f32 %v2537_v8, %v2306_v1  ;;  %v3006_v47 = vmul.f32 %v7310_v10, %v2938_v40  ;;  %v2566_v30 = vadd.f32 %v2534_v45, %v2303_v63  ;;  %v10897_v10 = vld [vmem:[#allocation20_spill] sm:$0xff] }
 0x296   : > { %2604 = vrot.lane.b32.xlu1 %v6027_v42, %s10609_s27  ;;  %v1533_v55 = vmul.f32 %v6864_v44, %v1462_v35  ;;  %v1326_v62 = vmul.f32 %v10820_v2, %v1269_v4  ;;  %v1620_v51 = vadd.f32 %v1588_v39, %v1357_v41  ;;  %v1005_v0 = vmul.f32 %v6644_v15, %v950_v29  ;;  %v10839_v35 = vld [vmem:[#allocation37_spill] sm:$0xff]  ;;  %v10840_v4 = vld [vmem:[#allocation100_spill] sm:$0xff] }
 0x297   : > { %v1729_v50 = vsel %vm1707_vm4, %v10821_v58, %v10837_v27  ;;  %v1008_v19 = vmul.f32 %v6840_v36, %v938_v28  ;;  %v2800_v45 = vmul.f32 %v10793_v11, %v2743_v18  ;;  %v1474_v8 = vsel %vm1444_vm3, %v10838_v7, %v10805_v49  ;;  %2375 = vrot.lane.b32.xlu0 %v10789_v23, %s10606_s16  ;;  %v10841_v39 = vld [vmem:[#allocation112_spill] sm:$0xff]  ;;  %v7484_v18 = vpop.permute.xlu1 %2347  ;;  %v7491_v29 = vpop.permute.xlu0 %3052 }
 0x298   : > { %v1851_v63 = vmul.f32 %v10839_v35, %v1794_v33  ;;  %v1327_v15 = vmul.f32 %v10820_v2, %v1270_v59  ;;  %v2158_v58 = vsel %vm2136_vm5, %v10841_v39, %v10840_v4  ;;  %v1324_v28 = vmul.f32 %v10820_v2, %v1267_v53  ;;  %10842 = vst [vmem:[#allocation197_spill] sm:$0xff] %v7484_v18  ;;  %v10843_v49 = vld [vmem:[#allocation156_spill] sm:$0xff]  ;;  %v10879_v2 = vld [vmem:[#allocation118_spill] sm:$0xff] }
 0x299   : > { %v3063_v40 = vmul.f32 %v10807_v54, %v3006_v47  ;;  %v1737_v1 = vsel %vm1707_vm4, %v10843_v49, %v10822_v57  ;;  %10844 = vst [vmem:[#allocation110_spill] sm:$0xff] %v7491_v29  ;;  %v2832_v33 = vadd.f32 %v2800_v45, %v2569_v22  ;;  %v2829_v41 = vadd.f32 %v7376_v13, %v2566_v30  ;;  %v10845_v49 = vld [vmem:[#allocation99_spill] sm:$0xff]  ;;  %v10846_v22 = vld [vmem:[#allocation113_spill] sm:$0xff] }
 0x29a   : > { %1169 = vrot.lane.b32.xlu1 %v10806_v17, %s10623_s28  ;;  %v1590_v59 = vmul.f32 %v10832_v21, %v1533_v55  ;;  %v1883_v53 = vadd.f32 %v1851_v63, %v1620_v51  ;;  %v1061_v11 = vmul.f32 %v10819_v25, %v1005_v0  ;;  %v1530_v47 = vmul.f32 %v10764_v61, %v1474_v8  ;;  %v10847_v30 = vld [vmem:[#allocation109_spill] sm:$0xff]  ;;  %v10863_v29 = vld [vmem:[#allocation155_spill] sm:$0xff] }
 0x29b   : > { %v1795_v54 = vmul.f32 %v6882_v14, %v1729_v50  ;;  %v1064_v7 = vmul.f32 %v10819_v25, %v1008_v19  ;;  %v1466_v57 = vsel %vm1444_vm3, %v10804_v3, %v10830_v24  ;;  %v2421_v13 = vsel %vm2399_vm6, %v10846_v22, %v10845_v49  ;;  %2628 = vrot.lane.b32.xlu0 %v10801_v46, %s10609_s27  ;;  %v7517_v50 = vpop.permute.xlu1 %2531  ;;  %v10849_v19 = vld [vmem:[#allocation175_spill] sm:$0xff]  ;;  %v10881_v25 = vld [vmem:[#allocation129_spill] sm:$0xff] }
 0x29c   : > { %v1725_v61 = vsel %vm1707_vm4, %v10837_v27, %v10847_v30  ;;  %v2223_v55 = vmul.f32 %v6899_v16, %v2158_v58  ;;  %v1356_v51 = vadd.f32 %v1324_v28, %v1061_v11  ;;  %v1793_v0 = vmul.f32 %v6715_v56, %v1737_v1  ;;  %10848 = vst [vmem:[#allocation98_spill] sm:$0xff] %v7517_v50  ;;  %v10850_v27 = vld [vmem:[#allocation182_spill] sm:$0xff]  ;;  %v10851_v58 = vld [vmem:[#allocation195_spill] sm:$0xff]  ;;  %v10852_v28 = vld [vmem:[#allocation24_spill] sm:$0xff] }
 0x29d   : > { %v1359_v3 = vadd.f32 %v1327_v15, %v1064_v7  ;;  %v2684_v24 = vsel %vm2662_vm7, %v7222_v37, %v7115_v31  ;;  %v3095_v45 = vadd.f32 %v3063_v40, %v2832_v33  ;;  %v3092_v8 = vadd.f32 %v7386_v38, %v2829_v41  ;;  %v7530_v7 = vpop.permute.xlu0 %3125  ;;  %v10858_v41 = vld [vmem:[#allocation38_spill] sm:$0xff]  ;;  %v10861_v50 = vld [vmem:[#allocation188_spill] sm:$0xff]  ;;  %v10862_v30 = vld [vmem:[#allocation11_spill] sm:$0xff] }
 0x29e   : > { %1424 = vrot.lane.b32.xlu1 %v10849_v19, %s10605_s26  ;;  %v1532_v63 = vmul.f32 %v10850_v27, %v1466_v57  ;;  %v2486_v11 = vmul.f32 %v10851_v58, %v2421_v13  ;;  %v2049_v56 = vadd.f32 %v10852_v28, %v1883_v53  ;;  %v1587_v1 = vmul.f32 %v10832_v21, %v1530_v47  ;;  %v10859_v13 = vld [vmem:[#allocation215_spill] sm:$0xff] }
 0x29f   : > { %10853 = vst [vmem:[#allocation93_spill] sm:$0xff] %v7530_v7  ;;  %2875 = vrot.lane.b32.xlu0 %v10813_v60, %s10612_s23  ;;  %v7536_v15 = vadd.f32 %v7530_v7, %v7403_v52  ;;  %v7539_v40 = vadd.f32 %v7530_v7, %v3095_v45  ;;  %v7543_v38 = vadd.f32 %v7530_v7, %v7388_v20  ;;  %v7551_v60 = vpop.permute.xlu1 %2632  ;;  %v10888_v58 = vld [vmem:[#allocation119_spill] sm:$0xff] }
 0x2a0   : > { %v7546_v33 = vadd.f32 %v7530_v7, %v3092_v8  ;;  %v2280_v53 = vmul.f32 %v10858_v41, %v2223_v55  ;;  %v1619_v47 = vadd.f32 %v1587_v1, %v1356_v51  ;;  %v1850_v57 = vmul.f32 %v10839_v35, %v1793_v0  ;;  %10860 = vst [vmem:[#allocation52_spill] sm:$0xff] %v7551_v60  ;;  %v10865_v55 = vld [vmem:[#allocation111_spill] sm:$0xff]  ;;  %v5283_v8 = vld [vmem:[%s9996_s3 + $0x18] sm:$0xff] }
 0x2a1   : > { %10854 = vst [vmem:[#allocation198_spill] sm:$0xff] %v7536_v15  ;;  %10855 = vst [vmem:[#allocation96_spill] sm:$0xff] %v7539_v40  ;;  %v2749_v28 = vmul.f32 %v10859_v13, %v2684_v24  ;;  %v1358_v52 = vadd.f32 %v1326_v62, %v1063_v12  ;;  %v1796_v45 = vmul.f32 %v10861_v50, %v1725_v61  ;;  %3364 = vmatprep.mubr.f32.mxu0 %v7536_v15  ;;  %v7564_v24 = vpop.permute.xlu0 %2339  ;;  %v10867_v12 = vld [vmem:[#allocation78_spill] sm:$0xff]  ;;  %v10872_v7 = vld [vmem:[#allocation19_spill] sm:$0xff] }
 0x2a2   : > { %10856 = vst [vmem:[#allocation106_spill] sm:$0xff] %v7543_v38  ;;  %10857 = vst [vmem:[#allocation94_spill] sm:$0xff] %v7546_v33  ;;  %v7556_v48 = vrot.slane %v10863_v29, %v10862_v30  ;;  %3449 = vmatprep.mubr.f32.mxu1 %v7539_v40  ;;  %v1622_v20 = vadd.f32 %v1590_v59, %v1359_v3  ;;  %v2154_v51 = vsel %vm2136_vm5, %v10840_v4, %v10865_v55  ;;  %v10868_v61 = vld [vmem:[#allocation102_spill] sm:$0xff]  ;;  %v10869_v3 = vld [vmem:[#allocation189_spill] sm:$0xff] }
 0x2a3   : > { %v2312_v0 = vadd.f32 %v2280_v53, %v2049_v56  ;;  %10866 = vst [vmem:[#allocation97_spill] sm:$0xff] %v7564_v24  ;;  %3450 = vmatmul.mubr.f32.vlgmr.msra.gmra.mrb[16].mxu1 %v7543_v38  ;;  %2128 = vrot.lane.b32.xlu1 %v10867_v12, %s10597_s0  ;;  %v1589_v62 = vmul.f32 %v10832_v21, %v1532_v63  ;;  %v10870_v63 = vld [vmem:[#allocation43_spill] sm:$0xff]  ;;  %v10882_v13 = vld [vmem:[#allocation114_spill] sm:$0xff] }
 0x2a4   : > { %10864 = vst [vmem:[#allocation91_spill] sm:$0xff] %v7556_v48  ;;  %v2162_v59 = vsel %vm2136_vm5, %v10868_v61, %v10841_v39  ;;  %v2425_v4 = vsel %vm2399_vm6, %v10869_v3, %v10846_v22  ;;  %3365 = vmatmul.mubr.f32.vlgmr.msra.gmra.mrb[16].mxu0 %v7546_v33  ;;  %3137 = vperm.xlu0 %5266, %v5283_v8   ;;  %v10871_v40 = vld [vmem:[#allocation47_spill] sm:$0xff]  ;;  %v7585_v39 = vpop.permute.xlu1 %2879  ;;  %v10873_v33 = vld [vmem:[#allocation65_spill] sm:$0xff]  ;;  %v10876_v8 = vld [vmem:[#allocation74_spill] sm:$0xff] }
 0x2a5   : > { %v1852_v56 = vmul.f32 %v10839_v35, %v1795_v54  ;;  %v2543_v1 = vmul.f32 %v10870_v63, %v2486_v11  ;;  %v1882_v53 = vadd.f32 %v1850_v57, %v1619_v47  ;;  %v2806_v15 = vmul.f32 %v10871_v40, %v2749_v28  ;;  %v10874_v11 = vld [vmem:[#allocation190_spill] sm:$0xff]  ;;  %v10875_v57 = vld [vmem:[#allocation192_spill] sm:$0xff]  ;;  %v7600_v21 = vpop.permute.xlu0 %888 }
 0x2a6   : > { %v1853_v38 = vmul.f32 %v10839_v35, %v1796_v45  ;;  %v2224_v22 = vmul.f32 %v10872_v7, %v2154_v51  ;;  %v2688_v3 = vsel %vm2662_vm7, %v10873_v33, %v7222_v37  ;;  %v2947_v54 = vsel %vm2925_vm8, %v7458_v34, %v7585_v39  ;;  %10877 = vst [vmem:[#allocation100_spill] sm:$0xff] %v7600_v21  ;;  %v10878_v45 = vld [vmem:[#allocation121_spill] sm:$0xff]  ;;  %v10880_v37 = vld [vmem:[#allocation115_spill] sm:$0xff] }
 0x2a7   : > { %v2222_v47 = vmul.f32 %v10874_v11, %v2162_v59  ;;  %v2485_v28 = vmul.f32 %v10875_v57, %v2425_v4  ;;  %v3012_v61 = vmul.f32 %v10876_v8, %v2947_v54  ;;  %2383 = vrot.lane.b32.xlu1 %v10878_v45, %s10606_s16  ;;  %v2575_v51 = vadd.f32 %v2543_v1, %v2312_v0  ;;  %v10883_v54 = vld [vmem:[#allocation172_spill] sm:$0xff]  ;;  %v10885_v57 = vld [vmem:[#allocation214_spill] sm:$0xff]  ;;  %v10886_v0 = vld [vmem:[#allocation177_spill] sm:$0xff] }
 0x2a8   : > { %v1621_v35 = vadd.f32 %v1589_v62, %v1358_v52  ;;  %v1208_v33 = vsel %vm1181_vm1, %v10880_v37, %v10879_v2  ;;  %v947_v59 = vsel %vm920_vm2, %v10882_v13, %v10881_v25  ;;  %v1885_v4 = vadd.f32 %v1853_v38, %v1622_v20  ;;  %892 = vrot.lane.b32.xlu0 %v10883_v54, %s10602_s19  ;;  %v10884_v8 = vld [vmem:[#allocation200_spill] sm:$0xff]  ;;  %v7617_v62 = vpop.permute.xlu1 %3129  ;;  %v10889_v38 = vld [vmem:[#allocation13_spill] sm:$0xff]  ;;  %v10890_v20 = vld [vmem:[#allocation158_spill] sm:$0xff] }
 0x2a9   : > { %v2048_v21 = vadd.f32 %v10884_v8, %v1882_v53  ;;  %v2748_v7 = vmul.f32 %v10885_v57, %v2688_v3  ;;  %v3069_v52 = vmul.f32 %v10886_v0, %v3012_v61  ;;  %10887 = vst [vmem:[#allocation112_spill] sm:$0xff] %v7617_v62  ;;  %v2838_v1 = vadd.f32 %v2806_v15, %v2575_v51  ;;  %v10893_v3 = vld [vmem:[#allocation117_spill] sm:$0xff]  ;;  %v7638_v8 = vpop.permute.xlu0 %1151 }
 0x2aa   : > { %v2281_v37 = vmul.f32 %v10858_v41, %v2224_v22  ;;  %v1204_v13 = vsel %vm1181_vm1, %v10879_v2, %v10888_v58  ;;  %v7626_v24 = vrot.slane %v10890_v20, %v10889_v38  ;;  %v7630_v53 = vrot.slane %v10863_v29, %v10889_v38  ;;  %10894 = vst [vmem:[#allocation182_spill] sm:$0xff] %v7638_v8  ;;  %v10895_v57 = vld [vmem:[#allocation193_spill] sm:$0xff] }
 0x2ab   : > { %v2279_v61 = vmul.f32 %v10858_v41, %v2222_v47  ;;  %v943_v15 = vsel %vm920_vm2, %v10881_v25, %v10893_v3  ;;  %v2542_v22 = vmul.f32 %v10870_v63, %v2485_v28  ;;  %2636 = vrot.lane.b32.xlu1 %v10883_v54, %s10609_s27  ;;  %v3101_v2 = vadd.f32 %v3069_v52, %v2838_v1  ;;  %v10898_v25 = vld [vmem:[#allocation194_spill] sm:$0xff] }
 0x2ac   : > { %10891 = vst [vmem:[#allocation99_spill] sm:$0xff] %v7626_v24  ;;  %10892 = vst [vmem:[#allocation113_spill] sm:$0xff] %v7630_v53  ;;  %v1884_v51 = vadd.f32 %v1852_v56, %v1621_v35  ;;  %v1276_v18 = vmul.f32 %v10895_v57, %v1208_v33  ;;  %v1014_v11 = vmul.f32 %v10896_v9, %v947_v59  ;;  %1155 = vrot.lane.b32.xlu0 %v10883_v54, %s10623_s28  ;;  %v7651_v63 = vpop.permute.xlu1 %2863  ;;  %v10901_v35 = vld [vmem:[#allocation120_spill] sm:$0xff]  ;;  %v10903_v59 = vld [vmem:[#allocation185_spill] sm:$0xff] }
 0x2ad   : > { %v7645_v47 = vadd.f32 %v10897_v10, %v1885_v4  ;;  %v1277_v45 = vmul.f32 %v10898_v25, %v1204_v13  ;;  %v2311_v28 = vadd.f32 %v2279_v61, %v2048_v21  ;;  %v2805_v8 = vmul.f32 %v10871_v40, %v2748_v7  ;;  %10899 = vst [vmem:[#allocation24_spill] sm:$0xff] %v7651_v63  ;;  %v10902_v10 = vld [vmem:[#allocation123_spill] sm:$0xff]  ;;  %v10904_v7 = vld [vmem:[#allocation125_spill] sm:$0xff]  ;;  %v10905_v1 = vld [vmem:[#allocation122_spill] sm:$0xff]  ;;  %v7674_v9 = vpop.permute.xlu0 %1428 }
 0x2ae   : > { %v7654_v52 = vadd.f32 %v7617_v62, %v3101_v2  ;;  %v939_v33 = vsel %vm920_vm2, %v10893_v3, %v10901_v35  ;;  %v1200_v56 = vsel %vm1181_vm1, %v10888_v58, %v10902_v10  ;;  %v1015_v4 = vmul.f32 %v10903_v59, %v943_v15  ;;  %v10906_v2 = vld [vmem:[#allocation216_spill] sm:$0xff]  ;;  %10907 = vst [vmem:[#allocation155_spill] sm:$0xff] %v7674_v9  ;;  %v10908_v57 = vld [vmem:[#allocation63_spill] sm:$0xff]  ;;  %v10910_v15 = vld [vmem:[#allocation30_spill] sm:$0xff] }
 0x2af   : > { %v2951_v21 = vsel %vm2925_vm8, %v7651_v63, %v7458_v34  ;;  %v1471_v13 = vsel %vm1444_vm3, %v10905_v1, %v10904_v7  ;;  %v2574_v61 = vadd.f32 %v2542_v22, %v2311_v28  ;;  %2883 = vrot.lane.b32.xlu1 %v10908_v57, %s10612_s23  ;;  %v10909_v58 = vld [vmem:[#allocation124_spill] sm:$0xff]  ;;  %v1070_v63 = vmul.f32 %v10910_v15, %v1014_v11  ;;  %v10911_v10 = vld [vmem:[#allocation127_spill] sm:$0xff]  ;;  %v10912_v28 = vld [vmem:[#allocation54_spill] sm:$0xff] }
 0x2b0   : > { %10900 = vst [vmem:[#allocation188_spill] sm:$0xff] %v7654_v52  ;;  %v3011_v3 = vmul.f32 %v10906_v2, %v2951_v21  ;;  %3369 = vmatprep.mubr.f32.mxu0 %v7654_v52  ;;  %v1467_v34 = vsel %vm1444_vm3, %v10904_v7, %v10909_v58  ;;  %v1463_v22 = vsel %vm1444_vm3, %v10909_v58, %v10911_v10  ;;  %v10913_v57 = vld [vmem:[#allocation116_spill] sm:$0xff]  ;;  %v10914_v1 = vld [vmem:[#allocation130_spill] sm:$0xff]  ;;  %v7700_v35 = vpop.permute.xlu1 %896  ;;  %v10917_v10 = vld [vmem:[#allocation181_spill] sm:$0xff] }
 0x2b1   : > { %v2050_v21 = vadd.f32 %v10912_v28, %v1884_v51  ;;  %1432 = vrot.lane.b32.xlu0 %v10806_v17, %s10605_s26  ;;  %v1730_v52 = vsel %vm1707_vm4, %v10914_v1, %v10913_v57  ;;  %v10915_v2 = vld [vmem:[#allocation126_spill] sm:$0xff]  ;;  %10916 = vst [vmem:[#allocation111_spill] sm:$0xff] %v7700_v35  ;;  %v2837_v58 = vadd.f32 %v2805_v8, %v2574_v61  ;;  %v10918_v9 = vld [vmem:[#allocation32_spill] sm:$0xff]  ;;  %v10919_v61 = vld [vmem:[#allocation131_spill] sm:$0xff] }
 0x2b2   : > { %v1734_v11 = vsel %vm1707_vm4, %v10915_v2, %v10914_v1  ;;  %v3068_v7 = vmul.f32 %v10886_v0, %v3011_v3  ;;  %v1016_v51 = vmul.f32 %v6840_v36, %v939_v33  ;;  %v1278_v28 = vmul.f32 %v6848_v5, %v1200_v56  ;;  %v7709_v2 = vpop.permute.xlu0 %1683  ;;  %v10920_v3 = vld [vmem:[#allocation12_spill] sm:$0xff] }
 0x2b3   : > { %v1539_v40 = vmul.f32 %v10917_v10, %v1471_v13  ;;  %v1071_v17 = vmul.f32 %v10910_v15, %v1015_v4  ;;  %v1333_v16 = vmul.f32 %v10918_v9, %v1276_v18  ;;  %v1334_v43 = vmul.f32 %v10918_v9, %v1277_v45  ;;  %2867 = vrot.lane.b32.xlu1 %v6027_v42, %s10612_s23 }
 0x2b4   : > { %v1540_v54 = vmul.f32 %v10850_v27, %v1467_v34  ;;  %v3100_v8 = vadd.f32 %v3068_v7, %v2837_v58  ;;  %v1541_v33 = vmul.f32 %v6864_v44, %v1463_v22  ;;  %v1726_v56 = vsel %vm1707_vm4, %v10913_v57, %v10919_v61  ;;  %v7728_v34 = vpop.permute.xlu1 %1159  ;;  %v10926_v58 = vld [vmem:[#allocation140_spill] sm:$0xff] }
 0x2b5   : > { %v1802_v4 = vmul.f32 %v6868_v6, %v1734_v11  ;;  %v1803_v18 = vmul.f32 %v6882_v14, %v1730_v52  ;;  %1687 = vrot.lane.b32.xlu0 %v10849_v19, %s10598_s17  ;;  %v1365_v45 = vadd.f32 %v1333_v16, %v1070_v63  ;;  %v7722_v13 = vadd.f32 %v2281_v37, %v2050_v21  ;;  %v10923_v52 = vld [vmem:[#allocation34_spill] sm:$0xff]  ;;  %v10924_v63 = vld [vmem:[#allocation139_spill] sm:$0xff]  ;;  %v10931_v6 = vld [vmem:[#allocation132_spill] sm:$0xff] }
 0x2b6   : > { %v7726_v42 = vrot.slane %v10863_v29, %v10920_v3  ;;  %10921 = vst [vmem:[#allocation78_spill] sm:$0xff] %v7728_v34  ;;  %v7731_v22 = vadd.f32 %v7617_v62, %v3100_v8  ;;  %v1072_v57 = vmul.f32 %v10910_v15, %v1016_v51  ;;  %v1335_v1 = vmul.f32 %v10918_v9, %v1278_v28  ;;  %v10925_v37 = vld [vmem:[#allocation134_spill] sm:$0xff]  ;;  %v7745_v61 = vpop.permute.xlu0 %2094  ;;  %v10928_v51 = vld [vmem:[#allocation179_spill] sm:$0xff] }
 0x2b7   : > { %v1596_v11 = vmul.f32 %v10923_v52, %v1539_v40  ;;  %v1366_v7 = vadd.f32 %v1334_v43, %v1071_v17  ;;  %v1804_v16 = vmul.f32 %v10861_v50, %v1726_v56  ;;  %v1201_v21 = vsel %vm1181_vm1, %v10925_v37, %v10924_v63  ;;  %10927 = vst [vmem:[#allocation115_spill] sm:$0xff] %v7745_v61  ;;  %v10929_v40 = vld [vmem:[#allocation42_spill] sm:$0xff]  ;;  %v10936_v61 = vld [vmem:[#allocation61_spill] sm:$0xff] }
 0x2b8   : > { %10922 = vst [vmem:[#allocation118_spill] sm:$0xff] %v7731_v22  ;;  %v1205_v8 = vsel %vm1181_vm1, %v10926_v58, %v10925_v37  ;;  %900 = vrot.lane.b32.xlu1 %v10928_v51, %s10602_s19  ;;  %3370 = vmatmul.mubr.f32.gmra.mrb[18].mxu0 %v7731_v22  ;;  %v1597_v43 = vmul.f32 %v10923_v52, %v1540_v54  ;;  %v10930_v37 = vld [vmem:[#allocation137_spill] sm:$0xff]  ;;  %v10932_v58 = vld [vmem:[#allocation138_spill] sm:$0xff]  ;;  %v10933_v22 = vld [vmem:[#allocation151_spill] sm:$0xff] }
 0x2b9   : > { %v1598_v17 = vmul.f32 %v10923_v52, %v1541_v33  ;;  %v1859_v28 = vmul.f32 %v10929_v40, %v1802_v4  ;;  %v1860_v56 = vmul.f32 %v10929_v40, %v1803_v18  ;;  %2122 = vrot.lane.b32.xlu0 %v6737_v32, %s10597_s0  ;;  %v1628_v63 = vadd.f32 %v1596_v11, %v1365_v45  ;;  %v7768_v4 = vpop.permute.xlu1 %1675  ;;  %v10935_v52 = vld [vmem:[#allocation171_spill] sm:$0xff]  ;;  %v10993_v32 = vld [vmem:[#allocation150_spill] sm:$0xff] }
 0x2ba   : > { %v940_v10 = vsel %vm920_vm2, %v10931_v6, %v10930_v37  ;;  %v944_v54 = vsel %vm920_vm2, %v10932_v58, %v10931_v6  ;;  %v2150_v33 = vsel %vm2136_vm5, %v10865_v55, %v10933_v22  ;;  %10934 = vst [vmem:[#allocation129_spill] sm:$0xff] %v7768_v4  ;;  %v1629_v18 = vadd.f32 %v1597_v43, %v1366_v7  ;;  %v10937_v58 = vld [vmem:[#allocation14_spill] sm:$0xff]  ;;  %v7785_v7 = vpop.permute.xlu0 %2371  ;;  %v10958_v4 = vld [vmem:[#allocation196_spill] sm:$0xff] }
 0x2bb   : > { %v1286_v45 = vmul.f32 %v6848_v5, %v1201_v21  ;;  %v1285_v11 = vmul.f32 %v10898_v25, %v1205_v8  ;;  %v1194_v37 = vsel %vm1181_vm1, %v10936_v61, %v10935_v52  ;;  %v1367_v9 = vadd.f32 %v1335_v1, %v1072_v57  ;;  %10940 = vst [vmem:[#allocation119_spill] sm:$0xff] %v7785_v7  ;;  %v10941_v61 = vld [vmem:[#allocation81_spill] sm:$0xff] }
 0x2bc   : > { %v1861_v6 = vmul.f32 %v10929_v40, %v1804_v16  ;;  %v7779_v15 = vrot.slane %v10863_v29, %v10937_v58  ;;  %v7783_v55 = vrot.slane %v10890_v20, %v10920_v3  ;;  %1163 = vrot.lane.b32.xlu1 %v10928_v51, %s10623_s28  ;;  %v1024_v5 = vmul.f32 %v6840_v36, %v940_v10  ;;  %v10942_v1 = vld [vmem:[#allocation169_spill] sm:$0xff]  ;;  %v10943_v16 = vld [vmem:[#allocation59_spill] sm:$0xff] }
 0x2bd   : > { %v1023_v25 = vmul.f32 %v10903_v59, %v944_v54  ;;  %v2225_v57 = vmul.f32 %v10941_v61, %v2150_v33  ;;  %v933_v29 = vsel %vm920_vm2, %v10943_v16, %v10942_v1  ;;  %2638 = vrot.lane.b32.xlu0 %v10789_v23, %s10609_s27  ;;  %v1630_v21 = vadd.f32 %v1598_v17, %v1367_v9  ;;  %v7803_v36 = vpop.permute.xlu1 %2086  ;;  %v10946_v59 = vld [vmem:[#allocation36_spill] sm:$0xff]  ;;  %v10947_v40 = vld [vmem:[#allocation173_spill] sm:$0xff] }
 0x2be   : > { %10938 = vst [vmem:[#allocation114_spill] sm:$0xff] %v7779_v15  ;;  %10939 = vst [vmem:[#allocation200_spill] sm:$0xff] %v7783_v55  ;;  %v1891_v8 = vadd.f32 %v1859_v28, %v1628_v63  ;;  %v1263_v43 = vmul.f32 %v7556_v48, %v1194_v37  ;;  %v7801_v22 = vrot.slane %v10890_v20, %v10937_v58  ;;  %v10948_v16 = vld [vmem:[#allocation141_spill] sm:$0xff]  ;;  %v10950_v63 = vld [vmem:[#allocation90_spill] sm:$0xff]  ;;  %v7822_v37 = vpop.permute.xlu0 %2618 }
 0x2bf   : > { %10945 = vst [vmem:[#allocation117_spill] sm:$0xff] %v7803_v36  ;;  %v1892_v10 = vadd.f32 %v1860_v56, %v1629_v18  ;;  %v1343_v54 = vmul.f32 %v10946_v59, %v1286_v45  ;;  %v1342_v33 = vmul.f32 %v10946_v59, %v1285_v11  ;;  %v1468_v7 = vsel %vm1444_vm3, %v10948_v16, %v10947_v40  ;;  %v10951_v28 = vld [vmem:[#allocation160_spill] sm:$0xff]  ;;  %v10957_v59 = vld [vmem:[#allocation23_spill] sm:$0xff] }
 0x2c0   : > { %10944 = vst [vmem:[#allocation158_spill] sm:$0xff] %v7801_v22  ;;  %v7811_v9 = vadd.f32 %v1861_v6, %v1630_v21  ;;  %v1001_v17 = vmul.f32 %v10950_v63, %v933_v29  ;;  %v7816_v20 = vrot.slane %v10951_v28, %v10862_v30  ;;  %v7820_v56 = vrot.slane %v10951_v28, %v10889_v38  ;;  %v10954_v18 = vld [vmem:[#allocation128_spill] sm:$0xff]  ;;  %v10956_v29 = vld [vmem:[#allocation82_spill] sm:$0xff]  ;;  %v10991_v63 = vld [vmem:[#allocation191_spill] sm:$0xff] }
 0x2c1   : > { %10953 = vst [vmem:[#allocation185_spill] sm:$0xff] %v7822_v37  ;;  %1679 = vrot.lane.b32.xlu1 %v10954_v18, %s10598_s17  ;;  %v10955_v45 = vld [vmem:[#allocation40_spill] sm:$0xff]  ;;  %v2282_v21 = vmul.f32 %v10858_v41, %v2225_v57  ;;  %v1190_v36 = vsel %vm1181_vm1, %v10935_v52, %v10956_v29  ;;  %2891 = vrot.lane.b32.xlu0 %v10801_v46, %s10612_s23  ;;  %v7844_v57 = vpop.permute.xlu1 %2363 }
 0x2c2   : > { %10949 = vst [vmem:[#allocation20_spill] sm:$0xff] %v7811_v9  ;;  %10952 = vst [vmem:[#allocation194_spill] sm:$0xff] %v7816_v20  ;;  %v1080_v11 = vmul.f32 %v10955_v45, %v1024_v5  ;;  %v1079_v6 = vmul.f32 %v10955_v45, %v1023_v25  ;;  %v1320_v16 = vmul.f32 %v10957_v59, %v1263_v43  ;;  %v10959_v25 = vld [vmem:[#allocation201_spill] sm:$0xff] }
 0x2c3   : > { %v1548_v9 = vmul.f32 %v10850_v27, %v1468_v7  ;;  %v929_v5 = vsel %vm920_vm2, %v10942_v1, %v10958_v4  ;;  %v7842_v18 = vadd.f32 %v10959_v25, %v1891_v8  ;;  %10960 = vst [vmem:[#allocation125_spill] sm:$0xff] %v7844_v57  ;;  %v10961_v45 = vld [vmem:[#allocation53_spill] sm:$0xff]  ;;  %v7853_v46 = vrot.slane %v10951_v28, %v10920_v3  ;;  %v10965_v1 = vld [vmem:[#allocation218_spill] sm:$0xff] }
 0x2c4   : > { %v7846_v41 = vadd.f32 %v1343_v54, %v1080_v11  ;;  %v1374_v52 = vadd.f32 %v1342_v33, %v1079_v6  ;;  %v7849_v34 = vadd.f32 %v10961_v45, %v1892_v10  ;;  %v10964_v27 = vld [vmem:[#allocation21_spill] sm:$0xff]  ;;  %v1264_v43 = vmul.f32 %v7630_v53, %v1190_v36  ;;  %v2888_v33 = vpop.permute.xlu0 %2887  ;;  %v10967_v10 = vld [vmem:[#allocation148_spill] sm:$0xff] }
 0x2c5   : > { %10963 = vst [vmem:[#allocation63_spill] sm:$0xff] %v7853_v46  ;;  %v1057_v7 = vmul.f32 %v10964_v27, %v1001_v17  ;;  %v2417_v8 = vsel %vm2399_vm6, %v10845_v49, %v10965_v1  ;;  %v7863_v54 = vrot.slane %v10951_v28, %v10937_v58  ;;  %2114 = vrot.lane.b32.xlu1 %v10967_v10, %s10597_s0  ;;  %v10968_v17 = vld [vmem:[#allocation58_spill] sm:$0xff]  ;;  %v10969_v6 = vld [vmem:[#allocation164_spill] sm:$0xff]  ;;  %v10974_v53 = vld [vmem:[#allocation205_spill] sm:$0xff] }
 0x2c6   : > { %10962 = vst [vmem:[#allocation122_spill] sm:$0xff] %v7849_v34  ;;  %v2314_v45 = vadd.f32 %v2282_v21, %v7645_v47  ;;  %v1002_v11 = vmul.f32 %v7626_v24, %v929_v5  ;;  %v2413_v36 = vsel %vm2399_vm6, %v10965_v1, %v10968_v17  ;;  %v7875_v49 = vrot.slane %v10969_v6, %v10862_v30  ;;  %v10971_v28 = vld [vmem:[#allocation178_spill] sm:$0xff]  ;;  %v10973_v34 = vld [vmem:[#allocation41_spill] sm:$0xff]  ;;  %v7890_v5 = vpop.permute.xlu1 %2610 }
 0x2c7   : > { %10966 = vst [vmem:[#allocation124_spill] sm:$0xff] %v7863_v54  ;;  %908 = vrot.lane.b32.xlu0 %v10971_v28, %s10602_s19  ;;  %v7879_v25 = vadd.f32 %v1320_v16, %v1057_v7  ;;  %v1605_v57 = vmul.f32 %v10973_v34, %v1548_v9  ;;  %v1464_v47 = vsel %vm1444_vm3, %v10947_v40, %v10974_v53  ;;  %v10976_v1 = vld [vmem:[#allocation50_spill] sm:$0xff]  ;;  %v10979_v53 = vld [vmem:[#allocation213_spill] sm:$0xff] }
 0x2c8   : > { %10970 = vst [vmem:[#allocation54_spill] sm:$0xff] %v7875_v49  ;;  %v7888_v21 = vrot.slane %v10969_v6, %v10889_v38  ;;  %v2487_v17 = vmul.f32 %v10976_v1, %v2417_v8  ;;  %v10977_v49 = vld [vmem:[#allocation89_spill] sm:$0xff]  ;;  %v7903_v40 = vrot.slane %v10969_v6, %v10920_v3  ;;  %v1321_v7 = vmul.f32 %v10957_v59, %v1264_v43  ;;  %v10981_v1 = vld [vmem:[#allocation84_spill] sm:$0xff]  ;;  %v7911_v35 = vpop.permute.xlu0 %2078  ;;  %v10985_v3 = vld [vmem:[#allocation70_spill] sm:$0xff] }
 0x2c9   : > { %10972 = vst [vmem:[#allocation116_spill] sm:$0xff] %v7879_v25  ;;  %v2680_v16 = vsel %vm2662_vm7, %v7115_v31, %v10977_v49  ;;  %v2676_v9 = vsel %vm2662_vm7, %v10977_v49, %v7551_v60  ;;  %v2488_v24 = vmul.f32 %v10981_v1, %v2413_v36  ;;  %10982 = vst [vmem:[#allocation134_spill] sm:$0xff] %v7911_v35  ;;  %2391 = vrot.lane.b32.xlu1 %v10867_v12, %s10606_s16  ;;  %v10984_v60 = vld [vmem:[#allocation144_spill] sm:$0xff]  ;;  %v10992_v38 = vld [vmem:[#allocation43_spill] sm:$0xff] }
 0x2ca   : > { %10975 = vst [vmem:[#allocation130_spill] sm:$0xff] %v7888_v21  ;;  %10978 = vst [vmem:[#allocation126_spill] sm:$0xff] %v7903_v40  ;;  %v10980_v21 = vld [vmem:[#allocation199_spill] sm:$0xff]  ;;  %v7917_v31 = vrot.slane %v10969_v6, %v10937_v58  ;;  %v1058_v49 = vmul.f32 %v10964_v27, %v1002_v11  ;;  %v1549_v43 = vmul.f32 %v6864_v44, %v1464_v47  ;;  %v10986_v35 = vld [vmem:[#allocation172_spill] sm:$0xff]  ;;  %v7940_v48 = vpop.permute.xlu1 %2794 }
 0x2cb   : > { %v2159_v8 = vsel %vm2136_vm5, %v10980_v21, %v10979_v53  ;;  %v1182_v23 = vsel %vm1181_vm1, %v10985_v3, %v10984_v60  ;;  %v2943_v36 = vsel %vm2925_vm8, %v7585_v39, %v2888_v33  ;;  %1418 = vrot.lane.b32.xlu0 %v10986_v35, %s10605_s26  ;;  %v1186_v6 = vsel %vm1181_vm1, %v10956_v29, %v10985_v3  ;;  %v10987_v11 = vld [vmem:[#allocation86_spill] sm:$0xff]  ;;  %v10988_v47 = vld [vmem:[#allocation60_spill] sm:$0xff]  ;;  %v10989_v60 = vld [vmem:[#allocation79_spill] sm:$0xff] }
 0x2cc   : > { %10983 = vst [vmem:[#allocation132_spill] sm:$0xff] %v7917_v31  ;;  %v925_v44 = vsel %vm920_vm2, %v10958_v4, %v10987_v11  ;;  %v2750_v58 = vmul.f32 %v10988_v47, %v2680_v16  ;;  %v2751_v1 = vmul.f32 %v10989_v60, %v2676_v9  ;;  %10990 = vst [vmem:[#allocation171_spill] sm:$0xff] %v7940_v48  ;;  %v10994_v16 = vld [vmem:[#allocation155_spill] sm:$0xff]  ;;  %v10995_v47 = vld [vmem:[#allocation202_spill] sm:$0xff]  ;;  %v7958_v48 = vpop.permute.xlu0 %904 }
 0x2cd   : > { %v7942_v39 = vadd.f32 %v1605_v57, %v1374_v52  ;;  %v2231_v25 = vmul.f32 %v10991_v63, %v2159_v8  ;;  %v2544_v19 = vmul.f32 %v10992_v38, %v2487_v17  ;;  %v921_v3 = vsel %vm920_vm2, %v10987_v11, %v10993_v32  ;;  %v10996_v57 = vld [vmem:[#allocation76_spill] sm:$0xff]  ;;  %v10997_v17 = vld [vmem:[#allocation121_spill] sm:$0xff]  ;;  %v10999_v11 = vld [vmem:[#allocation174_spill] sm:$0xff] }
 0x2ce   : > { %v7950_v29 = vadd.f32 %v1321_v7, %v1058_v49  ;;  %v2545_v4 = vmul.f32 %v10992_v38, %v2488_v24  ;;  %v1449_v9 = vsel %vm1444_vm3, %v10995_v47, %v10994_v16  ;;  %v3013_v52 = vmul.f32 %v10996_v57, %v2943_v36  ;;  %2646 = vrot.lane.b32.xlu1 %v10997_v17, %s10609_s27  ;;  %v10998_v49 = vld [vmem:[#allocation146_spill] sm:$0xff]  ;;  %v11000_v63 = vld [vmem:[#allocation47_spill] sm:$0xff] }
 0x2cf   : > { %v1265_v8 = vmul.f32 %v7726_v42, %v1186_v6  ;;  %v1266_v32 = vmul.f32 %v7779_v15, %v1182_v23  ;;  %v1003_v7 = vmul.f32 %v7783_v55, %v925_v44  ;;  %v1445_v24 = vsel %vm1444_vm3, %v10994_v16, %v10998_v49  ;;  %1695 = vrot.lane.b32.xlu0 %v10999_v11, %s10598_s17  ;;  %v7977_v23 = vpop.permute.xlu1 %2895  ;;  %v11002_v44 = vld [vmem:[#allocation46_spill] sm:$0xff] }
 0x2d0   : > { %v7972_v36 = vmul.f32 %v10973_v34, %v1549_v43  ;;  %v1004_v38 = vmul.f32 %v7801_v22, %v921_v3  ;;  %v2807_v57 = vmul.f32 %v11000_v63, %v2750_v58  ;;  %v2808_v6 = vmul.f32 %v11000_v63, %v2751_v1  ;;  %11001 = vst [vmem:[#allocation61_spill] sm:$0xff] %v7977_v23  ;;  %v11003_v58 = vld [vmem:[#allocation83_spill] sm:$0xff]  ;;  %v7988_v1 = vpop.permute.xlu0 %1414 }
 0x2d1   : > { %v2288_v60 = vmul.f32 %v11002_v44, %v2231_v25  ;;  %v2576_v15 = vadd.f32 %v2544_v19, %v7722_v13  ;;  %v1528_v16 = vmul.f32 %v7853_v46, %v1449_v9  ;;  %v2939_v49 = vsel %vm2925_vm8, %v2888_v33, %v7977_v23  ;;  %v11004_v25 = vld [vmem:[#allocation75_spill] sm:$0xff] }
 0x2d2   : > { %v2577_v43 = vadd.f32 %v2545_v4, %v2314_v45  ;;  %v1529_v34 = vmul.f32 %v7863_v54, %v1445_v24  ;;  %v3070_v3 = vmul.f32 %v10886_v0, %v3013_v52  ;;  %v3014_v11 = vmul.f32 %v11003_v58, %v2939_v49  ;;  %2899 = vrot.lane.b32.xlu1 %v10986_v35, %s10612_s23  ;;  %v3237_v49 = vld [vmem:[%s9998_s5 + $0x208] sm:$0xff]  ;;  %v11009_v58 = vld [vmem:[#allocation149_spill] sm:$0xff] }
 0x2d3   : > { %v1322_v19 = vmul.f32 %v10957_v59, %v1265_v8  ;;  %v1323_v13 = vmul.f32 %v10957_v59, %v1266_v32  ;;  %v2163_v33 = vsel %vm2136_vm5, %v11004_v25, %v10980_v21  ;;  %v1059_v45 = vmul.f32 %v10964_v27, %v1003_v7  ;;  %2377 = vrot.lane.b32.xlu0 %v10967_v10, %s10606_s16  ;;  %v8003_v52 = vpop.permute.xlu1 %2602  ;;  %v3252_v59 = vld [vmem:[%s9998_s5 + $0x280] sm:$0xff]  ;;  %v3253_v21 = vld [vmem:[%s9998_s5 + $0x288] sm:$0xff]  ;;  %v11007_v7 = vld [vmem:[#allocation66_spill] sm:$0xff] }
 0x2d4   : > { %v1060_v4 = vmul.f32 %v10964_v27, %v1004_v38  ;;  %v3071_v9 = vmul.f32 %v10886_v0, %v3014_v11  ;;  %11005 = vst [vmem:[#allocation169_spill] sm:$0xff] %v8003_v52  ;;  %v2840_v24 = vadd.f32 %v2808_v6, %v2577_v43  ;;  %v2839_v8 = vadd.f32 %v2807_v57, %v2576_v15  ;;  %v3236_v32 = vld [vmem:[%s9998_s5 + $0x200] sm:$0xff]  ;;  %v11006_v38 = vld [vmem:[#allocation88_spill] sm:$0xff]  ;;  %v11008_v57 = vld [vmem:[#allocation22_spill] sm:$0xff]  ;;  %v1692_v0 = vpop.permute.xlu0 %1691 }
 0x2d5   : > { %v1453_v27 = vsel %vm1444_vm3, %v11006_v38, %v10995_v47  ;;  %v1457_v15 = vsel %vm1444_vm3, %v11007_v7, %v11006_v38  ;;  %v1585_v11 = vmul.f32 %v11008_v57, %v1528_v16  ;;  %v5139_v6 = vpack.c.bf16 %v3253_v21, %v3252_v59  ;;  %v11010_v59 = vld [vmem:[#allocation85_spill] sm:$0xff]  ;;  %v11011_v21 = vld [vmem:[#allocation103_spill] sm:$0xff] }
 0x2d6   : > { %v1586_v43 = vmul.f32 %v11008_v57, %v1529_v34  ;;  %1171 = vrot.lane.b32.xlu1 %v10971_v28, %s10623_s28  ;;  %v3103_v23 = vadd.f32 %v3071_v9, %v2840_v24  ;;  %v3102_v47 = vadd.f32 %v3070_v3, %v2839_v8  ;;  %v5141_v25 = vpack.c.bf16 %v3237_v49, %v3236_v32  ;;  %s11351_s28 = sld [smem:[#allocation222_spill]] }
 0x2d7   : > { %v1354_v63 = vadd.f32 %v1322_v19, %v1059_v45  ;;  %v1708_v38 = vsel %vm1707_vm4, %v1692_v0, %v11009_v58  ;;  %v1712_v16 = vsel %vm1707_vm4, %v7709_v2, %v1692_v0  ;;  %2654 = vrot.lane.b32.xlu0 %v10867_v12, %s10609_s27  ;;  %5140 = vmatprep.subr.bf16.mxu0 %v5139_v6  ;;  %v8043_v9 = vpop.permute.xlu1 %1167  ;;  %v3254_v0 = vld [vmem:[%s9998_s5 + $0x290] sm:$0xff]  ;;  %v3255_v58 = vld [vmem:[%s9998_s5 + $0x298] sm:$0xff] }
 0x2d8   : > { %v1355_v34 = vadd.f32 %v1323_v13, %v1060_v4  ;;  %v1727_v3 = vsel %vm1707_vm4, %v11011_v21, %v11010_v59  ;;  %v1791_v19 = vmul.f32 %v7903_v40, %v1712_v16  ;;  %v1792_v45 = vmul.f32 %v7917_v31, %v1708_v38  ;;  %5142 = vmatpush3.bf16.msra.mxu0 %v5141_v25  ;;  %v11012_v13 = vld [vmem:[#allocation211_spill] sm:$0xff]  ;;  %v11014_v25 = vld [vmem:[#allocation25_spill] sm:$0xff]  ;;  %v8060_v38 = vpop.permute.xlu0 %2110 }
 0x2d9   : > { %v1731_v4 = vsel %vm1707_vm4, %v11012_v13, %v11011_v21  ;;  %v1617_v24 = vadd.f32 %v1585_v11, %v1354_v63  ;;  %v8056_v8 = vadd.f32 %v7617_v62, %v3103_v23  ;;  %v5143_v32 = vpack.c.bf16 %v3255_v58, %v3254_v0  ;;  %11015 = vst [vmem:[#allocation173_spill] sm:$0xff] %v8060_v38  ;;  %v3238_v63 = vld [vmem:[%s9998_s5 + $0x210] sm:$0xff]  ;;  %v3239_v23 = vld [vmem:[%s9998_s5 + $0x218] sm:$0xff] }
 0x2da   : > { %v1618_v7 = vadd.f32 %v1586_v43, %v1355_v34  ;;  %v1848_v6 = vmul.f32 %v11014_v25, %v1791_v19  ;;  %v1849_v49 = vmul.f32 %v11014_v25, %v1792_v45  ;;  %1426 = vrot.lane.b32.xlu1 %v10928_v51, %s10605_s26  ;;  %v8065_v16 = vadd.f32 %v7617_v62, %v3102_v47  ;;  %v11017_v34 = vld [vmem:[#allocation190_spill] sm:$0xff]  ;;  %v11029_v62 = vld [vmem:[#allocation45_spill] sm:$0xff] }
 0x2db   : > { %11013 = vst [vmem:[#allocation59_spill] sm:$0xff] %v8056_v8  ;;  %v8075_v11 = vadd.f32 %v7972_v36, %v7846_v41  ;;  %v8078_v43 = vadd.f32 %v2288_v60, %v7842_v18  ;;  %2909 = vrot.lane.b32.xlu0 %v10997_v17, %s10612_s23  ;;  %3454 = vmatprep.mubr.f32.mxu1 %v8056_v8  ;;  %v8086_v58 = vpop.permute.xlu1 %1422  ;;  %v11018_v17 = vld [vmem:[#allocation57_spill] sm:$0xff] }
 0x2dc   : > { %11016 = vst [vmem:[#allocation160_spill] sm:$0xff] %v8065_v16  ;;  %v5145_v47 = vpack.c.bf16 %v3239_v23, %v3238_v63  ;;  %v2230_v21 = vmul.f32 %v11017_v34, %v2163_v33  ;;  %v1811_v19 = vmul.f32 %v6882_v14, %v1731_v4  ;;  %v1880_v45 = vadd.f32 %v1848_v6, %v1617_v24  ;;  %v11019_v36 = vld [vmem:[#allocation69_spill] sm:$0xff]  ;;  %v3256_v14 = vld [vmem:[%s9998_s5 + $0x2a0] sm:$0xff]  ;;  %v3257_v33 = vld [vmem:[%s9998_s5 + $0x2a8] sm:$0xff] }
 0x2dd   : > { %v1881_v0 = vadd.f32 %v1849_v49, %v1618_v7  ;;  %3455 = vmatmul.mubr.f32.gmra.mrb[18].mxu1 %v8065_v16  ;;  %v1526_v41 = vmul.f32 %v7816_v20, %v1457_v15  ;;  %v1527_v18 = vmul.f32 %v7820_v56, %v1453_v27  ;;  %v1812_v60 = vmul.f32 %v10861_v50, %v1727_v3  ;;  %v11020_v50 = vld [vmem:[#allocation101_spill] sm:$0xff]  ;;  %v11024_v7 = vld [vmem:[#allocation87_spill] sm:$0xff]  ;;  %v11025_v6 = vld [vmem:[#allocation64_spill] sm:$0xff] }
 0x2de   : > { %v2151_v63 = vsel %vm2136_vm5, %v11019_v36, %v11018_v17  ;;  %5144 = vmatprep.subr.bf16.mxu0 %v5143_v32  ;;  %v2155_v27 = vsel %vm2136_vm5, %v10979_v53, %v11019_v36  ;;  %v11021_v15 = vld [vmem:[#allocation197_spill] sm:$0xff]  ;;  %v8113_v32 = vpop.permute.xlu0 %2357  ;;  %2130 = vrot.lane.b32.xlu1 %v11024_v7, %s10597_s0  ;;  %v8118_v49 = vadd.f32 %v11025_v6, %v1880_v45  ;;  %v3240_v53 = vld [vmem:[%s9998_s5 + $0x220] sm:$0xff]  ;;  %v3241_v23 = vld [vmem:[%s9998_s5 + $0x228] sm:$0xff] }
 0x2df   : > { %v2422_v3 = vsel %vm2399_vm6, %v11021_v15, %v11020_v50  ;;  %v11022_v4 = vld [vmem:[#allocation97_spill] sm:$0xff]  ;;  %11023 = vst [vmem:[#allocation82_spill] sm:$0xff] %v8113_v32  ;;  %1681 = vrot.lane.b32.xlu0 %v10986_v35, %s10598_s17  ;;  %5146 = vmatpush3.bf16.msra.mxu0 %v5145_v47  ;;  %v5147_v45 = vpack.c.bf16 %v3257_v33, %v3256_v14  ;;  %v3259_v16 = vld [vmem:[%s9998_s5 + $0x2b8] sm:$0xff]  ;;  %v8139_v59 = vpop.permute.xlu1 %2102  ;;  %v11032_v14 = vld [vmem:[#allocation195_spill] sm:$0xff] }
 0x2e0   : > { %v2426_v24 = vsel %vm2399_vm6, %v11022_v4, %v11021_v15  ;;  %11026 = vst [vmem:[#allocation23_spill] sm:$0xff] %v8118_v49  ;;  %v3258_v36 = vld [vmem:[%s9998_s5 + $0x2b0] sm:$0xff]  ;;  %v11027_v15 = vld [vmem:[#allocation56_spill] sm:$0xff]  ;;  %v5149_v6 = vpack.c.bf16 %v3241_v23, %v3240_v53  ;;  %v2287_v4 = vmul.f32 %v11002_v44, %v2230_v21  ;;  %v1868_v17 = vmul.f32 %v11029_v62, %v1811_v19  ;;  %v11033_v53 = vld [vmem:[#allocation19_spill] sm:$0xff] }
 0x2e1   : > { %v8132_v8 = vadd.f32 %v11027_v15, %v1881_v0  ;;  %v11030_v49 = vld [vmem:[#allocation180_spill] sm:$0xff]  ;;  %v5151_v35 = vpack.c.bf16 %v3259_v16, %v3258_v36  ;;  %v1583_v0 = vmul.f32 %v11008_v57, %v1526_v41  ;;  %v1584_v47 = vmul.f32 %v11008_v57, %v1527_v18  ;;  %5148 = vmatprep.subr.bf16.mxu0 %v5147_v45  ;;  %v11036_v57 = vld [vmem:[#allocation167_spill] sm:$0xff]  ;;  %v3242_v41 = vld [vmem:[%s9998_s5 + $0x230] sm:$0xff] }
 0x2e2   : > { %v8143_v34 = vrot.slane %v11030_v49, %v10862_v30  ;;  %v2494_v33 = vmul.f32 %v11032_v14, %v2422_v3  ;;  %v2685_v21 = vsel %vm2662_vm7, %v7890_v5, %v7822_v37  ;;  %v1869_v19 = vmul.f32 %v11029_v62, %v1812_v60  ;;  %v8156_v36 = vpop.permute.xlu0 %2634  ;;  %2385 = vrot.lane.b32.xlu1 %v11036_v57, %s10606_s16  ;;  %v3243_v18 = vld [vmem:[%s9998_s5 + $0x238] sm:$0xff]  ;;  %v11037_v60 = vld [vmem:[#allocation100_spill] sm:$0xff]  ;;  %v11038_v3 = vld [vmem:[#allocation105_spill] sm:$0xff] }
 0x2e3   : > { %11028 = vst [vmem:[#allocation196_spill] sm:$0xff] %v8132_v8  ;;  %v2232_v23 = vmul.f32 %v11033_v53, %v2155_v27  ;;  %v2233_v15 = vmul.f32 %v10941_v61, %v2151_v63  ;;  %v11034_v8 = vld [vmem:[#allocation192_spill] sm:$0xff]  ;;  %11035 = vst [vmem:[#allocation53_spill] sm:$0xff] %v8156_v36  ;;  %v934_v63 = vsel %vm920_vm2, %v11038_v3, %v11037_v60  ;;  %v11039_v27 = vld [vmem:[#allocation182_spill] sm:$0xff]  ;;  %5150 = vmatpush3.bf16.msra.mxu0 %v5149_v6  ;;  %v8179_v32 = vpop.permute.xlu1 %2349 }
 0x2e4   : > { %11031 = vst [vmem:[#allocation201_spill] sm:$0xff] %v8143_v34  ;;  %v2493_v16 = vmul.f32 %v11034_v8, %v2426_v24  ;;  %v11040_v24 = vld [vmem:[#allocation108_spill] sm:$0xff]  ;;  %v11041_v8 = vld [vmem:[#allocation175_spill] sm:$0xff]  ;;  %v5153_v14 = vpack.c.bf16 %v3243_v18, %v3242_v41  ;;  %v11042_v62 = vld [vmem:[#allocation170_spill] sm:$0xff]  ;;  %v1900_v40 = vadd.f32 %v1868_v17, %v7942_v39  ;;  %5152 = vmatprep.subr.bf16.mxu0 %v5151_v35 }
 0x2e5   : > { %v1195_v45 = vsel %vm1181_vm1, %v11040_v24, %v11039_v27  ;;  %2116 = vrot.lane.b32.xlu0 %v11041_v8, %s10597_s0  ;;  %v2319_v31 = vadd.f32 %v2287_v4, %v11042_v62  ;;  %v11043_v30 = vld [vmem:[#allocation215_spill] sm:$0xff]  ;;  %11044 = vst [vmem:[#allocation21_spill] sm:$0xff] %v8179_v32  ;;  %v11045_v37 = vld [vmem:[#allocation13_spill] sm:$0xff]  ;;  %v3261_v6 = vld [vmem:[%s9998_s5 + $0x2c8] sm:$0xff]  ;;  %v8195_v39 = vadd.f32 %v1584_v47, %v7950_v29 }
 0x2e6   : > { %v2757_v13 = vmul.f32 %v11043_v30, %v2685_v21  ;;  %v8183_v3 = vrot.slane %v11030_v49, %v11045_v37  ;;  %v3260_v24 = vld [vmem:[%s9998_s5 + $0x2c0] sm:$0xff]  ;;  %v11047_v62 = vld [vmem:[#allocation116_spill] sm:$0xff]  ;;  %v11048_v17 = vld [vmem:[#allocation49_spill] sm:$0xff]  ;;  %v8199_v18 = vadd.f32 %v1869_v19, %v8075_v11  ;;  %v8204_v36 = vpop.permute.xlu0 %2881  ;;  %v8215_v47 = vmul.f32 %v11002_v44, %v2232_v23 }
 0x2e7   : > { %v8192_v4 = vadd.f32 %v1583_v0, %v11047_v62  ;;  %v2551_v21 = vmul.f32 %v11048_v17, %v2494_v33  ;;  %v5155_v41 = vpack.c.bf16 %v3261_v6, %v3260_v24  ;;  %v2550_v35 = vmul.f32 %v11048_v17, %v2493_v16  ;;  %v11049_v30 = vld [vmem:[#allocation90_spill] sm:$0xff]  ;;  %v11050_v37 = vld [vmem:[#allocation91_spill] sm:$0xff]  ;;  %11051 = vst [vmem:[#allocation148_spill] sm:$0xff] %v8204_v36  ;;  %v3245_v11 = vld [vmem:[%s9998_s5 + $0x248] sm:$0xff] }
 0x2e8   : > { %11046 = vst [vmem:[#allocation218_spill] sm:$0xff] %v8183_v3  ;;  %v1009_v32 = vmul.f32 %v11049_v30, %v934_v63  ;;  %v1271_v49 = vmul.f32 %v11050_v37, %v1195_v45  ;;  %v11052_v0 = vld [vmem:[#allocation107_spill] sm:$0xff]  ;;  %11053 = vst [vmem:[#allocation164_spill] sm:$0xff] %v8215_v47  ;;  %v8218_v33 = vmul.f32 %v11002_v44, %v2233_v15  ;;  %5154 = vmatpush3.bf16.msra.mxu0 %v5153_v14  ;;  %v11056_v45 = vld [vmem:[#allocation78_spill] sm:$0xff] }
 0x2e9   : > { %2901 = vrot.lane.b32.xlu1 %v11052_v0, %s10612_s23  ;;  %v3244_v29 = vld [vmem:[%s9998_s5 + $0x240] sm:$0xff]  ;;  %2393 = vrot.lane.b32.xlu0 %v11024_v7, %s10606_s16  ;;  %v1191_v24 = vsel %vm1181_vm1, %v11039_v27, %v11056_v45  ;;  %v11057_v23 = vld [vmem:[#allocation162_spill] sm:$0xff]  ;;  %v8234_v0 = vpop.permute.xlu1 %2626  ;;  %v3262_v14 = vld [vmem:[%s9998_s5 + $0x2d0] sm:$0xff] }
 0x2ea   : > { %11054 = vst [vmem:[#allocation89_spill] sm:$0xff] %v8218_v33  ;;  %v5157_v19 = vpack.c.bf16 %v3245_v11, %v3244_v29  ;;  %v11055_v16 = vld [vmem:[#allocation111_spill] sm:$0xff]  ;;  %v2814_v6 = vmul.f32 %v11057_v23, %v2757_v13  ;;  %11060 = vst [vmem:[#allocation199_spill] sm:$0xff] %v8234_v0  ;;  %5156 = vmatprep.subr.bf16.mxu0 %v5155_v41  ;;  %v2583_v13 = vadd.f32 %v2551_v21, %v8078_v43  ;;  %v11062_v41 = vld [vmem:[#allocation72_spill] sm:$0xff] }
 0x2eb   : > { %v930_v63 = vsel %vm920_vm2, %v11037_v60, %v11055_v16  ;;  %v11058_v62 = vld [vmem:[#allocation203_spill] sm:$0xff]  ;;  %v3263_v60 = vld [vmem:[%s9998_s5 + $0x2d8] sm:$0xff]  ;;  %v3285_v44 = vld [vmem:[%s9998_s5 + $0x388] sm:$0xff]  ;;  %v8263_v21 = vadd.f32 %v2550_v35, %v2319_v31 }
 0x2ec   : > { %v8232_v15 = vadd.f32 %v11058_v62, %v1900_v40  ;;  %v3284_v27 = vld [vmem:[%s9998_s5 + $0x380] sm:$0xff]  ;;  %v11061_v40 = vld [vmem:[#allocation129_spill] sm:$0xff]  ;;  %v5159_v62 = vpack.c.bf16 %v3263_v60, %v3262_v14  ;;  %v3269_v43 = vld [vmem:[%s9998_s5 + $0x308] sm:$0xff]  ;;  %v8271_v14 = vpop.permute.xlu0 %3133  ;;  %5158 = vmatpush3.bf16.msra.mxu0 %v5157_v19 }
 0x2ed   : > { %v1716_v29 = vsel %vm1707_vm4, %v11061_v40, %v7709_v2  ;;  %v1720_v11 = vsel %vm1707_vm4, %v11062_v41, %v11061_v40  ;;  %v3268_v33 = vld [vmem:[%s9998_s5 + $0x300] sm:$0xff]  ;;  %v11064_v17 = vld [vmem:[#allocation33_spill] sm:$0xff]  ;;  %11065 = vst [vmem:[#allocation144_spill] sm:$0xff] %v8271_v14  ;;  %1434 = vrot.lane.b32.xlu1 %v10971_v28, %s10605_s26  ;;  %v5171_v60 = vpack.c.bf16 %v3285_v44, %v3284_v27  ;;  %v11069_v35 = vld [vmem:[#allocation130_spill] sm:$0xff]  ;;  %v8289_v61 = vpop.permute.xlu1 %2873 }
 0x2ee   : > { %11059 = vst [vmem:[#allocation213_spill] sm:$0xff] %v8232_v15  ;;  %v11063_v2 = vld [vmem:[#allocation31_spill] sm:$0xff]  ;;  %v8269_v40 = vmul.f32 %v11064_v17, %v1271_v49  ;;  %v11067_v0 = vld [vmem:[#allocation113_spill] sm:$0xff]  ;;  %2648 = vrot.lane.b32.xlu0 %v11036_v57, %s10609_s27  ;;  %v5173_v31 = vpack.c.bf16 %v3269_v43, %v3268_v33  ;;  %v8287_v34 = vmul.f32 %v11069_v35, %v1716_v29  ;;  %v3247_v19 = vld [vmem:[%s9998_s5 + $0x258] sm:$0xff] }
 0x2ef   : > { %v8266_v47 = vmul.f32 %v11063_v2, %v1009_v32  ;;  %v11066_v41 = vld [vmem:[#allocation99_spill] sm:$0xff]  ;;  %v8279_v3 = vmul.f32 %v11067_v0, %v1191_v24  ;;  %v11068_v32 = vld [vmem:[#allocation54_spill] sm:$0xff]  ;;  %v2846_v44 = vadd.f32 %v2814_v6, %v2583_v13  ;;  %5160 = vmatprep.subr.bf16.mxu0 %v5159_v62  ;;  %5172 = vmatprep.subr.bf16.mxu1 %v5171_v60  ;;  %v11070_v33 = vld [vmem:[#allocation152_spill] sm:$0xff] }
 0x2f0   : > { %v8276_v15 = vmul.f32 %v11066_v41, %v930_v63  ;;  %v8284_v49 = vmul.f32 %v11068_v32, %v1720_v11  ;;  %v3246_v63 = vld [vmem:[%s9998_s5 + $0x250] sm:$0xff]  ;;  %v922_v24 = vsel %vm920_vm2, %v7958_v48, %v11070_v33  ;;  %v926_v6 = vsel %vm920_vm2, %v11055_v16, %v7958_v48  ;;  %5174 = vmatpush3.bf16.msra.mxu1 %v5173_v31  ;;  %v3264_v29 = vld [vmem:[%s9998_s5 + $0x2e0] sm:$0xff]  ;;  %v3265_v11 = vld [vmem:[%s9998_s5 + $0x2e8] sm:$0xff] }
 0x2f1   : > { %v2948_v27 = vsel %vm2925_vm8, %v8289_v61, %v8204_v36  ;;  %v5161_v13 = vpack.c.bf16 %v3247_v19, %v3246_v63  ;;  %v3286_v62 = vld [vmem:[%s9998_s5 + $0x390] sm:$0xff]  ;;  %v1187_v43 = vsel %vm1181_vm1, %v11056_v45, %v8043_v9  ;;  %v11072_v60 = vld [vmem:[#allocation74_spill] sm:$0xff]  ;;  %v8327_v63 = vpop.permute.xlu0 %890  ;;  %1689 = vrot.lane.b32.xlu1 %v10928_v51, %s10598_s17  ;;  %v5163_v19 = vpack.c.bf16 %v3265_v11, %v3264_v29  ;;  %v11073_v45 = vld [vmem:[#allocation120_spill] sm:$0xff] }
 0x2f2   : > { %v11071_v48 = vld [vmem:[#allocation153_spill] sm:$0xff]  ;;  %v3020_v31 = vmul.f32 %v11072_v60, %v2948_v27  ;;  %v3287_v33 = vld [vmem:[%s9998_s5 + $0x398] sm:$0xff]  ;;  %v935_v27 = vsel %vm920_vm2, %v11073_v45, %v8327_v63  ;;  %1697 = vrot.lane.b32.xlu0 %v10971_v28, %s10598_s17  ;;  %v3248_v60 = vld [vmem:[%s9998_s5 + $0x260] sm:$0xff]  ;;  %v1011_v45 = vmul.f32 %v7783_v55, %v926_v6 }
 0x2f3   : > { %v1183_v16 = vsel %vm1181_vm1, %v8043_v9, %v11071_v48  ;;  %v3270_v48 = vld [vmem:[%s9998_s5 + $0x310] sm:$0xff]  ;;  %v3271_v9 = vld [vmem:[%s9998_s5 + $0x318] sm:$0xff]  ;;  %5162 = vmatpush3.bf16.msra.mxu0 %v5161_v13  ;;  %v5175_v29 = vpack.c.bf16 %v3287_v33, %v3286_v62  ;;  %v3249_v36 = vld [vmem:[%s9998_s5 + $0x268] sm:$0xff]  ;;  %v2689_v13 = vsel %vm2662_vm7, %v8003_v52, %v7890_v5  ;;  %v1012_v5 = vmul.f32 %v7801_v22, %v922_v24 }
 0x2f4   : > { %v5177_v11 = vpack.c.bf16 %v3271_v9, %v3270_v48  ;;  %v3266_v51 = vld [vmem:[%s9998_s5 + $0x2f0] sm:$0xff]  ;;  %v11074_v62 = vld [vmem:[#allocation110_spill] sm:$0xff]  ;;  %v8361_v48 = vpop.permute.xlu1 %3057  ;;  %5164 = vmatprep.subr.bf16.mxu0 %v5163_v19  ;;  %v5165_v9 = vpack.c.bf16 %v3249_v36, %v3248_v60  ;;  %v3288_v32 = vld [vmem:[%s9998_s5 + $0x3a0] sm:$0xff]  ;;  %v1017_v53 = vmul.f32 %v11049_v30, %v935_v27 }
 0x2f5   : > { %v3077_v33 = vmul.f32 %v11074_v62, %v3020_v31  ;;  %11075 = vst [vmem:[#allocation70_spill] sm:$0xff] %v8361_v48  ;;  %v3267_v35 = vld [vmem:[%s9998_s5 + $0x2f8] sm:$0xff]  ;;  %v3289_v6 = vld [vmem:[%s9998_s5 + $0x3a8] sm:$0xff]  ;;  %v1273_v31 = vmul.f32 %v7726_v42, %v1187_v43  ;;  %5176 = vmatprep.subr.bf16.mxu1 %v5175_v29  ;;  %v3272_v36 = vld [vmem:[%s9998_s5 + $0x320] sm:$0xff]  ;;  %v8382_v50 = vpop.permute.xlu0 %1153 }
 0x2f6   : > { %v5167_v52 = vpack.c.bf16 %v3267_v35, %v3266_v51  ;;  %v5179_v19 = vpack.c.bf16 %v3289_v6, %v3288_v32  ;;  %v3273_v60 = vld [vmem:[%s9998_s5 + $0x328] sm:$0xff]  ;;  %v11076_v48 = vld [vmem:[#allocation114_spill] sm:$0xff]  ;;  %5178 = vmatpush3.bf16.msra.mxu1 %v5177_v11  ;;  %v3250_v51 = vld [vmem:[%s9998_s5 + $0x270] sm:$0xff]  ;;  %2379 = vrot.lane.b32.xlu0 %v11041_v8, %s10606_s16 }
 0x2f7   : > { %v1274_v55 = vmul.f32 %v11076_v48, %v1183_v16  ;;  %v11077_v24 = vld [vmem:[#allocation174_spill] sm:$0xff]  ;;  %v3109_v43 = vadd.f32 %v3077_v33, %v2846_v44  ;;  %v11079_v16 = vld [vmem:[#allocation123_spill] sm:$0xff]  ;;  %5166 = vmatpush3.bf16.msra.mxu0 %v5165_v9  ;;  %v5181_v44 = vpack.c.bf16 %v3273_v60, %v3272_v36  ;;  %v3274_v9 = vld [vmem:[%s9998_s5 + $0x330] sm:$0xff]  ;;  %v1067_v36 = vmul.f32 %v11063_v2, %v1011_v45 }
 0x2f8   : > { %2124 = vrot.lane.b32.xlu1 %v11077_v24, %s10597_s0  ;;  %v3251_v32 = vld [vmem:[%s9998_s5 + $0x278] sm:$0xff]  ;;  %v1196_v27 = vsel %vm1181_vm1, %v11079_v16, %v8382_v50  ;;  %v8400_v33 = vpop.permute.xlu1 %2341  ;;  %5168 = vmatprep.subr.bf16.mxu0 %v5167_v52  ;;  %v1068_v60 = vmul.f32 %v11063_v2, %v1012_v5  ;;  %v1330_v52 = vmul.f32 %v11064_v17, %v1273_v31 }
 0x2f9   : > { %v11078_v35 = vld [vmem:[#allocation214_spill] sm:$0xff]  ;;  %v1279_v11 = vmul.f32 %v11050_v37, %v1196_v27  ;;  %11080 = vst [vmem:[#allocation86_spill] sm:$0xff] %v8400_v33  ;;  %v8403_v6 = vadd.f32 %v8271_v14, %v3109_v43  ;;  %5180 = vmatprep.subr.bf16.mxu1 %v5179_v19  ;;  %v11083_v37 = vld [vmem:[#allocation32_spill] sm:$0xff]  ;;  %v1431_v33 = vpop.permute.xlu0 %1430 }
 0x2fa   : > { %v2756_v29 = vmul.f32 %v11078_v35, %v2689_v13  ;;  %v5169_v13 = vpack.c.bf16 %v3251_v32, %v3250_v51  ;;  %v3290_v35 = vld [vmem:[%s9998_s5 + $0x3b0] sm:$0xff]  ;;  %v3291_v16 = vld [vmem:[%s9998_s5 + $0x3b8] sm:$0xff]  ;;  %v1331_v51 = vmul.f32 %v11064_v17, %v1274_v55  ;;  %v1450_v31 = vsel %vm1444_vm3, %v8086_v58, %v1431_v33  ;;  %2656 = vrot.lane.b32.xlu0 %v11024_v7, %s10609_s27 }
 0x2fb   : > { %11081 = vst [vmem:[#allocation150_spill] sm:$0xff] %v8403_v6  ;;  %v5183_v19 = vpack.c.bf16 %v3291_v16, %v3290_v35  ;;  %v3275_v43 = vld [vmem:[%s9998_s5 + $0x338] sm:$0xff]  ;;  %v1336_v30 = vmul.f32 %v11083_v37, %v1279_v11  ;;  %3374 = vmatprep.mubr.f32.mxu0 %v8403_v6  ;;  %5182 = vmatpush3.bf16.msra.mxu1 %v5181_v44  ;;  %v3293_v44 = vld [vmem:[%s9998_s5 + $0x3c8] sm:$0xff] }
 0x2fc   : > { %v11082_v32 = vld [vmem:[#allocation30_spill] sm:$0xff]  ;;  %2640 = vrot.lane.b32.xlu1 %v10967_v10, %s10609_s27  ;;  %v5185_v55 = vpack.c.bf16 %v3275_v43, %v3274_v9  ;;  %v1536_v11 = vmul.f32 %v7853_v46, %v1450_v31  ;;  %v8439_v6 = vpop.permute.xlu1 %2865  ;;  %5170 = vmatpush3.bf16.msra.mxu0 %v5169_v13  ;;  %v1362_v9 = vadd.f32 %v1330_v52, %v1067_v36  ;;  %v11087_v46 = vld [vmem:[#allocation216_spill] sm:$0xff] }
 0x2fd   : > { %v1073_v27 = vmul.f32 %v11082_v32, %v1017_v53  ;;  %v11084_v45 = vld [vmem:[#allocation154_spill] sm:$0xff]  ;;  %v2813_v53 = vmul.f32 %v11057_v23, %v2756_v29  ;;  %11085 = vst [vmem:[#allocation155_spill] sm:$0xff] %v8439_v6  ;;  %v1846_v29 = vmul.f32 %v11014_v25, %v8284_v49  ;;  %v2952_v13 = vsel %vm2925_vm8, %v8439_v6, %v8289_v61  ;;  %v8462_v49 = vpop.permute.xlu0 %1685  ;;  %v11088_v36 = vld [vmem:[#allocation104_spill] sm:$0xff] }
 0x2fe   : > { %v1446_v5 = vsel %vm1444_vm3, %v1431_v33, %v11084_v45  ;;  %v3292_v33 = vld [vmem:[%s9998_s5 + $0x3c0] sm:$0xff]  ;;  %5184 = vmatprep.subr.bf16.mxu1 %v5183_v19  ;;  %v1363_v45 = vadd.f32 %v1331_v51, %v1068_v60  ;;  %v3019_v48 = vmul.f32 %v11087_v46, %v2952_v13  ;;  %v1329_v61 = vmul.f32 %v11064_v17, %v8279_v3 }
 0x2ff   : > { %v8435_v35 = vadd.f32 %v1336_v30, %v1073_v27  ;;  %v1537_v16 = vmul.f32 %v7863_v54, %v1446_v5  ;;  %v3276_v30 = vld [vmem:[%s9998_s5 + $0x340] sm:$0xff]  ;;  %v5187_v43 = vpack.c.bf16 %v3293_v44, %v3292_v33  ;;  %v3277_v27 = vld [vmem:[%s9998_s5 + $0x348] sm:$0xff]  ;;  %v1458_v52 = vsel %vm1444_vm3, %v11088_v36, %v7988_v1  ;;  %2911 = vrot.lane.b32.xlu0 %v11036_v57, %s10612_s23  ;;  %v3279_v33 = vld [vmem:[%s9998_s5 + $0x358] sm:$0xff] }
 0x300   : > { %v11086_v5 = vld [vmem:[#allocation35_spill] sm:$0xff]  ;;  %2917 = vrot.lane.b32.xlu1 %v10867_v12, %s10612_s23  ;;  %5186 = vmatpush3.bf16.msra.mxu1 %v5185_v55  ;;  %v5189_v60 = vpack.c.bf16 %v3277_v27, %v3276_v30  ;;  %v8479_v12 = vpop.permute.xlu1 %898  ;;  %v2845_v3 = vadd.f32 %v2813_v53, %v8263_v21  ;;  %v1847_v17 = vmul.f32 %v11014_v25, %v8287_v34  ;;  %v3294_v21 = vld [vmem:[%s9998_s5 + $0x3d0] sm:$0xff]  ;;  %v3295_v25 = vld [vmem:[%s9998_s5 + $0x3d8] sm:$0xff] }
 0x301   : > { %v1593_v31 = vmul.f32 %v11086_v5, %v1536_v11  ;;  %v1594_v54 = vmul.f32 %v11086_v5, %v1537_v16  ;;  %v3076_v11 = vmul.f32 %v11074_v62, %v3019_v48  ;;  %5188 = vmatprep.subr.bf16.mxu1 %v5187_v43  ;;  %v1878_v16 = vadd.f32 %v1846_v29, %v8192_v4  ;;  %v3278_v34 = vld [vmem:[%s9998_s5 + $0x350] sm:$0xff]  ;;  %v11090_v48 = vld [vmem:[#allocation92_spill] sm:$0xff]  ;;  %v3280_v43 = vld [vmem:[%s9998_s5 + $0x360] sm:$0xff] }
 0x302   : > { %v1454_v57 = vsel %vm1444_vm3, %v7988_v1, %v8086_v58  ;;  %v1066_v1 = vmul.f32 %v11063_v2, %v8276_v15  ;;  %v11089_v58 = vld [vmem:[#allocation204_spill] sm:$0xff]  ;;  %v5191_v53 = vpack.c.bf16 %v3295_v25, %v3294_v21  ;;  %v1360_v44 = vadd.f32 %v8269_v40, %v8266_v47  ;;  %v3296_v47 = vld [vmem:[%s9998_s5 + $0x3e0] sm:$0xff] }
 0x303   : > { %v8474_v19 = vadd.f32 %v1593_v31, %v1362_v9  ;;  %v8476_v51 = vadd.f32 %v1594_v54, %v1363_v45  ;;  %v931_v54 = vsel %vm920_vm2, %v8327_v63, %v8479_v12  ;;  %v8506_v4 = vadd.f32 %v11089_v58, %v8199_v18  ;;  %v8508_v63 = vpop.permute.xlu0 %2120  ;;  %2126 = vrot.lane.b32.xlu0 %v10971_v28, %s10597_s0  ;;  %v3297_v40 = vld [vmem:[%s9998_s5 + $0x3e8] sm:$0xff]  ;;  %v11092_v31 = vld [vmem:[#allocation206_spill] sm:$0xff] }
 0x304   : > { %2132 = vrot.lane.b32.xlu1 %v11090_v48, %s10597_s0  ;;  %v3108_v55 = vadd.f32 %v3076_v11, %v2845_v3  ;;  %v1534_v15 = vmul.f32 %v7816_v20, %v1458_v52  ;;  %5190 = vmatpush3.bf16.msra.mxu1 %v5189_v60  ;;  %v5193_v18 = vpack.c.bf16 %v3279_v33, %v3278_v34  ;;  %v8522_v9 = vpop.permute.xlu1 %1161  ;;  %v3281_v52 = vld [vmem:[%s9998_s5 + $0x368] sm:$0xff]  ;;  %v3282_v33 = vld [vmem:[%s9998_s5 + $0x370] sm:$0xff] }
 0x305   : > { %v1361_v2 = vadd.f32 %v1329_v61, %v1066_v1  ;;  %v1535_v30 = vmul.f32 %v7820_v56, %v1454_v57  ;;  %v1018_v29 = vmul.f32 %v11066_v41, %v931_v54  ;;  %5192 = vmatprep.subr.bf16.mxu1 %v5191_v53  ;;  %v1879_v27 = vadd.f32 %v1847_v17, %v8195_v39  ;;  %v11093_v39 = vld [vmem:[#allocation115_spill] sm:$0xff]  ;;  %v3298_v17 = vld [vmem:[%s9998_s5 + $0x3f0] sm:$0xff] }
 0x306   : > { %v8525_v13 = vadd.f32 %v8271_v14, %v3108_v55  ;;  %v1192_v45 = vsel %vm1181_vm1, %v8382_v50, %v8522_v9  ;;  %v8542_v61 = vadd.f32 %v11092_v31, %v1878_v16  ;;  %v5195_v36 = vpack.c.bf16 %v3297_v40, %v3296_v47  ;;  %v3299_v16 = vld [vmem:[%s9998_s5 + $0x3f8] sm:$0xff]  ;;  %v11095_v57 = vld [vmem:[#allocation125_spill] sm:$0xff]  ;;  %v11097_v47 = vld [vmem:[#allocation19_spill] sm:$0xff] }
 0x307   : > { %v2152_v60 = vsel %vm2136_vm5, %v8139_v59, %v8060_v38  ;;  %v2156_v11 = vsel %vm2136_vm5, %v11093_v39, %v8139_v59  ;;  %v1280_v50 = vmul.f32 %v11067_v0, %v1192_v45  ;;  %v8556_v3 = vpop.permute.xlu0 %2373  ;;  %v11096_v54 = vld [vmem:[#allocation101_spill] sm:$0xff]  ;;  %v1591_v21 = vmul.f32 %v11086_v5, %v1534_v15  ;;  %2642 = vrot.lane.b32.xlu0 %v11041_v8, %s10609_s27  ;;  %v3283_v15 = vld [vmem:[%s9998_s5 + $0x378] sm:$0xff]  ;;  %v11157_v0 = vld [vmem:[#allocation132_spill] sm:$0xff] }
 0x308   : > { %11091 = vst [vmem:[#allocation202_spill] sm:$0xff] %v8525_v13  ;;  %11094 = vst [vmem:[#allocation121_spill] sm:$0xff] %v8556_v3  ;;  %2387 = vrot.lane.b32.xlu1 %v11077_v24, %s10606_s16  ;;  %3375 = vmatmul.mubr.f32.gmra.mrb[20].mxu0 %v8525_v13  ;;  %v2418_v59 = vsel %vm2399_vm6, %v11096_v54, %v11095_v57  ;;  %v5197_v25 = vpack.c.bf16 %v3281_v52, %v3280_v43  ;;  %v1678_v55 = vpop.permute.xlu1 %1677  ;;  %v11098_v40 = vld [vmem:[#allocation81_spill] sm:$0xff]  ;;  %v11100_v31 = vld [vmem:[#allocation54_spill] sm:$0xff] }
 0x309   : > { %5194 = vmatpush3.bf16.msra.mxu1 %v5193_v18  ;;  %v1592_v34 = vmul.f32 %v11086_v5, %v1535_v30  ;;  %v1074_v1 = vmul.f32 %v11082_v32, %v1018_v29  ;;  %v1337_v58 = vmul.f32 %v11083_v37, %v1280_v50  ;;  %v5199_v53 = vpack.c.bf16 %v3299_v16, %v3298_v17  ;;  %v11099_v30 = vld [vmem:[#allocation109_spill] sm:$0xff]  ;;  %v11101_v52 = vld [vmem:[#allocation130_spill] sm:$0xff]  ;;  %v11103_v16 = vld [vmem:[#allocation119_spill] sm:$0xff] }
 0x30a   : > { %5196 = vmatprep.subr.bf16.mxu1 %v5195_v36  ;;  %v2240_v18 = vmul.f32 %v11097_v47, %v2156_v11  ;;  %v2241_v43 = vmul.f32 %v11098_v40, %v2152_v60  ;;  %v1717_v5 = vsel %vm1707_vm4, %v1678_v55, %v8462_v49  ;;  %v1721_v29 = vsel %vm1707_vm4, %v11099_v30, %v1678_v55  ;;  %v11102_v60 = vld [vmem:[#allocation207_spill] sm:$0xff]  ;;  %v11104_v47 = vld [vmem:[#allocation50_spill] sm:$0xff] }
 0x30b   : > { %v8591_v45 = vadd.f32 %v1337_v58, %v1074_v1  ;;  %v1797_v36 = vmul.f32 %v11100_v31, %v1721_v29  ;;  %v1798_v50 = vmul.f32 %v11101_v52, %v1717_v5  ;;  %v8595_v17 = vpop.permute.xlu0 %2620  ;;  %v2045_v11 = vadd.f32 %v11102_v60, %v1879_v27  ;;  %2919 = vrot.lane.b32.xlu0 %v11024_v7, %s10612_s23  ;;  %v11105_v5 = vld [vmem:[#allocation37_spill] sm:$0xff]  ;;  %v11106_v27 = vld [vmem:[#allocation51_spill] sm:$0xff] }
 0x30c   : > { %2903 = vrot.lane.b32.xlu1 %v10967_v10, %s10612_s23  ;;  %v2414_v54 = vsel %vm2399_vm6, %v11095_v57, %v11103_v16  ;;  %v2495_v55 = vmul.f32 %v11104_v47, %v2418_v59  ;;  %v5201_v1 = vpack.c.bf16 %v3283_v15, %v3282_v33  ;;  %v1623_v58 = vadd.f32 %v1591_v21, %v1360_v44  ;;  %v2113_v29 = vpop.permute.xlu1 %2112  ;;  %v11107_v59 = vld [vmem:[#allocation143_spill] sm:$0xff]  ;;  %v11108_v21 = vld [vmem:[#allocation201_spill] sm:$0xff] }
 0x30d   : > { %5198 = vmatpush3.bf16.msra.mxu1 %v5197_v25  ;;  %v1624_v40 = vadd.f32 %v1592_v34, %v1361_v2  ;;  %v1854_v30 = vmul.f32 %v11105_v5, %v1797_v36  ;;  %v1855_v10 = vmul.f32 %v11105_v5, %v1798_v50  ;;  %v2297_v60 = vmul.f32 %v11106_v27, %v2240_v18  ;;  %v11109_v34 = vld [vmem:[#allocation218_spill] sm:$0xff]  ;;  %v11112_v18 = vld [vmem:[#allocation84_spill] sm:$0xff]  ;;  %v11113_v36 = vld [vmem:[#allocation53_spill] sm:$0xff] }
 0x30e   : > { %5200 = vmatprep.subr.bf16.mxu1 %v5199_v53  ;;  %v2298_v13 = vmul.f32 %v11106_v27, %v2241_v43  ;;  %v2141_v57 = vsel %vm2136_vm5, %v2113_v29, %v8508_v63  ;;  %v2145_v7 = vsel %vm2136_vm5, %v11107_v59, %v2113_v29  ;;  %v11111_v53 = vld [vmem:[#allocation179_spill] sm:$0xff]  ;;  %v2496_v43 = vmul.f32 %v11112_v18, %v2414_v54  ;;  %v11115_v29 = vld [vmem:[#allocation185_spill] sm:$0xff]  ;;  %v11117_v54 = vld [vmem:[#allocation62_spill] sm:$0xff] }
 0x30f   : > { %v1886_v44 = vadd.f32 %v1854_v30, %v1623_v58  ;;  %v1887_v2 = vadd.f32 %v1855_v10, %v1624_v40  ;;  %v2218_v25 = vmul.f32 %v11108_v21, %v2145_v7  ;;  %v2219_v33 = vmul.f32 %v11109_v34, %v2141_v57  ;;  %v8619_v15 = vpop.permute.xlu0 %2897  ;;  %v11114_v50 = vld [vmem:[#allocation199_spill] sm:$0xff]  ;;  %2381 = vrot.lane.b32.xlu0 %v11111_v53, %s10606_s16  ;;  %v11116_v40 = vld [vmem:[#allocation26_spill] sm:$0xff]  ;;  %v11119_v7 = vld [vmem:[#allocation212_spill] sm:$0xff] }
 0x310   : > { %11110 = vst [vmem:[#allocation146_spill] sm:$0xff] %v8619_v15  ;;  %2118 = vrot.lane.b32.xlu1 %v11111_v53, %s10597_s0  ;;  %v2677_v6 = vsel %vm2662_vm7, %v11114_v50, %v11113_v36  ;;  %v2681_v58 = vsel %vm2662_vm7, %v11115_v29, %v11114_v50  ;;  %v2366_v57 = vpop.permute.xlu1 %2365  ;;  %v11121_v36 = vld [vmem:[#allocation213_spill] sm:$0xff]  ;;  %v2330_v21 = vadd.f32 %v2298_v13, %v8506_v4  ;;  %v11123_v4 = vld [vmem:[#allocation60_spill] sm:$0xff]  ;;  %v11159_v41 = vld [vmem:[#allocation39_spill] sm:$0xff] }
 0x311   : > { %5202 = vmatpush3.bf16.msra.mxu1 %v5201_v1  ;;  %v2275_v30 = vmul.f32 %v11116_v40, %v2218_v25  ;;  %v2276_v10 = vmul.f32 %v11116_v40, %v2219_v33  ;;  %v8637_v59 = vadd.f32 %v11117_v54, %v1886_v44  ;;  %v8640_v38 = vadd.f32 %v11119_v7, %v1887_v2  ;;  %v11122_v1 = vld [vmem:[#allocation82_spill] sm:$0xff]  ;;  %v11125_v7 = vld [vmem:[#allocation159_spill] sm:$0xff] }
 0x312   : > { %v2329_v16 = vadd.f32 %v2297_v60, %v11121_v36  ;;  %v2415_v50 = vsel %vm2399_vm6, %v2366_v57, %v8556_v3  ;;  %v2419_v25 = vsel %vm2399_vm6, %v11122_v1, %v2366_v57  ;;  %v2758_v13 = vmul.f32 %v11123_v4, %v2681_v58  ;;  %v11124_v36 = vld [vmem:[#allocation79_spill] sm:$0xff] }
 0x313   : > { %11118 = vst [vmem:[#allocation88_spill] sm:$0xff] %v8637_v59  ;;  %11120 = vst [vmem:[#allocation66_spill] sm:$0xff] %v8640_v38  ;;  %v8651_v33 = vadd.f32 %v2275_v30, %v8542_v61  ;;  %v8653_v44 = vadd.f32 %v2276_v10, %v2045_v11  ;;  %v2503_v2 = vmul.f32 %v11104_v47, %v2419_v25  ;;  %v907_v60 = vpop.permute.xlu0 %906  ;;  %2658 = vrot.lane.b32.xlu0 %v11090_v48, %s10609_s27  ;;  %v11126_v11 = vld [vmem:[#allocation98_spill] sm:$0xff]  ;;  %v11127_v30 = vld [vmem:[#allocation200_spill] sm:$0xff] }
 0x314   : > { %v2504_v29 = vmul.f32 %v11112_v18, %v2415_v50  ;;  %2395 = vrot.lane.b32.xlu1 %v11090_v48, %s10606_s16  ;;  %v2759_v54 = vmul.f32 %v11124_v36, %v2677_v6  ;;  %v923_v57 = vsel %vm920_vm2, %v907_v60, %v11125_v7  ;;  %v927_v61 = vsel %vm920_vm2, %v8479_v12, %v907_v60  ;;  %v8675_v6 = vpop.permute.xlu1 %2612  ;;  %v11128_v50 = vld [vmem:[#allocation140_spill] sm:$0xff]  ;;  %v11129_v25 = vld [vmem:[#allocation135_spill] sm:$0xff]  ;;  %v11132_v59 = vld [vmem:[#allocation49_spill] sm:$0xff] }
 0x315   : > { %v2560_v47 = vmul.f32 %v11126_v11, %v2503_v2  ;;  %v1019_v10 = vmul.f32 %v11127_v30, %v927_v61  ;;  %v8673_v58 = vmul.f32 %v7801_v22, %v923_v57  ;;  %v1209_v7 = vsel %vm1181_vm1, %v11129_v25, %v11128_v50  ;;  %v11130_v12 = vld [vmem:[#allocation20_spill] sm:$0xff]  ;;  %v11134_v38 = vld [vmem:[#allocation133_spill] sm:$0xff]  ;;  %v11135_v61 = vld [vmem:[#allocation122_spill] sm:$0xff] }
 0x316   : > { %v2561_v18 = vmul.f32 %v11126_v11, %v2504_v29  ;;  %v11131_v60 = vld [vmem:[#allocation80_spill] sm:$0xff]  ;;  %v2552_v36 = vmul.f32 %v11132_v59, %v2495_v55  ;;  %v2553_v2 = vmul.f32 %v11132_v59, %v2496_v43  ;;  %v11133_v29 = vld [vmem:[#allocation138_spill] sm:$0xff]  ;;  %v11138_v55 = vld [vmem:[#allocation89_spill] sm:$0xff]  ;;  %v2815_v43 = vmul.f32 %v11057_v23, %v2758_v13 }
 0x317   : > { %v2059_v3 = vadd.f32 %v11131_v60, %v11130_v12  ;;  %v948_v57 = vsel %vm920_vm2, %v11134_v38, %v11133_v29  ;;  %v11136_v22 = vld [vmem:[#allocation164_spill] sm:$0xff]  ;;  %v8691_v34 = vadd.f32 %v2560_v47, %v2329_v16  ;;  %v8695_v50 = vpop.permute.xlu0 %1416  ;;  %v2816_v12 = vmul.f32 %v11057_v23, %v2759_v54  ;;  %v11139_v38 = vld [vmem:[#allocation127_spill] sm:$0xff]  ;;  %2913 = vrot.lane.b32.xlu0 %v11077_v24, %s10612_s23  ;;  %v11140_v16 = vld [vmem:[#allocation141_spill] sm:$0xff] }
 0x318   : > { %v2321_v30 = vadd.f32 %v11136_v22, %v11135_v61  ;;  %v8693_v52 = vadd.f32 %v2561_v18, %v2330_v21  ;;  %2650 = vrot.lane.b32.xlu1 %v11077_v24, %s10609_s27  ;;  %v1459_v22 = vsel %vm1444_vm3, %v11139_v38, %v8695_v50  ;;  %v11141_v21 = vld [vmem:[#allocation136_spill] sm:$0xff]  ;;  %v11142_v18 = vld [vmem:[#allocation193_spill] sm:$0xff]  ;;  %v11144_v29 = vld [vmem:[#allocation187_spill] sm:$0xff]  ;;  %v2890_v61 = vpop.permute.xlu1 %2889 }
 0x319   : > { %v2322_v25 = vadd.f32 %v11138_v55, %v2059_v3  ;;  %v1472_v47 = vsel %vm1444_vm3, %v11141_v21, %v11140_v16  ;;  %v1284_v60 = vmul.f32 %v11142_v18, %v1209_v7  ;;  %v11143_v3 = vld [vmem:[#allocation211_spill] sm:$0xff]  ;;  %v1542_v54 = vmul.f32 %v7816_v20, %v1459_v22  ;;  %v11145_v59 = vld [vmem:[#allocation148_spill] sm:$0xff]  ;;  %v11146_v21 = vld [vmem:[#allocation34_spill] sm:$0xff] }
 0x31a   : > { %11137 = vst [vmem:[#allocation22_spill] sm:$0xff] %v8693_v52  ;;  %v1735_v13 = vsel %vm1707_vm4, %v11144_v29, %v11143_v3  ;;  %v2584_v55 = vadd.f32 %v2552_v36, %v2321_v30  ;;  %v2940_v23 = vsel %vm2925_vm8, %v2890_v61, %v8619_v15  ;;  %v2944_v16 = vsel %vm2925_vm8, %v11145_v59, %v2890_v61  ;;  %v11147_v18 = vld [vmem:[#allocation76_spill] sm:$0xff]  ;;  %v11148_v24 = vld [vmem:[#allocation83_spill] sm:$0xff]  ;;  %v11151_v30 = vld [vmem:[#allocation186_spill] sm:$0xff] }
 0x31b   : > { %v2585_v38 = vadd.f32 %v2553_v2, %v2322_v25  ;;  %v1599_v7 = vmul.f32 %v11146_v21, %v1542_v54  ;;  %v3021_v52 = vmul.f32 %v11147_v18, %v2944_v16  ;;  %v3022_v31 = vmul.f32 %v11148_v24, %v2940_v23  ;;  %v1694_v3 = vpop.permute.xlu0 %1693  ;;  %v11149_v22 = vld [vmem:[#allocation95_spill] sm:$0xff]  ;;  %v11153_v25 = vld [vmem:[#allocation156_spill] sm:$0xff]  ;;  %2644 = vrot.lane.b32.xlu0 %v11111_v53, %s10609_s27 }
 0x31c   : > { %2134 = vrot.lane.b32.xlu1 %v11149_v22, %s10597_s0  ;;  %v11150_v36 = vld [vmem:[#allocation11_spill] sm:$0xff]  ;;  %v1709_v29 = vsel %vm1707_vm4, %v1694_v3, %v11153_v25  ;;  %v1713_v59 = vsel %vm1707_vm4, %v8462_v49, %v1694_v3  ;;  %v2847_v54 = vadd.f32 %v2815_v43, %v2584_v55  ;;  %v8747_v18 = vpop.permute.xlu1 %2604  ;;  %v11158_v3 = vld [vmem:[#allocation208_spill] sm:$0xff]  ;;  %s404_s0 = sand.u32 1, %s5358_s22  }
 0x31d   : > { %v8731_v2 = vrot.slane %v11151_v30, %v11150_v36  ;;  %v2848_v23 = vadd.f32 %v2816_v12, %v2585_v38  ;;  %v8742_v61 = vadd.f32 %v1599_v7, %v8435_v35  ;;  %v3078_v16 = vmul.f32 %v11074_v62, %v3021_v52  ;;  %v11154_v36 = vld [vmem:[#allocation126_spill] sm:$0xff]  ;;  %11155 = vst [vmem:[#allocation103_spill] sm:$0xff] %v8747_v18  ;;  %v11156_v25 = vld [vmem:[#allocation183_spill] sm:$0xff]  ;;  %v11160_v12 = vld [vmem:[#allocation68_spill] sm:$0xff]  ;;  %s9952_s21 = scalar_lea.sflag [#allocation3], %s404_s0 }
 0x31e   : > { %v3079_v15 = vmul.f32 %v11074_v62, %v3022_v31  ;;  %v1799_v24 = vmul.f32 %v11154_v36, %v1713_v59  ;;  %v1022_v20 = vmul.f32 %v11156_v25, %v948_v57  ;;  %v1800_v49 = vmul.f32 %v11157_v0, %v1709_v29  ;;  %v11161_v35 = vld [vmem:[#allocation181_spill] sm:$0xff]  ;;  %v11162_v57 = vld [vmem:[#allocation36_spill] sm:$0xff] }
 0x31f   : > { %11152 = vst [vmem:[#allocation149_spill] sm:$0xff] %v8731_v2  ;;  %v2022_v46 = vmul.f32 %v11159_v41, %v11158_v3  ;;  %v2023_v43 = vmul.f32 %v11159_v41, %v11160_v12  ;;  %v1547_v55 = vmul.f32 %v11161_v35, %v1472_v47  ;;  %v8757_v38 = vpop.permute.xlu0 %2375  ;;  %v3110_v7 = vadd.f32 %v3078_v16, %v2847_v54  ;;  %v11163_v29 = vld [vmem:[#allocation184_spill] sm:$0xff]  ;;  %v11164_v62 = vld [vmem:[#allocation145_spill] sm:$0xff]  ;;  %v11169_v35 = vld [vmem:[#allocation114_spill] sm:$0xff] }
 0x320   : > { %v1856_v52 = vmul.f32 %v11105_v5, %v1799_v24  ;;  %2389 = vrot.lane.b32.xlu1 %v10971_v28, %s10606_s16  ;;  %v3111_v31 = vadd.f32 %v3079_v15, %v2848_v23  ;;  %v1341_v59 = vmul.f32 %v11162_v57, %v1284_v60  ;;  %v1810_v25 = vmul.f32 %v11163_v29, %v1735_v13  ;;  %v1170_v23 = vpop.permute.xlu1 %1169  ;;  %v11166_v13 = vld [vmem:[#allocation157_spill] sm:$0xff]  ;;  %v11168_v16 = vld [vmem:[#allocation28_spill] sm:$0xff] }
 0x321   : > { %v1857_v3 = vmul.f32 %v11105_v5, %v1800_v49  ;;  %v2408_v41 = vsel %vm2399_vm6, %v11164_v62, %v8757_v38  ;;  %2921 = vrot.lane.b32.xlu0 %v11090_v48, %s10612_s23  ;;  %v1075_v24 = vmul.f32 %v11082_v32, %v1019_v10  ;;  %v1184_v54 = vsel %vm1181_vm1, %v1170_v23, %v11166_v13 }
 0x322   : > { %v1888_v47 = vadd.f32 %v1856_v52, %v8474_v19  ;;  %v2481_v15 = vmul.f32 %v8731_v2, %v2408_v41  ;;  %v8774_v60 = vadd.f32 %v8271_v14, %v3111_v31  ;;  %v1188_v62 = vsel %vm1181_vm1, %v8522_v9, %v1170_v23  ;;  %v11187_v2 = vld [vmem:[#allocation191_spill] sm:$0xff] }
 0x323   : > { %v1889_v5 = vadd.f32 %v1857_v3, %v8476_v51  ;;  %v8784_v10 = vadd.f32 %v8271_v14, %v3110_v7  ;;  %v1076_v19 = vmul.f32 %v11082_v32, %v8673_v58  ;;  %v1281_v12 = vmul.f32 %v7726_v42, %v1188_v62  ;;  %v8791_v52 = vpop.permute.xlu0 %2628  ;;  %v11186_v14 = vld [vmem:[#allocation176_spill] sm:$0xff] }
 0x324   : > { %11165 = vst [vmem:[#allocation25_spill] sm:$0xff] %v8774_v60  ;;  %v2538_v49 = vmul.f32 %v11168_v16, %v2481_v15  ;;  %v1282_v51 = vmul.f32 %v11169_v35, %v1184_v54  ;;  %2905 = vrot.lane.b32.xlu1 %v11041_v8, %s10612_s23  ;;  %v2682_v9 = vsel %vm2662_vm7, %v8595_v17, %v8791_v52  ;;  %v8813_v41 = vpop.permute.xlu1 %1424  ;;  %v11171_v15 = vld [vmem:[#allocation40_spill] sm:$0xff]  ;;  %v11175_v54 = vld [vmem:[#allocation171_spill] sm:$0xff] }
 0x325   : > { %11167 = vst [vmem:[#allocation69_spill] sm:$0xff] %v8784_v10  ;;  %2907 = vrot.lane.b32.xlu0 %v11111_v53, %s10612_s23  ;;  %3459 = vmatprep.mubr.f32.mxu1 %v8774_v60  ;;  %v8802_v32 = vadd.f32 %v2022_v46, %v1888_v47  ;;  %v8804_v58 = vadd.f32 %v2023_v43, %v1889_v5  ;;  %v11172_v43 = vld [vmem:[#allocation12_spill] sm:$0xff]  ;;  %v11174_v5 = vld [vmem:[#allocation14_spill] sm:$0xff] }
 0x326   : > { %v8807_v31 = vadd.f32 %v2538_v49, %v8651_v33  ;;  %v1338_v7 = vmul.f32 %v11083_v37, %v1281_v12  ;;  %v1339_v29 = vmul.f32 %v11083_v37, %v1282_v51  ;;  %v2766_v3 = vmul.f32 %v11123_v4, %v2682_v9  ;;  %3460 = vmatmul.mubr.f32.gmra.mrb[20].mxu1 %v8784_v10  ;;  %v11173_v33 = vld [vmem:[#allocation180_spill] sm:$0xff]  ;;  %v11177_v9 = vld [vmem:[#allocation45_spill] sm:$0xff] }
 0x327   : > { %v1078_v23 = vmul.f32 %v11171_v15, %v1022_v20  ;;  %v1455_v46 = vsel %vm1444_vm3, %v8695_v50, %v8813_v41  ;;  %v8822_v47 = vrot.slane %v11173_v33, %v11172_v43  ;;  %v8826_v37 = vrot.slane %v11173_v33, %v11174_v5  ;;  %v8834_v49 = vpop.permute.xlu0 %2875  ;;  %v11176_v50 = vld [vmem:[#allocation41_spill] sm:$0xff]  ;;  %v11179_v33 = vld [vmem:[#allocation134_spill] sm:$0xff] }
 0x328   : > { %11170 = vst [vmem:[#allocation197_spill] sm:$0xff] %v8807_v31  ;;  %v8828_v4 = vadd.f32 %v1338_v7, %v1075_v24  ;;  %v8830_v13 = vadd.f32 %v1339_v29, %v1076_v19  ;;  %v2823_v62 = vmul.f32 %v11175_v54, %v2766_v3  ;;  %v1543_v20 = vmul.f32 %v7820_v56, %v1455_v46  ;;  %v11178_v19 = vld [vmem:[#allocation117_spill] sm:$0xff]  ;;  %v2129_v46 = vpop.permute.xlu1 %2128  ;;  %v11188_v31 = vld [vmem:[#allocation190_spill] sm:$0xff] }
 0x329   : > { %2397 = vrot.lane.b32.xlu1 %v11149_v22, %s10606_s16  ;;  %v1604_v12 = vmul.f32 %v11176_v50, %v1547_v55  ;;  %v1373_v51 = vadd.f32 %v1341_v59, %v1078_v23  ;;  %2923 = vrot.lane.b32.xlu0 %v11149_v22, %s10612_s23  ;;  %v1867_v24 = vmul.f32 %v11177_v9, %v1810_v25  ;;  %v11180_v25 = vld [vmem:[#allocation67_spill] sm:$0xff]  ;;  %s4768_s16 = sshll.u32 %s404_s0, 7 }
 0x32a   : > { %v2160_v7 = vsel %vm2136_vm5, %v11178_v19, %v11093_v39  ;;  %v8847_v29 = vadd.f32 %v2823_v62, %v8691_v34  ;;  %v1600_v3 = vmul.f32 %v11146_v21, %v1543_v20  ;;  %v2164_v55 = vsel %vm2136_vm5, %v11179_v33, %v11178_v19  ;;  %v11181_v39 = vld [vmem:[#allocation13_spill] sm:$0xff] }
 0x32b   : > { %v2137_v59 = vsel %vm2136_vm5, %v8508_v63, %v2129_v46  ;;  %v2165_v23 = vsel %vm2136_vm5, %v2129_v46, %v11180_v25  ;;  %v8862_v34 = vrot.slane %v11151_v30, %v11181_v39  ;;  %v11183_v62 = vld [vmem:[#allocation21_spill] sm:$0xff]  ;;  %v8873_v10 = vpop.permute.xlu0 %3137  ;;  %v1636_v46 = vadd.f32 %v1604_v12, %v1373_v51  ;;  %v11185_v25 = vld [vmem:[#allocation71_spill] sm:$0xff] }
 0x32c   : > { %v2423_v20 = vsel %vm2399_vm6, %v11183_v62, %v11122_v1  ;;  %v8869_v60 = vadd.f32 %v1600_v3, %v8591_v45  ;;  %v2220_v19 = vmul.f32 %v8822_v47, %v2137_v59  ;;  %v2221_v63 = vmul.f32 %v8826_v37, %v2165_v23  ;;  %11184 = vst [vmem:[#allocation64_spill] sm:$0xff] %v8873_v10  ;;  %v8886_v59 = vpop.permute.xlu1 %2383  ;;  %v11189_v12 = vld [vmem:[#allocation195_spill] sm:$0xff] }
 0x32d   : > { %11182 = vst [vmem:[#allocation87_spill] sm:$0xff] %v8862_v34  ;;  %2652 = vrot.lane.b32.xlu1 %v10971_v28, %s10609_s27  ;;  %v1976_v33 = vmul.f32 %v11186_v14, %v11185_v25  ;;  %v2239_v53 = vmul.f32 %v11187_v2, %v2160_v7  ;;  %v2686_v45 = vsel %vm2662_vm7, %v8675_v6, %v8595_v17  ;;  %v11190_v2 = vld [vmem:[#allocation86_spill] sm:$0xff]  ;;  %v11191_v7 = vld [vmem:[#allocation23_spill] sm:$0xff] }
 0x32e   : > { %v2277_v1 = vmul.f32 %v11116_v40, %v2220_v19  ;;  %v2278_v3 = vmul.f32 %v11116_v40, %v2221_v63  ;;  %v1899_v23 = vadd.f32 %v1867_v24, %v1636_v46  ;;  %v2238_v9 = vmul.f32 %v11188_v31, %v2164_v55  ;;  %v11192_v40 = vld [vmem:[#allocation196_spill] sm:$0xff]  ;;  %v11194_v46 = vld [vmem:[#allocation215_spill] sm:$0xff] }
 0x32f   : > { %v2502_v51 = vmul.f32 %v11189_v12, %v2423_v20  ;;  %v2404_v14 = vsel %vm2399_vm6, %v8757_v38, %v8886_v59  ;;  %v2427_v17 = vsel %vm2399_vm6, %v11190_v2, %v11183_v62  ;;  %v893_v24 = vpop.permute.xlu0 %892  ;;  %v11193_v55 = vld [vmem:[#allocation48_spill] sm:$0xff]  ;;  %v2296_v38 = vmul.f32 %v11106_v27, %v2239_v53  ;;  %v11195_v12 = vld [vmem:[#allocation137_spill] sm:$0xff] }
 0x330   : > { %v8899_v19 = vadd.f32 %v2277_v1, %v11191_v7  ;;  %v8902_v63 = vadd.f32 %v2278_v3, %v11192_v40  ;;  %v2482_v31 = vmul.f32 %v8862_v34, %v2404_v14  ;;  %v2033_v20 = vmul.f32 %v11193_v55, %v1976_v33  ;;  %v8918_v14 = vpop.permute.xlu1 %2636  ;;  %v11197_v40 = vld [vmem:[#allocation192_spill] sm:$0xff] }
 0x331   : > { %2660 = vrot.lane.b32.xlu1 %v11149_v22, %s10609_s27  ;;  %v2765_v25 = vmul.f32 %v11194_v46, %v2686_v45  ;;  %v936_v62 = vsel %vm920_vm2, %v11195_v12, %v893_v24  ;;  %v2690_v1 = vsel %vm2662_vm7, %v8747_v18, %v8675_v6  ;;  %11196 = vst [vmem:[#allocation56_spill] sm:$0xff] %v8918_v14  ;;  %v11199_v12 = vld [vmem:[#allocation90_spill] sm:$0xff]  ;;  %s9907_s27 = scalar_lea.vmem [#allocation2], %s4768_s16 }
 0x332   : > { %v2539_v3 = vmul.f32 %v11168_v16, %v2482_v31  ;;  %v2065_v7 = vadd.f32 %v2033_v20, %v1899_v23  ;;  %v2559_v33 = vmul.f32 %v11126_v11, %v2502_v51  ;;  %v2501_v53 = vmul.f32 %v11197_v40, %v2427_v17  ;;  %v11200_v18 = vld [vmem:[#allocation214_spill] sm:$0xff]  ;;  %v11201_v20 = vld [vmem:[#allocation139_spill] sm:$0xff]  ;;  %s4702_s1 = sshll.u32 %s9907_s27, 4  ;;  %s9942_s1 = int_to_ptr.vmem [resolvable:$true] %s4702_s1 }
 0x333   : > { %v2295_v45 = vmul.f32 %v11106_v27, %v2238_v9  ;;  %v1025_v2 = vmul.f32 %v11199_v12, %v936_v62  ;;  %v1156_v34 = vpop.permute.xlu0 %1155  ;;  %v2822_v31 = vmul.f32 %v11175_v54, %v2765_v25  ;;  %v2764_v23 = vmul.f32 %v11200_v18, %v2690_v1  ;;  %v11202_v9 = vld [vmem:[#allocation91_spill] sm:$0xff]  ;;  %v11204_v12 = vld [vmem:[#allocation74_spill] sm:$0xff]  ;;  %s5304_s19 = scalar_lea.vmem %s9942_s1, 2048  ;;  %p5311_p0 = scmp.lt.s32.totalorder %s9942_s1, %s5309_s18 }
 0x334   : > { %v8924_v46 = vadd.f32 %v2539_v3, %v8653_v44  ;;  %v2328_v6 = vadd.f32 %v2296_v38, %v2065_v7  ;;  %v1197_v51 = vsel %vm1181_vm1, %v11201_v20, %v1156_v34  ;;  %v3641_v44 = vld [vmem:[%s10001_s8] sm:$0xff]  ;;  %v8938_v62 = vpop.permute.xlu1 %2883  ;;  %v2558_v40 = vmul.f32 %v11126_v11, %v2501_v53  ;;  %p5305_p11 = scmp.ne.s32.totalorder %s9942_s1, %s5304_s19  ;;  %p5312_p1 = scmp.lt.s32.totalorder %s5310_s14, %s5304_s19 }
 0x335   : > { %2915 = vrot.lane.b32.xlu1 %v10971_v28, %s10612_s23  ;;  %v1287_v17 = vmul.f32 %v11202_v9, %v1197_v51  ;;  %v2949_v18 = vsel %vm2925_vm8, %v8834_v49, %v8938_v62  ;;  %v11203_v38 = vld [vmem:[#allocation219_spill] sm:$0xff]  ;;  %v1081_v1 = vmul.f32 %v11171_v15, %v1025_v2  ;;  %v11206_v2 = vld [vmem:[#allocation70_spill] sm:$0xff]  ;;  %s4869_s23 = sshll.u32 %s5471_s25, 11 }
 0x336   : > { %11198 = vst [vmem:[#allocation167_spill] sm:$0xff] %v8924_v46  ;;  %v2591_v3 = vadd.f32 %v2559_v33, %v2328_v6  ;;  %v2327_v25 = vadd.f32 %v2295_v45, %v11203_v38  ;;  %v3028_v20 = vmul.f32 %v11204_v12, %v2949_v18  ;;  %v2821_v33 = vmul.f32 %v11175_v54, %v2764_v23  ;;  %v11205_v6 = vld [vmem:[#allocation163_spill] sm:$0xff]  ;;  %v11208_v18 = vld [vmem:[#allocation124_spill] sm:$0xff]  ;;  %v11225_v28 = vld [vmem:[#allocation218_spill] sm:$0xff]  ;;  %s9940_s30 = scalar_lea.hbm %s11351_s28, %s4869_s23  ;;  %p5306_p12 = pnand %p5305_p11, %p5488_p5 }
 0x337   : > { %v1344_v7 = vmul.f32 %v11162_v57, %v1287_v17  ;;  %v1433_v27 = vpop.permute.xlu0 %1432  ;;  %v11207_v17 = vld [vmem:[#allocation63_spill] sm:$0xff]  ;;  %p5313_p2 = por %p5312_p1, %p5311_p0 }
 0x338   : > { %v2854_v51 = vadd.f32 %v2822_v31, %v2591_v3  ;;  %v1447_v53 = vsel %vm1444_vm3, %v1433_v27, %v11205_v6  ;;  %v1451_v9 = vsel %vm1444_vm3, %v8813_v41, %v1433_v27  ;;  %v3085_v38 = vmul.f32 %v11206_v2, %v3028_v20  ;;  %v11210_v41 = vld [vmem:[#allocation216_spill] sm:$0xff]  ;;  %p5307_p13 = pneg %p5306_p12 }
 0x339   : > { %3644 = vperm.xlu1 %5268, %v3641_v44   ;;  %v8956_v45 = vadd.f32 %v1344_v7, %v1081_v1  ;;  %v1544_v11 = vmul.f32 %v11207_v17, %v1451_v9  ;;  %v1545_v12 = vmul.f32 %v11208_v18, %v1447_v53  ;;  %v8961_v44 = vpop.permute.xlu1 %2867  ;;  %v2590_v31 = vadd.f32 %v2558_v40, %v2327_v25  ;;  %v11226_v18 = vld [vmem:[#allocation168_spill] sm:$0xff] }
 0x33a   : > { %11209 = vst [vmem:[#allocation100_spill] sm:$0xff] %v8961_v44  ;;  %v2953_v23 = vsel %vm2925_vm8, %v8961_v44, %v8834_v49  ;;  %v3117_v20 = vadd.f32 %v3085_v38, %v2854_v51  ;;  %p5314_p3 = pnand %p5313_p2, %p5307_p13 }
 0x33b   : > { %v1601_v3 = vmul.f32 %v11146_v21, %v1544_v11  ;;  %v1602_v27 = vmul.f32 %v11146_v21, %v1545_v12  ;;  %v3027_v1 = vmul.f32 %v11210_v41, %v2953_v23  ;;  %v8970_v7 = vpop.permute.xlu0 %1687  ;;  %v2853_v6 = vadd.f32 %v2821_v33, %v2590_v31  ;;  %v11212_v33 = vld [vmem:[#allocation99_spill] sm:$0xff]  ;;  %v11214_v31 = vld [vmem:[#allocation113_spill] sm:$0xff] }
 0x33c   : > { %v8980_v49 = vadd.f32 %v8873_v10, %v3117_v20  ;;  %v11215_v20 = vld [vmem:[#allocation131_spill] sm:$0xff] }
 0x33d   : > { %v8973_v53 = vadd.f32 %v1601_v3, %v8828_v4  ;;  %v8976_v40 = vadd.f32 %v1602_v27, %v8830_v13  ;;  %v3084_v25 = vmul.f32 %v11206_v2, %v3027_v1  ;;  %v901_v9 = vpop.permute.xlu1 %900 }
 0x33e   : > { %11211 = vst [vmem:[#allocation105_spill] sm:$0xff] %v8980_v49  ;;  %v932_v11 = vsel %vm920_vm2, %v893_v24, %v901_v9  ;;  %3379 = vmatprep.mubr.f32.mxu0 %v8980_v49 }
 0x33f   : > { %v8984_v21 = vpop.permute.xlu0 %2122  ;;  %v3116_v51 = vadd.f32 %v3084_v25, %v2853_v6  ;;  %v1026_v4 = vmul.f32 %v11212_v33, %v932_v11  ;;  %v11217_v25 = vld [vmem:[#allocation15_spill] sm:$0xff]  ;;  %v11218_v33 = vld [vmem:[#allocation54_spill] sm:$0xff] }
 0x341   : > { %v8988_v38 = vpop.permute.xlu1 %1163  ;;  %v8991_v13 = vadd.f32 %v8873_v10, %v3116_v51  ;;  %v1082_v24 = vmul.f32 %v11171_v15, %v1026_v4 }
 0x342   : > { %v1193_v12 = vsel %vm1181_vm1, %v1156_v34, %v8988_v38  ;;  %v11216_v34 = vld [vmem:[#allocation128_spill] sm:$0xff] }
 0x343   : > { %11213 = vst [vmem:[#allocation182_spill] sm:$0xff] %v8991_v13  ;;  %v1288_v23 = vmul.f32 %v11214_v31, %v1193_v12  ;;  %v8997_v3 = vpop.permute.xlu0 %2638  ;;  %3380 = vmatmul.mubr.f32.gmra.mrb[22].mxu0 %v8991_v13  ;;  %v1971_v11 = vmul.f32 %v11217_v25, %v11216_v34  ;;  %v11219_v31 = vld [vmem:[#allocation130_spill] sm:$0xff] }
 0x345   : > { %v1345_v27 = vmul.f32 %v11162_v57, %v1288_v23  ;;  %v1680_v41 = vpop.permute.xlu1 %1679  ;;  %v11220_v23 = vld [vmem:[#allocation42_spill] sm:$0xff] }
 0x346   : > { %v1718_v1 = vsel %vm1707_vm4, %v1680_v41, %v8970_v7  ;;  %v1722_v6 = vsel %vm1707_vm4, %v11215_v20, %v1680_v41  ;;  %v11222_v20 = vld [vmem:[#allocation44_spill] sm:$0xff] }
 0x347   : > { %v9010_v51 = vadd.f32 %v1345_v27, %v1082_v24  ;;  %v1805_v12 = vmul.f32 %v11218_v33, %v1722_v6  ;;  %v1806_v4 = vmul.f32 %v11219_v31, %v1718_v1  ;;  %v2892_v49 = vpop.permute.xlu0 %2891  ;;  %v2028_v34 = vmul.f32 %v11222_v20, %v1971_v11 }
 0x348   : > { %v9027_v1 = vrot.slane %v11151_v30, %v11172_v43 }
 0x349   : > { %v1862_v13 = vmul.f32 %v11220_v23, %v1805_v12  ;;  %v1863_v44 = vmul.f32 %v11220_v23, %v1806_v4  ;;  %v9016_v22 = vpop.permute.xlu1 %2114  ;;  %v11224_v12 = vld [vmem:[#allocation17_spill] sm:$0xff] }
 0x34a   : > { %11221 = vst [vmem:[#allocation108_spill] sm:$0xff] %v9016_v22  ;;  %v2142_v41 = vsel %vm2136_vm5, %v9016_v22, %v8984_v21  ;;  %11223 = vst [vmem:[#allocation175_spill] sm:$0xff] %v9027_v1  ;;  %v1972_v4 = vmul.f32 %v11224_v12, %v11041_v8  ;;  %v11230_v12 = vld [vmem:[#allocation38_spill] sm:$0xff] }
 0x34b   : > { %v1894_v24 = vadd.f32 %v1862_v13, %v8742_v61  ;;  %v1895_v27 = vadd.f32 %v1863_v44, %v8869_v60  ;;  %v909_v6 = vpop.permute.xlu0 %908  ;;  %v2227_v31 = vmul.f32 %v11225_v28, %v2142_v41  ;;  %v9039_v61 = vrot.slane %v11151_v30, %v11174_v5  ;;  %v11228_v44 = vld [vmem:[#allocation200_spill] sm:$0xff]  ;;  %v11229_v13 = vld [vmem:[#allocation158_spill] sm:$0xff] }
 0x34c   : > { %v924_v22 = vsel %vm920_vm2, %v909_v6, %v11226_v18  ;;  %v928_v11 = vsel %vm920_vm2, %v901_v9, %v909_v6  ;;  %v2678_v60 = vsel %vm2662_vm7, %v8791_v52, %v8918_v14  ;;  %v11231_v9 = vld [vmem:[#allocation73_spill] sm:$0xff]  ;;  %v2945_v52 = vsel %vm2925_vm8, %v8938_v62, %v2892_v49 }
 0x34d   : > { %11227 = vst [vmem:[#allocation170_spill] sm:$0xff] %v9039_v61  ;;  %v1027_v8 = vmul.f32 %v11228_v44, %v928_v11  ;;  %v1028_v41 = vmul.f32 %v11229_v13, %v924_v22  ;;  %v2392_v28 = vpop.permute.xlu1 %2391  ;;  %v2284_v17 = vmul.f32 %v11230_v12, %v2227_v31  ;;  %v9054_v6 = vadd.f32 %v2028_v34, %v1894_v24  ;;  %v11233_v31 = vld [vmem:[#allocation66_spill] sm:$0xff]  ;;  %v11235_v14 = vld [vmem:[#allocation205_spill] sm:$0xff]  ;;  %v11236_v34 = vld [vmem:[#allocation79_spill] sm:$0xff] }
 0x34e   : > { %v2400_v18 = vsel %vm2399_vm6, %v8886_v59, %v2392_v28  ;;  %v2428_v30 = vsel %vm2399_vm6, %v2392_v28, %v11231_v9  ;;  %v2029_v44 = vmul.f32 %v11222_v20, %v1972_v4  ;;  %v2767_v24 = vmul.f32 %v11236_v34, %v2678_v60  ;;  %v11238_v4 = vld [vmem:[#allocation76_spill] sm:$0xff]  ;;  %v11241_v34 = vld [vmem:[#allocation166_spill] sm:$0xff] }
 0x34f   : > { %11232 = vst [vmem:[#allocation116_spill] sm:$0xff] %v9054_v6  ;;  %v2483_v11 = vmul.f32 %v9027_v1, %v2400_v18  ;;  %v1419_v22 = vpop.permute.xlu0 %1418  ;;  %v9062_v13 = vadd.f32 %v2284_v17, %v11233_v31  ;;  %v2484_v59 = vmul.f32 %v9039_v61, %v2428_v30  ;;  %v11237_v6 = vld [vmem:[#allocation194_spill] sm:$0xff]  ;;  %v3029_v1 = vmul.f32 %v11238_v4, %v2945_v52  ;;  %v11240_v61 = vld [vmem:[#allocation16_spill] sm:$0xff]  ;;  %v11245_v4 = vld [vmem:[#allocation209_spill] sm:$0xff] }
 0x350   : > { %v1460_v28 = vsel %vm1444_vm3, %v11235_v14, %v1419_v22  ;;  %v9073_v18 = vadd.f32 %v2029_v44, %v1895_v27  ;;  %v11239_v14 = vld [vmem:[#allocation174_spill] sm:$0xff] }
 0x351   : > { %11234 = vst [vmem:[#allocation107_spill] sm:$0xff] %v9062_v13  ;;  %v2540_v9 = vmul.f32 %v11168_v16, %v2483_v11  ;;  %v1550_v62 = vmul.f32 %v11237_v6, %v1460_v28  ;;  %v9071_v46 = vpop.permute.xlu1 %2646  ;;  %v2541_v17 = vmul.f32 %v11168_v16, %v2484_v59  ;;  %v1973_v60 = vmul.f32 %v11240_v61, %v11239_v14  ;;  %v11242_v16 = vld [vmem:[#allocation18_spill] sm:$0xff] }
 0x352   : > { %v1974_v52 = vmul.f32 %v11242_v16, %v11090_v48  ;;  %v11246_v14 = vld [vmem:[#allocation22_spill] sm:$0xff] }
 0x353   : > { %v2572_v30 = vadd.f32 %v2540_v9, %v8899_v19  ;;  %v1607_v31 = vmul.f32 %v11176_v50, %v1550_v62  ;;  %v1696_v13 = vpop.permute.xlu0 %1695  ;;  %v2573_v11 = vadd.f32 %v2541_v17, %v8902_v63  ;;  %v2824_v19 = vmul.f32 %v11175_v54, %v2767_v24  ;;  %v11244_v24 = vld [vmem:[#allocation83_spill] sm:$0xff] }
 0x354   : > { %v1710_v6 = vsel %vm1707_vm4, %v1696_v13, %v11241_v34  ;;  %v1714_v27 = vsel %vm1707_vm4, %v8970_v7, %v1696_v13  ;;  %v3086_v9 = vmul.f32 %v11206_v2, %v3029_v1  ;;  %v9109_v17 = vrot.slane %v11245_v4, %v11172_v43 }
 0x355   : > { %v9092_v44 = vadd.f32 %v1607_v31, %v8956_v45  ;;  %v1807_v59 = vmul.f32 %v11154_v36, %v1714_v27  ;;  %v1808_v63 = vmul.f32 %v11157_v0, %v1710_v6  ;;  %v9096_v28 = vpop.permute.xlu1 %2899  ;;  %v2030_v31 = vmul.f32 %v11222_v20, %v1973_v60 }
 0x356   : > { %11243 = vst [vmem:[#allocation111_spill] sm:$0xff] %v9096_v28  ;;  %v2941_v7 = vsel %vm2925_vm8, %v2892_v49, %v9096_v28  ;;  %v2031_v1 = vmul.f32 %v11222_v20, %v1974_v52  ;;  %v2856_v34 = vadd.f32 %v2824_v19, %v11246_v14  ;;  %v9125_v20 = vrot.slane %v11245_v4, %v11174_v5 }
 0x357   : > { %v1864_v13 = vmul.f32 %v11220_v23, %v1807_v59  ;;  %v1865_v48 = vmul.f32 %v11220_v23, %v1808_v63  ;;  %v3030_v62 = vmul.f32 %v11244_v24, %v2941_v7  ;;  %v9105_v45 = vpop.permute.xlu0 %2377  ;;  %v11247_v59 = vld [vmem:[#allocation161_spill] sm:$0xff]  ;;  %v3118_v60 = vadd.f32 %v3086_v9, %v8847_v29  ;;  %v11248_v24 = vld [vmem:[#allocation55_spill] sm:$0xff] }
 0x358   : > { %v1084_v29 = vmul.f32 %v11171_v15, %v1028_v41 }
 0x359   : > { %v1896_v49 = vadd.f32 %v1864_v13, %v8973_v53  ;;  %v1897_v6 = vadd.f32 %v1865_v48, %v8976_v40  ;;  %v3087_v23 = vmul.f32 %v11206_v2, %v3030_v62  ;;  %v1172_v27 = vpop.permute.xlu1 %1171  ;;  %v1083_v53 = vmul.f32 %v11171_v15, %v1027_v8 }
 0x35a   : > { %v1185_v63 = vsel %vm1181_vm1, %v1172_v27, %v11247_v59  ;;  %v1189_v7 = vsel %vm1181_vm1, %v8988_v38, %v1172_v27 }
 0x35b   : > { %v1289_v40 = vmul.f32 %v7726_v42, %v1189_v7  ;;  %v1290_v52 = vmul.f32 %v11169_v35, %v1185_v63  ;;  %v2655_v19 = vpop.permute.xlu0 %2654  ;;  %v3119_v13 = vadd.f32 %v3087_v23, %v2856_v34  ;;  %v9137_v62 = vadd.f32 %v2030_v31, %v1896_v49 }
 0x35c   : > { %v2663_v48 = vsel %vm2662_vm7, %v9071_v46, %v2655_v19  ;;  %v2691_v38 = vsel %vm2662_vm7, %v2655_v19, %v11248_v24  ;;  %v9139_v14 = vadd.f32 %v2031_v1, %v1897_v6  ;;  %v9155_v1 = vadd.f32 %v8873_v10, %v3118_v60 }
 0x35d   : > { %v1346_v42 = vmul.f32 %v11162_v57, %v1289_v40  ;;  %v1347_v35 = vmul.f32 %v11162_v57, %v1290_v52  ;;  %v2746_v8 = vmul.f32 %v9109_v17, %v2663_v48  ;;  %v9145_v9 = vpop.permute.xlu1 %1426  ;;  %v2747_v34 = vmul.f32 %v9125_v20, %v2691_v38  ;;  %v11251_v57 = vld [vmem:[#allocation27_spill] sm:$0xff]  ;;  %v11253_v40 = vld [vmem:[#allocation142_spill] sm:$0xff] }
 0x35e   : > { %v1456_v23 = vsel %vm1444_vm3, %v1419_v22, %v9145_v9  ;;  %v9152_v31 = vadd.f32 %v8873_v10, %v3119_v13  ;;  %11250 = vst [vmem:[#allocation203_spill] sm:$0xff] %v9155_v1  ;;  %v11252_v22 = vld [vmem:[#allocation11_spill] sm:$0xff]  ;;  %v9173_v7 = vrot.slane %v11245_v4, %v11181_v39  ;;  %v2671_v52 = vsel %vm2662_vm7, %v11253_v40, %v8997_v3  ;;  %v11258_v40 = vld [vmem:[#allocation45_spill] sm:$0xff] }
 0x35f   : > { %v9157_v15 = vadd.f32 %v1346_v42, %v1083_v53  ;;  %v9159_v41 = vadd.f32 %v1347_v35, %v1084_v29  ;;  %v2803_v49 = vmul.f32 %v11251_v57, %v2746_v8  ;;  %v1551_v6 = vmul.f32 %v7820_v56, %v1456_v23  ;;  %v9163_v27 = vpop.permute.xlu0 %2909  ;;  %v11255_v42 = vld [vmem:[#allocation85_spill] sm:$0xff]  ;;  %v11256_v23 = vld [vmem:[#allocation210_spill] sm:$0xff] }
 0x360   : > { %11249 = vst [vmem:[#allocation78_spill] sm:$0xff] %v9152_v31  ;;  %v2804_v59 = vmul.f32 %v11251_v57, %v2747_v34  ;;  %3464 = vmatprep.mubr.f32.mxu1 %v9152_v31  ;;  %v9169_v63 = vrot.slane %v11245_v4, %v11252_v22  ;;  %v11254_v4 = vld [vmem:[#allocation102_spill] sm:$0xff]  ;;  %v2667_v48 = vsel %vm2662_vm7, %v8997_v3, %v9071_v46 }
 0x361   : > { %v9175_v60 = vadd.f32 %v2803_v49, %v2572_v30  ;;  %v1608_v53 = vmul.f32 %v11176_v50, %v1551_v6  ;;  %3465 = vmatmul.mubr.f32.gmra.mrb[22].mxu1 %v9155_v1  ;;  %v2131_v56 = vpop.permute.xlu1 %2130  ;;  %v9212_v49 = vrot.slane %v11256_v23, %v11252_v22  ;;  %v11257_v6 = vld [vmem:[#allocation172_spill] sm:$0xff]  ;;  %v11266_v1 = vld [vmem:[#allocation165_spill] sm:$0xff] }
 0x362   : > { %v9183_v19 = vadd.f32 %v2804_v59, %v2573_v11  ;;  %v2138_v13 = vsel %vm2136_vm5, %v8984_v21, %v2131_v56  ;;  %v2166_v30 = vsel %vm2136_vm5, %v2131_v56, %v11254_v4  ;;  %v2744_v35 = vmul.f32 %v9169_v63, %v2671_v52 }
 0x363   : > { %v9196_v24 = vadd.f32 %v1608_v53, %v9010_v51  ;;  %v2228_v38 = vmul.f32 %v8822_v47, %v2138_v13  ;;  %v2229_v11 = vmul.f32 %v8826_v37, %v2166_v30  ;;  %v1682_v29 = vpop.permute.xlu0 %1681  ;;  %v2745_v51 = vmul.f32 %v9173_v7, %v2667_v48 }
 0x364   : > { %v1723_v21 = vsel %vm1707_vm4, %v11255_v42, %v1682_v29  ;;  %v1979_v59 = vmul.f32 %v11217_v25, %v11257_v6  ;;  %v2801_v4 = vmul.f32 %v11251_v57, %v2744_v35 }
 0x365   : > { %v2285_v8 = vmul.f32 %v11230_v12, %v2228_v38  ;;  %v2286_v34 = vmul.f32 %v11230_v12, %v2229_v11  ;;  %v1813_v46 = vmul.f32 %v11218_v33, %v1723_v21  ;;  %v9207_v3 = vpop.permute.xlu1 %2385  ;;  %v9223_v33 = vrot.slane %v11256_v23, %v11181_v39 }
 0x366   : > { %v2802_v48 = vmul.f32 %v11251_v57, %v2745_v51  ;;  %v2036_v38 = vmul.f32 %v11193_v55, %v1979_v59  ;;  %v11260_v57 = vld [vmem:[#allocation189_spill] sm:$0xff]  ;;  %v11263_v59 = vld [vmem:[#allocation175_spill] sm:$0xff] }
 0x367   : > { %v2317_v53 = vadd.f32 %v2285_v8, %v8802_v32  ;;  %v2318_v56 = vadd.f32 %v2286_v34, %v8804_v58  ;;  %v1870_v52 = vmul.f32 %v11258_v40, %v1813_v46  ;;  %v9219_v13 = vpop.permute.xlu0 %2116  ;;  %v11259_v58 = vld [vmem:[#allocation147_spill] sm:$0xff]  ;;  %v11261_v8 = vld [vmem:[#allocation197_spill] sm:$0xff] }
 0x368   : > { %v2833_v34 = vadd.f32 %v2801_v4, %v11261_v8  ;;  %v11262_v46 = vld [vmem:[#allocation29_spill] sm:$0xff] }
 0x369   : > { %v1902_v22 = vadd.f32 %v1870_v52, %v9092_v44  ;;  %v2902_v30 = vpop.permute.xlu1 %2901 }
 0x36a   : > { %v2930_v32 = vsel %vm2925_vm8, %v2902_v30, %v9163_v27  ;;  %v2934_v25 = vsel %vm2925_vm8, %v11259_v58, %v2902_v30 }
 0x36b   : > { %v3007_v39 = vmul.f32 %v9212_v49, %v2934_v25  ;;  %v3008_v11 = vmul.f32 %v9223_v33, %v2930_v32  ;;  %v2394_v42 = vpop.permute.xlu0 %2393  ;;  %v9243_v35 = vadd.f32 %v2036_v38, %v1902_v22  ;;  %v11264_v32 = vld [vmem:[#allocation167_spill] sm:$0xff]  ;;  %v11265_v25 = vld [vmem:[#allocation170_spill] sm:$0xff] }
 0x36c   : > { %v2401_v44 = vsel %vm2399_vm6, %v9207_v3, %v2394_v42  ;;  %v2429_v21 = vsel %vm2399_vm6, %v2394_v42, %v11260_v57  ;;  %v2834_v58 = vadd.f32 %v2802_v48, %v11264_v32  ;;  %v11267_v38 = vld [vmem:[#allocation43_spill] sm:$0xff]  ;;  %v11269_v57 = vld [vmem:[#allocation124_spill] sm:$0xff] }
 0x36d   : > { %v3064_v51 = vmul.f32 %v11262_v46, %v3007_v39  ;;  %v3065_v6 = vmul.f32 %v11262_v46, %v3008_v11  ;;  %v2491_v52 = vmul.f32 %v11263_v59, %v2401_v44  ;;  %v1435_v30 = vpop.permute.xlu1 %1434  ;;  %v2492_v31 = vmul.f32 %v11265_v25, %v2429_v21  ;;  %v11268_v42 = vld [vmem:[#allocation63_spill] sm:$0xff]  ;;  %v11270_v21 = vld [vmem:[#allocation93_spill] sm:$0xff] }
 0x36e   : > { %v1448_v10 = vsel %vm1444_vm3, %v1435_v30, %v11266_v1  ;;  %v1452_v22 = vsel %vm1444_vm3, %v9145_v9, %v1435_v30 }
 0x36f   : > { %v3096_v4 = vadd.f32 %v3064_v51, %v2833_v34  ;;  %v2548_v39 = vmul.f32 %v11267_v38, %v2491_v52  ;;  %v1552_v11 = vmul.f32 %v11268_v42, %v1452_v22  ;;  %v1553_v44 = vmul.f32 %v11269_v57, %v1448_v10  ;;  %v2649_v8 = vpop.permute.xlu0 %2648  ;;  %v11275_v42 = vld [vmem:[#allocation178_spill] sm:$0xff]  ;;  %v11276_v57 = vld [vmem:[#allocation95_spill] sm:$0xff] }
 0x370   : > { %v2549_v48 = vmul.f32 %v11267_v38, %v2492_v31  ;;  %v3097_v32 = vadd.f32 %v3065_v6, %v2834_v58  ;;  %v11271_v6 = vld [vmem:[#allocation130_spill] sm:$0xff] }
 0x371   : > { %v9262_v2 = vadd.f32 %v11270_v21, %v3096_v4  ;;  %v2580_v28 = vadd.f32 %v2548_v39, %v2317_v53  ;;  %v1609_v1 = vmul.f32 %v11176_v50, %v1552_v11  ;;  %v1610_v54 = vmul.f32 %v11176_v50, %v1553_v44  ;;  %v1690_v9 = vpop.permute.xlu1 %1689  ;;  %v11272_v53 = vld [vmem:[#allocation217_spill] sm:$0xff] }
 0x372   : > { %v2581_v34 = vadd.f32 %v2549_v48, %v2318_v56  ;;  %v1719_v51 = vsel %vm1707_vm4, %v1682_v29, %v1690_v9  ;;  %v9269_v52 = vadd.f32 %v11270_v21, %v3097_v32  ;;  %v11273_v29 = vld [vmem:[#allocation179_spill] sm:$0xff]  ;;  %v11274_v56 = vld [vmem:[#allocation17_spill] sm:$0xff]  ;;  %v1981_v11 = vmul.f32 %v11240_v61, %v11275_v42 }
 0x373   : > { %v1641_v10 = vadd.f32 %v1609_v1, %v9157_v15  ;;  %v1642_v31 = vadd.f32 %v1610_v54, %v9159_v41  ;;  %v1814_v30 = vmul.f32 %v11271_v6, %v1719_v51  ;;  %v1698_v58 = vpop.permute.xlu0 %1697  ;;  %v1980_v4 = vmul.f32 %v11274_v56, %v11273_v29  ;;  %v11281_v42 = vld [vmem:[#allocation77_spill] sm:$0xff] }
 0x374   : > { %v1711_v22 = vsel %vm1707_vm4, %v1698_v58, %v11272_v53  ;;  %v1715_v50 = vsel %vm1707_vm4, %v1690_v9, %v1698_v58  ;;  %3534 = vmatprep.mubr.f32.mxu0 %v9269_v52  ;;  %v1982_v44 = vmul.f32 %v11242_v16, %v11276_v57  ;;  %v2038_v61 = vmul.f32 %v11193_v55, %v1981_v11  ;;  %v11277_v16 = vld [vmem:[#allocation108_spill] sm:$0xff]  ;;  %v11278_v53 = vld [vmem:[#allocation151_spill] sm:$0xff]  ;;  %v11282_v57 = vld [vmem:[#allocation58_spill] sm:$0xff] }
 0x375   : > { %v1871_v39 = vmul.f32 %v11258_v40, %v1814_v30  ;;  %v1815_v15 = vmul.f32 %v11154_v36, %v1715_v50  ;;  %v1816_v54 = vmul.f32 %v11157_v0, %v1711_v22  ;;  %3535 = vmatmul.mubr.f32.vlgmr.msra.gmra.mrb[24].mxu0 %v9262_v2  ;;  %v9286_v41 = vpop.permute.xlu1 %2124  ;;  %v2037_v0 = vmul.f32 %v11193_v55, %v1980_v4  ;;  %v11279_v50 = vld [vmem:[#allocation65_spill] sm:$0xff] }
 0x376   : > { %v2039_v58 = vmul.f32 %v11193_v55, %v1982_v44  ;;  %v2409_v44 = vsel %vm2399_vm6, %v11282_v57, %v9105_v45 }
 0x377   : > { %v1903_v48 = vadd.f32 %v1871_v39, %v9196_v24  ;;  %v1872_v32 = vmul.f32 %v11258_v40, %v1815_v15  ;;  %v1873_v1 = vmul.f32 %v11258_v40, %v1816_v54  ;;  %v9295_v9 = vpop.permute.xlu0 %2379  ;;  %v2146_v24 = vsel %vm2136_vm5, %v11278_v53, %v11277_v16 }
 0x378   : > { %v2405_v40 = vsel %vm2399_vm6, %v9105_v45, %v9207_v3 }
 0x379   : > { %v1904_v36 = vadd.f32 %v1872_v32, %v1641_v10  ;;  %v1905_v51 = vadd.f32 %v1873_v1, %v1642_v31  ;;  %v2641_v6 = vpop.permute.xlu1 %2640  ;;  %v9298_v30 = vadd.f32 %v2037_v0, %v1903_v48  ;;  %v9312_v10 = vrot.slane %v11256_v23, %v11172_v43  ;;  %v11280_v43 = vld [vmem:[#allocation201_spill] sm:$0xff]  ;;  %v11283_v48 = vld [vmem:[#allocation87_spill] sm:$0xff] }
 0x37a   : > { %v9316_v31 = vrot.slane %v11256_v23, %v11174_v5  ;;  %v2226_v15 = vmul.f32 %v11280_v43, %v2146_v24  ;;  %v4946_v5 = vpop.f32.mrb[16].mxu1  ;;  %v2490_v32 = vmul.f32 %v11283_v48, %v2405_v40  ;;  %v11284_v1 = vld [vmem:[#allocation47_spill] sm:$0xff] }
 0x37b   : > { %v2657_v22 = vpop.permute.xlu0 %2656  ;;  %v9323_v56 = vadd.f32 %v2038_v61, %v1904_v36  ;;  %v9325_v4 = vadd.f32 %v2039_v58, %v1905_v51  ;;  %v4902_v51 = vpop.f32.mrb[16].mxu0  ;;  %v11285_v58 = vld [vmem:[#allocation52_spill] sm:$0xff] }
 0x37c   : > { %v2664_v55 = vsel %vm2662_vm7, %v2649_v8, %v2657_v22  ;;  %v2692_v29 = vsel %vm2662_vm7, %v2657_v22, %v11279_v50  ;;  %v2672_v16 = vsel %vm2662_vm7, %v11285_v58, %v2641_v6  ;;  %v4903_v45 = vpop.f32.mrb[17].mxu0  ;;  %v4947_v22 = vpop.f32.mrb[17].mxu1  ;;  %v11288_v58 = vld [vmem:[#allocation46_spill] sm:$0xff] }
 0x37d   : > { %v2754_v3 = vmul.f32 %v9109_v17, %v2664_v55  ;;  %v2918_v39 = vpop.permute.xlu1 %2917  ;;  %v2755_v54 = vmul.f32 %v9125_v20, %v2692_v29  ;;  %v4904_v50 = vadd.f32 %v4903_v45, %v4902_v51  ;;  %v4948_v29 = vadd.f32 %v4947_v22, %v4946_v5 }
 0x37e   : > { %v2926_v23 = vsel %vm2925_vm8, %v9163_v27, %v2918_v39  ;;  %v2954_v11 = vsel %vm2925_vm8, %v2918_v39, %v11281_v42  ;;  %v2668_v27 = vsel %vm2662_vm7, %v2641_v6, %v2649_v8  ;;  %v2283_v45 = vmul.f32 %v11230_v12, %v2226_v15  ;;  %v11289_v15 = vld [vmem:[#allocation88_spill] sm:$0xff] }
 0x37f   : > { %v2811_v0 = vmul.f32 %v11284_v1, %v2754_v3  ;;  %v3009_v36 = vmul.f32 %v9312_v10, %v2926_v23  ;;  %v2912_v61 = vpop.permute.xlu0 %2911  ;;  %v2812_v53 = vmul.f32 %v11284_v1, %v2755_v54  ;;  %v3010_v24 = vmul.f32 %v9316_v31, %v2954_v11  ;;  %v11286_v23 = vld [vmem:[#allocation75_spill] sm:$0xff] }
 0x380   : > { %v2752_v22 = vmul.f32 %v9169_v63, %v2672_v16  ;;  %v2315_v16 = vadd.f32 %v2283_v45, %v11289_v15 }
 0x381   : > { %v9350_v40 = vadd.f32 %v2811_v0, %v2580_v28  ;;  %v3066_v55 = vmul.f32 %v11262_v46, %v3009_v36  ;;  %v2133_v3 = vpop.permute.xlu1 %2132  ;;  %v2844_v39 = vadd.f32 %v2812_v53, %v2581_v34  ;;  %v3067_v8 = vmul.f32 %v11262_v46, %v3010_v24  ;;  %v11287_v34 = vld [vmem:[#allocation149_spill] sm:$0xff] }
 0x382   : > { %v2139_v6 = vsel %vm2136_vm5, %v9286_v41, %v2133_v3  ;;  %v2167_v54 = vsel %vm2136_vm5, %v2133_v3, %v11286_v23  ;;  %v9361_v28 = vadd.f32 %v4948_v29, %v4904_v50  ;;  %v2489_v46 = vmul.f32 %v11287_v34, %v2409_v44 }
 0x383   : > { %v3098_v42 = vadd.f32 %v3066_v55, %v9175_v60  ;;  %v2236_v11 = vmul.f32 %v8822_v47, %v2139_v6  ;;  %v2237_v5 = vmul.f32 %v8826_v37, %v2167_v54  ;;  %v9365_v57 = vpop.permute.xlu0 %2126  ;;  %v3099_v0 = vadd.f32 %v3067_v8, %v9183_v19  ;;  %v11291_v8 = vld [vmem:[#allocation107_spill] sm:$0xff] }
 0x384   : > { %v2753_v36 = vmul.f32 %v9173_v7, %v2668_v27  ;;  %v2547_v19 = vmul.f32 %v11267_v38, %v2490_v32  ;;  %v2546_v29 = vmul.f32 %v11267_v38, %v2489_v46  ;;  %v2809_v32 = vmul.f32 %v11284_v1, %v2752_v22  ;;  %v11293_v46 = vld [vmem:[#allocation24_spill] sm:$0xff] }
 0x385   : > { %v9371_v51 = vadd.f32 %v11270_v21, %v3098_v42  ;;  %v2293_v53 = vmul.f32 %v11288_v58, %v2236_v11  ;;  %v2294_v60 = vmul.f32 %v11288_v58, %v2237_v5  ;;  %v9375_v24 = vpop.permute.xlu1 %2387  ;;  %v9380_v55 = vadd.f32 %v11270_v21, %v3099_v0  ;;  %v11292_v11 = vld [vmem:[#allocation57_spill] sm:$0xff] }
 0x386   : > { %v2810_v12 = vmul.f32 %v11284_v1, %v2753_v36  ;;  %v2579_v38 = vadd.f32 %v2547_v19, %v11291_v8  ;;  %v2578_v42 = vadd.f32 %v2546_v29, %v2315_v16  ;;  %v2147_v1 = vsel %vm2136_vm5, %v11292_v11, %v9219_v13 }
 0x387   : > { %v9384_v44 = vadd.f32 %v2293_v53, %v9137_v62  ;;  %v9387_v27 = vadd.f32 %v2294_v60, %v9139_v14  ;;  %v9389_v50 = vpop.permute.xlu0 %2642  ;;  %3619 = vmatprep.mubr.f32.mxu1 %v9380_v55  ;;  %v11290_v14 = vld [vmem:[#allocation61_spill] sm:$0xff]  ;;  %v2234_v15 = vmul.f32 %v11280_v43, %v2147_v1 }
 0x388   : > { %3620 = vmatmul.mubr.f32.vlgmr.msra.gmra.mrb[24].mxu1 %v9371_v51  ;;  %v2842_v36 = vadd.f32 %v2810_v12, %v2579_v38  ;;  %v11294_v53 = vld [vmem:[#allocation177_spill] sm:$0xff]  ;;  %v2841_v29 = vadd.f32 %v2809_v32, %v2578_v42  ;;  %v2143_v12 = vsel %vm2136_vm5, %v9219_v13, %v9286_v41 }
 0x389   : > { %v2904_v21 = vpop.permute.xlu1 %2903  ;;  %v11297_v42 = vld [vmem:[#allocation97_spill] sm:$0xff] }
 0x38a   : > { %v2931_v62 = vsel %vm2925_vm8, %v2904_v21, %v2912_v61  ;;  %v2935_v3 = vsel %vm2925_vm8, %v11290_v14, %v2904_v21 }
 0x38b   : > { %v3015_v6 = vmul.f32 %v9212_v49, %v2935_v3  ;;  %v3016_v23 = vmul.f32 %v9223_v33, %v2931_v62  ;;  %v2920_v54 = vpop.permute.xlu0 %2919  ;;  %v11295_v3 = vld [vmem:[#allocation119_spill] sm:$0xff]  ;;  %v4905_v41 = vpop.f32.mrb[18].mxu0 }
 0x38c   : > { %v2927_v5 = vsel %vm2925_vm8, %v2912_v61, %v2920_v54  ;;  %v2955_v0 = vsel %vm2925_vm8, %v2920_v54, %v11293_v46  ;;  %v2410_v32 = vsel %vm2399_vm6, %v11295_v3, %v9295_v9  ;;  %v11298_v46 = vld [vmem:[#allocation218_spill] sm:$0xff] }
 0x38d   : > { %v3072_v60 = vmul.f32 %v11294_v53, %v3015_v6  ;;  %v3073_v45 = vmul.f32 %v11294_v53, %v3016_v23  ;;  %v3017_v22 = vmul.f32 %v9312_v10, %v2927_v5  ;;  %v9417_v19 = vpop.permute.xlu1 %2118  ;;  %v3018_v21 = vmul.f32 %v9316_v31, %v2955_v0  ;;  %v11296_v6 = vld [vmem:[#allocation112_spill] sm:$0xff] }
 0x38e   : > { %v2291_v5 = vmul.f32 %v11288_v58, %v2234_v15  ;;  %v2235_v0 = vmul.f32 %v11298_v46, %v2143_v12  ;;  %v2497_v12 = vmul.f32 %v11287_v34, %v2410_v32 }
 0x38f   : > { %v9421_v16 = vpop.permute.xlu0 %2381  ;;  %v3105_v61 = vadd.f32 %v3073_v45, %v2842_v36  ;;  %v3075_v62 = vmul.f32 %v11294_v53, %v3018_v21  ;;  %v3104_v14 = vadd.f32 %v3072_v60, %v2841_v29  ;;  %v3074_v8 = vmul.f32 %v11294_v53, %v3017_v22  ;;  %v11299_v36 = vld [vmem:[#allocation173_spill] sm:$0xff]  ;;  %v4906_v22 = vpop.f32.mrb[19].mxu0 }
 0x390   : > { %v2148_v53 = vsel %vm2136_vm5, %v11299_v36, %v9417_v19  ;;  %v11300_v21 = vld [vmem:[#allocation169_spill] sm:$0xff]  ;;  %v9457_v15 = vadd.f32 %v4906_v22, %v4905_v41  ;;  %v11303_v36 = vld [vmem:[#allocation162_spill] sm:$0xff]  ;;  %v2292_v22 = vmul.f32 %v11288_v58, %v2235_v0 }
 0x391   : > { %v2396_v38 = vpop.permute.xlu1 %2395  ;;  %v9434_v23 = vadd.f32 %v11296_v6, %v3105_v61  ;;  %v9443_v11 = vadd.f32 %v11296_v6, %v3104_v14  ;;  %v3107_v1 = vadd.f32 %v3075_v62, %v2844_v39  ;;  %v11301_v62 = vld [vmem:[#allocation49_spill] sm:$0xff] }
 0x392   : > { %v2402_v54 = vsel %vm2399_vm6, %v9375_v24, %v2396_v38  ;;  %v2430_v13 = vsel %vm2399_vm6, %v2396_v38, %v11297_v42  ;;  %v3106_v38 = vadd.f32 %v3074_v8, %v9350_v40  ;;  %v2406_v42 = vsel %vm2399_vm6, %v9295_v9, %v9375_v24 }
 0x393   : > { %v2499_v60 = vmul.f32 %v11263_v59, %v2402_v54  ;;  %v2659_v45 = vpop.permute.xlu0 %2658  ;;  %3539 = vmatprep.mubr.f32.mxu0 %v9434_v23  ;;  %v2500_v29 = vmul.f32 %v11265_v25, %v2430_v13  ;;  %v9461_v61 = vadd.f32 %v11296_v6, %v3107_v1  ;;  %v11302_v13 = vld [vmem:[#allocation53_spill] sm:$0xff]  ;;  %v2242_v40 = vmul.f32 %v11280_v43, %v2148_v53 }
 0x394   : > { %v2693_v39 = vsel %vm2662_vm7, %v2659_v45, %v11300_v21  ;;  %3540 = vmatmul.mubr.f32.gmra.mrb[26].mxu0 %v9443_v11  ;;  %v2673_v41 = vsel %vm2662_vm7, %v11302_v13, %v9389_v50  ;;  %v9483_v9 = vadd.f32 %v11296_v6, %v3106_v38  ;;  %v11304_v21 = vld [vmem:[#allocation121_spill] sm:$0xff]  ;;  %v2554_v43 = vmul.f32 %v11301_v62, %v2497_v12  ;;  %v11306_v38 = vld [vmem:[#allocation51_spill] sm:$0xff] }
 0x395   : > { %v2556_v14 = vmul.f32 %v11301_v62, %v2499_v60  ;;  %v2763_v3 = vmul.f32 %v9125_v20, %v2693_v39  ;;  %v2651_v54 = vpop.permute.xlu1 %2650  ;;  %v2557_v1 = vmul.f32 %v11301_v62, %v2500_v29  ;;  %3624 = vmatprep.mubr.f32.mxu1 %v9461_v61  ;;  %v2411_v29 = vsel %vm2399_vm6, %v11304_v21, %v9421_v16 }
 0x396   : > { %v2665_v32 = vsel %vm2662_vm7, %v2651_v54, %v2659_v45  ;;  %v2760_v53 = vmul.f32 %v9169_v63, %v2673_v41  ;;  %3625 = vmatmul.mubr.f32.gmra.mrb[26].mxu1 %v9483_v9  ;;  %v2669_v58 = vsel %vm2662_vm7, %v9389_v50, %v2651_v54  ;;  %v2505_v13 = vmul.f32 %v11287_v34, %v2411_v29 }
 0x397   : > { %v2588_v8 = vadd.f32 %v2556_v14, %v9384_v44  ;;  %v2820_v60 = vmul.f32 %v11303_v36, %v2763_v3  ;;  %v2914_v24 = vpop.permute.xlu0 %2913  ;;  %v2589_v39 = vadd.f32 %v2557_v1, %v9387_v27  ;;  %v2762_v45 = vmul.f32 %v9109_v17, %v2665_v32  ;;  %v11305_v3 = vld [vmem:[#allocation134_spill] sm:$0xff]  ;;  %v11307_v1 = vld [vmem:[#allocation116_spill] sm:$0xff] }
 0x398   : > { %v2498_v44 = vmul.f32 %v11283_v48, %v2406_v42  ;;  %v2299_v42 = vmul.f32 %v11306_v38, %v2242_v40  ;;  %v2323_v32 = vadd.f32 %v2291_v5, %v11307_v1  ;;  %v2817_v34 = vmul.f32 %v11303_v36, %v2760_v53 }
 0x399   : > { %v2135_v6 = vpop.permute.xlu1 %2134  ;;  %v2852_v0 = vadd.f32 %v2820_v60, %v2589_v39  ;;  %v2819_v14 = vmul.f32 %v11303_v36, %v2762_v45  ;;  %v2761_v60 = vmul.f32 %v9173_v7, %v2669_v58  ;;  %v11308_v39 = vld [vmem:[#allocation56_spill] sm:$0xff] }
 0x39a   : > { %v2140_v27 = vsel %vm2136_vm5, %v9365_v57, %v2135_v6  ;;  %v2168_v12 = vsel %vm2136_vm5, %v2135_v6, %v11305_v3  ;;  %v2555_v40 = vmul.f32 %v11301_v62, %v2498_v44  ;;  %v2324_v6 = vadd.f32 %v2292_v22, %v9073_v18 }
 0x39b   : > { %v2244_v41 = vmul.f32 %v8822_v47, %v2140_v27  ;;  %v2245_v50 = vmul.f32 %v8826_v37, %v2168_v12  ;;  %v9510_v54 = vpop.permute.xlu0 %2644  ;;  %v2851_v21 = vadd.f32 %v2819_v14, %v2588_v8  ;;  %v2586_v5 = vadd.f32 %v2554_v43, %v2323_v32  ;;  %v11309_v14 = vld [vmem:[#allocation98_spill] sm:$0xff] }
 0x39c   : > { %v2674_v45 = vsel %vm2662_vm7, %v11308_v39, %v9510_v54  ;;  %v2331_v8 = vadd.f32 %v2299_v42, %v9243_v35  ;;  %v2562_v27 = vmul.f32 %v11309_v14, %v2505_v13  ;;  %v2818_v53 = vmul.f32 %v11303_v36, %v2761_v60  ;;  %v11313_v60 = vld [vmem:[#allocation110_spill] sm:$0xff] }
 0x39d   : > { %v2301_v47 = vmul.f32 %v11306_v38, %v2244_v41  ;;  %v2302_v37 = vmul.f32 %v11306_v38, %v2245_v50  ;;  %v2390_v29 = vpop.permute.xlu1 %2389  ;;  %v2768_v58 = vmul.f32 %v9169_v63, %v2674_v45  ;;  %v11310_v41 = vld [vmem:[#allocation155_spill] sm:$0xff]  ;;  %v2587_v22 = vadd.f32 %v2555_v40, %v2324_v6  ;;  %v11312_v50 = vld [vmem:[#allocation146_spill] sm:$0xff] }
 0x39e   : > { %v2849_v63 = vadd.f32 %v2817_v34, %v2586_v5  ;;  %v2594_v32 = vadd.f32 %v2562_v27, %v2331_v8 }
 0x39f   : > { %v2333_v3 = vadd.f32 %v2301_v47, %v9323_v56  ;;  %v2334_v62 = vadd.f32 %v2302_v37, %v9325_v4  ;;  %v2922_v44 = vpop.permute.xlu0 %2921  ;;  %v2144_v56 = vsel %vm2136_vm5, %v9417_v19, %v9365_v57  ;;  %v11311_v4 = vld [vmem:[#allocation171_spill] sm:$0xff]  ;;  %v2850_v47 = vadd.f32 %v2818_v53, %v2587_v22 }
 0x3a0   : > { %v2928_v12 = vsel %vm2925_vm8, %v2914_v24, %v2922_v44  ;;  %v2956_v18 = vsel %vm2925_vm8, %v2922_v44, %v11310_v41  ;;  %v2825_v36 = vmul.f32 %v11311_v4, %v2768_v58  ;;  %v2407_v57 = vsel %vm2399_vm6, %v9421_v16, %v2390_v29  ;;  %v11315_v16 = vld [vmem:[#allocation86_spill] sm:$0xff] }
 0x3a1   : > { %v3025_v35 = vmul.f32 %v9312_v10, %v2928_v12  ;;  %v3026_v43 = vmul.f32 %v9316_v31, %v2956_v18  ;;  %v2906_v42 = vpop.permute.xlu1 %2905  ;;  %v11316_v18 = vld [vmem:[#allocation70_spill] sm:$0xff] }
 0x3a2   : > { %v2932_v13 = vsel %vm2925_vm8, %v2906_v42, %v2914_v24  ;;  %v2936_v1 = vsel %vm2925_vm8, %v11312_v50, %v2906_v42  ;;  %v11314_v24 = vld [vmem:[#allocation111_spill] sm:$0xff]  ;;  %v2857_v44 = vadd.f32 %v2825_v36, %v2594_v32 }
 0x3a3   : > { %v3082_v39 = vmul.f32 %v11313_v60, %v3025_v35  ;;  %v3083_v45 = vmul.f32 %v11313_v60, %v3026_v43  ;;  %v3023_v40 = vmul.f32 %v9212_v49, %v2936_v1  ;;  %v2908_v34 = vpop.permute.xlu0 %2907  ;;  %v3024_v19 = vmul.f32 %v9223_v33, %v2932_v13 }
 0x3a4   : > { %v2937_v37 = vsel %vm2925_vm8, %v11314_v24, %v2908_v34 }
 0x3a5   : > { %v3080_v6 = vmul.f32 %v11313_v60, %v3023_v40  ;;  %v3031_v5 = vmul.f32 %v9212_v49, %v2937_v37  ;;  %v2398_v58 = vpop.permute.xlu1 %2397  ;;  %v3115_v8 = vadd.f32 %v3083_v45, %v2852_v0  ;;  %v3114_v27 = vadd.f32 %v3082_v39, %v2851_v21  ;;  %v11317_v49 = vld [vmem:[#allocation144_spill] sm:$0xff] }
 0x3a6   : > { %v3081_v53 = vmul.f32 %v11313_v60, %v3024_v19  ;;  %v2403_v12 = vsel %vm2399_vm6, %v2390_v29, %v2398_v58  ;;  %v2431_v41 = vsel %vm2399_vm6, %v2398_v58, %v11315_v16  ;;  %v2243_v0 = vmul.f32 %v11298_v46, %v2144_v56  ;;  %v11318_v45 = vld [vmem:[#allocation100_spill] sm:$0xff] }
 0x3a7   : > { %v3088_v22 = vmul.f32 %v11316_v18, %v3031_v5  ;;  %v2507_v35 = vmul.f32 %v11263_v59, %v2403_v12  ;;  %v2508_v43 = vmul.f32 %v11265_v25, %v2431_v41  ;;  %v9568_v42 = vadd.f32 %v11317_v49, %v3115_v8  ;;  %v2924_v21 = vpop.permute.xlu0 %2923 }
 0x3a8   : > { %v9572_v36 = vadd.f32 %v11317_v49, %v3114_v27  ;;  %v3113_v29 = vadd.f32 %v3081_v53, %v2850_v47  ;;  %v3112_v13 = vadd.f32 %v3080_v6, %v2849_v63  ;;  %v2506_v25 = vmul.f32 %v11283_v48, %v2407_v57 }
 0x3a9   : > { %v2564_v50 = vmul.f32 %v11309_v14, %v2507_v35  ;;  %v2565_v1 = vmul.f32 %v11309_v14, %v2508_v43  ;;  %3629 = vmatprep.mubr.f32.mxu1 %v9568_v42  ;;  %v2653_v59 = vpop.permute.xlu1 %2652  ;;  %v3120_v32 = vadd.f32 %v3088_v22, %v2857_v44  ;;  %v2957_v40 = vsel %vm2925_vm8, %v2924_v21, %v11318_v45 }
 0x3aa   : > { %3630 = vmatmul.mubr.f32.gmra.mrb[28].mxu1 %v9572_v36  ;;  %v2670_v46 = vsel %vm2662_vm7, %v9510_v54, %v2653_v59  ;;  %v9583_v56 = vadd.f32 %v11317_v49, %v3113_v29  ;;  %v9586_v63 = vadd.f32 %v11317_v49, %v3112_v13  ;;  %v2300_v48 = vmul.f32 %v11306_v38, %v2243_v0  ;;  %v11320_v49 = vld [vmem:[#allocation64_spill] sm:$0xff] }
 0x3ab   : > { %v2596_v60 = vadd.f32 %v2564_v50, %v2333_v3  ;;  %v2597_v39 = vadd.f32 %v2565_v1, %v2334_v62  ;;  %v2769_v47 = vmul.f32 %v9173_v7, %v2670_v46  ;;  %v2563_v57 = vmul.f32 %v11309_v14, %v2506_v25  ;;  %v11319_v62 = vld [vmem:[#allocation103_spill] sm:$0xff] }
 0x3ac   : > { %3544 = vmatprep.mubr.f32.mxu0 %v9583_v56  ;;  %v3034_v19 = vmul.f32 %v9316_v31, %v2957_v40  ;;  %v2332_v7 = vadd.f32 %v2300_v48, %v9298_v30  ;;  %v5378_v50 = vmov 0.0|0.0  }
 0x3ad   : > { %3545 = vmatmul.mubr.f32.gmra.mrb[28].mxu0 %v9586_v63  ;;  %v2661_v54 = vpop.permute.xlu1 %2660  ;;  %v2826_v6 = vmul.f32 %v11311_v4, %v2769_v47  ;;  %5203 = vmatprep.subr.bf16.mxu0 %v5378_v50 }
 0x3ae   : > { %v2666_v3 = vsel %vm2662_vm7, %v2653_v59, %v2661_v54  ;;  %v2694_v24 = vsel %vm2662_vm7, %v2661_v54, %v11319_v62  ;;  %v2595_v58 = vadd.f32 %v2563_v57, %v2332_v7  ;;  %v3091_v8 = vmul.f32 %v11316_v18, %v3034_v19 }
 0x3af   : > { %v2770_v38 = vmul.f32 %v9109_v17, %v2666_v3  ;;  %v2771_v37 = vmul.f32 %v9125_v20, %v2694_v24 }
 0x3b0   : > { %v4949_v12 = vpop.f32.mrb[18].mxu1  ;;  %v2858_v16 = vadd.f32 %v2826_v6, %v2595_v58 }
 0x3b1   : > { %v2827_v5 = vmul.f32 %v11311_v4, %v2770_v38  ;;  %v2828_v14 = vmul.f32 %v11311_v4, %v2771_v37  ;;  %v2916_v31 = vpop.permute.xlu1 %2915  ;;  %v4950_v22 = vpop.f32.mrb[19].mxu1 }
 0x3b2   : > { %v2929_v27 = vsel %vm2925_vm8, %v2916_v31, %v2924_v21  ;;  %v2933_v17 = vsel %vm2925_vm8, %v2908_v34, %v2916_v31  ;;  %v4951_v43 = vadd.f32 %v4950_v22, %v4949_v12 }
 0x3b3   : > { %v2859_v44 = vadd.f32 %v2827_v5, %v2596_v60  ;;  %v2860_v20 = vadd.f32 %v2828_v14, %v2597_v39  ;;  %v3032_v30 = vmul.f32 %v9223_v33, %v2933_v17  ;;  %v3033_v53 = vmul.f32 %v9312_v10, %v2929_v27 }
 0x3b4   : > { %v3457_v21 = vadd.f32 %v4951_v43, %v9457_v15 }
 0x3b5   : > { %v3089_v4 = vmul.f32 %v11316_v18, %v3032_v30  ;;  %v3090_v41 = vmul.f32 %v11316_v18, %v3033_v53  ;;  %v3123_v35 = vadd.f32 %v3091_v8, %v2860_v20  ;;  %v9629_v18 = vadd.f32 %v11320_v49, %v3120_v32 }
 0x3b6   : > { %v5380_v32 = vmov 0.0  }
 0x3b7   : > { %v9618_v0 = vadd.f32 %v11320_v49, %v3123_v35  ;;  %v3121_v26 = vadd.f32 %v3089_v4, %v2858_v16  ;;  %v3122_v34 = vadd.f32 %v3090_v41, %v2859_v44 }
 0x3b9   : > { %11321 = vst [vmem:[#allocation129_spill] sm:$0xff] %v9618_v0  ;;  %3634 = vmatprep.mubr.f32.mxu1 %v9618_v0  ;;  %v9623_v33 = vadd.f32 %v11320_v49, %v3121_v26  ;;  %v9626_v10 = vadd.f32 %v11320_v49, %v3122_v34 }
 0x3bb   : > { %11322 = vst [vmem:[#allocation72_spill] sm:$0xff] %v9623_v33  ;;  %11323 = vst [vmem:[#allocation31_spill] sm:$0xff] %v9626_v10  ;;  %3549 = vmatprep.mubr.f32.mxu0 %v9623_v33  ;;  %3635 = vmatmul.mubr.f32.gmra.mrb[30].mxu1 %v9626_v10 }
 0x3bc   : > { %3550 = vmatmul.mubr.f32.gmra.mrb[30].mxu0 %v9629_v18 }
 0x3bd   : > { %5064 = vmatprep.mubr.msk.f32.mxu0 %vm5379_vm9, %v5380_v32 }
 0x3db   : > { %v4908_v29 = vpop.f32.mrb[20].mxu0 }
 0x3dc   : > { %v4909_v13 = vpop.f32.mrb[21].mxu0 }
 0x3dd   : > { %v4910_v15 = vadd.f32 %v4909_v13, %v4908_v29 }
 0x3f9   : > { %v4952_v1 = vpop.f32.mrb[20].mxu1 }
 0x3fa   : > { %v4953_v59 = vpop.f32.mrb[21].mxu1 }
 0x3fb   : > { %v4954_v25 = vadd.f32 %v4953_v59, %v4952_v1  ;;  %v5381_v1 = vmov 2   ;;  %v5284_v59 = vld [vmem:[%s9996_s3] sm:$0xff] }
 0x3fc   : > { %5269 = vset.pattern.permute.xlu0 %v5381_v1  ;;  %5270 = vset.pattern.permute.xlu1 %v5381_v1 }
 0x3fd   : > { %v3462_v46 = vadd.f32 %v4954_v25, %v4910_v15  ;;  %v3640_v15 = vld [vmem:[%s10000_s7] sm:$0xff]  ;;  %3727 = vperm.xlu0 %5269, %v5284_v59   ;;  %v5285_v25 = vld [vmem:[%s9996_s3 + $0x8] sm:$0xff] }
 0x3fe   : > { %3731 = vperm.xlu1 %5270, %v5285_v25  }
 0x416   : > { %v4911_v60 = vpop.f32.mrb[22].mxu0 }
 0x417   : > { %v4912_v39 = vpop.f32.mrb[23].mxu0 }
 0x418   : > { %v4913_v45 = vadd.f32 %v4912_v39, %v4911_v60  ;;  %v5287_v60 = vld [vmem:[%s9996_s3 + $0x18] sm:$0xff]  ;;  %v11324_v39 = vmov 0  }
 0x419   : > { %3739 = vperm.xlu0 %5269, %v5287_v60   ;;  %v4464_v60 = vld [vmem:[%s10004_s11] sm:$0xff] }
 0x41d   : > { %5272 = vset.pattern.permute.xlu0 %v11324_v39 }
 0x434   : > { %v4955_v40 = vpop.f32.mrb[22].mxu1 }
 0x435   : > { %v4956_v48 = vpop.f32.mrb[23].mxu1 }
 0x436   : > { %v4957_v47 = vadd.f32 %v4956_v48, %v4955_v40 }
 0x438   : > { %v3467_v54 = vadd.f32 %v4957_v47, %v4913_v45  ;;  %v3645_v45 = vpop.permute.xlu1 %3644 }
 0x448   : > { %v4990_v57 = vpop.f32.mrb[24].mxu0 }
 0x449   : > { %v4991_v19 = vpop.f32.mrb[25].mxu0 }
 0x44a   : > { %v4992_v3 = vadd.f32 %v4991_v19, %v4990_v57  ;;  %v3723_v57 = vld [vmem:[%s10002_s9 + $0x8] sm:$0xff]  ;;  %v3724_v19 = vld [vmem:[%s10002_s9 + $0x10] sm:$0xff] }
 0x44c   : > { %v3537_v62 = vadd.f32 %v4992_v3, %v9361_v28  ;;  %v3725_v3 = vld [vmem:[%s10002_s9 + $0x18] sm:$0xff] }
 0x45b   : > { %v5034_v24 = vpop.f32.mrb[24].mxu1 }
 0x45c   : > { %v5035_v38 = vpop.f32.mrb[25].mxu1 }
 0x45d   : > { %v5036_v37 = vadd.f32 %v5035_v38, %v5034_v24  ;;  %v3857_v24 = vld [vmem:[%s9999_s6 + $0x8] sm:$0xff] }
 0x45f   : > { %v3622_v7 = vadd.f32 %v5036_v37, %v3537_v62  ;;  %v3856_v62 = vld [vmem:[%s9999_s6] sm:$0xff]  ;;  %v3865_v37 = vcombine.high %v3857_v24, %v3857_v24 }
 0x460   : > { %v3864_v38 = vcombine.high %v3856_v62, %v3856_v62 }
 0x467   : > { %v4993_v6 = vpop.f32.mrb[26].mxu0 }
 0x468   : > { %v4994_v5 = vpop.f32.mrb[27].mxu0 }
 0x469   : > { %v4995_v14 = vadd.f32 %v4994_v5, %v4993_v6  ;;  %v5037_v58 = vpop.f32.mrb[26].mxu1  ;;  %v3859_v6 = vld [vmem:[%s9999_s6 + $0x18] sm:$0xff] }
 0x46a   : > { %v5038_v8 = vpop.f32.mrb[27].mxu1 }
 0x46b   : > { %v3542_v31 = vadd.f32 %v4995_v14, %v3457_v21  ;;  %v5039_v27 = vadd.f32 %v5038_v8, %v5037_v58  ;;  %v3867_v14 = vcombine.high %v3859_v6, %v3859_v6 }
 0x46d   : > { %v3627_v17 = vadd.f32 %v5039_v27, %v3542_v31 }
 0x46f   : > { %v5204_v44 = vpack.c.bf16 %v3627_v17, %v3622_v7  ;;  %v3858_v7 = vld [vmem:[%s9999_s6 + $0x10] sm:$0xff] }
 0x470   : > { %v3866_v5 = vcombine.high %v3858_v7, %v3858_v7 }
 0x471   : > { %5205 = vmatpush3.bf16.msra.mxu0 %v5204_v44 }
 0x472   : > { %5206 = vmatprep.subr.bf16.mxu0 %v5378_v50  ;;  %v3722_v50 = vld [vmem:[%s10002_s9] sm:$0xff] }
 0x473   : > { %5069 = vmatprep.mubr.msk.f32.mxu1 %vm3742_vm11, %v3722_v50 }
 0x47c   : > { %v3728_v58 = vpop.permute.xlu0 %3727 }
 0x47d   : > { %v5040_v20 = vpop.f32.mrb[28].mxu1  ;;  %v3732_v31 = vpop.permute.xlu1 %3731 }
 0x47e   : > { %v5041_v30 = vpop.f32.mrb[29].mxu1 }
 0x47f   : > { %v5042_v53 = vadd.f32 %v5041_v30, %v5040_v20 }
 0x480   : > { %v4996_v12 = vpop.f32.mrb[28].mxu0 }
 0x481   : > { %v4997_v28 = vpop.f32.mrb[29].mxu0 }
 0x482   : > { %v4998_v16 = vadd.f32 %v4997_v28, %v4996_v12 }
 0x484   : > { %v3547_v4 = vadd.f32 %v4998_v16, %v3462_v46  ;;  %v5286_v46 = vld [vmem:[%s9996_s3 + $0x10] sm:$0xff] }
 0x485   : > { %3735 = vperm.xlu1 %5270, %v5286_v46   ;;  %v4465_v46 = vld [vmem:[%s10004_s11 + $0x8] sm:$0xff] }
 0x486   : > { %v3632_v41 = vadd.f32 %v5042_v53, %v3547_v4  ;;  %4473 = vperm.xlu0 %5272, %v4465_v46  }
 0x489   : > { %5271 = vset.pattern.permute.xlu1 %v11324_v39 }
 0x48a   : > { %4468 = vperm.xlu1 %5271, %v4464_v60  }
 0x48e   : > { %v5043_v22 = vpop.f32.mrb[30].mxu1 }
 0x48f   : > { %v4999_v35 = vpop.f32.mrb[30].mxu0  ;;  %v5044_v43 = vpop.f32.mrb[31].mxu1 }
 0x490   : > { %v5045_v49 = vadd.f32 %v5044_v43, %v5043_v22  ;;  %v5000_v26 = vpop.f32.mrb[31].mxu0 }
 0x491   : > { %v5001_v34 = vadd.f32 %v5000_v26, %v4999_v35 }
 0x493   : > { %v3552_v21 = vadd.f32 %v5001_v34, %v3467_v54 }
 0x495   : > { %v3637_v29 = vadd.f32 %v5045_v49, %v3552_v21 }
 0x497   : > { %v5207_v13 = vpack.c.bf16 %v3637_v29, %v3632_v41 }
 0x498   : > { %v3740_v16 = vpop.permute.xlu0 %3739 }
 0x499   : > { %5208 = vmatpush3.bf16.msra.mxu0 %v5207_v13 }
 0x49a   : > { %4834 = vmatprep.subr.msk.mxu0 %vm3881_vm12, %v3864_v38 }
 0x49c   : > { %5065 = vmatmul.mubr.msk.f32.vlgmr.msra.gmra.mrb[32].mxu0 %vm3647_vm10, %v3640_v15 }
 0x49d   : > { %3962 = vmatprep.mubr.f32.mxu0 %v5380_v32  ;;  %4835 = vmatpush1.msk.msra.mxu0 %vm3881_vm12, %v3856_v62 }
 0x49e   : > { %4846 = vmatprep.subr.msk.mxu0 %vm3881_vm12, %v3866_v5 }
 0x504   : > { %v3736_v30 = vpop.permute.xlu1 %3735 }
 0x56f   : > { %v3717_v40 = vpop.f32.mrb[32].mxu0 }
 0x570   : > { %v3718_v48 = vadd.f32 %v3717_v40, %v3645_v45  ;;  %v5066_v47 = vpop.f32.mrb[33].mxu0  ;;  %v11325_v40 = vld [vmem:[#allocation94_spill] sm:$0xff] }
 0x571   : > { %v11326_v47 = vld [vmem:[#allocation106_spill] sm:$0xff] }
 0x572   : > { %v3721_v54 = vmax.f32 %v3718_v48, 0.0 }
 0x574   : > { %5067 = vmatprep.subr.mxu1 %v3721_v54 }
 0x575   : > { %5068 = vmatpush3.msra.mxu1 %v3721_v54 }
 0x576   : > { %5070 = vmatmul.mubr.msk.f32.vlgmr.msra.gmra.mrb[32].mxu1 %vm3742_vm11, %v3723_v57  ;;  %4840 = vmatprep.subr.msk.mxu1 %vm3881_vm12, %v3865_v37 }
 0x577   : > { %5072 = vmatprep.mubr.msk.f32.mxu1 %vm3742_vm11, %v3724_v19  ;;  %4841 = vmatpush1.msk.msra.mxu1 %vm3881_vm12, %v3857_v24  ;;  %v11328_v24 = vld [vmem:[#allocation96_spill] sm:$0xff] }
 0x578   : > { %4852 = vmatprep.subr.msk.mxu1 %vm3881_vm12, %v3867_v14 }
 0x57a   : > { %5073 = vmatmul.mubr.msk.f32.gmra.mrb[34].mxu1 %vm3742_vm11, %v3725_v3  ;;  %v11327_v3 = vld [vmem:[#allocation198_spill] sm:$0xff] }
 0x57b   : > { %4051 = vmatprep.mubr.f32.mxu1 %v5380_v32 }
 0x649   : > { %v5071_v8 = vpop.f32.mrb[32].mxu1 }
 0x64a   : > { %v3821_v27 = vpop.f32.mrb[33].mxu1  ;;  %v3827_v17 = vadd.f32 %v5071_v8, %v3732_v31 }
 0x64b   : > { %v3822_v44 = vadd.f32 %v3821_v27, %v3728_v58  ;;  %v11329_v27 = vld [vmem:[#allocation118_spill] sm:$0xff] }
 0x64c   : > { %v3841_v20 = vadd.f32 3.0, %v3827_v17 }
 0x64d   : > { %v3840_v53 = vadd.f32 3.0, %v3822_v44  ;;  %v5074_v12 = vpop.f32.mrb[34].mxu1  ;;  %v11330_v44 = vld [vmem:[#allocation160_spill] sm:$0xff] }
 0x64e   : > { %v3831_v28 = vpop.f32.mrb[35].mxu1  ;;  %v3845_v41 = vmax.f32 %v3841_v20, 0.0  ;;  %v3837_v35 = vadd.f32 %v5074_v12, %v3740_v16  ;;  %v11331_v12 = vld [vmem:[#allocation188_spill] sm:$0xff]  ;;  %v11332_v16 = vld [vmem:[#allocation59_spill] sm:$0xff] }
 0x64f   : > { %v3844_v4 = vmax.f32 %v3840_v53, 0.0  ;;  %v3832_v22 = vadd.f32 %v3831_v28, %v3736_v30 }
 0x650   : > { %v3849_v34 = vmin.f32 %v3845_v41, 6.0  ;;  %v3843_v29 = vadd.f32 3.0, %v3837_v35 }
 0x651   : > { %v3848_v43 = vmin.f32 %v3844_v4, 6.0  ;;  %v3842_v49 = vadd.f32 3.0, %v3832_v22 }
 0x652   : > { %v3853_v13 = vmul.f32 0.16666667, %v3849_v34  ;;  %v3847_v50 = vmax.f32 %v3843_v29, 0.0 }
 0x653   : > { %v3852_v26 = vmul.f32 0.16666667, %v3848_v43  ;;  %v3846_v21 = vmax.f32 %v3842_v49, 0.0 }
 0x654   : > { %v3851_v59 = vmin.f32 %v3847_v50, 6.0 }
 0x655   : > { %4836 = vmatmul.mubr.msk.f32.vlgmr.msra.gmra.mrb[34].mxu0 %vm3868_vm13, %v3852_v26  ;;  %4842 = vmatmul.mubr.msk.f32.vlgmr.msra.gmra.mrb[36].mxu1 %vm3868_vm13, %v3852_v26  ;;  %v3850_v15 = vmin.f32 %v3846_v21, 6.0 }
 0x656   : > { %3968 = vmatprep.mubr.f32.mxu0 %v5380_v32  ;;  %4057 = vmatprep.mubr.f32.mxu1 %v5380_v32  ;;  %v3855_v25 = vmul.f32 0.16666667, %v3851_v59 }
 0x657   : > { %4847 = vmatpush1.msk.msra.mxu0 %vm3881_vm12, %v3858_v7  ;;  %4853 = vmatpush1.msk.msra.mxu1 %vm3881_vm12, %v3859_v6  ;;  %v3854_v1 = vmul.f32 0.16666667, %v3850_v15 }
 0x659   : > { %4837 = vmatmul.mubr.msk.f32.gmra.mrb[36].mxu0 %vm3868_vm13, %v3853_v13  ;;  %4843 = vmatmul.mubr.msk.f32.gmra.mrb[38].mxu1 %vm3868_vm13, %v3853_v13 }
 0x65a   : > { %3974 = vmatprep.mubr.f32.mxu0 %v5380_v32  ;;  %4063 = vmatprep.mubr.f32.mxu1 %v5380_v32 }
 0x65d   : > { %4838 = vmatmul.mubr.msk.f32.gmra.mrb[38].mxu0 %vm3868_vm13, %v3854_v1  ;;  %4844 = vmatmul.mubr.msk.f32.gmra.mrb[40].mxu1 %vm3868_vm13, %v3854_v1 }
 0x65e   : > { %3980 = vmatprep.mubr.f32.mxu0 %v5380_v32  ;;  %4069 = vmatprep.mubr.f32.mxu1 %v5380_v32 }
 0x661   : > { %4839 = vmatmul.mubr.msk.f32.gmra.mrb[40].mxu0 %vm3868_vm13, %v3855_v25  ;;  %4845 = vmatmul.mubr.msk.f32.gmra.mrb[42].mxu1 %vm3868_vm13, %v3855_v25 }
 0x662   : > { %4140 = vmatprep.mubr.f32.mxu0 %v5380_v32  ;;  %4229 = vmatprep.mubr.f32.mxu1 %v5380_v32 }
 0x665   : > { %4848 = vmatmul.mubr.msk.f32.vlgmr.msra.gmra.mrb[42].mxu0 %vm3868_vm13, %v3852_v26  ;;  %4854 = vmatmul.mubr.msk.f32.vlgmr.msra.gmra.mrb[44].mxu1 %vm3868_vm13, %v3852_v26 }
 0x666   : > { %4146 = vmatprep.mubr.f32.mxu0 %v5380_v32  ;;  %4235 = vmatprep.mubr.f32.mxu1 %v5380_v32 }
 0x669   : > { %4849 = vmatmul.mubr.msk.f32.gmra.mrb[44].mxu0 %vm3868_vm13, %v3853_v13  ;;  %4855 = vmatmul.mubr.msk.f32.gmra.mrb[46].mxu1 %vm3868_vm13, %v3853_v13 }
 0x66a   : > { %4152 = vmatprep.mubr.f32.mxu0 %v5380_v32  ;;  %4241 = vmatprep.mubr.f32.mxu1 %v5380_v32 }
 0x66d   : > { %4850 = vmatmul.mubr.msk.f32.gmra.mrb[46].mxu0 %vm3868_vm13, %v3854_v1  ;;  %4856 = vmatmul.mubr.msk.f32.gmra.mrb[48].mxu1 %vm3868_vm13, %v3854_v1 }
 0x66e   : > { %4158 = vmatprep.mubr.f32.mxu0 %v5380_v32  ;;  %4247 = vmatprep.mubr.f32.mxu1 %v5380_v32 }
 0x671   : > { %4851 = vmatmul.mubr.msk.f32.gmra.mrb[48].mxu0 %vm3868_vm13, %v3855_v25  ;;  %4857 = vmatmul.mubr.msk.f32.gmra.mrb[50].mxu1 %vm3868_vm13, %v3855_v25 }
 0x672   : > { %4516 = vmatprep.mubr.bf16.mxu0 %v11324_v39  ;;  %4559 = vmatprep.mubr.bf16.mxu1 %v11324_v39 }
 0x728   : > { %v3964_v45 = vpop.f32.mrb[34].mxu0  ;;  %v4053_v32 = vpop.f32.mrb[36].mxu1 }
 0x729   : > { %v4254_v48 = vmul.f32 %v3964_v45, %v11325_v40  ;;  %v4256_v54 = vmul.f32 %v4053_v32, %v11326_v47  ;;  %v3966_v57 = vpop.f32.mrb[35].mxu0  ;;  %v4055_v19 = vpop.f32.mrb[37].mxu1 }
 0x72a   : > { %v9733_v62 = vmul.f32 %v3966_v57, %v11327_v3  ;;  %v9736_v38 = vmul.f32 %v4055_v19, %v11328_v24 }
 0x72b   : > { %v4286_v37 = vadd.f32 3.0, %v4254_v48  ;;  %v4288_v7 = vadd.f32 3.0, %v4256_v54 }
 0x72c   : > { %v4287_v6 = vadd.f32 3.0, %v9733_v62  ;;  %v4289_v5 = vadd.f32 3.0, %v9736_v38  ;;  %v3970_v14 = vpop.f32.mrb[36].mxu0  ;;  %v4059_v31 = vpop.f32.mrb[38].mxu1 }
 0x72d   : > { %v4318_v58 = vmax.f32 %v4286_v37, 0.0  ;;  %v4320_v8 = vmax.f32 %v4288_v7, 0.0  ;;  %v4262_v17 = vmul.f32 %v3970_v14, %v11329_v27  ;;  %v4264_v20 = vmul.f32 %v4059_v31, %v11330_v44  ;;  %v3972_v30 = vpop.f32.mrb[37].mxu0  ;;  %v4061_v53 = vpop.f32.mrb[39].mxu1  ;;  %v11333_v7 = vld [vmem:[#allocation202_spill] sm:$0xff] }
 0x72e   : > { %v9743_v28 = vmul.f32 %v3972_v30, %v11331_v12  ;;  %v9746_v4 = vmul.f32 %v4061_v53, %v11332_v16  ;;  %v4319_v49 = vmax.f32 %v4287_v6, 0.0  ;;  %v4321_v26 = vmax.f32 %v4289_v5, 0.0  ;;  %v11334_v5 = vld [vmem:[#allocation69_spill] sm:$0xff] }
 0x72f   : > { %v4350_v41 = vmin.f32 %v4318_v58, 6.0  ;;  %v4352_v22 = vmin.f32 %v4320_v8, 6.0  ;;  %v4294_v35 = vadd.f32 3.0, %v4262_v17  ;;  %v4296_v43 = vadd.f32 3.0, %v4264_v20 }
 0x730   : > { %v4295_v34 = vadd.f32 3.0, %v9743_v28  ;;  %v4297_v21 = vadd.f32 3.0, %v9746_v4  ;;  %v3976_v29 = vpop.f32.mrb[38].mxu0  ;;  %v4065_v13 = vpop.f32.mrb[40].mxu1  ;;  %v4351_v47 = vmin.f32 %v4319_v49, 6.0  ;;  %v4353_v57 = vmin.f32 %v4321_v26, 6.0 }
 0x731   : > { %v4326_v15 = vmax.f32 %v4294_v35, 0.0  ;;  %v4328_v50 = vmax.f32 %v4296_v43, 0.0  ;;  %v4382_v1 = vmul.f32 0.16666667, %v4350_v41  ;;  %v4384_v59 = vmul.f32 0.16666667, %v4352_v22 }
 0x732   : > { %v4327_v25 = vmax.f32 %v4295_v34, 0.0  ;;  %v4329_v46 = vmax.f32 %v4297_v21, 0.0  ;;  %v3978_v32 = vpop.f32.mrb[39].mxu0  ;;  %v4067_v40 = vpop.f32.mrb[41].mxu1  ;;  %v9751_v6 = vmul.f32 %v3976_v29, %v11333_v7  ;;  %v9754_v14 = vmul.f32 %v4065_v13, %v11334_v5  ;;  %v11335_v43 = vld [vmem:[#allocation150_spill] sm:$0xff]  ;;  %v11336_v26 = vld [vmem:[#allocation25_spill] sm:$0xff] }
 0x733   : > { %v4358_v60 = vmin.f32 %v4326_v15, 6.0  ;;  %v4360_v45 = vmin.f32 %v4328_v50, 6.0  ;;  %v9756_v8 = vmul.f32 %v4382_v1, %v4254_v48  ;;  %v9758_v27 = vmul.f32 %v4384_v59, %v4256_v54  ;;  %v11337_v59 = vld [vmem:[#allocation182_spill] sm:$0xff] }
 0x734   : > { %v3982_v19 = vpop.f32.mrb[40].mxu0  ;;  %v4071_v3 = vpop.f32.mrb[42].mxu1  ;;  %v4359_v44 = vmin.f32 %v4327_v25, 6.0  ;;  %v4361_v30 = vmin.f32 %v4329_v46, 6.0  ;;  %v4302_v16 = vadd.f32 3.0, %v9751_v6  ;;  %v4304_v41 = vadd.f32 3.0, %v9754_v14 }
 0x735   : > { %v4390_v24 = vmul.f32 0.16666667, %v4358_v60  ;;  %v4392_v37 = vmul.f32 0.16666667, %v4360_v45  ;;  %v3984_v31 = vpop.f32.mrb[41].mxu0  ;;  %v4073_v58 = vpop.f32.mrb[43].mxu1  ;;  %v9767_v49 = vmul.f32 %v3978_v32, %v11335_v43  ;;  %v9770_v48 = vmul.f32 %v4067_v40, %v11336_v26 }
 0x736   : > { %v4383_v22 = vmul.f32 0.16666667, %v4351_v47  ;;  %v4385_v35 = vmul.f32 0.16666667, %v4353_v57  ;;  %v4334_v21 = vmax.f32 %v4302_v16, 0.0  ;;  %v4336_v29 = vmax.f32 %v4304_v41, 0.0 }
 0x737   : > { %v9760_v53 = vmul.f32 %v4390_v24, %v4262_v17  ;;  %v9762_v12 = vmul.f32 %v4392_v37, %v4264_v20  ;;  %v4391_v50 = vmul.f32 0.16666667, %v4359_v44  ;;  %v4393_v1 = vmul.f32 0.16666667, %v4361_v30  ;;  %v11338_v46 = vld [vmem:[#allocation203_spill] sm:$0xff]  ;;  %v11339_v40 = vld [vmem:[#allocation105_spill] sm:$0xff] }
 0x738   : > { %v4142_v54 = vpop.f32.mrb[42].mxu0  ;;  %v4231_v34 = vpop.f32.mrb[44].mxu1  ;;  %v4278_v25 = vmul.f32 %v3982_v19, %v11337_v59  ;;  %v4280_v60 = vmul.f32 %v4071_v3, %v11338_v46  ;;  %v4366_v45 = vmin.f32 %v4334_v21, 6.0  ;;  %v4368_v32 = vmin.f32 %v4336_v29, 6.0  ;;  %v11340_v57 = vld [vmem:[#allocation78_spill] sm:$0xff] }
 0x739   : > { %v4144_v13 = vpop.f32.mrb[43].mxu0  ;;  %v4233_v15 = vpop.f32.mrb[45].mxu1  ;;  %v9779_v47 = vmul.f32 %v3984_v31, %v11339_v40  ;;  %v9782_v24 = vmul.f32 %v4073_v58, %v11340_v57  ;;  %v4303_v37 = vadd.f32 3.0, %v9767_v49  ;;  %v4305_v7 = vadd.f32 3.0, %v9770_v48 }
 0x73a   : > { %v4310_v5 = vadd.f32 3.0, %v4278_v25  ;;  %v4312_v16 = vadd.f32 3.0, %v4280_v60  ;;  %v9787_v19 = vmul.f32 %v4383_v22, %v9733_v62  ;;  %v4417_v31 = vmul.f32 %v4385_v35, %v9736_v38 }
 0x73b   : > { %v4311_v3 = vadd.f32 3.0, %v9779_v47  ;;  %v4313_v41 = vadd.f32 3.0, %v9782_v24  ;;  %v4398_v43 = vmul.f32 0.16666667, %v4366_v45  ;;  %v4423_v21 = vmul.f32 %v4391_v50, %v9743_v28 }
 0x73c   : > { %v4148_v44 = vpop.f32.mrb[44].mxu0  ;;  %v4237_v30 = vpop.f32.mrb[46].mxu1  ;;  %v4342_v58 = vmax.f32 %v4310_v5, 0.0  ;;  %v4344_v26 = vmax.f32 %v4312_v16, 0.0  ;;  %v4425_v29 = vmul.f32 %v4393_v1, %v9746_v4  ;;  %v4400_v59 = vmul.f32 0.16666667, %v4368_v32 }
 0x73d   : > { %v4343_v46 = vmax.f32 %v4311_v3, 0.0  ;;  %v4150_v40 = vpop.f32.mrb[45].mxu0  ;;  %v4239_v57 = vpop.f32.mrb[47].mxu1  ;;  %v4335_v20 = vmax.f32 %v4303_v37, 0.0  ;;  %v4337_v62 = vmax.f32 %v4305_v7, 0.0  ;;  %v4345_v10 = vmax.f32 %v4313_v41, 0.0 }
 0x73e   : > { %v4374_v22 = vmin.f32 %v4342_v58, 6.0  ;;  %v4376_v17 = vmin.f32 %v4344_v26, 6.0  ;;  %v9795_v38 = vmul.f32 %v4142_v54, %v9262_v2  ;;  %v9798_v35 = vmul.f32 %v4231_v34, %v9371_v51 }
 0x73f   : > { %v4375_v33 = vmin.f32 %v4343_v46, 6.0  ;;  %v9801_v45 = vmul.f32 %v4144_v13, %v9269_v52  ;;  %v9804_v32 = vmul.f32 %v4233_v15, %v9380_v55  ;;  %v9807_v37 = vmul.f32 %v4398_v43, %v9751_v6 }
 0x740   : > { %v4154_v39 = vpop.f32.mrb[46].mxu0  ;;  %v4243_v0 = vpop.f32.mrb[48].mxu1  ;;  %v4406_v50 = vmul.f32 0.16666667, %v4374_v22  ;;  %v4408_v1 = vmul.f32 0.16666667, %v4376_v17  ;;  %v9810_v7 = vmul.f32 %v4400_v59, %v9754_v14  ;;  %v4266_v59 = vmul.f32 %v4148_v44, %v9443_v11 }
 0x741   : > { %v4156_v28 = vpop.f32.mrb[47].mxu0  ;;  %v4245_v4 = vpop.f32.mrb[49].mxu1  ;;  %11341 = vst [vmem:[#allocation33_spill] sm:$0xff] %v9807_v37  ;;  %v4290_v2 = vadd.f32 3.0, %v9795_v38  ;;  %v4292_v51 = vadd.f32 3.0, %v9798_v35  ;;  %v4291_v52 = vadd.f32 3.0, %v9801_v45  ;;  %v4449_v22 = vpack.c.bf16 %v4423_v21, %v9787_v19 }
 0x742   : > { %v9814_v54 = vmul.f32 %v4406_v50, %v4278_v25  ;;  %v9816_v34 = vmul.f32 %v4408_v1, %v4280_v60  ;;  %v4293_v17 = vadd.f32 3.0, %v9804_v32  ;;  %v4367_v6 = vmin.f32 %v4335_v20, 6.0 }
 0x743   : > { %v4369_v15 = vmin.f32 %v4337_v62, 6.0  ;;  %v4322_v14 = vmax.f32 %v4290_v2, 0.0  ;;  %v4324_v5 = vmax.f32 %v4292_v51, 0.0  ;;  %v4407_v41 = vmul.f32 0.16666667, %v4375_v33  ;;  %4484 = vmatprep.subr.bf16.mxu0 %v4449_v22 }
 0x744   : > { %v9820_v55 = vpop.f32.mrb[48].mxu0  ;;  %v9822_v13 = vpop.f32.mrb[50].mxu1  ;;  %v4377_v43 = vmin.f32 %v4345_v10, 6.0  ;;  %v4323_v58 = vmax.f32 %v4291_v52, 0.0  ;;  %v4325_v26 = vmax.f32 %v4293_v17, 0.0  ;;  %v4268_v20 = vmul.f32 %v4237_v30, %v9483_v9 }
 0x745   : > { %v9824_v16 = vpop.f32.mrb[49].mxu0  ;;  %v9826_v3 = vpop.f32.mrb[51].mxu1  ;;  %v4354_v46 = vmin.f32 %v4322_v14, 6.0  ;;  %v4356_v62 = vmin.f32 %v4324_v5, 6.0  ;;  %v4451_v50 = vpack.c.bf16 %v4425_v29, %v4417_v31  ;;  %v4399_v1 = vmul.f32 0.16666667, %v4367_v6 }
 0x746   : > { %v4401_v2 = vmul.f32 0.16666667, %v4369_v15  ;;  %v4298_v51 = vadd.f32 3.0, %v4266_v59  ;;  %v4300_v25 = vadd.f32 3.0, %v4268_v20  ;;  %v4439_v37 = vmul.f32 %v4407_v41, %v9779_v47 }
 0x747   : > { %v4409_v60 = vmul.f32 0.16666667, %v4377_v43  ;;  %4527 = vmatprep.subr.bf16.mxu1 %v4451_v50  ;;  %v4267_v33 = vmul.f32 %v4150_v40, %v9434_v23  ;;  %v4269_v11 = vmul.f32 %v4239_v57, %v9461_v61  ;;  %v4355_v10 = vmin.f32 %v4323_v58, 6.0 }
 0x748   : > { %v4357_v9 = vmin.f32 %v4325_v26, 6.0  ;;  %v4330_v44 = vmax.f32 %v4298_v51, 0.0  ;;  %v4332_v30 = vmax.f32 %v4300_v25, 0.0  ;;  %v11342_v19 = vpack.c.bf16 %v9760_v53, %v9756_v8 }
 0x749   : > { %v11343_v31 = vpack.c.bf16 %v9762_v12, %v9758_v27  ;;  %v4386_v47 = vmul.f32 0.16666667, %v4354_v46  ;;  %v4388_v21 = vmul.f32 0.16666667, %v4356_v62  ;;  %v4299_v29 = vadd.f32 3.0, %v4267_v33 }
 0x74a   : > { %4485 = vmatpush1.bf16.msra.mxu0 %v11342_v19  ;;  %v4301_v52 = vadd.f32 3.0, %v4269_v11  ;;  %v4362_v17 = vmin.f32 %v4330_v44, 6.0  ;;  %v4364_v23 = vmin.f32 %v4332_v30, 6.0  ;;  %v9845_v61 = vmul.f32 %v4154_v39, %v9586_v63  ;;  %v11344_v44 = vld [vmem:[#allocation31_spill] sm:$0xff] }
 0x74b   : > { %4528 = vmatpush1.bf16.msra.mxu1 %v11343_v31  ;;  %v9848_v40 = vmul.f32 %v4243_v0, %v9572_v36  ;;  %v4331_v57 = vmax.f32 %v4299_v29, 0.0  ;;  %v9851_v8 = vmul.f32 %v4156_v28, %v9583_v56  ;;  %v9854_v27 = vmul.f32 %v4245_v4, %v9568_v42 }
 0x74c   : > { %v4333_v6 = vmax.f32 %v4301_v52, 0.0  ;;  %v4394_v53 = vmul.f32 0.16666667, %v4362_v17  ;;  %v4396_v12 = vmul.f32 0.16666667, %v4364_v23  ;;  %v4306_v15 = vadd.f32 3.0, %v9845_v61 }
 0x74d   : > { %v4308_v14 = vadd.f32 3.0, %v9848_v40  ;;  %v4418_v63 = vmul.f32 %v4386_v47, %v9795_v38  ;;  %v4363_v39 = vmin.f32 %v4331_v57, 6.0  ;;  %v4307_v36 = vadd.f32 3.0, %v9851_v8 }
 0x74e   : > { %v4365_v5 = vmin.f32 %v4333_v6, 6.0  ;;  %v4420_v0 = vmul.f32 %v4388_v21, %v9798_v35  ;;  %v4426_v25 = vmul.f32 %v4394_v53, %v4266_v59  ;;  %v4428_v56 = vmul.f32 %v4396_v12, %v4268_v20 }
 0x74f   : > { %v4309_v28 = vadd.f32 3.0, %v9854_v27  ;;  %v4441_v42 = vmul.f32 %v4409_v60, %v9782_v24  ;;  %v4395_v4 = vmul.f32 0.16666667, %v4363_v39  ;;  %v4338_v43 = vmax.f32 %v4306_v15, 0.0 }
 0x750   : > { %v4397_v41 = vmul.f32 0.16666667, %v4365_v5  ;;  %v4387_v58 = vmul.f32 0.16666667, %v4355_v10  ;;  %v4452_v26 = vpack.c.bf16 %v4426_v25, %v4418_v63  ;;  %v4454_v46 = vpack.c.bf16 %v4428_v56, %v4420_v0 }
 0x751   : > { %v4340_v62 = vmax.f32 %v4308_v14, 0.0  ;;  %v4431_v38 = vmul.f32 %v4399_v1, %v9767_v49  ;;  %v4433_v22 = vmul.f32 %v4401_v2, %v9770_v48  ;;  %v4389_v50 = vmul.f32 0.16666667, %v4357_v9  ;;  %v11347_v9 = vld [vmem:[#allocation33_spill] sm:$0xff] }
 0x752   : > { %v4339_v51 = vmax.f32 %v4307_v36, 0.0  ;;  %v4427_v35 = vmul.f32 %v4395_v4, %v4267_v33  ;;  %v4341_v59 = vmax.f32 %v4309_v28, 0.0  ;;  %v4282_v20 = vmul.f32 %v9820_v55, %v9629_v18  ;;  %v11345_v33 = vld [vmem:[#allocation72_spill] sm:$0xff]  ;;  %v5279_v55 = vld [vmem:[%s10003_s10] sm:$0xff]  }
 0x753   : > { %v4284_v24 = vmul.f32 %v9822_v13, %v11344_v44  ;;  %v4429_v60 = vmul.f32 %v4397_v41, %v4269_v11  ;;  %v4370_v30 = vmin.f32 %v4338_v43, 6.0  ;;  %v4457_v10 = vpack.c.bf16 %v4439_v37, %v4431_v38  ;;  %v11346_v11 = vld [vmem:[#allocation129_spill] sm:$0xff]  ;;  %v9897_v38 = vpop.permute.xlu0 %4473 }
 0x754   : > { %v4459_v19 = vpack.c.bf16 %v4441_v42, %v4433_v22  ;;  %v4419_v31 = vmul.f32 %v4387_v58, %v9801_v45  ;;  %v4372_v47 = vmin.f32 %v4340_v62, 6.0  ;;  %v4314_v49 = vadd.f32 3.0, %v4282_v20 }
 0x755   : > { %v4316_v1 = vadd.f32 3.0, %v4284_v24  ;;  %v4421_v48 = vmul.f32 %v4389_v50, %v9804_v32  ;;  %v4371_v2 = vmin.f32 %v4339_v51, 6.0  ;;  %4486 = vmatprep.subr.bf16.mxu0 %v4457_v10  ;;  %v4283_v18 = vmul.f32 %v9824_v16, %v11345_v33 }
 0x756   : > { %4529 = vmatprep.subr.bf16.mxu1 %v4459_v19  ;;  %v4346_v13 = vmax.f32 %v4314_v49, 0.0  ;;  %v4285_v45 = vmul.f32 %v9826_v3, %v11346_v11  ;;  %v11348_v21 = vpack.c.bf16 %v9814_v54, %v11347_v9  ;;  %v11349_v32 = vpack.c.bf16 %v9816_v34, %v9810_v7 }
 0x757   : > { %v4348_v37 = vmax.f32 %v4316_v1, 0.0  ;;  %v4453_v29 = vpack.c.bf16 %v4427_v35, %v4419_v31  ;;  %v4402_v52 = vmul.f32 0.16666667, %v4370_v30  ;;  %v4373_v16 = vmin.f32 %v4341_v59, 6.0  ;;  %v5288_v30 = vld [vmem:[%s5513_s29] sm:$0xff]  ;;  %v5290_v1 = vld [vmem:[%s5513_s29 + $0x10] sm:$0xff] }
 0x758   : > { %4487 = vmatpush1.bf16.msra.mxu0 %v11348_v21  ;;  %4530 = vmatpush1.bf16.msra.mxu1 %v11349_v32  ;;  %v4315_v17 = vadd.f32 3.0, %v4283_v18  ;;  %v4455_v23 = vpack.c.bf16 %v4429_v60, %v4421_v48  ;;  %v4404_v57 = vmul.f32 0.16666667, %v4372_v47  ;;  %v4378_v6 = vmin.f32 %v4346_v13, 6.0  ;;  %v5289_v47 = vld [vmem:[%s5513_s29 + $0x8] sm:$0xff]  ;;  %v5292_v13 = vld [vmem:[%s5513_s29 + $0x18] sm:$0xff] }
 0x759   : > { %v4380_v53 = vmin.f32 %v4348_v37, 6.0  ;;  %v4317_v12 = vadd.f32 3.0, %v4285_v45  ;;  %4570 = vmatprep.subr.bf16.mxu0 %v4453_v29  ;;  %v4434_v7 = vmul.f32 %v4402_v52, %v9845_v61  ;;  %v4403_v34 = vmul.f32 0.16666667, %v4371_v2  ;;  %v5294_v21 = vld [vmem:[%s5513_s29 + $0x48] sm:$0xff]  ;;  %v5295_v29 = vld [vmem:[%s5513_s29 + $0x58] sm:$0xff] }
 0x75a   : > { %v4347_v15 = vmax.f32 %v4315_v17, 0.0  ;;  %4613 = vmatprep.subr.bf16.mxu1 %v4455_v23  ;;  %v4410_v54 = vmul.f32 0.16666667, %v4378_v6  ;;  %v4405_v63 = vmul.f32 0.16666667, %v4373_v16  ;;  %v11350_v5 = vmov 0  }
 0x75b   : > { %4859 = vmatmul.mubr.msk.bf16.vlgmr.msra.gmra.mrb[52].mxu0 %vm3647_vm10, %v5279_v55  ;;  %v4412_v3 = vmul.f32 0.16666667, %v4380_v53  ;;  %v4349_v14 = vmax.f32 %v4317_v12, 0.0  ;;  %4860 = vmatmul.mubr.msk.bf16.vlgmr.msra.gmra.mrb[52].mxu1 %vm3647_vm10, %v5279_v55  ;;  %v4436_v36 = vmul.f32 %v4404_v57, %v9848_v40  ;;  %v4435_v61 = vmul.f32 %v4403_v34, %v9851_v8  ;;  %v4469_v40 = vpop.permute.xlu1 %4468 }
 0x75c   : > { %4571 = vmatpush1.bf16.msra.mxu0 %v4452_v26  ;;  %v4379_v39 = vmin.f32 %v4347_v15, 6.0  ;;  %4614 = vmatpush1.bf16.msra.mxu1 %v4454_v46  ;;  %v4442_v0 = vmul.f32 %v4410_v54, %v4282_v20  ;;  %v4437_v58 = vmul.f32 %v4405_v63, %v9854_v27  ;;  %v5296_v54 = vld [vmem:[%s5513_s29 + $0x20] sm:$0xff] }
 0x75d   : > { %4602 = vmatprep.mubr.bf16.mxu0 %v11350_v5  ;;  %v4444_v25 = vmul.f32 %v4412_v3, %v4284_v24  ;;  %v4381_v56 = vmin.f32 %v4349_v14, 6.0  ;;  %4645 = vmatprep.mubr.bf16.mxu1 %v11350_v5 }
 0x75e   : > { %v4411_v28 = vmul.f32 0.16666667, %v4379_v39  ;;  %v4460_v42 = vpack.c.bf16 %v4442_v0, %v4434_v7  ;;  %v5297_v39 = vld [vmem:[%s5513_s29 + $0x30] sm:$0xff] }
 0x75f   : > { %v4462_v4 = vpack.c.bf16 %v4444_v25, %v4436_v36  ;;  %v4413_v41 = vmul.f32 0.16666667, %v4381_v56  ;;  %v5298_v36 = vld [vmem:[%s5513_s29 + $0x28] sm:$0xff] }
 0x760   : > { %v4443_v43 = vmul.f32 %v4411_v28, %v4283_v18  ;;  %v5291_v18 = vld [vmem:[%s5513_s29 + $0x40] sm:$0xff] }
 0x761   : > { %v4445_v26 = vmul.f32 %v4413_v41, %v4285_v45  ;;  %v5293_v45 = vld [vmem:[%s5513_s29 + $0x50] sm:$0xff]  ;;  %v5300_v41 = vld [vmem:[%s5513_s29 + $0x60] sm:$0xff] }
 0x762   : > { %v4461_v46 = vpack.c.bf16 %v4443_v43, %v4435_v61 }
 0x763   : > { %v4463_v62 = vpack.c.bf16 %v4445_v26, %v4437_v58  ;;  %v5301_v58 = vld [vmem:[%s5513_s29 + $0x70] sm:$0xff] }
 0x764   : > { %4572 = vmatprep.subr.bf16.mxu0 %v4461_v46  ;;  %v5302_v46 = vld [vmem:[%s5513_s29 + $0x68] sm:$0xff] }
 0x765   : > { %4615 = vmatprep.subr.bf16.mxu1 %v4463_v62  ;;  %4573 = vmatpush1.bf16.msra.mxu0 %v4460_v42  ;;  %v5299_v42 = vld [vmem:[%s5513_s29 + $0x38] sm:$0xff] }
 0x766   : > { %4616 = vmatpush1.bf16.msra.mxu1 %v4462_v4 }
 0x768   : > { %4861 = vmatmul.mubr.msk.bf16.vlgmr.msra.gmra.mrb[56].mxu0 %vm3647_vm10, %v5279_v55 }
 0x769   : > { %4862 = vmatmul.mubr.msk.bf16.vlgmr.msra.gmra.mrb[56].mxu1 %vm3647_vm10, %v5279_v55 }
 0x82e   : > { %v4518_v8 = vpop.f32.mrb[52].mxu0  ;;  %v4561_v27 = vpop.f32.mrb[52].mxu1 }
 0x82f   : > { %v4520_v22 = vpop.f32.mrb[53].mxu0  ;;  %v4519_v50 = vadd.f32 %v4518_v8, %v4469_v40  ;;  %v4563_v51 = vpop.f32.mrb[53].mxu1  ;;  %v4562_v20 = vadd.f32 %v4561_v27, %v4469_v40 }
 0x830   : > { %v4522_v35 = vpop.f32.mrb[54].mxu0  ;;  %v4521_v59 = vadd.f32 %v4520_v22, %v4469_v40  ;;  %v4565_v44 = vpop.f32.mrb[54].mxu1  ;;  %v4564_v60 = vadd.f32 %v4563_v51, %v4469_v40 }
 0x831   : > { %v4523_v24 = vadd.f32 %v4522_v35, %v9897_v38  ;;  %v4656_v10 = vadd.f32 %v5288_v30, %v4519_v50  ;;  %v4524_v19 = vpop.f32.mrb[55].mxu0  ;;  %v4566_v31 = vadd.f32 %v4565_v44, %v9897_v38  ;;  %v4658_v48 = vadd.f32 %v5290_v1, %v4562_v20  ;;  %v4567_v33 = vpop.f32.mrb[55].mxu1 }
 0x832   : > { %v4657_v49 = vadd.f32 %v5289_v47, %v4521_v59  ;;  %v4525_v2 = vadd.f32 %v4524_v19, %v9897_v38  ;;  %v4659_v37 = vadd.f32 %v5292_v13, %v4564_v60  ;;  %v4568_v11 = vadd.f32 %v4567_v33, %v9897_v38 }
 0x833   : > { %v4664_v55 = vadd.f32 %v5291_v18, %v4523_v24  ;;  %4672 = vst [vmem:[%s9907_s27] sm:$0xff] %v4656_v10  ;;  %v4666_v9 = vadd.f32 %v5293_v45, %v4566_v31  ;;  %4674 = vst [vmem:[%s9907_s27 + $0x10] sm:$0xff] %v4658_v48 }
 0x834   : > { %4673 = vst [vmem:[%s9907_s27 + $0x8] sm:$0xff] %v4657_v49  ;;  %v4665_v32 = vadd.f32 %v5294_v21, %v4525_v2  ;;  %4675 = vst [vmem:[%s9907_s27 + $0x18] sm:$0xff] %v4659_v37  ;;  %v4667_v52 = vadd.f32 %v5295_v29, %v4568_v11 }
 0x835   : > { %4680 = vst [vmem:[%s9907_s27 + $0x40] sm:$0xff] %v4664_v55  ;;  %4682 = vst [vmem:[%s9907_s27 + $0x50] sm:$0xff] %v4666_v9 }
 0x836   : > { %4681 = vst [vmem:[%s9907_s27 + $0x48] sm:$0xff] %v4665_v32  ;;  %4683 = vst [vmem:[%s9907_s27 + $0x58] sm:$0xff] %v4667_v52 }
 0x83b   : > { %v4604_v16 = vpop.f32.mrb[56].mxu0 }
 0x83c   : > { %v4605_v17 = vadd.f32 %v4604_v16, %v4469_v40  ;;  %v4647_v23 = vpop.f32.mrb[56].mxu1  ;;  %v4606_v57 = vpop.f32.mrb[57].mxu0 }
 0x83d   : > { %v4648_v6 = vadd.f32 %v4647_v23, %v4469_v40  ;;  %v4607_v53 = vadd.f32 %v4606_v57, %v4469_v40  ;;  %v4649_v12 = vpop.f32.mrb[57].mxu1  ;;  %v4608_v15 = vpop.f32.mrb[58].mxu0 }
 0x83e   : > { %v4660_v3 = vadd.f32 %v5296_v54, %v4605_v17  ;;  %v4650_v14 = vadd.f32 %v4649_v12, %v4469_v40  ;;  %v4609_v7 = vadd.f32 %v4608_v15, %v9897_v38  ;;  %v4651_v34 = vpop.f32.mrb[58].mxu1  ;;  %v4610_v63 = vpop.f32.mrb[59].mxu0  ;;  %v5303_v40 = vld [vmem:[%s5513_s29 + $0x78] sm:$0xff] }
 0x83f   : > { %v4662_v5 = vadd.f32 %v5297_v39, %v4648_v6  ;;  %v4661_v0 = vadd.f32 %v5298_v36, %v4607_v53  ;;  %v4652_v25 = vadd.f32 %v4651_v34, %v9897_v38  ;;  %v4611_v56 = vadd.f32 %v4610_v63, %v9897_v38  ;;  %v4653_v28 = vpop.f32.mrb[59].mxu1 }
 0x840   : > { %4676 = vst [vmem:[%s9907_s27 + $0x20] sm:$0xff] %v4660_v3  ;;  %v4663_v4 = vadd.f32 %v5299_v42, %v4650_v14  ;;  %v4668_v61 = vadd.f32 %v5300_v41, %v4609_v7  ;;  %v4654_v43 = vadd.f32 %v4653_v28, %v9897_v38 }
 0x841   : > { %4678 = vst [vmem:[%s9907_s27 + $0x30] sm:$0xff] %v4662_v5  ;;  %4677 = vst [vmem:[%s9907_s27 + $0x28] sm:$0xff] %v4661_v0  ;;  %v4670_v26 = vadd.f32 %v5301_v58, %v4652_v25  ;;  %v4669_v62 = vadd.f32 %v5302_v46, %v4611_v56 }
 0x842   : > { %4679 = vst [vmem:[%s9907_s27 + $0x38] sm:$0xff] %v4663_v4  ;;  %4684 = vst [vmem:[%s9907_s27 + $0x60] sm:$0xff] %v4668_v61  ;;  %v4671_v8 = vadd.f32 %v5303_v40, %v4654_v43 }
 0x843   : > { %4686 = vst [vmem:[%s9907_s27 + $0x70] sm:$0xff] %v4670_v26  ;;  %4685 = vst [vmem:[%s9907_s27 + $0x68] sm:$0xff] %v4669_v62 }
 0x844   : > { %4687 = vst [vmem:[%s9907_s27 + $0x78] sm:$0xff] %v4671_v8 }
 0x845   : > { %5317 = shalt.err (!%p5314_p3)
}
 0x846   : > { %s5318_s29 = scalar_lea.hbm %s9940_s30, 2048  ;;  %s5322_s17 = scalar_lea.hbm %s11351_s28, 4096 }
 0x847   : > { %p5319_p4 = scmp.ne.s32.totalorder %s9940_s30, %s5318_s29  ;;  %p5323_p9 = scmp.lt.u32.totalorder %s9940_s30, %s11351_s28 }
 0x848   : > { %p5324_p10 = scmp.lt.u32.totalorder %s5322_s17, %s5318_s29  ;;  %p5326_p12 = scmp.lt.u32.totalorder %s5318_s29, %s9940_s30 }
 0x849   : > { %p5320_p7 = pnand %p5319_p4, %p5488_p5 }
 0x84a   : > { %p5325_p11 = por %p5324_p10, %p5323_p9 }
 0x84b   : > { %p5321_p8 = pneg %p5320_p7 }
 0x84c   : > { %p5327_p13 = por %p5326_p12, %p5325_p11 }
 0x84e   : > { %p5328_p0 = pnand %p5327_p13, %p5321_p8 }
 0x850   : > { %5331 = shalt.err (!%p5328_p0)
}
 0x851   : > { %s5383_s16 = smov 1024   ;;  %s5384_s27 = smov 64  }
 0x852   : > { %5209 = dma.vmem_to_hbm [thread:$0]  (%p5488_p5), %s9942_s1, 2048, %s9940_s30, %s9952_s21, %s5383_s16, %s5383_s16, %s5384_s27  }
 0x853 PF: > { %s11352_s23 = sld [smem:[#allocation7_spill]]  ;;  %s11353_s25 = sld [smem:[#allocation5_spill]] }
 0x859   : > { %p5215_p1 = scmp.ge.s32.totalorder %s11352_s23, 2  ;;  %s4717_s19 = sand.u32 1, %s11353_s25  }
 0x85a   : > { %s4718_s20 = scalar_lea.sflag [#allocation3], %s4717_s19 }
 0x85b   : > { %p5212_p2 = pnand %p5215_p1, %p5492_p6 }
 0x85d   : > { %5349 = dma.done.wait (!%p5212_p2), %s4718_s20, 2048  }
 0x85e   : > { %5351 = vsyncadd (!%p5212_p2), %s4718_s20, 4294965248  ;;  %s11355_s24 = sld [smem:[#allocation8_spill]]  ;;  %s11356_s18 = sld [smem:[#allocation6_spill]] }
 0x85f   : > { %s11357_s23 = sld [smem:[#allocation9_spill]]  ;;  %s11358_s21 = smov %s5358_s22 }
 0x864   : > { %p22_p3 = scmp.ge.s32.totalorder %s11355_s24, 4   ;;  %s11359_s22 = smov %s11356_s18 }
 0x866   :  { %24 = sbr.rel (!%p22_p3) target bundleno = 7 (0x7), region = 119 }
 0x86d   :  { %4723 = vsyncpa [#allocation3], 1 }
 0x86e   :  { %4725 = vsyncpa [#allocation3 + $0x1], 1 }

</bundles_post_ra>
